<compile_context>
chip_gen: v5e
topology: v5e:2x2
jax: 0.10.0
libtpu: 0.0.40
codegen_flags: <defaults>
</compile_context>

<pallas_src>
import functools

import jax
import jax.numpy as jnp
from jax import lax
from jax.experimental import pallas as pl
from jax.experimental.pallas import tpu as pltpu

MAX_HIST = 8  # max_attention_history (T)


def _trace_kernel(xp_ref, tq_ref, mask_ref, init_ref,
                  w_hh_ref, w_head_ref, pos_head_ref,
                  attw_ref, probs_ref, reuse_ref, state_ref):
  """Processes KS consecutive cache accesses per grid step.

  state_ref (VMEM-resident output block across the grid, shape (B, T+2, H)):
    [:, :T]   rolling history of model-"next_h" (= LSTM cell) states, oldest first
    [:, T]    current LSTM cell state  c   (model label: next_h)
    [:, T+1]  current LSTM hidden state h  (model label: next_c)
  """
  T = MAX_HIST
  KS, B = xp_ref.shape[0], xp_ref.shape[1]
  H = w_hh_ref.shape[0]

  # Load the initial recurrent state into the resident output block once.
  @pl.when(pl.program_id(0) == 0)
  def _():
    state_ref[...] = init_ref[...]

  w_hh = w_hh_ref[...]          # (H, 4H)
  w_head = w_head_ref[...]      # (H, 2)
  pos_head = pos_head_ref[...]  # (T, 2)  positional part + bias of both heads

  # Recurrent state lives in registers for the KS inner steps.
  keys0 = state_ref[:, 0:T, :]                       # (B, T, H) history (cell states)
  c0 = state_ref[:, T, :]                            # (B, H) LSTM c
  h0 = state_ref[:, T + 1, :]                        # (B, H) LSTM h
  # Head projection of the existing history, computed once per grid step and
  # then maintained incrementally (one new row per time step).
  kh0 = jnp.dot(keys0.reshape(B * T, H), w_head,
                preferred_element_type=jnp.float32).reshape(B, T, 2)

  def step(k, carry):
    c, h, keys, key_head = carry

    # ---- LSTM cell: input projection was hoisted; only h @ W_hh remains ----
    gates = xp_ref[k] + jnp.dot(h, w_hh, preferred_element_type=jnp.float32)
    sig = jax.nn.sigmoid(gates)                      # one wide EUP pass (i,f,g,o)
    i_g = sig[:, 0:H]
    f_g = sig[:, H:2 * H]
    o_g = sig[:, 3 * H:4 * H]
    g_g = jnp.tanh(gates[:, 2 * H:3 * H])
    c1 = f_g * c + i_g * g_g                         # LSTM cell   (model "next_h")
    h1 = o_g * jnp.tanh(c1)                          # LSTM hidden (model "next_c")

    # ---- slide the history window + its cached head projection (registers) ----
    keys = jnp.concatenate([keys[:, 1:], c1[:, None, :]], axis=1)        # (B,T,H)
    new_kh = jnp.dot(c1, w_head, preferred_element_type=jnp.float32)     # (B,2)
    key_head = jnp.concatenate([key_head[:, 1:], new_kh[:, None, :]], axis=1)

    # ---- GeneralAttention over the history (query projection was hoisted) ----
    tq = tq_ref[k]                                                       # (B,N,H)
    scores = jnp.einsum('bnh,bth->bnt', tq, keys,
                        preferred_element_type=jnp.float32)              # (B,N,T)
    scores = scores - jnp.max(scores, axis=-1, keepdims=True)
    e = jnp.exp(scores)
    attw = e / jnp.sum(e, axis=-1, keepdims=True)    # EXACT normalisation (parity)
    attw_ref[k] = attw

    # ---- heads, collapsed: Linear([ctx_h; ctx_p]) = attw @ (keys@W_h + pos@W_p + b)
    kp = key_head + pos_head[None]                                       # (B,T,2)
    lr = jnp.einsum('bnt,btk->bnk', attw, kp,
                    preferred_element_type=jnp.float32)                  # (B,N,2)
    logits = lr[:, :, 0]
    reuse = lr[:, :, 1]

    # ---- softmax over lines fused with mask renormalisation (exact divide) ----
    logits = logits - jnp.max(logits, axis=-1, keepdims=True)
    em = jnp.exp(logits) * mask_ref[k]                                   # (B,N)
    # NB: fully-masked rows yield all-zero probs here (reference would NaN).
    denom = jnp.maximum(jnp.sum(em, axis=-1, keepdims=True), 1e-30)
    probs_ref[k] = em / denom
    reuse_ref[k] = reuse
    return (c1, h1, keys, key_head)

  c, h, keys, _ = lax.fori_loop(0, KS, step, (c0, h0, keys0, kh0),
                                unroll=True if KS <= 32 else 8)

  # Write the recurrent state back to the resident slab once per grid step.
  state_ref[:, 0:T, :] = keys
  state_ref[:, T, :] = c
  state_ref[:, T + 1, :] = h


def _resident_spec(shape):
  nd = len(shape)
  return pl.BlockSpec(shape, lambda g: (0,) * nd)   # constant block -> fetched once


def eviction_policy_forward(params, pc_ids, addr_ids, line_addr_ids, mask,
                            prev_c, prev_h, hist_prev, *, steps_per_block=None):
  """Runs EvictionPolicyModel.forward over S consecutive cache accesses.

  Args:
    pc_ids, addr_ids : (S, B) int32 per-step ids.
    line_addr_ids    : (S, B, N) int32 cache-line address ids.
    mask             : (S, B, N) 1.0 for valid lines, 0.0 for padding.
    prev_c, prev_h   : (B, H) recurrent tuple from the previous call (model labels).
    hist_prev        : (B, MAX_HIST-1, H) past "next_h" history, oldest first.
    steps_per_block  : accesses processed per grid iteration (KS).

  Returns:
    probs (S,B,N), pred_reuse_distances (S,B,N),
    next_hidden_state = (next_c (B,H), next_h (B,H), history (B,MAX_HIST,H)),
    attention_weights (S,B,N,MAX_HIST).
  """
  S, B = pc_ids.shape
  N = line_addr_ids.shape[2]
  H = prev_c.shape[-1]
  T = MAX_HIST

  if steps_per_block is None:
    steps_per_block = S if S <= 32 else 16
  if S % steps_per_block != 0:
    steps_per_block = S          # TODO(synk): pad the trace for uneven chunking.
  KS = steps_per_block
  SG = S // KS

  # --- plain-JAX glue: batched embedding gathers for the whole chunk ---
  # TODO(synk): for huge vocab tables / very long traces, gather rows in-kernel
  # via scalar-prefetched ids + DMA from HBM instead of materialising (S,B,*).
  pc_emb = params['pc_table'][pc_ids]                               # (S, B, d_pc)
  addr_emb = params['addr_table'][addr_ids]                         # (S, B, d_addr)
  x_all = jnp.concatenate([pc_emb, addr_emb], axis=-1).astype(jnp.float32)
  D_in = x_all.shape[-1]
  q_all = params['line_table'][line_addr_ids].astype(jnp.float32)   # (S, B, N, d_line)
  Dl = q_all.shape[-1]
  mask_all = mask.astype(jnp.float32)

  # --- hoisted recurrence-independent matmuls (full-width MXU work in XLA) ---
  x_proj_all = (x_all.reshape(S * B, D_in) @ params['w_ih']
                + params['b_lstm']).reshape(S, B, 4 * H)            # (S, B, 4H)
  tq_all = (q_all.reshape(S * B * N, Dl)
            @ params['w_att']).reshape(S, B, N, H)                  # (S, B, N, H)

  # Head weights: Linear(H + d_pos, 1) x2 split into H-part and positional part;
  # positional part + bias precomputed per history slot (bias folds in because
  # the attention weights sum to one — exact now that the softmax divide is exact).
  pos = params['pos_table'][:T].astype(jnp.float32)                 # (T, P)
  w_head_h = jnp.concatenate([params['w_score_h'], params['w_reuse_h']], -1)  # (H,2)
  w_head_p = jnp.concatenate([params['w_score_p'], params['w_reuse_p']], -1)  # (P,2)
  pos_head = pos @ w_head_p + params['b_heads'][None, :]            # (T, 2)

  # Initial state slab: slot 0 is dropped by the first shift-append.
  init_state = jnp.concatenate(
      [jnp.zeros((B, 1, H), jnp.float32),
       hist_prev.astype(jnp.float32),              # slots 1..T-1
       prev_h.astype(jnp.float32)[:, None],        # slot T   : LSTM c_0
       prev_c.astype(jnp.float32)[:, None]],       # slot T+1 : LSTM h_0
      axis=1)                                      # (B, T+2, H)

  # TODO(synk): on v7x, shard an independent axis (e.g. batch halves / separate
  # trace chunks) over a leading "parallel" grid dimension to use the second
  # TensorCore; the S axis must stay "arbitrary" because of the recurrence.
  attw_out, probs_out, reuse_out, state_out = pl.pallas_call(
      _trace_kernel,
      grid=(SG,),
      in_specs=[
          pl.BlockSpec((KS, B, 4 * H), lambda g: (g, 0, 0)),         # x @ W_ih + b
          pl.BlockSpec((KS, B, N, H), lambda g: (g, 0, 0, 0)),       # q @ W_att
          pl.BlockSpec((KS, B, N), lambda g: (g, 0, 0)),             # mask
          _resident_spec((B, T + 2, H)),                             # init state
          _resident_spec((H, 4 * H)),                                # LSTM W_hh
          _resident_spec((H, 2)),                                    # head W (H part)
          _resident_spec((T, 2)),                                    # pos part + bias
      ],
      out_specs=(
          pl.BlockSpec((KS, B, N, T), lambda g: (g, 0, 0, 0)),       # attention wts
          pl.BlockSpec((KS, B, N), lambda g: (g, 0, 0)),             # probs
          pl.BlockSpec((KS, B, N), lambda g: (g, 0, 0)),             # reuse distances
          pl.BlockSpec((B, T + 2, H), lambda g: (0, 0, 0)),          # resident state
      ),
      out_shape=(
          jax.ShapeDtypeStruct((S, B, N, T), jnp.float32),
          jax.ShapeDtypeStruct((S, B, N), jnp.float32),
          jax.ShapeDtypeStruct((S, B, N), jnp.float32),
          jax.ShapeDtypeStruct((B, T + 2, H), jnp.float32),
      ),
      compiler_params=pltpu.CompilerParams(
          dimension_semantics=("arbitrary",)),       # sequential recurrence
  )(x_proj_all, tq_all, mask_all, init_state,
    params['w_hh'], w_head_h, pos_head)

  hist_next = state_out[:, :T]
  next_h = state_out[:, T]
  next_c = state_out[:, T + 1]
  return probs_out, reuse_out, (next_c, next_h, hist_next), attw_out


def init_params(key, *, pc_vocab, addr_vocab, d_pc, d_addr, d_line, d_pos, H):
  ks = jax.random.split(key, 12)
  D_in = d_pc + d_addr

  def nrm(k, shape, scale=0.1):
    return (scale * jax.random.normal(k, shape)).astype(jnp.float32)

  # nn.LSTMCell weights pre-transposed to (in, 4H), gate column order i,f,g,o;
  # bias = b_ih + b_hh.  Kept as f32 for parity with the PyTorch reference
  # (bf16 weight storage is a further option on v6e/v7x; see review notes).
  return dict(
      pc_table=nrm(ks[0], (pc_vocab, d_pc), 1.0),
      addr_table=nrm(ks[1], (addr_vocab, d_addr), 1.0),
      line_table=nrm(ks[2], (addr_vocab, d_line), 1.0),
      pos_table=nrm(ks[3], (MAX_HIST, d_pos), 1.0),
      w_ih=nrm(ks[4], (D_in, 4 * H)),                       # input->gates
      w_hh=nrm(ks[5], (H, 4 * H)),                          # hidden->gates
      b_lstm=nrm(ks[6], (1, 4 * H)),
      w_att=nrm(ks[7], (d_line, H)),                        # GeneralAttention proj
      w_score_h=nrm(ks[8], (H, 1)),
      w_score_p=nrm(ks[9], (d_pos, 1)),
      w_reuse_h=nrm(ks[10], (H, 1)),
      w_reuse_p=nrm(ks[11], (d_pos, 1)),
      b_heads=jnp.array([0.01, 0.02], dtype=jnp.float32),   # [b_scorer, b_reuse]
  )
  # TODO(synk): cache_pc_embedder path ('none' config), the reuse_dist-only probs
  # override, the loss()/training loop, and variable-length history warm-up at the
  # very start of a trace are outside the forward hot path and are not implemented.


if __name__ == "__main__":
  S, B, N, H = 16, 2, 8, 32
  d_pc, d_addr, d_line, d_pos = 16, 16, 16, 8
  pc_vocab, addr_vocab = 32, 64

  key = jax.random.PRNGKey(0)
  k_param, k_in = jax.random.split(key)
  params = init_params(k_param, pc_vocab=pc_vocab, addr_vocab=addr_vocab,
                       d_pc=d_pc, d_addr=d_addr, d_line=d_line, d_pos=d_pos, H=H)

  ks = jax.random.split(k_in, 6)
  pc_ids = jax.random.randint(ks[0], (S, B), 0, pc_vocab)
  addr_ids = jax.random.randint(ks[1], (S, B), 0, addr_vocab)
  line_ids = jax.random.randint(ks[2], (S, B, N), 0, addr_vocab)
  mask = jnp.ones((S, B, N), jnp.float32).at[:, 0, N - 1].set(0.0)  # one padded line
  # simulate a warmed-up prev_hidden_state from earlier accesses in the trace
  prev_c = 0.1 * jax.random.normal(ks[3], (B, H), jnp.float32)
  prev_h = 0.1 * jax.random.normal(ks[4], (B, H), jnp.float32)
  hist_prev = 0.1 * jax.random.normal(ks[5], (B, MAX_HIST - 1, H), jnp.float32)

  fwd = jax.jit(functools.partial(eviction_policy_forward, steps_per_block=S))
  probs, pred_reuse, (nc, nh, hist), attw = fwd(
      params, pc_ids, addr_ids, line_ids, mask, prev_c, prev_h, hist_prev)
  jax.block_until_ready((probs, pred_reuse, nc, nh, hist, attw))

  assert probs.shape == (S, B, N)
  assert pred_reuse.shape == (S, B, N)
  assert nc.shape == (B, H) and nh.shape == (B, H)
  assert hist.shape == (B, MAX_HIST, H)
  assert attw.shape == (S, B, N, MAX_HIST)
  assert bool(jnp.all(jnp.isfinite(probs)))
  assert bool(jnp.all(jnp.isfinite(pred_reuse)))
  assert bool(jnp.allclose(jnp.sum(probs, -1), 1.0, atol=1e-5))     # exact normalize
  assert bool(jnp.allclose(jnp.sum(attw, -1), 1.0, atol=1e-5))      # exact softmax now
  assert bool(jnp.allclose(hist[:, -1], nh, atol=1e-6))             # history appends next_h
  assert bool(jnp.all(probs[:, 0, N - 1] == 0.0))                   # masked line gets 0
  print("KERNEL_OK")
</pallas_src>

<mosaic_0001>
module attributes {stable_mosaic.version = 11 : i64} {
  func.func @_trace_kernel(%arg0: i32, %arg1: memref<16x2x128xf32, #tpu.memory_space<vmem>>, %arg2: memref<16x2x8x32xf32, #tpu.memory_space<vmem>>, %arg3: memref<16x2x8xf32, #tpu.memory_space<vmem>>, %arg4: memref<2x10x32xf32, #tpu.memory_space<vmem>>, %arg5: memref<32x128xf32, #tpu.memory_space<vmem>>, %arg6: memref<32x2xf32, #tpu.memory_space<vmem>>, %arg7: memref<8x2xf32, #tpu.memory_space<vmem>>, %arg8: memref<16x2x8x8xf32, #tpu.memory_space<vmem>>, %arg9: memref<16x2x8xf32, #tpu.memory_space<vmem>>, %arg10: memref<16x2x8xf32, #tpu.memory_space<vmem>>, %arg11: memref<2x10x32xf32, #tpu.memory_space<vmem>>) attributes {dimension_semantics = [#tpu.dimension_semantics<arbitrary>], iteration_bounds = array<i64: 1>, scalar_prefetch = 0 : i64, scratch_operands = 0 : i64, tpu.core_type = #tpu.core_type<tc>, window_params = [{transform_indices = @transform_0, window_bounds = array<i64: 16, 2, 128>}, {transform_indices = @transform_1, window_bounds = array<i64: 16, 2, 8, 32>}, {transform_indices = @transform_2, window_bounds = array<i64: 16, 2, 8>}, {pipeline_mode = #tpu.pipeline_mode<synchronous>, transform_indices = @transform_3, window_bounds = array<i64: 2, 10, 32>}, {pipeline_mode = #tpu.pipeline_mode<synchronous>, transform_indices = @transform_4, window_bounds = array<i64: 32, 128>}, {pipeline_mode = #tpu.pipeline_mode<synchronous>, transform_indices = @transform_5, window_bounds = array<i64: 32, 2>}, {pipeline_mode = #tpu.pipeline_mode<synchronous>, transform_indices = @transform_6, window_bounds = array<i64: 8, 2>}, {transform_indices = @transform_7, window_bounds = array<i64: 16, 2, 8, 8>}, {transform_indices = @transform_8, window_bounds = array<i64: 16, 2, 8>}, {transform_indices = @transform_9, window_bounds = array<i64: 16, 2, 8>}, {pipeline_mode = #tpu.pipeline_mode<synchronous>, transform_indices = @transform_10, window_bounds = array<i64: 2, 10, 32>}]} {
    %c0_i32 = arith.constant 0 : i32
    %0 = arith.cmpi eq, %arg0, %c0_i32 : i32
    %1 = arith.extui %0 : i1 to i32
    %c0_i32_0 = arith.constant 0 : i32
    %2 = arith.cmpi ne, %1, %c0_i32_0 : i32
    scf.if %2 {
      %c0_407 = arith.constant 0 : index
      %c0_408 = arith.constant 0 : index
      %c0_409 = arith.constant 0 : index
      %1221 = vector.load %arg4[%c0_407, %c0_408, %c0_409] : memref<2x10x32xf32, #tpu.memory_space<vmem>>, vector<2x10x32xf32>
      %c0_410 = arith.constant 0 : index
      %c0_411 = arith.constant 0 : index
      %c0_412 = arith.constant 0 : index
      %1222 = vector.load %arg11[%c0_410, %c0_411, %c0_412] : memref<2x10x32xf32, #tpu.memory_space<vmem>>, vector<2x10x32xf32>
      tpu.vector_store %arg11[%c0_410, %c0_411, %c0_412], %1221 {strides = array<i32>} : memref<2x10x32xf32, #tpu.memory_space<vmem>>, vector<2x10x32xf32>,
    } else {
    }
    %c0 = arith.constant 0 : index
    %c0_1 = arith.constant 0 : index
    %3 = vector.load %arg5[%c0, %c0_1] : memref<32x128xf32, #tpu.memory_space<vmem>>, vector<32x128xf32>
    %c0_2 = arith.constant 0 : index
    %c0_3 = arith.constant 0 : index
    %4 = vector.load %arg6[%c0_2, %c0_3] : memref<32x2xf32, #tpu.memory_space<vmem>>, vector<32x2xf32>
    %c0_4 = arith.constant 0 : index
    %c0_5 = arith.constant 0 : index
    %5 = vector.load %arg7[%c0_4, %c0_5] : memref<8x2xf32, #tpu.memory_space<vmem>>, vector<8x2xf32>
    %c0_6 = arith.constant 0 : index
    %c0_7 = arith.constant 0 : index
    %c0_8 = arith.constant 0 : index
    %6 = vector.load %arg11[%c0_6, %c0_7, %c0_8] : memref<2x10x32xf32, #tpu.memory_space<vmem>>, vector<2x8x32xf32>
    %c0_9 = arith.constant 0 : index
    %c8 = arith.constant 8 : index
    %c0_10 = arith.constant 0 : index
    %7 = vector.load %arg11[%c0_9, %c8, %c0_10] : memref<2x10x32xf32, #tpu.memory_space<vmem>>, vector<2x1x32xf32>
    %8 = vector.shape_cast %7 : vector<2x1x32xf32> to vector<2x32xf32>
    %c0_11 = arith.constant 0 : index
    %c9 = arith.constant 9 : index
    %c0_12 = arith.constant 0 : index
    %9 = vector.load %arg11[%c0_11, %c9, %c0_12] : memref<2x10x32xf32, #tpu.memory_space<vmem>>, vector<2x1x32xf32>
    %10 = vector.shape_cast %9 : vector<2x1x32xf32> to vector<2x32xf32>
    %11 = vector.shape_cast %6 : vector<2x8x32xf32> to vector<16x32xf32>
    %cst = arith.constant dense<0.000000e+00> : vector<16x2xf32>
    %12 = tpu.matmul %11, %4, %cst {dimension_numbers = #tpu.dot_dimension_numbers<[1], [0], [0], [1], [0, 0, 1, 1], [], []>} : vector<16x32xf32>, vector<32x2xf32>, vector<16x2xf32> -> vector<16x2xf32>
    %13 = vector.shape_cast %12 : vector<16x2xf32> to vector<2x8x2xf32>
    %c0_i32_13 = arith.constant 0 : i32
    %14 = arith.index_cast %c0_i32_13 : i32 to index
    %c0_14 = arith.constant 0 : index
    %c0_15 = arith.constant 0 : index
    %15 = vector.load %arg1[%14, %c0_14, %c0_15] : memref<16x2x128xf32, #tpu.memory_space<vmem>>, vector<1x2x128xf32>
    %16 = vector.shape_cast %15 : vector<1x2x128xf32> to vector<2x128xf32>
    %cst_16 = arith.constant dense<0.000000e+00> : vector<2x128xf32>
    %17 = tpu.matmul %10, %3, %cst_16 {dimension_numbers = #tpu.dot_dimension_numbers<[1], [0], [0], [1], [0, 0, 1, 1], [], []>} : vector<2x32xf32>, vector<32x128xf32>, vector<2x128xf32> -> vector<2x128xf32>
    %18 = arith.addf %16, %17 : vector<2x128xf32>
    %19 = arith.negf %18 : vector<2x128xf32>
    %20 = math.exp %19 : vector<2x128xf32>
    %cst_17 = arith.constant 1.000000e+00 : f32
    %21 = vector.broadcast %cst_17 : f32 to vector<2x128xf32>
    %22 = arith.addf %21, %20 : vector<2x128xf32>
    %23 = arith.divf %21, %22 : vector<2x128xf32>
    %24 = vector.extract_strided_slice %23 {offsets = [0, 0], sizes = [2, 32], strides = [1, 1]} : vector<2x128xf32> to vector<2x32xf32>
    %25 = vector.extract_strided_slice %23 {offsets = [0, 32], sizes = [2, 32], strides = [1, 1]} : vector<2x128xf32> to vector<2x32xf32>
    %26 = vector.extract_strided_slice %23 {offsets = [0, 96], sizes = [2, 32], strides = [1, 1]} : vector<2x128xf32> to vector<2x32xf32>
    %27 = vector.extract_strided_slice %18 {offsets = [0, 64], sizes = [2, 32], strides = [1, 1]} : vector<2x128xf32> to vector<2x32xf32>
    %28 = math.tanh %27 : vector<2x32xf32>
    %29 = arith.mulf %25, %8 : vector<2x32xf32>
    %30 = arith.mulf %24, %28 : vector<2x32xf32>
    %31 = arith.addf %29, %30 : vector<2x32xf32>
    %32 = math.tanh %31 : vector<2x32xf32>
    %33 = arith.mulf %26, %32 : vector<2x32xf32>
    %34 = vector.extract_strided_slice %6 {offsets = [0, 1, 0], sizes = [2, 7, 32], strides = [1, 1, 1]} : vector<2x8x32xf32> to vector<2x7x32xf32>
    %35 = vector.shape_cast %31 : vector<2x32xf32> to vector<2x1x32xf32>
    %36 = tpu.concatenate %34, %35 in 1 : vector<2x7x32xf32>, vector<2x1x32xf32> -> vector<2x8x32xf32>
    %cst_18 = arith.constant dense<0.000000e+00> : vector<2x2xf32>
    %37 = tpu.matmul %31, %4, %cst_18 {dimension_numbers = #tpu.dot_dimension_numbers<[1], [0], [0], [1], [0, 0, 1, 1], [], []>} : vector<2x32xf32>, vector<32x2xf32>, vector<2x2xf32> -> vector<2x2xf32>
    %38 = vector.extract_strided_slice %13 {offsets = [0, 1, 0], sizes = [2, 7, 2], strides = [1, 1, 1]} : vector<2x8x2xf32> to vector<2x7x2xf32>
    %39 = vector.shape_cast %37 : vector<2x2xf32> to vector<2x1x2xf32>
    %40 = tpu.concatenate %38, %39 in 1 : vector<2x7x2xf32>, vector<2x1x2xf32> -> vector<2x8x2xf32>
    %41 = arith.index_cast %c0_i32_13 : i32 to index
    %c0_19 = arith.constant 0 : index
    %c0_20 = arith.constant 0 : index
    %c0_21 = arith.constant 0 : index
    %42 = vector.load %arg2[%41, %c0_19, %c0_20, %c0_21] : memref<16x2x8x32xf32, #tpu.memory_space<vmem>>, vector<1x2x8x32xf32>
    %43 = vector.shape_cast %42 : vector<1x2x8x32xf32> to vector<2x8x32xf32>
    "tpu.trace_start"() <{level = 10 : i32, message = "bnh,bth->bnt"}> : () -> ()
    %cst_22 = arith.constant dense<0.000000e+00> : vector<2x8x8xf32>
    %44 = tpu.matmul %43, %36, %cst_22 {dimension_numbers = #tpu.dot_dimension_numbers<[2], [2], [1], [1], [0, 0, 0, 1, 1, 1], [0], [0]>} : vector<2x8x32xf32>, vector<2x8x32xf32>, vector<2x8x8xf32> -> vector<2x8x8xf32>
    "tpu.trace_stop"() : () -> ()
    %cst_23 = arith.constant dense<0xFF800000> : vector<2x8xf32>
    %45 = vector.multi_reduction <maximumf>, %44, %cst_23 [2] : vector<2x8x8xf32> to vector<2x8xf32>
    %46 = vector.shape_cast %45 : vector<2x8xf32> to vector<2x8x1xf32>
    %47 = vector.broadcast %46 : vector<2x8x1xf32> to vector<2x8x8xf32>
    %48 = arith.subf %44, %47 : vector<2x8x8xf32>
    %49 = math.exp %48 : vector<2x8x8xf32>
    %cst_24 = arith.constant dense<0.000000e+00> : vector<2x8xf32>
    %50 = vector.multi_reduction <add>, %49, %cst_24 [2] : vector<2x8x8xf32> to vector<2x8xf32>
    %51 = vector.shape_cast %50 : vector<2x8xf32> to vector<2x8x1xf32>
    %52 = vector.broadcast %51 : vector<2x8x1xf32> to vector<2x8x8xf32>
    %53 = arith.divf %49, %52 : vector<2x8x8xf32>
    %54 = arith.index_cast %c0_i32_13 : i32 to index
    %c0_25 = arith.constant 0 : index
    %c0_26 = arith.constant 0 : index
    %c0_27 = arith.constant 0 : index
    %55 = vector.load %arg8[%54, %c0_25, %c0_26, %c0_27] : memref<16x2x8x8xf32, #tpu.memory_space<vmem>>, vector<1x2x8x8xf32>
    %56 = vector.shape_cast %55 : vector<1x2x8x8xf32> to vector<2x8x8xf32>
    %57 = vector.shape_cast %53 : vector<2x8x8xf32> to vector<1x2x8x8xf32>
    tpu.vector_store %arg8[%54, %c0_25, %c0_26, %c0_27], %57 {strides = array<i32>} : memref<16x2x8x8xf32, #tpu.memory_space<vmem>>, vector<1x2x8x8xf32>,
    %58 = vector.shape_cast %5 : vector<8x2xf32> to vector<1x8x2xf32>
    %59 = vector.broadcast %58 : vector<1x8x2xf32> to vector<2x8x2xf32>
    %60 = arith.addf %40, %59 : vector<2x8x2xf32>
    "tpu.trace_start"() <{level = 10 : i32, message = "bnt,btk->bnk"}> : () -> ()
    %cst_28 = arith.constant dense<0.000000e+00> : vector<2x8x2xf32>
    %61 = tpu.matmul %53, %60, %cst_28 {dimension_numbers = #tpu.dot_dimension_numbers<[2], [1], [1], [2], [0, 0, 0, 1, 1, 2], [0], [0]>} : vector<2x8x8xf32>, vector<2x8x2xf32>, vector<2x8x2xf32> -> vector<2x8x2xf32>
    "tpu.trace_stop"() : () -> ()
    %62 = vector.extract_strided_slice %61 {offsets = [0, 0, 0], sizes = [2, 8, 1], strides = [1, 1, 1]} : vector<2x8x2xf32> to vector<2x8x1xf32>
    %63 = vector.shape_cast %62 : vector<2x8x1xf32> to vector<2x8xf32>
    %64 = vector.extract_strided_slice %61 {offsets = [0, 0, 1], sizes = [2, 8, 1], strides = [1, 1, 1]} : vector<2x8x2xf32> to vector<2x8x1xf32>
    %65 = vector.shape_cast %64 : vector<2x8x1xf32> to vector<2x8xf32>
    %cst_29 = arith.constant dense<0xFF800000> : vector<2xf32>
    %66 = vector.multi_reduction <maximumf>, %63, %cst_29 [1] : vector<2x8xf32> to vector<2xf32>
    %67 = vector.shape_cast %66 : vector<2xf32> to vector<2x1xf32>
    %68 = vector.broadcast %67 : vector<2x1xf32> to vector<2x8xf32>
    %69 = arith.subf %63, %68 : vector<2x8xf32>
    %70 = math.exp %69 : vector<2x8xf32>
    %71 = arith.index_cast %c0_i32_13 : i32 to index
    %c0_30 = arith.constant 0 : index
    %c0_31 = arith.constant 0 : index
    %72 = vector.load %arg3[%71, %c0_30, %c0_31] : memref<16x2x8xf32, #tpu.memory_space<vmem>>, vector<1x2x8xf32>
    %73 = vector.shape_cast %72 : vector<1x2x8xf32> to vector<2x8xf32>
    %74 = arith.mulf %70, %73 : vector<2x8xf32>
    %cst_32 = arith.constant dense<0.000000e+00> : vector<2xf32>
    %75 = vector.multi_reduction <add>, %74, %cst_32 [1] : vector<2x8xf32> to vector<2xf32>
    %76 = vector.shape_cast %75 : vector<2xf32> to vector<2x1xf32>
    %cst_33 = arith.constant 1.000000e-30 : f32
    %77 = vector.broadcast %cst_33 : f32 to vector<2x1xf32>
    %78 = arith.maximumf %76, %77 : vector<2x1xf32>
    %79 = vector.broadcast %78 : vector<2x1xf32> to vector<2x8xf32>
    %80 = arith.divf %74, %79 : vector<2x8xf32>
    %81 = arith.index_cast %c0_i32_13 : i32 to index
    %c0_34 = arith.constant 0 : index
    %c0_35 = arith.constant 0 : index
    %82 = vector.load %arg9[%81, %c0_34, %c0_35] : memref<16x2x8xf32, #tpu.memory_space<vmem>>, vector<1x2x8xf32>
    %83 = vector.shape_cast %82 : vector<1x2x8xf32> to vector<2x8xf32>
    %84 = vector.shape_cast %80 : vector<2x8xf32> to vector<1x2x8xf32>
    tpu.vector_store %arg9[%81, %c0_34, %c0_35], %84 {strides = array<i32>} : memref<16x2x8xf32, #tpu.memory_space<vmem>>, vector<1x2x8xf32>,
    %85 = arith.index_cast %c0_i32_13 : i32 to index
    %c0_36 = arith.constant 0 : index
    %c0_37 = arith.constant 0 : index
    %86 = vector.load %arg10[%85, %c0_36, %c0_37] : memref<16x2x8xf32, #tpu.memory_space<vmem>>, vector<1x2x8xf32>
    %87 = vector.shape_cast %86 : vector<1x2x8xf32> to vector<2x8xf32>
    %88 = vector.shape_cast %65 : vector<2x8xf32> to vector<1x2x8xf32>
    tpu.vector_store %arg10[%85, %c0_36, %c0_37], %88 {strides = array<i32>} : memref<16x2x8xf32, #tpu.memory_space<vmem>>, vector<1x2x8xf32>,
    %c1_i32 = arith.constant 1 : i32
    %89 = arith.index_cast %c1_i32 : i32 to index
    %c0_38 = arith.constant 0 : index
    %c0_39 = arith.constant 0 : index
    %90 = vector.load %arg1[%89, %c0_38, %c0_39] : memref<16x2x128xf32, #tpu.memory_space<vmem>>, vector<1x2x128xf32>
    %91 = vector.shape_cast %90 : vector<1x2x128xf32> to vector<2x128xf32>
    %cst_40 = arith.constant dense<0.000000e+00> : vector<2x128xf32>
    %92 = tpu.matmul %33, %3, %cst_40 {dimension_numbers = #tpu.dot_dimension_numbers<[1], [0], [0], [1], [0, 0, 1, 1], [], []>} : vector<2x32xf32>, vector<32x128xf32>, vector<2x128xf32> -> vector<2x128xf32>
    %93 = arith.addf %91, %92 : vector<2x128xf32>
    %94 = arith.negf %93 : vector<2x128xf32>
    %95 = math.exp %94 : vector<2x128xf32>
    %cst_41 = arith.constant 1.000000e+00 : f32
    %96 = vector.broadcast %cst_41 : f32 to vector<2x128xf32>
    %97 = arith.addf %96, %95 : vector<2x128xf32>
    %98 = arith.divf %96, %97 : vector<2x128xf32>
    %99 = vector.extract_strided_slice %98 {offsets = [0, 0], sizes = [2, 32], strides = [1, 1]} : vector<2x128xf32> to vector<2x32xf32>
    %100 = vector.extract_strided_slice %98 {offsets = [0, 32], sizes = [2, 32], strides = [1, 1]} : vector<2x128xf32> to vector<2x32xf32>
    %101 = vector.extract_strided_slice %98 {offsets = [0, 96], sizes = [2, 32], strides = [1, 1]} : vector<2x128xf32> to vector<2x32xf32>
    %102 = vector.extract_strided_slice %93 {offsets = [0, 64], sizes = [2, 32], strides = [1, 1]} : vector<2x128xf32> to vector<2x32xf32>
    %103 = math.tanh %102 : vector<2x32xf32>
    %104 = arith.mulf %100, %31 : vector<2x32xf32>
    %105 = arith.mulf %99, %103 : vector<2x32xf32>
    %106 = arith.addf %104, %105 : vector<2x32xf32>
    %107 = math.tanh %106 : vector<2x32xf32>
    %108 = arith.mulf %101, %107 : vector<2x32xf32>
    %109 = vector.extract_strided_slice %36 {offsets = [0, 1, 0], sizes = [2, 7, 32], strides = [1, 1, 1]} : vector<2x8x32xf32> to vector<2x7x32xf32>
    %110 = vector.shape_cast %106 : vector<2x32xf32> to vector<2x1x32xf32>
    %111 = tpu.concatenate %109, %110 in 1 : vector<2x7x32xf32>, vector<2x1x32xf32> -> vector<2x8x32xf32>
    %cst_42 = arith.constant dense<0.000000e+00> : vector<2x2xf32>
    %112 = tpu.matmul %106, %4, %cst_42 {dimension_numbers = #tpu.dot_dimension_numbers<[1], [0], [0], [1], [0, 0, 1, 1], [], []>} : vector<2x32xf32>, vector<32x2xf32>, vector<2x2xf32> -> vector<2x2xf32>
    %113 = vector.extract_strided_slice %40 {offsets = [0, 1, 0], sizes = [2, 7, 2], strides = [1, 1, 1]} : vector<2x8x2xf32> to vector<2x7x2xf32>
    %114 = vector.shape_cast %112 : vector<2x2xf32> to vector<2x1x2xf32>
    %115 = tpu.concatenate %113, %114 in 1 : vector<2x7x2xf32>, vector<2x1x2xf32> -> vector<2x8x2xf32>
    %116 = arith.index_cast %c1_i32 : i32 to index
    %c0_43 = arith.constant 0 : index
    %c0_44 = arith.constant 0 : index
    %c0_45 = arith.constant 0 : index
    %117 = vector.load %arg2[%116, %c0_43, %c0_44, %c0_45] : memref<16x2x8x32xf32, #tpu.memory_space<vmem>>, vector<1x2x8x32xf32>
    %118 = vector.shape_cast %117 : vector<1x2x8x32xf32> to vector<2x8x32xf32>
    "tpu.trace_start"() <{level = 10 : i32, message = "bnh,bth->bnt"}> : () -> ()
    %cst_46 = arith.constant dense<0.000000e+00> : vector<2x8x8xf32>
    %119 = tpu.matmul %118, %111, %cst_46 {dimension_numbers = #tpu.dot_dimension_numbers<[2], [2], [1], [1], [0, 0, 0, 1, 1, 1], [0], [0]>} : vector<2x8x32xf32>, vector<2x8x32xf32>, vector<2x8x8xf32> -> vector<2x8x8xf32>
    "tpu.trace_stop"() : () -> ()
    %cst_47 = arith.constant dense<0xFF800000> : vector<2x8xf32>
    %120 = vector.multi_reduction <maximumf>, %119, %cst_47 [2] : vector<2x8x8xf32> to vector<2x8xf32>
    %121 = vector.shape_cast %120 : vector<2x8xf32> to vector<2x8x1xf32>
    %122 = vector.broadcast %121 : vector<2x8x1xf32> to vector<2x8x8xf32>
    %123 = arith.subf %119, %122 : vector<2x8x8xf32>
    %124 = math.exp %123 : vector<2x8x8xf32>
    %cst_48 = arith.constant dense<0.000000e+00> : vector<2x8xf32>
    %125 = vector.multi_reduction <add>, %124, %cst_48 [2] : vector<2x8x8xf32> to vector<2x8xf32>
    %126 = vector.shape_cast %125 : vector<2x8xf32> to vector<2x8x1xf32>
    %127 = vector.broadcast %126 : vector<2x8x1xf32> to vector<2x8x8xf32>
    %128 = arith.divf %124, %127 : vector<2x8x8xf32>
    %129 = arith.index_cast %c1_i32 : i32 to index
    %c0_49 = arith.constant 0 : index
    %c0_50 = arith.constant 0 : index
    %c0_51 = arith.constant 0 : index
    %130 = vector.load %arg8[%129, %c0_49, %c0_50, %c0_51] : memref<16x2x8x8xf32, #tpu.memory_space<vmem>>, vector<1x2x8x8xf32>
    %131 = vector.shape_cast %130 : vector<1x2x8x8xf32> to vector<2x8x8xf32>
    %132 = vector.shape_cast %128 : vector<2x8x8xf32> to vector<1x2x8x8xf32>
    tpu.vector_store %arg8[%129, %c0_49, %c0_50, %c0_51], %132 {strides = array<i32>} : memref<16x2x8x8xf32, #tpu.memory_space<vmem>>, vector<1x2x8x8xf32>,
    %133 = vector.shape_cast %5 : vector<8x2xf32> to vector<1x8x2xf32>
    %134 = vector.broadcast %133 : vector<1x8x2xf32> to vector<2x8x2xf32>
    %135 = arith.addf %115, %134 : vector<2x8x2xf32>
    "tpu.trace_start"() <{level = 10 : i32, message = "bnt,btk->bnk"}> : () -> ()
    %cst_52 = arith.constant dense<0.000000e+00> : vector<2x8x2xf32>
    %136 = tpu.matmul %128, %135, %cst_52 {dimension_numbers = #tpu.dot_dimension_numbers<[2], [1], [1], [2], [0, 0, 0, 1, 1, 2], [0], [0]>} : vector<2x8x8xf32>, vector<2x8x2xf32>, vector<2x8x2xf32> -> vector<2x8x2xf32>
    "tpu.trace_stop"() : () -> ()
    %137 = vector.extract_strided_slice %136 {offsets = [0, 0, 0], sizes = [2, 8, 1], strides = [1, 1, 1]} : vector<2x8x2xf32> to vector<2x8x1xf32>
    %138 = vector.shape_cast %137 : vector<2x8x1xf32> to vector<2x8xf32>
    %139 = vector.extract_strided_slice %136 {offsets = [0, 0, 1], sizes = [2, 8, 1], strides = [1, 1, 1]} : vector<2x8x2xf32> to vector<2x8x1xf32>
    %140 = vector.shape_cast %139 : vector<2x8x1xf32> to vector<2x8xf32>
    %cst_53 = arith.constant dense<0xFF800000> : vector<2xf32>
    %141 = vector.multi_reduction <maximumf>, %138, %cst_53 [1] : vector<2x8xf32> to vector<2xf32>
    %142 = vector.shape_cast %141 : vector<2xf32> to vector<2x1xf32>
    %143 = vector.broadcast %142 : vector<2x1xf32> to vector<2x8xf32>
    %144 = arith.subf %138, %143 : vector<2x8xf32>
    %145 = math.exp %144 : vector<2x8xf32>
    %146 = arith.index_cast %c1_i32 : i32 to index
    %c0_54 = arith.constant 0 : index
    %c0_55 = arith.constant 0 : index
    %147 = vector.load %arg3[%146, %c0_54, %c0_55] : memref<16x2x8xf32, #tpu.memory_space<vmem>>, vector<1x2x8xf32>
    %148 = vector.shape_cast %147 : vector<1x2x8xf32> to vector<2x8xf32>
    %149 = arith.mulf %145, %148 : vector<2x8xf32>
    %cst_56 = arith.constant dense<0.000000e+00> : vector<2xf32>
    %150 = vector.multi_reduction <add>, %149, %cst_56 [1] : vector<2x8xf32> to vector<2xf32>
    %151 = vector.shape_cast %150 : vector<2xf32> to vector<2x1xf32>
    %cst_57 = arith.constant 1.000000e-30 : f32
    %152 = vector.broadcast %cst_57 : f32 to vector<2x1xf32>
    %153 = arith.maximumf %151, %152 : vector<2x1xf32>
    %154 = vector.broadcast %153 : vector<2x1xf32> to vector<2x8xf32>
    %155 = arith.divf %149, %154 : vector<2x8xf32>
    %156 = arith.index_cast %c1_i32 : i32 to index
    %c0_58 = arith.constant 0 : index
    %c0_59 = arith.constant 0 : index
    %157 = vector.load %arg9[%156, %c0_58, %c0_59] : memref<16x2x8xf32, #tpu.memory_space<vmem>>, vector<1x2x8xf32>
    %158 = vector.shape_cast %157 : vector<1x2x8xf32> to vector<2x8xf32>
    %159 = vector.shape_cast %155 : vector<2x8xf32> to vector<1x2x8xf32>
    tpu.vector_store %arg9[%156, %c0_58, %c0_59], %159 {strides = array<i32>} : memref<16x2x8xf32, #tpu.memory_space<vmem>>, vector<1x2x8xf32>,
    %160 = arith.index_cast %c1_i32 : i32 to index
    %c0_60 = arith.constant 0 : index
    %c0_61 = arith.constant 0 : index
    %161 = vector.load %arg10[%160, %c0_60, %c0_61] : memref<16x2x8xf32, #tpu.memory_space<vmem>>, vector<1x2x8xf32>
    %162 = vector.shape_cast %161 : vector<1x2x8xf32> to vector<2x8xf32>
    %163 = vector.shape_cast %140 : vector<2x8xf32> to vector<1x2x8xf32>
    tpu.vector_store %arg10[%160, %c0_60, %c0_61], %163 {strides = array<i32>} : memref<16x2x8xf32, #tpu.memory_space<vmem>>, vector<1x2x8xf32>,
    %c2_i32 = arith.constant 2 : i32
    %164 = arith.index_cast %c2_i32 : i32 to index
    %c0_62 = arith.constant 0 : index
    %c0_63 = arith.constant 0 : index
    %165 = vector.load %arg1[%164, %c0_62, %c0_63] : memref<16x2x128xf32, #tpu.memory_space<vmem>>, vector<1x2x128xf32>
    %166 = vector.shape_cast %165 : vector<1x2x128xf32> to vector<2x128xf32>
    %cst_64 = arith.constant dense<0.000000e+00> : vector<2x128xf32>
    %167 = tpu.matmul %108, %3, %cst_64 {dimension_numbers = #tpu.dot_dimension_numbers<[1], [0], [0], [1], [0, 0, 1, 1], [], []>} : vector<2x32xf32>, vector<32x128xf32>, vector<2x128xf32> -> vector<2x128xf32>
    %168 = arith.addf %166, %167 : vector<2x128xf32>
    %169 = arith.negf %168 : vector<2x128xf32>
    %170 = math.exp %169 : vector<2x128xf32>
    %cst_65 = arith.constant 1.000000e+00 : f32
    %171 = vector.broadcast %cst_65 : f32 to vector<2x128xf32>
    %172 = arith.addf %171, %170 : vector<2x128xf32>
    %173 = arith.divf %171, %172 : vector<2x128xf32>
    %174 = vector.extract_strided_slice %173 {offsets = [0, 0], sizes = [2, 32], strides = [1, 1]} : vector<2x128xf32> to vector<2x32xf32>
    %175 = vector.extract_strided_slice %173 {offsets = [0, 32], sizes = [2, 32], strides = [1, 1]} : vector<2x128xf32> to vector<2x32xf32>
    %176 = vector.extract_strided_slice %173 {offsets = [0, 96], sizes = [2, 32], strides = [1, 1]} : vector<2x128xf32> to vector<2x32xf32>
    %177 = vector.extract_strided_slice %168 {offsets = [0, 64], sizes = [2, 32], strides = [1, 1]} : vector<2x128xf32> to vector<2x32xf32>
    %178 = math.tanh %177 : vector<2x32xf32>
    %179 = arith.mulf %175, %106 : vector<2x32xf32>
    %180 = arith.mulf %174, %178 : vector<2x32xf32>
    %181 = arith.addf %179, %180 : vector<2x32xf32>
    %182 = math.tanh %181 : vector<2x32xf32>
    %183 = arith.mulf %176, %182 : vector<2x32xf32>
    %184 = vector.extract_strided_slice %111 {offsets = [0, 1, 0], sizes = [2, 7, 32], strides = [1, 1, 1]} : vector<2x8x32xf32> to vector<2x7x32xf32>
    %185 = vector.shape_cast %181 : vector<2x32xf32> to vector<2x1x32xf32>
    %186 = tpu.concatenate %184, %185 in 1 : vector<2x7x32xf32>, vector<2x1x32xf32> -> vector<2x8x32xf32>
    %cst_66 = arith.constant dense<0.000000e+00> : vector<2x2xf32>
    %187 = tpu.matmul %181, %4, %cst_66 {dimension_numbers = #tpu.dot_dimension_numbers<[1], [0], [0], [1], [0, 0, 1, 1], [], []>} : vector<2x32xf32>, vector<32x2xf32>, vector<2x2xf32> -> vector<2x2xf32>
    %188 = vector.extract_strided_slice %115 {offsets = [0, 1, 0], sizes = [2, 7, 2], strides = [1, 1, 1]} : vector<2x8x2xf32> to vector<2x7x2xf32>
    %189 = vector.shape_cast %187 : vector<2x2xf32> to vector<2x1x2xf32>
    %190 = tpu.concatenate %188, %189 in 1 : vector<2x7x2xf32>, vector<2x1x2xf32> -> vector<2x8x2xf32>
    %191 = arith.index_cast %c2_i32 : i32 to index
    %c0_67 = arith.constant 0 : index
    %c0_68 = arith.constant 0 : index
    %c0_69 = arith.constant 0 : index
    %192 = vector.load %arg2[%191, %c0_67, %c0_68, %c0_69] : memref<16x2x8x32xf32, #tpu.memory_space<vmem>>, vector<1x2x8x32xf32>
    %193 = vector.shape_cast %192 : vector<1x2x8x32xf32> to vector<2x8x32xf32>
    "tpu.trace_start"() <{level = 10 : i32, message = "bnh,bth->bnt"}> : () -> ()
    %cst_70 = arith.constant dense<0.000000e+00> : vector<2x8x8xf32>
    %194 = tpu.matmul %193, %186, %cst_70 {dimension_numbers = #tpu.dot_dimension_numbers<[2], [2], [1], [1], [0, 0, 0, 1, 1, 1], [0], [0]>} : vector<2x8x32xf32>, vector<2x8x32xf32>, vector<2x8x8xf32> -> vector<2x8x8xf32>
    "tpu.trace_stop"() : () -> ()
    %cst_71 = arith.constant dense<0xFF800000> : vector<2x8xf32>
    %195 = vector.multi_reduction <maximumf>, %194, %cst_71 [2] : vector<2x8x8xf32> to vector<2x8xf32>
    %196 = vector.shape_cast %195 : vector<2x8xf32> to vector<2x8x1xf32>
    %197 = vector.broadcast %196 : vector<2x8x1xf32> to vector<2x8x8xf32>
    %198 = arith.subf %194, %197 : vector<2x8x8xf32>
    %199 = math.exp %198 : vector<2x8x8xf32>
    %cst_72 = arith.constant dense<0.000000e+00> : vector<2x8xf32>
    %200 = vector.multi_reduction <add>, %199, %cst_72 [2] : vector<2x8x8xf32> to vector<2x8xf32>
    %201 = vector.shape_cast %200 : vector<2x8xf32> to vector<2x8x1xf32>
    %202 = vector.broadcast %201 : vector<2x8x1xf32> to vector<2x8x8xf32>
    %203 = arith.divf %199, %202 : vector<2x8x8xf32>
    %204 = arith.index_cast %c2_i32 : i32 to index
    %c0_73 = arith.constant 0 : index
    %c0_74 = arith.constant 0 : index
    %c0_75 = arith.constant 0 : index
    %205 = vector.load %arg8[%204, %c0_73, %c0_74, %c0_75] : memref<16x2x8x8xf32, #tpu.memory_space<vmem>>, vector<1x2x8x8xf32>
    %206 = vector.shape_cast %205 : vector<1x2x8x8xf32> to vector<2x8x8xf32>
    %207 = vector.shape_cast %203 : vector<2x8x8xf32> to vector<1x2x8x8xf32>
    tpu.vector_store %arg8[%204, %c0_73, %c0_74, %c0_75], %207 {strides = array<i32>} : memref<16x2x8x8xf32, #tpu.memory_space<vmem>>, vector<1x2x8x8xf32>,
    %208 = vector.shape_cast %5 : vector<8x2xf32> to vector<1x8x2xf32>
    %209 = vector.broadcast %208 : vector<1x8x2xf32> to vector<2x8x2xf32>
    %210 = arith.addf %190, %209 : vector<2x8x2xf32>
    "tpu.trace_start"() <{level = 10 : i32, message = "bnt,btk->bnk"}> : () -> ()
    %cst_76 = arith.constant dense<0.000000e+00> : vector<2x8x2xf32>
    %211 = tpu.matmul %203, %210, %cst_76 {dimension_numbers = #tpu.dot_dimension_numbers<[2], [1], [1], [2], [0, 0, 0, 1, 1, 2], [0], [0]>} : vector<2x8x8xf32>, vector<2x8x2xf32>, vector<2x8x2xf32> -> vector<2x8x2xf32>
    "tpu.trace_stop"() : () -> ()
    %212 = vector.extract_strided_slice %211 {offsets = [0, 0, 0], sizes = [2, 8, 1], strides = [1, 1, 1]} : vector<2x8x2xf32> to vector<2x8x1xf32>
    %213 = vector.shape_cast %212 : vector<2x8x1xf32> to vector<2x8xf32>
    %214 = vector.extract_strided_slice %211 {offsets = [0, 0, 1], sizes = [2, 8, 1], strides = [1, 1, 1]} : vector<2x8x2xf32> to vector<2x8x1xf32>
    %215 = vector.shape_cast %214 : vector<2x8x1xf32> to vector<2x8xf32>
    %cst_77 = arith.constant dense<0xFF800000> : vector<2xf32>
    %216 = vector.multi_reduction <maximumf>, %213, %cst_77 [1] : vector<2x8xf32> to vector<2xf32>
    %217 = vector.shape_cast %216 : vector<2xf32> to vector<2x1xf32>
    %218 = vector.broadcast %217 : vector<2x1xf32> to vector<2x8xf32>
    %219 = arith.subf %213, %218 : vector<2x8xf32>
    %220 = math.exp %219 : vector<2x8xf32>
    %221 = arith.index_cast %c2_i32 : i32 to index
    %c0_78 = arith.constant 0 : index
    %c0_79 = arith.constant 0 : index
    %222 = vector.load %arg3[%221, %c0_78, %c0_79] : memref<16x2x8xf32, #tpu.memory_space<vmem>>, vector<1x2x8xf32>
    %223 = vector.shape_cast %222 : vector<1x2x8xf32> to vector<2x8xf32>
    %224 = arith.mulf %220, %223 : vector<2x8xf32>
    %cst_80 = arith.constant dense<0.000000e+00> : vector<2xf32>
    %225 = vector.multi_reduction <add>, %224, %cst_80 [1] : vector<2x8xf32> to vector<2xf32>
    %226 = vector.shape_cast %225 : vector<2xf32> to vector<2x1xf32>
    %cst_81 = arith.constant 1.000000e-30 : f32
    %227 = vector.broadcast %cst_81 : f32 to vector<2x1xf32>
    %228 = arith.maximumf %226, %227 : vector<2x1xf32>
    %229 = vector.broadcast %228 : vector<2x1xf32> to vector<2x8xf32>
    %230 = arith.divf %224, %229 : vector<2x8xf32>
    %231 = arith.index_cast %c2_i32 : i32 to index
    %c0_82 = arith.constant 0 : index
    %c0_83 = arith.constant 0 : index
    %232 = vector.load %arg9[%231, %c0_82, %c0_83] : memref<16x2x8xf32, #tpu.memory_space<vmem>>, vector<1x2x8xf32>
    %233 = vector.shape_cast %232 : vector<1x2x8xf32> to vector<2x8xf32>
    %234 = vector.shape_cast %230 : vector<2x8xf32> to vector<1x2x8xf32>
    tpu.vector_store %arg9[%231, %c0_82, %c0_83], %234 {strides = array<i32>} : memref<16x2x8xf32, #tpu.memory_space<vmem>>, vector<1x2x8xf32>,
    %235 = arith.index_cast %c2_i32 : i32 to index
    %c0_84 = arith.constant 0 : index
    %c0_85 = arith.constant 0 : index
    %236 = vector.load %arg10[%235, %c0_84, %c0_85] : memref<16x2x8xf32, #tpu.memory_space<vmem>>, vector<1x2x8xf32>
    %237 = vector.shape_cast %236 : vector<1x2x8xf32> to vector<2x8xf32>
    %238 = vector.shape_cast %215 : vector<2x8xf32> to vector<1x2x8xf32>
    tpu.vector_store %arg10[%235, %c0_84, %c0_85], %238 {strides = array<i32>} : memref<16x2x8xf32, #tpu.memory_space<vmem>>, vector<1x2x8xf32>,
    %c3_i32 = arith.constant 3 : i32
    %239 = arith.index_cast %c3_i32 : i32 to index
    %c0_86 = arith.constant 0 : index
    %c0_87 = arith.constant 0 : index
    %240 = vector.load %arg1[%239, %c0_86, %c0_87] : memref<16x2x128xf32, #tpu.memory_space<vmem>>, vector<1x2x128xf32>
    %241 = vector.shape_cast %240 : vector<1x2x128xf32> to vector<2x128xf32>
    %cst_88 = arith.constant dense<0.000000e+00> : vector<2x128xf32>
    %242 = tpu.matmul %183, %3, %cst_88 {dimension_numbers = #tpu.dot_dimension_numbers<[1], [0], [0], [1], [0, 0, 1, 1], [], []>} : vector<2x32xf32>, vector<32x128xf32>, vector<2x128xf32> -> vector<2x128xf32>
    %243 = arith.addf %241, %242 : vector<2x128xf32>
    %244 = arith.negf %243 : vector<2x128xf32>
    %245 = math.exp %244 : vector<2x128xf32>
    %cst_89 = arith.constant 1.000000e+00 : f32
    %246 = vector.broadcast %cst_89 : f32 to vector<2x128xf32>
    %247 = arith.addf %246, %245 : vector<2x128xf32>
    %248 = arith.divf %246, %247 : vector<2x128xf32>
    %249 = vector.extract_strided_slice %248 {offsets = [0, 0], sizes = [2, 32], strides = [1, 1]} : vector<2x128xf32> to vector<2x32xf32>
    %250 = vector.extract_strided_slice %248 {offsets = [0, 32], sizes = [2, 32], strides = [1, 1]} : vector<2x128xf32> to vector<2x32xf32>
    %251 = vector.extract_strided_slice %248 {offsets = [0, 96], sizes = [2, 32], strides = [1, 1]} : vector<2x128xf32> to vector<2x32xf32>
    %252 = vector.extract_strided_slice %243 {offsets = [0, 64], sizes = [2, 32], strides = [1, 1]} : vector<2x128xf32> to vector<2x32xf32>
    %253 = math.tanh %252 : vector<2x32xf32>
    %254 = arith.mulf %250, %181 : vector<2x32xf32>
    %255 = arith.mulf %249, %253 : vector<2x32xf32>
    %256 = arith.addf %254, %255 : vector<2x32xf32>
    %257 = math.tanh %256 : vector<2x32xf32>
    %258 = arith.mulf %251, %257 : vector<2x32xf32>
    %259 = vector.extract_strided_slice %186 {offsets = [0, 1, 0], sizes = [2, 7, 32], strides = [1, 1, 1]} : vector<2x8x32xf32> to vector<2x7x32xf32>
    %260 = vector.shape_cast %256 : vector<2x32xf32> to vector<2x1x32xf32>
    %261 = tpu.concatenate %259, %260 in 1 : vector<2x7x32xf32>, vector<2x1x32xf32> -> vector<2x8x32xf32>
    %cst_90 = arith.constant dense<0.000000e+00> : vector<2x2xf32>
    %262 = tpu.matmul %256, %4, %cst_90 {dimension_numbers = #tpu.dot_dimension_numbers<[1], [0], [0], [1], [0, 0, 1, 1], [], []>} : vector<2x32xf32>, vector<32x2xf32>, vector<2x2xf32> -> vector<2x2xf32>
    %263 = vector.extract_strided_slice %190 {offsets = [0, 1, 0], sizes = [2, 7, 2], strides = [1, 1, 1]} : vector<2x8x2xf32> to vector<2x7x2xf32>
    %264 = vector.shape_cast %262 : vector<2x2xf32> to vector<2x1x2xf32>
    %265 = tpu.concatenate %263, %264 in 1 : vector<2x7x2xf32>, vector<2x1x2xf32> -> vector<2x8x2xf32>
    %266 = arith.index_cast %c3_i32 : i32 to index
    %c0_91 = arith.constant 0 : index
    %c0_92 = arith.constant 0 : index
    %c0_93 = arith.constant 0 : index
    %267 = vector.load %arg2[%266, %c0_91, %c0_92, %c0_93] : memref<16x2x8x32xf32, #tpu.memory_space<vmem>>, vector<1x2x8x32xf32>
    %268 = vector.shape_cast %267 : vector<1x2x8x32xf32> to vector<2x8x32xf32>
    "tpu.trace_start"() <{level = 10 : i32, message = "bnh,bth->bnt"}> : () -> ()
    %cst_94 = arith.constant dense<0.000000e+00> : vector<2x8x8xf32>
    %269 = tpu.matmul %268, %261, %cst_94 {dimension_numbers = #tpu.dot_dimension_numbers<[2], [2], [1], [1], [0, 0, 0, 1, 1, 1], [0], [0]>} : vector<2x8x32xf32>, vector<2x8x32xf32>, vector<2x8x8xf32> -> vector<2x8x8xf32>
    "tpu.trace_stop"() : () -> ()
    %cst_95 = arith.constant dense<0xFF800000> : vector<2x8xf32>
    %270 = vector.multi_reduction <maximumf>, %269, %cst_95 [2] : vector<2x8x8xf32> to vector<2x8xf32>
    %271 = vector.shape_cast %270 : vector<2x8xf32> to vector<2x8x1xf32>
    %272 = vector.broadcast %271 : vector<2x8x1xf32> to vector<2x8x8xf32>
    %273 = arith.subf %269, %272 : vector<2x8x8xf32>
    %274 = math.exp %273 : vector<2x8x8xf32>
    %cst_96 = arith.constant dense<0.000000e+00> : vector<2x8xf32>
    %275 = vector.multi_reduction <add>, %274, %cst_96 [2] : vector<2x8x8xf32> to vector<2x8xf32>
    %276 = vector.shape_cast %275 : vector<2x8xf32> to vector<2x8x1xf32>
    %277 = vector.broadcast %276 : vector<2x8x1xf32> to vector<2x8x8xf32>
    %278 = arith.divf %274, %277 : vector<2x8x8xf32>
    %279 = arith.index_cast %c3_i32 : i32 to index
    %c0_97 = arith.constant 0 : index
    %c0_98 = arith.constant 0 : index
    %c0_99 = arith.constant 0 : index
    %280 = vector.load %arg8[%279, %c0_97, %c0_98, %c0_99] : memref<16x2x8x8xf32, #tpu.memory_space<vmem>>, vector<1x2x8x8xf32>
    %281 = vector.shape_cast %280 : vector<1x2x8x8xf32> to vector<2x8x8xf32>
    %282 = vector.shape_cast %278 : vector<2x8x8xf32> to vector<1x2x8x8xf32>
    tpu.vector_store %arg8[%279, %c0_97, %c0_98, %c0_99], %282 {strides = array<i32>} : memref<16x2x8x8xf32, #tpu.memory_space<vmem>>, vector<1x2x8x8xf32>,
    %283 = vector.shape_cast %5 : vector<8x2xf32> to vector<1x8x2xf32>
    %284 = vector.broadcast %283 : vector<1x8x2xf32> to vector<2x8x2xf32>
    %285 = arith.addf %265, %284 : vector<2x8x2xf32>
    "tpu.trace_start"() <{level = 10 : i32, message = "bnt,btk->bnk"}> : () -> ()
    %cst_100 = arith.constant dense<0.000000e+00> : vector<2x8x2xf32>
    %286 = tpu.matmul %278, %285, %cst_100 {dimension_numbers = #tpu.dot_dimension_numbers<[2], [1], [1], [2], [0, 0, 0, 1, 1, 2], [0], [0]>} : vector<2x8x8xf32>, vector<2x8x2xf32>, vector<2x8x2xf32> -> vector<2x8x2xf32>
    "tpu.trace_stop"() : () -> ()
    %287 = vector.extract_strided_slice %286 {offsets = [0, 0, 0], sizes = [2, 8, 1], strides = [1, 1, 1]} : vector<2x8x2xf32> to vector<2x8x1xf32>
    %288 = vector.shape_cast %287 : vector<2x8x1xf32> to vector<2x8xf32>
    %289 = vector.extract_strided_slice %286 {offsets = [0, 0, 1], sizes = [2, 8, 1], strides = [1, 1, 1]} : vector<2x8x2xf32> to vector<2x8x1xf32>
    %290 = vector.shape_cast %289 : vector<2x8x1xf32> to vector<2x8xf32>
    %cst_101 = arith.constant dense<0xFF800000> : vector<2xf32>
    %291 = vector.multi_reduction <maximumf>, %288, %cst_101 [1] : vector<2x8xf32> to vector<2xf32>
    %292 = vector.shape_cast %291 : vector<2xf32> to vector<2x1xf32>
    %293 = vector.broadcast %292 : vector<2x1xf32> to vector<2x8xf32>
    %294 = arith.subf %288, %293 : vector<2x8xf32>
    %295 = math.exp %294 : vector<2x8xf32>
    %296 = arith.index_cast %c3_i32 : i32 to index
    %c0_102 = arith.constant 0 : index
    %c0_103 = arith.constant 0 : index
    %297 = vector.load %arg3[%296, %c0_102, %c0_103] : memref<16x2x8xf32, #tpu.memory_space<vmem>>, vector<1x2x8xf32>
    %298 = vector.shape_cast %297 : vector<1x2x8xf32> to vector<2x8xf32>
    %299 = arith.mulf %295, %298 : vector<2x8xf32>
    %cst_104 = arith.constant dense<0.000000e+00> : vector<2xf32>
    %300 = vector.multi_reduction <add>, %299, %cst_104 [1] : vector<2x8xf32> to vector<2xf32>
    %301 = vector.shape_cast %300 : vector<2xf32> to vector<2x1xf32>
    %cst_105 = arith.constant 1.000000e-30 : f32
    %302 = vector.broadcast %cst_105 : f32 to vector<2x1xf32>
    %303 = arith.maximumf %301, %302 : vector<2x1xf32>
    %304 = vector.broadcast %303 : vector<2x1xf32> to vector<2x8xf32>
    %305 = arith.divf %299, %304 : vector<2x8xf32>
    %306 = arith.index_cast %c3_i32 : i32 to index
    %c0_106 = arith.constant 0 : index
    %c0_107 = arith.constant 0 : index
    %307 = vector.load %arg9[%306, %c0_106, %c0_107] : memref<16x2x8xf32, #tpu.memory_space<vmem>>, vector<1x2x8xf32>
    %308 = vector.shape_cast %307 : vector<1x2x8xf32> to vector<2x8xf32>
    %309 = vector.shape_cast %305 : vector<2x8xf32> to vector<1x2x8xf32>
    tpu.vector_store %arg9[%306, %c0_106, %c0_107], %309 {strides = array<i32>} : memref<16x2x8xf32, #tpu.memory_space<vmem>>, vector<1x2x8xf32>,
    %310 = arith.index_cast %c3_i32 : i32 to index
    %c0_108 = arith.constant 0 : index
    %c0_109 = arith.constant 0 : index
    %311 = vector.load %arg10[%310, %c0_108, %c0_109] : memref<16x2x8xf32, #tpu.memory_space<vmem>>, vector<1x2x8xf32>
    %312 = vector.shape_cast %311 : vector<1x2x8xf32> to vector<2x8xf32>
    %313 = vector.shape_cast %290 : vector<2x8xf32> to vector<1x2x8xf32>
    tpu.vector_store %arg10[%310, %c0_108, %c0_109], %313 {strides = array<i32>} : memref<16x2x8xf32, #tpu.memory_space<vmem>>, vector<1x2x8xf32>,
    %c4_i32 = arith.constant 4 : i32
    %314 = arith.index_cast %c4_i32 : i32 to index
    %c0_110 = arith.constant 0 : index
    %c0_111 = arith.constant 0 : index
    %315 = vector.load %arg1[%314, %c0_110, %c0_111] : memref<16x2x128xf32, #tpu.memory_space<vmem>>, vector<1x2x128xf32>
    %316 = vector.shape_cast %315 : vector<1x2x128xf32> to vector<2x128xf32>
    %cst_112 = arith.constant dense<0.000000e+00> : vector<2x128xf32>
    %317 = tpu.matmul %258, %3, %cst_112 {dimension_numbers = #tpu.dot_dimension_numbers<[1], [0], [0], [1], [0, 0, 1, 1], [], []>} : vector<2x32xf32>, vector<32x128xf32>, vector<2x128xf32> -> vector<2x128xf32>
    %318 = arith.addf %316, %317 : vector<2x128xf32>
    %319 = arith.negf %318 : vector<2x128xf32>
    %320 = math.exp %319 : vector<2x128xf32>
    %cst_113 = arith.constant 1.000000e+00 : f32
    %321 = vector.broadcast %cst_113 : f32 to vector<2x128xf32>
    %322 = arith.addf %321, %320 : vector<2x128xf32>
    %323 = arith.divf %321, %322 : vector<2x128xf32>
    %324 = vector.extract_strided_slice %323 {offsets = [0, 0], sizes = [2, 32], strides = [1, 1]} : vector<2x128xf32> to vector<2x32xf32>
    %325 = vector.extract_strided_slice %323 {offsets = [0, 32], sizes = [2, 32], strides = [1, 1]} : vector<2x128xf32> to vector<2x32xf32>
    %326 = vector.extract_strided_slice %323 {offsets = [0, 96], sizes = [2, 32], strides = [1, 1]} : vector<2x128xf32> to vector<2x32xf32>
    %327 = vector.extract_strided_slice %318 {offsets = [0, 64], sizes = [2, 32], strides = [1, 1]} : vector<2x128xf32> to vector<2x32xf32>
    %328 = math.tanh %327 : vector<2x32xf32>
    %329 = arith.mulf %325, %256 : vector<2x32xf32>
    %330 = arith.mulf %324, %328 : vector<2x32xf32>
    %331 = arith.addf %329, %330 : vector<2x32xf32>
    %332 = math.tanh %331 : vector<2x32xf32>
    %333 = arith.mulf %326, %332 : vector<2x32xf32>
    %334 = vector.extract_strided_slice %261 {offsets = [0, 1, 0], sizes = [2, 7, 32], strides = [1, 1, 1]} : vector<2x8x32xf32> to vector<2x7x32xf32>
    %335 = vector.shape_cast %331 : vector<2x32xf32> to vector<2x1x32xf32>
    %336 = tpu.concatenate %334, %335 in 1 : vector<2x7x32xf32>, vector<2x1x32xf32> -> vector<2x8x32xf32>
    %cst_114 = arith.constant dense<0.000000e+00> : vector<2x2xf32>
    %337 = tpu.matmul %331, %4, %cst_114 {dimension_numbers = #tpu.dot_dimension_numbers<[1], [0], [0], [1], [0, 0, 1, 1], [], []>} : vector<2x32xf32>, vector<32x2xf32>, vector<2x2xf32> -> vector<2x2xf32>
    %338 = vector.extract_strided_slice %265 {offsets = [0, 1, 0], sizes = [2, 7, 2], strides = [1, 1, 1]} : vector<2x8x2xf32> to vector<2x7x2xf32>
    %339 = vector.shape_cast %337 : vector<2x2xf32> to vector<2x1x2xf32>
    %340 = tpu.concatenate %338, %339 in 1 : vector<2x7x2xf32>, vector<2x1x2xf32> -> vector<2x8x2xf32>
    %341 = arith.index_cast %c4_i32 : i32 to index
    %c0_115 = arith.constant 0 : index
    %c0_116 = arith.constant 0 : index
    %c0_117 = arith.constant 0 : index
    %342 = vector.load %arg2[%341, %c0_115, %c0_116, %c0_117] : memref<16x2x8x32xf32, #tpu.memory_space<vmem>>, vector<1x2x8x32xf32>
    %343 = vector.shape_cast %342 : vector<1x2x8x32xf32> to vector<2x8x32xf32>
    "tpu.trace_start"() <{level = 10 : i32, message = "bnh,bth->bnt"}> : () -> ()
    %cst_118 = arith.constant dense<0.000000e+00> : vector<2x8x8xf32>
    %344 = tpu.matmul %343, %336, %cst_118 {dimension_numbers = #tpu.dot_dimension_numbers<[2], [2], [1], [1], [0, 0, 0, 1, 1, 1], [0], [0]>} : vector<2x8x32xf32>, vector<2x8x32xf32>, vector<2x8x8xf32> -> vector<2x8x8xf32>
    "tpu.trace_stop"() : () -> ()
    %cst_119 = arith.constant dense<0xFF800000> : vector<2x8xf32>
    %345 = vector.multi_reduction <maximumf>, %344, %cst_119 [2] : vector<2x8x8xf32> to vector<2x8xf32>
    %346 = vector.shape_cast %345 : vector<2x8xf32> to vector<2x8x1xf32>
    %347 = vector.broadcast %346 : vector<2x8x1xf32> to vector<2x8x8xf32>
    %348 = arith.subf %344, %347 : vector<2x8x8xf32>
    %349 = math.exp %348 : vector<2x8x8xf32>
    %cst_120 = arith.constant dense<0.000000e+00> : vector<2x8xf32>
    %350 = vector.multi_reduction <add>, %349, %cst_120 [2] : vector<2x8x8xf32> to vector<2x8xf32>
    %351 = vector.shape_cast %350 : vector<2x8xf32> to vector<2x8x1xf32>
    %352 = vector.broadcast %351 : vector<2x8x1xf32> to vector<2x8x8xf32>
    %353 = arith.divf %349, %352 : vector<2x8x8xf32>
    %354 = arith.index_cast %c4_i32 : i32 to index
    %c0_121 = arith.constant 0 : index
    %c0_122 = arith.constant 0 : index
    %c0_123 = arith.constant 0 : index
    %355 = vector.load %arg8[%354, %c0_121, %c0_122, %c0_123] : memref<16x2x8x8xf32, #tpu.memory_space<vmem>>, vector<1x2x8x8xf32>
    %356 = vector.shape_cast %355 : vector<1x2x8x8xf32> to vector<2x8x8xf32>
    %357 = vector.shape_cast %353 : vector<2x8x8xf32> to vector<1x2x8x8xf32>
    tpu.vector_store %arg8[%354, %c0_121, %c0_122, %c0_123], %357 {strides = array<i32>} : memref<16x2x8x8xf32, #tpu.memory_space<vmem>>, vector<1x2x8x8xf32>,
    %358 = vector.shape_cast %5 : vector<8x2xf32> to vector<1x8x2xf32>
    %359 = vector.broadcast %358 : vector<1x8x2xf32> to vector<2x8x2xf32>
    %360 = arith.addf %340, %359 : vector<2x8x2xf32>
    "tpu.trace_start"() <{level = 10 : i32, message = "bnt,btk->bnk"}> : () -> ()
    %cst_124 = arith.constant dense<0.000000e+00> : vector<2x8x2xf32>
    %361 = tpu.matmul %353, %360, %cst_124 {dimension_numbers = #tpu.dot_dimension_numbers<[2], [1], [1], [2], [0, 0, 0, 1, 1, 2], [0], [0]>} : vector<2x8x8xf32>, vector<2x8x2xf32>, vector<2x8x2xf32> -> vector<2x8x2xf32>
    "tpu.trace_stop"() : () -> ()
    %362 = vector.extract_strided_slice %361 {offsets = [0, 0, 0], sizes = [2, 8, 1], strides = [1, 1, 1]} : vector<2x8x2xf32> to vector<2x8x1xf32>
    %363 = vector.shape_cast %362 : vector<2x8x1xf32> to vector<2x8xf32>
    %364 = vector.extract_strided_slice %361 {offsets = [0, 0, 1], sizes = [2, 8, 1], strides = [1, 1, 1]} : vector<2x8x2xf32> to vector<2x8x1xf32>
    %365 = vector.shape_cast %364 : vector<2x8x1xf32> to vector<2x8xf32>
    %cst_125 = arith.constant dense<0xFF800000> : vector<2xf32>
    %366 = vector.multi_reduction <maximumf>, %363, %cst_125 [1] : vector<2x8xf32> to vector<2xf32>
    %367 = vector.shape_cast %366 : vector<2xf32> to vector<2x1xf32>
    %368 = vector.broadcast %367 : vector<2x1xf32> to vector<2x8xf32>
    %369 = arith.subf %363, %368 : vector<2x8xf32>
    %370 = math.exp %369 : vector<2x8xf32>
    %371 = arith.index_cast %c4_i32 : i32 to index
    %c0_126 = arith.constant 0 : index
    %c0_127 = arith.constant 0 : index
    %372 = vector.load %arg3[%371, %c0_126, %c0_127] : memref<16x2x8xf32, #tpu.memory_space<vmem>>, vector<1x2x8xf32>
    %373 = vector.shape_cast %372 : vector<1x2x8xf32> to vector<2x8xf32>
    %374 = arith.mulf %370, %373 : vector<2x8xf32>
    %cst_128 = arith.constant dense<0.000000e+00> : vector<2xf32>
    %375 = vector.multi_reduction <add>, %374, %cst_128 [1] : vector<2x8xf32> to vector<2xf32>
    %376 = vector.shape_cast %375 : vector<2xf32> to vector<2x1xf32>
    %cst_129 = arith.constant 1.000000e-30 : f32
    %377 = vector.broadcast %cst_129 : f32 to vector<2x1xf32>
    %378 = arith.maximumf %376, %377 : vector<2x1xf32>
    %379 = vector.broadcast %378 : vector<2x1xf32> to vector<2x8xf32>
    %380 = arith.divf %374, %379 : vector<2x8xf32>
    %381 = arith.index_cast %c4_i32 : i32 to index
    %c0_130 = arith.constant 0 : index
    %c0_131 = arith.constant 0 : index
    %382 = vector.load %arg9[%381, %c0_130, %c0_131] : memref<16x2x8xf32, #tpu.memory_space<vmem>>, vector<1x2x8xf32>
    %383 = vector.shape_cast %382 : vector<1x2x8xf32> to vector<2x8xf32>
    %384 = vector.shape_cast %380 : vector<2x8xf32> to vector<1x2x8xf32>
    tpu.vector_store %arg9[%381, %c0_130, %c0_131], %384 {strides = array<i32>} : memref<16x2x8xf32, #tpu.memory_space<vmem>>, vector<1x2x8xf32>,
    %385 = arith.index_cast %c4_i32 : i32 to index
    %c0_132 = arith.constant 0 : index
    %c0_133 = arith.constant 0 : index
    %386 = vector.load %arg10[%385, %c0_132, %c0_133] : memref<16x2x8xf32, #tpu.memory_space<vmem>>, vector<1x2x8xf32>
    %387 = vector.shape_cast %386 : vector<1x2x8xf32> to vector<2x8xf32>
    %388 = vector.shape_cast %365 : vector<2x8xf32> to vector<1x2x8xf32>
    tpu.vector_store %arg10[%385, %c0_132, %c0_133], %388 {strides = array<i32>} : memref<16x2x8xf32, #tpu.memory_space<vmem>>, vector<1x2x8xf32>,
    %c5_i32 = arith.constant 5 : i32
    %389 = arith.index_cast %c5_i32 : i32 to index
    %c0_134 = arith.constant 0 : index
    %c0_135 = arith.constant 0 : index
    %390 = vector.load %arg1[%389, %c0_134, %c0_135] : memref<16x2x128xf32, #tpu.memory_space<vmem>>, vector<1x2x128xf32>
    %391 = vector.shape_cast %390 : vector<1x2x128xf32> to vector<2x128xf32>
    %cst_136 = arith.constant dense<0.000000e+00> : vector<2x128xf32>
    %392 = tpu.matmul %333, %3, %cst_136 {dimension_numbers = #tpu.dot_dimension_numbers<[1], [0], [0], [1], [0, 0, 1, 1], [], []>} : vector<2x32xf32>, vector<32x128xf32>, vector<2x128xf32> -> vector<2x128xf32>
    %393 = arith.addf %391, %392 : vector<2x128xf32>
    %394 = arith.negf %393 : vector<2x128xf32>
    %395 = math.exp %394 : vector<2x128xf32>
    %cst_137 = arith.constant 1.000000e+00 : f32
    %396 = vector.broadcast %cst_137 : f32 to vector<2x128xf32>
    %397 = arith.addf %396, %395 : vector<2x128xf32>
    %398 = arith.divf %396, %397 : vector<2x128xf32>
    %399 = vector.extract_strided_slice %398 {offsets = [0, 0], sizes = [2, 32], strides = [1, 1]} : vector<2x128xf32> to vector<2x32xf32>
    %400 = vector.extract_strided_slice %398 {offsets = [0, 32], sizes = [2, 32], strides = [1, 1]} : vector<2x128xf32> to vector<2x32xf32>
    %401 = vector.extract_strided_slice %398 {offsets = [0, 96], sizes = [2, 32], strides = [1, 1]} : vector<2x128xf32> to vector<2x32xf32>
    %402 = vector.extract_strided_slice %393 {offsets = [0, 64], sizes = [2, 32], strides = [1, 1]} : vector<2x128xf32> to vector<2x32xf32>
    %403 = math.tanh %402 : vector<2x32xf32>
    %404 = arith.mulf %400, %331 : vector<2x32xf32>
    %405 = arith.mulf %399, %403 : vector<2x32xf32>
    %406 = arith.addf %404, %405 : vector<2x32xf32>
    %407 = math.tanh %406 : vector<2x32xf32>
    %408 = arith.mulf %401, %407 : vector<2x32xf32>
    %409 = vector.extract_strided_slice %336 {offsets = [0, 1, 0], sizes = [2, 7, 32], strides = [1, 1, 1]} : vector<2x8x32xf32> to vector<2x7x32xf32>
    %410 = vector.shape_cast %406 : vector<2x32xf32> to vector<2x1x32xf32>
    %411 = tpu.concatenate %409, %410 in 1 : vector<2x7x32xf32>, vector<2x1x32xf32> -> vector<2x8x32xf32>
    %cst_138 = arith.constant dense<0.000000e+00> : vector<2x2xf32>
    %412 = tpu.matmul %406, %4, %cst_138 {dimension_numbers = #tpu.dot_dimension_numbers<[1], [0], [0], [1], [0, 0, 1, 1], [], []>} : vector<2x32xf32>, vector<32x2xf32>, vector<2x2xf32> -> vector<2x2xf32>
    %413 = vector.extract_strided_slice %340 {offsets = [0, 1, 0], sizes = [2, 7, 2], strides = [1, 1, 1]} : vector<2x8x2xf32> to vector<2x7x2xf32>
    %414 = vector.shape_cast %412 : vector<2x2xf32> to vector<2x1x2xf32>
    %415 = tpu.concatenate %413, %414 in 1 : vector<2x7x2xf32>, vector<2x1x2xf32> -> vector<2x8x2xf32>
    %416 = arith.index_cast %c5_i32 : i32 to index
    %c0_139 = arith.constant 0 : index
    %c0_140 = arith.constant 0 : index
    %c0_141 = arith.constant 0 : index
    %417 = vector.load %arg2[%416, %c0_139, %c0_140, %c0_141] : memref<16x2x8x32xf32, #tpu.memory_space<vmem>>, vector<1x2x8x32xf32>
    %418 = vector.shape_cast %417 : vector<1x2x8x32xf32> to vector<2x8x32xf32>
    "tpu.trace_start"() <{level = 10 : i32, message = "bnh,bth->bnt"}> : () -> ()
    %cst_142 = arith.constant dense<0.000000e+00> : vector<2x8x8xf32>
    %419 = tpu.matmul %418, %411, %cst_142 {dimension_numbers = #tpu.dot_dimension_numbers<[2], [2], [1], [1], [0, 0, 0, 1, 1, 1], [0], [0]>} : vector<2x8x32xf32>, vector<2x8x32xf32>, vector<2x8x8xf32> -> vector<2x8x8xf32>
    "tpu.trace_stop"() : () -> ()
    %cst_143 = arith.constant dense<0xFF800000> : vector<2x8xf32>
    %420 = vector.multi_reduction <maximumf>, %419, %cst_143 [2] : vector<2x8x8xf32> to vector<2x8xf32>
    %421 = vector.shape_cast %420 : vector<2x8xf32> to vector<2x8x1xf32>
    %422 = vector.broadcast %421 : vector<2x8x1xf32> to vector<2x8x8xf32>
    %423 = arith.subf %419, %422 : vector<2x8x8xf32>
    %424 = math.exp %423 : vector<2x8x8xf32>
    %cst_144 = arith.constant dense<0.000000e+00> : vector<2x8xf32>
    %425 = vector.multi_reduction <add>, %424, %cst_144 [2] : vector<2x8x8xf32> to vector<2x8xf32>
    %426 = vector.shape_cast %425 : vector<2x8xf32> to vector<2x8x1xf32>
    %427 = vector.broadcast %426 : vector<2x8x1xf32> to vector<2x8x8xf32>
    %428 = arith.divf %424, %427 : vector<2x8x8xf32>
    %429 = arith.index_cast %c5_i32 : i32 to index
    %c0_145 = arith.constant 0 : index
    %c0_146 = arith.constant 0 : index
    %c0_147 = arith.constant 0 : index
    %430 = vector.load %arg8[%429, %c0_145, %c0_146, %c0_147] : memref<16x2x8x8xf32, #tpu.memory_space<vmem>>, vector<1x2x8x8xf32>
    %431 = vector.shape_cast %430 : vector<1x2x8x8xf32> to vector<2x8x8xf32>
    %432 = vector.shape_cast %428 : vector<2x8x8xf32> to vector<1x2x8x8xf32>
    tpu.vector_store %arg8[%429, %c0_145, %c0_146, %c0_147], %432 {strides = array<i32>} : memref<16x2x8x8xf32, #tpu.memory_space<vmem>>, vector<1x2x8x8xf32>,
    %433 = vector.shape_cast %5 : vector<8x2xf32> to vector<1x8x2xf32>
    %434 = vector.broadcast %433 : vector<1x8x2xf32> to vector<2x8x2xf32>
    %435 = arith.addf %415, %434 : vector<2x8x2xf32>
    "tpu.trace_start"() <{level = 10 : i32, message = "bnt,btk->bnk"}> : () -> ()
    %cst_148 = arith.constant dense<0.000000e+00> : vector<2x8x2xf32>
    %436 = tpu.matmul %428, %435, %cst_148 {dimension_numbers = #tpu.dot_dimension_numbers<[2], [1], [1], [2], [0, 0, 0, 1, 1, 2], [0], [0]>} : vector<2x8x8xf32>, vector<2x8x2xf32>, vector<2x8x2xf32> -> vector<2x8x2xf32>
    "tpu.trace_stop"() : () -> ()
    %437 = vector.extract_strided_slice %436 {offsets = [0, 0, 0], sizes = [2, 8, 1], strides = [1, 1, 1]} : vector<2x8x2xf32> to vector<2x8x1xf32>
    %438 = vector.shape_cast %437 : vector<2x8x1xf32> to vector<2x8xf32>
    %439 = vector.extract_strided_slice %436 {offsets = [0, 0, 1], sizes = [2, 8, 1], strides = [1, 1, 1]} : vector<2x8x2xf32> to vector<2x8x1xf32>
    %440 = vector.shape_cast %439 : vector<2x8x1xf32> to vector<2x8xf32>
    %cst_149 = arith.constant dense<0xFF800000> : vector<2xf32>
    %441 = vector.multi_reduction <maximumf>, %438, %cst_149 [1] : vector<2x8xf32> to vector<2xf32>
    %442 = vector.shape_cast %441 : vector<2xf32> to vector<2x1xf32>
    %443 = vector.broadcast %442 : vector<2x1xf32> to vector<2x8xf32>
    %444 = arith.subf %438, %443 : vector<2x8xf32>
    %445 = math.exp %444 : vector<2x8xf32>
    %446 = arith.index_cast %c5_i32 : i32 to index
    %c0_150 = arith.constant 0 : index
    %c0_151 = arith.constant 0 : index
    %447 = vector.load %arg3[%446, %c0_150, %c0_151] : memref<16x2x8xf32, #tpu.memory_space<vmem>>, vector<1x2x8xf32>
    %448 = vector.shape_cast %447 : vector<1x2x8xf32> to vector<2x8xf32>
    %449 = arith.mulf %445, %448 : vector<2x8xf32>
    %cst_152 = arith.constant dense<0.000000e+00> : vector<2xf32>
    %450 = vector.multi_reduction <add>, %449, %cst_152 [1] : vector<2x8xf32> to vector<2xf32>
    %451 = vector.shape_cast %450 : vector<2xf32> to vector<2x1xf32>
    %cst_153 = arith.constant 1.000000e-30 : f32
    %452 = vector.broadcast %cst_153 : f32 to vector<2x1xf32>
    %453 = arith.maximumf %451, %452 : vector<2x1xf32>
    %454 = vector.broadcast %453 : vector<2x1xf32> to vector<2x8xf32>
    %455 = arith.divf %449, %454 : vector<2x8xf32>
    %456 = arith.index_cast %c5_i32 : i32 to index
    %c0_154 = arith.constant 0 : index
    %c0_155 = arith.constant 0 : index
    %457 = vector.load %arg9[%456, %c0_154, %c0_155] : memref<16x2x8xf32, #tpu.memory_space<vmem>>, vector<1x2x8xf32>
    %458 = vector.shape_cast %457 : vector<1x2x8xf32> to vector<2x8xf32>
    %459 = vector.shape_cast %455 : vector<2x8xf32> to vector<1x2x8xf32>
    tpu.vector_store %arg9[%456, %c0_154, %c0_155], %459 {strides = array<i32>} : memref<16x2x8xf32, #tpu.memory_space<vmem>>, vector<1x2x8xf32>,
    %460 = arith.index_cast %c5_i32 : i32 to index
    %c0_156 = arith.constant 0 : index
    %c0_157 = arith.constant 0 : index
    %461 = vector.load %arg10[%460, %c0_156, %c0_157] : memref<16x2x8xf32, #tpu.memory_space<vmem>>, vector<1x2x8xf32>
    %462 = vector.shape_cast %461 : vector<1x2x8xf32> to vector<2x8xf32>
    %463 = vector.shape_cast %440 : vector<2x8xf32> to vector<1x2x8xf32>
    tpu.vector_store %arg10[%460, %c0_156, %c0_157], %463 {strides = array<i32>} : memref<16x2x8xf32, #tpu.memory_space<vmem>>, vector<1x2x8xf32>,
    %c6_i32 = arith.constant 6 : i32
    %464 = arith.index_cast %c6_i32 : i32 to index
    %c0_158 = arith.constant 0 : index
    %c0_159 = arith.constant 0 : index
    %465 = vector.load %arg1[%464, %c0_158, %c0_159] : memref<16x2x128xf32, #tpu.memory_space<vmem>>, vector<1x2x128xf32>
    %466 = vector.shape_cast %465 : vector<1x2x128xf32> to vector<2x128xf32>
    %cst_160 = arith.constant dense<0.000000e+00> : vector<2x128xf32>
    %467 = tpu.matmul %408, %3, %cst_160 {dimension_numbers = #tpu.dot_dimension_numbers<[1], [0], [0], [1], [0, 0, 1, 1], [], []>} : vector<2x32xf32>, vector<32x128xf32>, vector<2x128xf32> -> vector<2x128xf32>
    %468 = arith.addf %466, %467 : vector<2x128xf32>
    %469 = arith.negf %468 : vector<2x128xf32>
    %470 = math.exp %469 : vector<2x128xf32>
    %cst_161 = arith.constant 1.000000e+00 : f32
    %471 = vector.broadcast %cst_161 : f32 to vector<2x128xf32>
    %472 = arith.addf %471, %470 : vector<2x128xf32>
    %473 = arith.divf %471, %472 : vector<2x128xf32>
    %474 = vector.extract_strided_slice %473 {offsets = [0, 0], sizes = [2, 32], strides = [1, 1]} : vector<2x128xf32> to vector<2x32xf32>
    %475 = vector.extract_strided_slice %473 {offsets = [0, 32], sizes = [2, 32], strides = [1, 1]} : vector<2x128xf32> to vector<2x32xf32>
    %476 = vector.extract_strided_slice %473 {offsets = [0, 96], sizes = [2, 32], strides = [1, 1]} : vector<2x128xf32> to vector<2x32xf32>
    %477 = vector.extract_strided_slice %468 {offsets = [0, 64], sizes = [2, 32], strides = [1, 1]} : vector<2x128xf32> to vector<2x32xf32>
    %478 = math.tanh %477 : vector<2x32xf32>
    %479 = arith.mulf %475, %406 : vector<2x32xf32>
    %480 = arith.mulf %474, %478 : vector<2x32xf32>
    %481 = arith.addf %479, %480 : vector<2x32xf32>
    %482 = math.tanh %481 : vector<2x32xf32>
    %483 = arith.mulf %476, %482 : vector<2x32xf32>
    %484 = vector.extract_strided_slice %411 {offsets = [0, 1, 0], sizes = [2, 7, 32], strides = [1, 1, 1]} : vector<2x8x32xf32> to vector<2x7x32xf32>
    %485 = vector.shape_cast %481 : vector<2x32xf32> to vector<2x1x32xf32>
    %486 = tpu.concatenate %484, %485 in 1 : vector<2x7x32xf32>, vector<2x1x32xf32> -> vector<2x8x32xf32>
    %cst_162 = arith.constant dense<0.000000e+00> : vector<2x2xf32>
    %487 = tpu.matmul %481, %4, %cst_162 {dimension_numbers = #tpu.dot_dimension_numbers<[1], [0], [0], [1], [0, 0, 1, 1], [], []>} : vector<2x32xf32>, vector<32x2xf32>, vector<2x2xf32> -> vector<2x2xf32>
    %488 = vector.extract_strided_slice %415 {offsets = [0, 1, 0], sizes = [2, 7, 2], strides = [1, 1, 1]} : vector<2x8x2xf32> to vector<2x7x2xf32>
    %489 = vector.shape_cast %487 : vector<2x2xf32> to vector<2x1x2xf32>
    %490 = tpu.concatenate %488, %489 in 1 : vector<2x7x2xf32>, vector<2x1x2xf32> -> vector<2x8x2xf32>
    %491 = arith.index_cast %c6_i32 : i32 to index
    %c0_163 = arith.constant 0 : index
    %c0_164 = arith.constant 0 : index
    %c0_165 = arith.constant 0 : index
    %492 = vector.load %arg2[%491, %c0_163, %c0_164, %c0_165] : memref<16x2x8x32xf32, #tpu.memory_space<vmem>>, vector<1x2x8x32xf32>
    %493 = vector.shape_cast %492 : vector<1x2x8x32xf32> to vector<2x8x32xf32>
    "tpu.trace_start"() <{level = 10 : i32, message = "bnh,bth->bnt"}> : () -> ()
    %cst_166 = arith.constant dense<0.000000e+00> : vector<2x8x8xf32>
    %494 = tpu.matmul %493, %486, %cst_166 {dimension_numbers = #tpu.dot_dimension_numbers<[2], [2], [1], [1], [0, 0, 0, 1, 1, 1], [0], [0]>} : vector<2x8x32xf32>, vector<2x8x32xf32>, vector<2x8x8xf32> -> vector<2x8x8xf32>
    "tpu.trace_stop"() : () -> ()
    %cst_167 = arith.constant dense<0xFF800000> : vector<2x8xf32>
    %495 = vector.multi_reduction <maximumf>, %494, %cst_167 [2] : vector<2x8x8xf32> to vector<2x8xf32>
    %496 = vector.shape_cast %495 : vector<2x8xf32> to vector<2x8x1xf32>
    %497 = vector.broadcast %496 : vector<2x8x1xf32> to vector<2x8x8xf32>
    %498 = arith.subf %494, %497 : vector<2x8x8xf32>
    %499 = math.exp %498 : vector<2x8x8xf32>
    %cst_168 = arith.constant dense<0.000000e+00> : vector<2x8xf32>
    %500 = vector.multi_reduction <add>, %499, %cst_168 [2] : vector<2x8x8xf32> to vector<2x8xf32>
    %501 = vector.shape_cast %500 : vector<2x8xf32> to vector<2x8x1xf32>
    %502 = vector.broadcast %501 : vector<2x8x1xf32> to vector<2x8x8xf32>
    %503 = arith.divf %499, %502 : vector<2x8x8xf32>
    %504 = arith.index_cast %c6_i32 : i32 to index
    %c0_169 = arith.constant 0 : index
    %c0_170 = arith.constant 0 : index
    %c0_171 = arith.constant 0 : index
    %505 = vector.load %arg8[%504, %c0_169, %c0_170, %c0_171] : memref<16x2x8x8xf32, #tpu.memory_space<vmem>>, vector<1x2x8x8xf32>
    %506 = vector.shape_cast %505 : vector<1x2x8x8xf32> to vector<2x8x8xf32>
    %507 = vector.shape_cast %503 : vector<2x8x8xf32> to vector<1x2x8x8xf32>
    tpu.vector_store %arg8[%504, %c0_169, %c0_170, %c0_171], %507 {strides = array<i32>} : memref<16x2x8x8xf32, #tpu.memory_space<vmem>>, vector<1x2x8x8xf32>,
    %508 = vector.shape_cast %5 : vector<8x2xf32> to vector<1x8x2xf32>
    %509 = vector.broadcast %508 : vector<1x8x2xf32> to vector<2x8x2xf32>
    %510 = arith.addf %490, %509 : vector<2x8x2xf32>
    "tpu.trace_start"() <{level = 10 : i32, message = "bnt,btk->bnk"}> : () -> ()
    %cst_172 = arith.constant dense<0.000000e+00> : vector<2x8x2xf32>
    %511 = tpu.matmul %503, %510, %cst_172 {dimension_numbers = #tpu.dot_dimension_numbers<[2], [1], [1], [2], [0, 0, 0, 1, 1, 2], [0], [0]>} : vector<2x8x8xf32>, vector<2x8x2xf32>, vector<2x8x2xf32> -> vector<2x8x2xf32>
    "tpu.trace_stop"() : () -> ()
    %512 = vector.extract_strided_slice %511 {offsets = [0, 0, 0], sizes = [2, 8, 1], strides = [1, 1, 1]} : vector<2x8x2xf32> to vector<2x8x1xf32>
    %513 = vector.shape_cast %512 : vector<2x8x1xf32> to vector<2x8xf32>
    %514 = vector.extract_strided_slice %511 {offsets = [0, 0, 1], sizes = [2, 8, 1], strides = [1, 1, 1]} : vector<2x8x2xf32> to vector<2x8x1xf32>
    %515 = vector.shape_cast %514 : vector<2x8x1xf32> to vector<2x8xf32>
    %cst_173 = arith.constant dense<0xFF800000> : vector<2xf32>
    %516 = vector.multi_reduction <maximumf>, %513, %cst_173 [1] : vector<2x8xf32> to vector<2xf32>
    %517 = vector.shape_cast %516 : vector<2xf32> to vector<2x1xf32>
    %518 = vector.broadcast %517 : vector<2x1xf32> to vector<2x8xf32>
    %519 = arith.subf %513, %518 : vector<2x8xf32>
    %520 = math.exp %519 : vector<2x8xf32>
    %521 = arith.index_cast %c6_i32 : i32 to index
    %c0_174 = arith.constant 0 : index
    %c0_175 = arith.constant 0 : index
    %522 = vector.load %arg3[%521, %c0_174, %c0_175] : memref<16x2x8xf32, #tpu.memory_space<vmem>>, vector<1x2x8xf32>
    %523 = vector.shape_cast %522 : vector<1x2x8xf32> to vector<2x8xf32>
    %524 = arith.mulf %520, %523 : vector<2x8xf32>
    %cst_176 = arith.constant dense<0.000000e+00> : vector<2xf32>
    %525 = vector.multi_reduction <add>, %524, %cst_176 [1] : vector<2x8xf32> to vector<2xf32>
    %526 = vector.shape_cast %525 : vector<2xf32> to vector<2x1xf32>
    %cst_177 = arith.constant 1.000000e-30 : f32
    %527 = vector.broadcast %cst_177 : f32 to vector<2x1xf32>
    %528 = arith.maximumf %526, %527 : vector<2x1xf32>
    %529 = vector.broadcast %528 : vector<2x1xf32> to vector<2x8xf32>
    %530 = arith.divf %524, %529 : vector<2x8xf32>
    %531 = arith.index_cast %c6_i32 : i32 to index
    %c0_178 = arith.constant 0 : index
    %c0_179 = arith.constant 0 : index
    %532 = vector.load %arg9[%531, %c0_178, %c0_179] : memref<16x2x8xf32, #tpu.memory_space<vmem>>, vector<1x2x8xf32>
    %533 = vector.shape_cast %532 : vector<1x2x8xf32> to vector<2x8xf32>
    %534 = vector.shape_cast %530 : vector<2x8xf32> to vector<1x2x8xf32>
    tpu.vector_store %arg9[%531, %c0_178, %c0_179], %534 {strides = array<i32>} : memref<16x2x8xf32, #tpu.memory_space<vmem>>, vector<1x2x8xf32>,
    %535 = arith.index_cast %c6_i32 : i32 to index
    %c0_180 = arith.constant 0 : index
    %c0_181 = arith.constant 0 : index
    %536 = vector.load %arg10[%535, %c0_180, %c0_181] : memref<16x2x8xf32, #tpu.memory_space<vmem>>, vector<1x2x8xf32>
    %537 = vector.shape_cast %536 : vector<1x2x8xf32> to vector<2x8xf32>
    %538 = vector.shape_cast %515 : vector<2x8xf32> to vector<1x2x8xf32>
    tpu.vector_store %arg10[%535, %c0_180, %c0_181], %538 {strides = array<i32>} : memref<16x2x8xf32, #tpu.memory_space<vmem>>, vector<1x2x8xf32>,
    %c7_i32 = arith.constant 7 : i32
    %539 = arith.index_cast %c7_i32 : i32 to index
    %c0_182 = arith.constant 0 : index
    %c0_183 = arith.constant 0 : index
    %540 = vector.load %arg1[%539, %c0_182, %c0_183] : memref<16x2x128xf32, #tpu.memory_space<vmem>>, vector<1x2x128xf32>
    %541 = vector.shape_cast %540 : vector<1x2x128xf32> to vector<2x128xf32>
    %cst_184 = arith.constant dense<0.000000e+00> : vector<2x128xf32>
    %542 = tpu.matmul %483, %3, %cst_184 {dimension_numbers = #tpu.dot_dimension_numbers<[1], [0], [0], [1], [0, 0, 1, 1], [], []>} : vector<2x32xf32>, vector<32x128xf32>, vector<2x128xf32> -> vector<2x128xf32>
    %543 = arith.addf %541, %542 : vector<2x128xf32>
    %544 = arith.negf %543 : vector<2x128xf32>
    %545 = math.exp %544 : vector<2x128xf32>
    %cst_185 = arith.constant 1.000000e+00 : f32
    %546 = vector.broadcast %cst_185 : f32 to vector<2x128xf32>
    %547 = arith.addf %546, %545 : vector<2x128xf32>
    %548 = arith.divf %546, %547 : vector<2x128xf32>
    %549 = vector.extract_strided_slice %548 {offsets = [0, 0], sizes = [2, 32], strides = [1, 1]} : vector<2x128xf32> to vector<2x32xf32>
    %550 = vector.extract_strided_slice %548 {offsets = [0, 32], sizes = [2, 32], strides = [1, 1]} : vector<2x128xf32> to vector<2x32xf32>
    %551 = vector.extract_strided_slice %548 {offsets = [0, 96], sizes = [2, 32], strides = [1, 1]} : vector<2x128xf32> to vector<2x32xf32>
    %552 = vector.extract_strided_slice %543 {offsets = [0, 64], sizes = [2, 32], strides = [1, 1]} : vector<2x128xf32> to vector<2x32xf32>
    %553 = math.tanh %552 : vector<2x32xf32>
    %554 = arith.mulf %550, %481 : vector<2x32xf32>
    %555 = arith.mulf %549, %553 : vector<2x32xf32>
    %556 = arith.addf %554, %555 : vector<2x32xf32>
    %557 = math.tanh %556 : vector<2x32xf32>
    %558 = arith.mulf %551, %557 : vector<2x32xf32>
    %559 = vector.extract_strided_slice %486 {offsets = [0, 1, 0], sizes = [2, 7, 32], strides = [1, 1, 1]} : vector<2x8x32xf32> to vector<2x7x32xf32>
    %560 = vector.shape_cast %556 : vector<2x32xf32> to vector<2x1x32xf32>
    %561 = tpu.concatenate %559, %560 in 1 : vector<2x7x32xf32>, vector<2x1x32xf32> -> vector<2x8x32xf32>
    %cst_186 = arith.constant dense<0.000000e+00> : vector<2x2xf32>
    %562 = tpu.matmul %556, %4, %cst_186 {dimension_numbers = #tpu.dot_dimension_numbers<[1], [0], [0], [1], [0, 0, 1, 1], [], []>} : vector<2x32xf32>, vector<32x2xf32>, vector<2x2xf32> -> vector<2x2xf32>
    %563 = vector.extract_strided_slice %490 {offsets = [0, 1, 0], sizes = [2, 7, 2], strides = [1, 1, 1]} : vector<2x8x2xf32> to vector<2x7x2xf32>
    %564 = vector.shape_cast %562 : vector<2x2xf32> to vector<2x1x2xf32>
    %565 = tpu.concatenate %563, %564 in 1 : vector<2x7x2xf32>, vector<2x1x2xf32> -> vector<2x8x2xf32>
    %566 = arith.index_cast %c7_i32 : i32 to index
    %c0_187 = arith.constant 0 : index
    %c0_188 = arith.constant 0 : index
    %c0_189 = arith.constant 0 : index
    %567 = vector.load %arg2[%566, %c0_187, %c0_188, %c0_189] : memref<16x2x8x32xf32, #tpu.memory_space<vmem>>, vector<1x2x8x32xf32>
    %568 = vector.shape_cast %567 : vector<1x2x8x32xf32> to vector<2x8x32xf32>
    "tpu.trace_start"() <{level = 10 : i32, message = "bnh,bth->bnt"}> : () -> ()
    %cst_190 = arith.constant dense<0.000000e+00> : vector<2x8x8xf32>
    %569 = tpu.matmul %568, %561, %cst_190 {dimension_numbers = #tpu.dot_dimension_numbers<[2], [2], [1], [1], [0, 0, 0, 1, 1, 1], [0], [0]>} : vector<2x8x32xf32>, vector<2x8x32xf32>, vector<2x8x8xf32> -> vector<2x8x8xf32>
    "tpu.trace_stop"() : () -> ()
    %cst_191 = arith.constant dense<0xFF800000> : vector<2x8xf32>
    %570 = vector.multi_reduction <maximumf>, %569, %cst_191 [2] : vector<2x8x8xf32> to vector<2x8xf32>
    %571 = vector.shape_cast %570 : vector<2x8xf32> to vector<2x8x1xf32>
    %572 = vector.broadcast %571 : vector<2x8x1xf32> to vector<2x8x8xf32>
    %573 = arith.subf %569, %572 : vector<2x8x8xf32>
    %574 = math.exp %573 : vector<2x8x8xf32>
    %cst_192 = arith.constant dense<0.000000e+00> : vector<2x8xf32>
    %575 = vector.multi_reduction <add>, %574, %cst_192 [2] : vector<2x8x8xf32> to vector<2x8xf32>
    %576 = vector.shape_cast %575 : vector<2x8xf32> to vector<2x8x1xf32>
    %577 = vector.broadcast %576 : vector<2x8x1xf32> to vector<2x8x8xf32>
    %578 = arith.divf %574, %577 : vector<2x8x8xf32>
    %579 = arith.index_cast %c7_i32 : i32 to index
    %c0_193 = arith.constant 0 : index
    %c0_194 = arith.constant 0 : index
    %c0_195 = arith.constant 0 : index
    %580 = vector.load %arg8[%579, %c0_193, %c0_194, %c0_195] : memref<16x2x8x8xf32, #tpu.memory_space<vmem>>, vector<1x2x8x8xf32>
    %581 = vector.shape_cast %580 : vector<1x2x8x8xf32> to vector<2x8x8xf32>
    %582 = vector.shape_cast %578 : vector<2x8x8xf32> to vector<1x2x8x8xf32>
    tpu.vector_store %arg8[%579, %c0_193, %c0_194, %c0_195], %582 {strides = array<i32>} : memref<16x2x8x8xf32, #tpu.memory_space<vmem>>, vector<1x2x8x8xf32>,
    %583 = vector.shape_cast %5 : vector<8x2xf32> to vector<1x8x2xf32>
    %584 = vector.broadcast %583 : vector<1x8x2xf32> to vector<2x8x2xf32>
    %585 = arith.addf %565, %584 : vector<2x8x2xf32>
    "tpu.trace_start"() <{level = 10 : i32, message = "bnt,btk->bnk"}> : () -> ()
    %cst_196 = arith.constant dense<0.000000e+00> : vector<2x8x2xf32>
    %586 = tpu.matmul %578, %585, %cst_196 {dimension_numbers = #tpu.dot_dimension_numbers<[2], [1], [1], [2], [0, 0, 0, 1, 1, 2], [0], [0]>} : vector<2x8x8xf32>, vector<2x8x2xf32>, vector<2x8x2xf32> -> vector<2x8x2xf32>
    "tpu.trace_stop"() : () -> ()
    %587 = vector.extract_strided_slice %586 {offsets = [0, 0, 0], sizes = [2, 8, 1], strides = [1, 1, 1]} : vector<2x8x2xf32> to vector<2x8x1xf32>
    %588 = vector.shape_cast %587 : vector<2x8x1xf32> to vector<2x8xf32>
    %589 = vector.extract_strided_slice %586 {offsets = [0, 0, 1], sizes = [2, 8, 1], strides = [1, 1, 1]} : vector<2x8x2xf32> to vector<2x8x1xf32>
    %590 = vector.shape_cast %589 : vector<2x8x1xf32> to vector<2x8xf32>
    %cst_197 = arith.constant dense<0xFF800000> : vector<2xf32>
    %591 = vector.multi_reduction <maximumf>, %588, %cst_197 [1] : vector<2x8xf32> to vector<2xf32>
    %592 = vector.shape_cast %591 : vector<2xf32> to vector<2x1xf32>
    %593 = vector.broadcast %592 : vector<2x1xf32> to vector<2x8xf32>
    %594 = arith.subf %588, %593 : vector<2x8xf32>
    %595 = math.exp %594 : vector<2x8xf32>
    %596 = arith.index_cast %c7_i32 : i32 to index
    %c0_198 = arith.constant 0 : index
    %c0_199 = arith.constant 0 : index
    %597 = vector.load %arg3[%596, %c0_198, %c0_199] : memref<16x2x8xf32, #tpu.memory_space<vmem>>, vector<1x2x8xf32>
    %598 = vector.shape_cast %597 : vector<1x2x8xf32> to vector<2x8xf32>
    %599 = arith.mulf %595, %598 : vector<2x8xf32>
    %cst_200 = arith.constant dense<0.000000e+00> : vector<2xf32>
    %600 = vector.multi_reduction <add>, %599, %cst_200 [1] : vector<2x8xf32> to vector<2xf32>
    %601 = vector.shape_cast %600 : vector<2xf32> to vector<2x1xf32>
    %cst_201 = arith.constant 1.000000e-30 : f32
    %602 = vector.broadcast %cst_201 : f32 to vector<2x1xf32>
    %603 = arith.maximumf %601, %602 : vector<2x1xf32>
    %604 = vector.broadcast %603 : vector<2x1xf32> to vector<2x8xf32>
    %605 = arith.divf %599, %604 : vector<2x8xf32>
    %606 = arith.index_cast %c7_i32 : i32 to index
    %c0_202 = arith.constant 0 : index
    %c0_203 = arith.constant 0 : index
    %607 = vector.load %arg9[%606, %c0_202, %c0_203] : memref<16x2x8xf32, #tpu.memory_space<vmem>>, vector<1x2x8xf32>
    %608 = vector.shape_cast %607 : vector<1x2x8xf32> to vector<2x8xf32>
    %609 = vector.shape_cast %605 : vector<2x8xf32> to vector<1x2x8xf32>
    tpu.vector_store %arg9[%606, %c0_202, %c0_203], %609 {strides = array<i32>} : memref<16x2x8xf32, #tpu.memory_space<vmem>>, vector<1x2x8xf32>,
    %610 = arith.index_cast %c7_i32 : i32 to index
    %c0_204 = arith.constant 0 : index
    %c0_205 = arith.constant 0 : index
    %611 = vector.load %arg10[%610, %c0_204, %c0_205] : memref<16x2x8xf32, #tpu.memory_space<vmem>>, vector<1x2x8xf32>
    %612 = vector.shape_cast %611 : vector<1x2x8xf32> to vector<2x8xf32>
    %613 = vector.shape_cast %590 : vector<2x8xf32> to vector<1x2x8xf32>
    tpu.vector_store %arg10[%610, %c0_204, %c0_205], %613 {strides = array<i32>} : memref<16x2x8xf32, #tpu.memory_space<vmem>>, vector<1x2x8xf32>,
    %c8_i32 = arith.constant 8 : i32
    %614 = arith.index_cast %c8_i32 : i32 to index
    %c0_206 = arith.constant 0 : index
    %c0_207 = arith.constant 0 : index
    %615 = vector.load %arg1[%614, %c0_206, %c0_207] : memref<16x2x128xf32, #tpu.memory_space<vmem>>, vector<1x2x128xf32>
    %616 = vector.shape_cast %615 : vector<1x2x128xf32> to vector<2x128xf32>
    %cst_208 = arith.constant dense<0.000000e+00> : vector<2x128xf32>
    %617 = tpu.matmul %558, %3, %cst_208 {dimension_numbers = #tpu.dot_dimension_numbers<[1], [0], [0], [1], [0, 0, 1, 1], [], []>} : vector<2x32xf32>, vector<32x128xf32>, vector<2x128xf32> -> vector<2x128xf32>
    %618 = arith.addf %616, %617 : vector<2x128xf32>
    %619 = arith.negf %618 : vector<2x128xf32>
    %620 = math.exp %619 : vector<2x128xf32>
    %cst_209 = arith.constant 1.000000e+00 : f32
    %621 = vector.broadcast %cst_209 : f32 to vector<2x128xf32>
    %622 = arith.addf %621, %620 : vector<2x128xf32>
    %623 = arith.divf %621, %622 : vector<2x128xf32>
    %624 = vector.extract_strided_slice %623 {offsets = [0, 0], sizes = [2, 32], strides = [1, 1]} : vector<2x128xf32> to vector<2x32xf32>
    %625 = vector.extract_strided_slice %623 {offsets = [0, 32], sizes = [2, 32], strides = [1, 1]} : vector<2x128xf32> to vector<2x32xf32>
    %626 = vector.extract_strided_slice %623 {offsets = [0, 96], sizes = [2, 32], strides = [1, 1]} : vector<2x128xf32> to vector<2x32xf32>
    %627 = vector.extract_strided_slice %618 {offsets = [0, 64], sizes = [2, 32], strides = [1, 1]} : vector<2x128xf32> to vector<2x32xf32>
    %628 = math.tanh %627 : vector<2x32xf32>
    %629 = arith.mulf %625, %556 : vector<2x32xf32>
    %630 = arith.mulf %624, %628 : vector<2x32xf32>
    %631 = arith.addf %629, %630 : vector<2x32xf32>
    %632 = math.tanh %631 : vector<2x32xf32>
    %633 = arith.mulf %626, %632 : vector<2x32xf32>
    %634 = vector.extract_strided_slice %561 {offsets = [0, 1, 0], sizes = [2, 7, 32], strides = [1, 1, 1]} : vector<2x8x32xf32> to vector<2x7x32xf32>
    %635 = vector.shape_cast %631 : vector<2x32xf32> to vector<2x1x32xf32>
    %636 = tpu.concatenate %634, %635 in 1 : vector<2x7x32xf32>, vector<2x1x32xf32> -> vector<2x8x32xf32>
    %cst_210 = arith.constant dense<0.000000e+00> : vector<2x2xf32>
    %637 = tpu.matmul %631, %4, %cst_210 {dimension_numbers = #tpu.dot_dimension_numbers<[1], [0], [0], [1], [0, 0, 1, 1], [], []>} : vector<2x32xf32>, vector<32x2xf32>, vector<2x2xf32> -> vector<2x2xf32>
    %638 = vector.extract_strided_slice %565 {offsets = [0, 1, 0], sizes = [2, 7, 2], strides = [1, 1, 1]} : vector<2x8x2xf32> to vector<2x7x2xf32>
    %639 = vector.shape_cast %637 : vector<2x2xf32> to vector<2x1x2xf32>
    %640 = tpu.concatenate %638, %639 in 1 : vector<2x7x2xf32>, vector<2x1x2xf32> -> vector<2x8x2xf32>
    %641 = arith.index_cast %c8_i32 : i32 to index
    %c0_211 = arith.constant 0 : index
    %c0_212 = arith.constant 0 : index
    %c0_213 = arith.constant 0 : index
    %642 = vector.load %arg2[%641, %c0_211, %c0_212, %c0_213] : memref<16x2x8x32xf32, #tpu.memory_space<vmem>>, vector<1x2x8x32xf32>
    %643 = vector.shape_cast %642 : vector<1x2x8x32xf32> to vector<2x8x32xf32>
    "tpu.trace_start"() <{level = 10 : i32, message = "bnh,bth->bnt"}> : () -> ()
    %cst_214 = arith.constant dense<0.000000e+00> : vector<2x8x8xf32>
    %644 = tpu.matmul %643, %636, %cst_214 {dimension_numbers = #tpu.dot_dimension_numbers<[2], [2], [1], [1], [0, 0, 0, 1, 1, 1], [0], [0]>} : vector<2x8x32xf32>, vector<2x8x32xf32>, vector<2x8x8xf32> -> vector<2x8x8xf32>
    "tpu.trace_stop"() : () -> ()
    %cst_215 = arith.constant dense<0xFF800000> : vector<2x8xf32>
    %645 = vector.multi_reduction <maximumf>, %644, %cst_215 [2] : vector<2x8x8xf32> to vector<2x8xf32>
    %646 = vector.shape_cast %645 : vector<2x8xf32> to vector<2x8x1xf32>
    %647 = vector.broadcast %646 : vector<2x8x1xf32> to vector<2x8x8xf32>
    %648 = arith.subf %644, %647 : vector<2x8x8xf32>
    %649 = math.exp %648 : vector<2x8x8xf32>
    %cst_216 = arith.constant dense<0.000000e+00> : vector<2x8xf32>
    %650 = vector.multi_reduction <add>, %649, %cst_216 [2] : vector<2x8x8xf32> to vector<2x8xf32>
    %651 = vector.shape_cast %650 : vector<2x8xf32> to vector<2x8x1xf32>
    %652 = vector.broadcast %651 : vector<2x8x1xf32> to vector<2x8x8xf32>
    %653 = arith.divf %649, %652 : vector<2x8x8xf32>
    %654 = arith.index_cast %c8_i32 : i32 to index
    %c0_217 = arith.constant 0 : index
    %c0_218 = arith.constant 0 : index
    %c0_219 = arith.constant 0 : index
    %655 = vector.load %arg8[%654, %c0_217, %c0_218, %c0_219] : memref<16x2x8x8xf32, #tpu.memory_space<vmem>>, vector<1x2x8x8xf32>
    %656 = vector.shape_cast %655 : vector<1x2x8x8xf32> to vector<2x8x8xf32>
    %657 = vector.shape_cast %653 : vector<2x8x8xf32> to vector<1x2x8x8xf32>
    tpu.vector_store %arg8[%654, %c0_217, %c0_218, %c0_219], %657 {strides = array<i32>} : memref<16x2x8x8xf32, #tpu.memory_space<vmem>>, vector<1x2x8x8xf32>,
    %658 = vector.shape_cast %5 : vector<8x2xf32> to vector<1x8x2xf32>
    %659 = vector.broadcast %658 : vector<1x8x2xf32> to vector<2x8x2xf32>
    %660 = arith.addf %640, %659 : vector<2x8x2xf32>
    "tpu.trace_start"() <{level = 10 : i32, message = "bnt,btk->bnk"}> : () -> ()
    %cst_220 = arith.constant dense<0.000000e+00> : vector<2x8x2xf32>
    %661 = tpu.matmul %653, %660, %cst_220 {dimension_numbers = #tpu.dot_dimension_numbers<[2], [1], [1], [2], [0, 0, 0, 1, 1, 2], [0], [0]>} : vector<2x8x8xf32>, vector<2x8x2xf32>, vector<2x8x2xf32> -> vector<2x8x2xf32>
    "tpu.trace_stop"() : () -> ()
    %662 = vector.extract_strided_slice %661 {offsets = [0, 0, 0], sizes = [2, 8, 1], strides = [1, 1, 1]} : vector<2x8x2xf32> to vector<2x8x1xf32>
    %663 = vector.shape_cast %662 : vector<2x8x1xf32> to vector<2x8xf32>
    %664 = vector.extract_strided_slice %661 {offsets = [0, 0, 1], sizes = [2, 8, 1], strides = [1, 1, 1]} : vector<2x8x2xf32> to vector<2x8x1xf32>
    %665 = vector.shape_cast %664 : vector<2x8x1xf32> to vector<2x8xf32>
    %cst_221 = arith.constant dense<0xFF800000> : vector<2xf32>
    %666 = vector.multi_reduction <maximumf>, %663, %cst_221 [1] : vector<2x8xf32> to vector<2xf32>
    %667 = vector.shape_cast %666 : vector<2xf32> to vector<2x1xf32>
    %668 = vector.broadcast %667 : vector<2x1xf32> to vector<2x8xf32>
    %669 = arith.subf %663, %668 : vector<2x8xf32>
    %670 = math.exp %669 : vector<2x8xf32>
    %671 = arith.index_cast %c8_i32 : i32 to index
    %c0_222 = arith.constant 0 : index
    %c0_223 = arith.constant 0 : index
    %672 = vector.load %arg3[%671, %c0_222, %c0_223] : memref<16x2x8xf32, #tpu.memory_space<vmem>>, vector<1x2x8xf32>
    %673 = vector.shape_cast %672 : vector<1x2x8xf32> to vector<2x8xf32>
    %674 = arith.mulf %670, %673 : vector<2x8xf32>
    %cst_224 = arith.constant dense<0.000000e+00> : vector<2xf32>
    %675 = vector.multi_reduction <add>, %674, %cst_224 [1] : vector<2x8xf32> to vector<2xf32>
    %676 = vector.shape_cast %675 : vector<2xf32> to vector<2x1xf32>
    %cst_225 = arith.constant 1.000000e-30 : f32
    %677 = vector.broadcast %cst_225 : f32 to vector<2x1xf32>
    %678 = arith.maximumf %676, %677 : vector<2x1xf32>
    %679 = vector.broadcast %678 : vector<2x1xf32> to vector<2x8xf32>
    %680 = arith.divf %674, %679 : vector<2x8xf32>
    %681 = arith.index_cast %c8_i32 : i32 to index
    %c0_226 = arith.constant 0 : index
    %c0_227 = arith.constant 0 : index
    %682 = vector.load %arg9[%681, %c0_226, %c0_227] : memref<16x2x8xf32, #tpu.memory_space<vmem>>, vector<1x2x8xf32>
    %683 = vector.shape_cast %682 : vector<1x2x8xf32> to vector<2x8xf32>
    %684 = vector.shape_cast %680 : vector<2x8xf32> to vector<1x2x8xf32>
    tpu.vector_store %arg9[%681, %c0_226, %c0_227], %684 {strides = array<i32>} : memref<16x2x8xf32, #tpu.memory_space<vmem>>, vector<1x2x8xf32>,
    %685 = arith.index_cast %c8_i32 : i32 to index
    %c0_228 = arith.constant 0 : index
    %c0_229 = arith.constant 0 : index
    %686 = vector.load %arg10[%685, %c0_228, %c0_229] : memref<16x2x8xf32, #tpu.memory_space<vmem>>, vector<1x2x8xf32>
    %687 = vector.shape_cast %686 : vector<1x2x8xf32> to vector<2x8xf32>
    %688 = vector.shape_cast %665 : vector<2x8xf32> to vector<1x2x8xf32>
    tpu.vector_store %arg10[%685, %c0_228, %c0_229], %688 {strides = array<i32>} : memref<16x2x8xf32, #tpu.memory_space<vmem>>, vector<1x2x8xf32>,
    %c9_i32 = arith.constant 9 : i32
    %689 = arith.index_cast %c9_i32 : i32 to index
    %c0_230 = arith.constant 0 : index
    %c0_231 = arith.constant 0 : index
    %690 = vector.load %arg1[%689, %c0_230, %c0_231] : memref<16x2x128xf32, #tpu.memory_space<vmem>>, vector<1x2x128xf32>
    %691 = vector.shape_cast %690 : vector<1x2x128xf32> to vector<2x128xf32>
    %cst_232 = arith.constant dense<0.000000e+00> : vector<2x128xf32>
    %692 = tpu.matmul %633, %3, %cst_232 {dimension_numbers = #tpu.dot_dimension_numbers<[1], [0], [0], [1], [0, 0, 1, 1], [], []>} : vector<2x32xf32>, vector<32x128xf32>, vector<2x128xf32> -> vector<2x128xf32>
    %693 = arith.addf %691, %692 : vector<2x128xf32>
    %694 = arith.negf %693 : vector<2x128xf32>
    %695 = math.exp %694 : vector<2x128xf32>
    %cst_233 = arith.constant 1.000000e+00 : f32
    %696 = vector.broadcast %cst_233 : f32 to vector<2x128xf32>
    %697 = arith.addf %696, %695 : vector<2x128xf32>
    %698 = arith.divf %696, %697 : vector<2x128xf32>
    %699 = vector.extract_strided_slice %698 {offsets = [0, 0], sizes = [2, 32], strides = [1, 1]} : vector<2x128xf32> to vector<2x32xf32>
    %700 = vector.extract_strided_slice %698 {offsets = [0, 32], sizes = [2, 32], strides = [1, 1]} : vector<2x128xf32> to vector<2x32xf32>
    %701 = vector.extract_strided_slice %698 {offsets = [0, 96], sizes = [2, 32], strides = [1, 1]} : vector<2x128xf32> to vector<2x32xf32>
    %702 = vector.extract_strided_slice %693 {offsets = [0, 64], sizes = [2, 32], strides = [1, 1]} : vector<2x128xf32> to vector<2x32xf32>
    %703 = math.tanh %702 : vector<2x32xf32>
    %704 = arith.mulf %700, %631 : vector<2x32xf32>
    %705 = arith.mulf %699, %703 : vector<2x32xf32>
    %706 = arith.addf %704, %705 : vector<2x32xf32>
    %707 = math.tanh %706 : vector<2x32xf32>
    %708 = arith.mulf %701, %707 : vector<2x32xf32>
    %709 = vector.extract_strided_slice %636 {offsets = [0, 1, 0], sizes = [2, 7, 32], strides = [1, 1, 1]} : vector<2x8x32xf32> to vector<2x7x32xf32>
    %710 = vector.shape_cast %706 : vector<2x32xf32> to vector<2x1x32xf32>
    %711 = tpu.concatenate %709, %710 in 1 : vector<2x7x32xf32>, vector<2x1x32xf32> -> vector<2x8x32xf32>
    %cst_234 = arith.constant dense<0.000000e+00> : vector<2x2xf32>
    %712 = tpu.matmul %706, %4, %cst_234 {dimension_numbers = #tpu.dot_dimension_numbers<[1], [0], [0], [1], [0, 0, 1, 1], [], []>} : vector<2x32xf32>, vector<32x2xf32>, vector<2x2xf32> -> vector<2x2xf32>
    %713 = vector.extract_strided_slice %640 {offsets = [0, 1, 0], sizes = [2, 7, 2], strides = [1, 1, 1]} : vector<2x8x2xf32> to vector<2x7x2xf32>
    %714 = vector.shape_cast %712 : vector<2x2xf32> to vector<2x1x2xf32>
    %715 = tpu.concatenate %713, %714 in 1 : vector<2x7x2xf32>, vector<2x1x2xf32> -> vector<2x8x2xf32>
    %716 = arith.index_cast %c9_i32 : i32 to index
    %c0_235 = arith.constant 0 : index
    %c0_236 = arith.constant 0 : index
    %c0_237 = arith.constant 0 : index
    %717 = vector.load %arg2[%716, %c0_235, %c0_236, %c0_237] : memref<16x2x8x32xf32, #tpu.memory_space<vmem>>, vector<1x2x8x32xf32>
    %718 = vector.shape_cast %717 : vector<1x2x8x32xf32> to vector<2x8x32xf32>
    "tpu.trace_start"() <{level = 10 : i32, message = "bnh,bth->bnt"}> : () -> ()
    %cst_238 = arith.constant dense<0.000000e+00> : vector<2x8x8xf32>
    %719 = tpu.matmul %718, %711, %cst_238 {dimension_numbers = #tpu.dot_dimension_numbers<[2], [2], [1], [1], [0, 0, 0, 1, 1, 1], [0], [0]>} : vector<2x8x32xf32>, vector<2x8x32xf32>, vector<2x8x8xf32> -> vector<2x8x8xf32>
    "tpu.trace_stop"() : () -> ()
    %cst_239 = arith.constant dense<0xFF800000> : vector<2x8xf32>
    %720 = vector.multi_reduction <maximumf>, %719, %cst_239 [2] : vector<2x8x8xf32> to vector<2x8xf32>
    %721 = vector.shape_cast %720 : vector<2x8xf32> to vector<2x8x1xf32>
    %722 = vector.broadcast %721 : vector<2x8x1xf32> to vector<2x8x8xf32>
    %723 = arith.subf %719, %722 : vector<2x8x8xf32>
    %724 = math.exp %723 : vector<2x8x8xf32>
    %cst_240 = arith.constant dense<0.000000e+00> : vector<2x8xf32>
    %725 = vector.multi_reduction <add>, %724, %cst_240 [2] : vector<2x8x8xf32> to vector<2x8xf32>
    %726 = vector.shape_cast %725 : vector<2x8xf32> to vector<2x8x1xf32>
    %727 = vector.broadcast %726 : vector<2x8x1xf32> to vector<2x8x8xf32>
    %728 = arith.divf %724, %727 : vector<2x8x8xf32>
    %729 = arith.index_cast %c9_i32 : i32 to index
    %c0_241 = arith.constant 0 : index
    %c0_242 = arith.constant 0 : index
    %c0_243 = arith.constant 0 : index
    %730 = vector.load %arg8[%729, %c0_241, %c0_242, %c0_243] : memref<16x2x8x8xf32, #tpu.memory_space<vmem>>, vector<1x2x8x8xf32>
    %731 = vector.shape_cast %730 : vector<1x2x8x8xf32> to vector<2x8x8xf32>
    %732 = vector.shape_cast %728 : vector<2x8x8xf32> to vector<1x2x8x8xf32>
    tpu.vector_store %arg8[%729, %c0_241, %c0_242, %c0_243], %732 {strides = array<i32>} : memref<16x2x8x8xf32, #tpu.memory_space<vmem>>, vector<1x2x8x8xf32>,
    %733 = vector.shape_cast %5 : vector<8x2xf32> to vector<1x8x2xf32>
    %734 = vector.broadcast %733 : vector<1x8x2xf32> to vector<2x8x2xf32>
    %735 = arith.addf %715, %734 : vector<2x8x2xf32>
    "tpu.trace_start"() <{level = 10 : i32, message = "bnt,btk->bnk"}> : () -> ()
    %cst_244 = arith.constant dense<0.000000e+00> : vector<2x8x2xf32>
    %736 = tpu.matmul %728, %735, %cst_244 {dimension_numbers = #tpu.dot_dimension_numbers<[2], [1], [1], [2], [0, 0, 0, 1, 1, 2], [0], [0]>} : vector<2x8x8xf32>, vector<2x8x2xf32>, vector<2x8x2xf32> -> vector<2x8x2xf32>
    "tpu.trace_stop"() : () -> ()
    %737 = vector.extract_strided_slice %736 {offsets = [0, 0, 0], sizes = [2, 8, 1], strides = [1, 1, 1]} : vector<2x8x2xf32> to vector<2x8x1xf32>
    %738 = vector.shape_cast %737 : vector<2x8x1xf32> to vector<2x8xf32>
    %739 = vector.extract_strided_slice %736 {offsets = [0, 0, 1], sizes = [2, 8, 1], strides = [1, 1, 1]} : vector<2x8x2xf32> to vector<2x8x1xf32>
    %740 = vector.shape_cast %739 : vector<2x8x1xf32> to vector<2x8xf32>
    %cst_245 = arith.constant dense<0xFF800000> : vector<2xf32>
    %741 = vector.multi_reduction <maximumf>, %738, %cst_245 [1] : vector<2x8xf32> to vector<2xf32>
    %742 = vector.shape_cast %741 : vector<2xf32> to vector<2x1xf32>
    %743 = vector.broadcast %742 : vector<2x1xf32> to vector<2x8xf32>
    %744 = arith.subf %738, %743 : vector<2x8xf32>
    %745 = math.exp %744 : vector<2x8xf32>
    %746 = arith.index_cast %c9_i32 : i32 to index
    %c0_246 = arith.constant 0 : index
    %c0_247 = arith.constant 0 : index
    %747 = vector.load %arg3[%746, %c0_246, %c0_247] : memref<16x2x8xf32, #tpu.memory_space<vmem>>, vector<1x2x8xf32>
    %748 = vector.shape_cast %747 : vector<1x2x8xf32> to vector<2x8xf32>
    %749 = arith.mulf %745, %748 : vector<2x8xf32>
    %cst_248 = arith.constant dense<0.000000e+00> : vector<2xf32>
    %750 = vector.multi_reduction <add>, %749, %cst_248 [1] : vector<2x8xf32> to vector<2xf32>
    %751 = vector.shape_cast %750 : vector<2xf32> to vector<2x1xf32>
    %cst_249 = arith.constant 1.000000e-30 : f32
    %752 = vector.broadcast %cst_249 : f32 to vector<2x1xf32>
    %753 = arith.maximumf %751, %752 : vector<2x1xf32>
    %754 = vector.broadcast %753 : vector<2x1xf32> to vector<2x8xf32>
    %755 = arith.divf %749, %754 : vector<2x8xf32>
    %756 = arith.index_cast %c9_i32 : i32 to index
    %c0_250 = arith.constant 0 : index
    %c0_251 = arith.constant 0 : index
    %757 = vector.load %arg9[%756, %c0_250, %c0_251] : memref<16x2x8xf32, #tpu.memory_space<vmem>>, vector<1x2x8xf32>
    %758 = vector.shape_cast %757 : vector<1x2x8xf32> to vector<2x8xf32>
    %759 = vector.shape_cast %755 : vector<2x8xf32> to vector<1x2x8xf32>
    tpu.vector_store %arg9[%756, %c0_250, %c0_251], %759 {strides = array<i32>} : memref<16x2x8xf32, #tpu.memory_space<vmem>>, vector<1x2x8xf32>,
    %760 = arith.index_cast %c9_i32 : i32 to index
    %c0_252 = arith.constant 0 : index
    %c0_253 = arith.constant 0 : index
    %761 = vector.load %arg10[%760, %c0_252, %c0_253] : memref<16x2x8xf32, #tpu.memory_space<vmem>>, vector<1x2x8xf32>
    %762 = vector.shape_cast %761 : vector<1x2x8xf32> to vector<2x8xf32>
    %763 = vector.shape_cast %740 : vector<2x8xf32> to vector<1x2x8xf32>
    tpu.vector_store %arg10[%760, %c0_252, %c0_253], %763 {strides = array<i32>} : memref<16x2x8xf32, #tpu.memory_space<vmem>>, vector<1x2x8xf32>,
    %c10_i32 = arith.constant 10 : i32
    %764 = arith.index_cast %c10_i32 : i32 to index
    %c0_254 = arith.constant 0 : index
    %c0_255 = arith.constant 0 : index
    %765 = vector.load %arg1[%764, %c0_254, %c0_255] : memref<16x2x128xf32, #tpu.memory_space<vmem>>, vector<1x2x128xf32>
    %766 = vector.shape_cast %765 : vector<1x2x128xf32> to vector<2x128xf32>
    %cst_256 = arith.constant dense<0.000000e+00> : vector<2x128xf32>
    %767 = tpu.matmul %708, %3, %cst_256 {dimension_numbers = #tpu.dot_dimension_numbers<[1], [0], [0], [1], [0, 0, 1, 1], [], []>} : vector<2x32xf32>, vector<32x128xf32>, vector<2x128xf32> -> vector<2x128xf32>
    %768 = arith.addf %766, %767 : vector<2x128xf32>
    %769 = arith.negf %768 : vector<2x128xf32>
    %770 = math.exp %769 : vector<2x128xf32>
    %cst_257 = arith.constant 1.000000e+00 : f32
    %771 = vector.broadcast %cst_257 : f32 to vector<2x128xf32>
    %772 = arith.addf %771, %770 : vector<2x128xf32>
    %773 = arith.divf %771, %772 : vector<2x128xf32>
    %774 = vector.extract_strided_slice %773 {offsets = [0, 0], sizes = [2, 32], strides = [1, 1]} : vector<2x128xf32> to vector<2x32xf32>
    %775 = vector.extract_strided_slice %773 {offsets = [0, 32], sizes = [2, 32], strides = [1, 1]} : vector<2x128xf32> to vector<2x32xf32>
    %776 = vector.extract_strided_slice %773 {offsets = [0, 96], sizes = [2, 32], strides = [1, 1]} : vector<2x128xf32> to vector<2x32xf32>
    %777 = vector.extract_strided_slice %768 {offsets = [0, 64], sizes = [2, 32], strides = [1, 1]} : vector<2x128xf32> to vector<2x32xf32>
    %778 = math.tanh %777 : vector<2x32xf32>
    %779 = arith.mulf %775, %706 : vector<2x32xf32>
    %780 = arith.mulf %774, %778 : vector<2x32xf32>
    %781 = arith.addf %779, %780 : vector<2x32xf32>
    %782 = math.tanh %781 : vector<2x32xf32>
    %783 = arith.mulf %776, %782 : vector<2x32xf32>
    %784 = vector.extract_strided_slice %711 {offsets = [0, 1, 0], sizes = [2, 7, 32], strides = [1, 1, 1]} : vector<2x8x32xf32> to vector<2x7x32xf32>
    %785 = vector.shape_cast %781 : vector<2x32xf32> to vector<2x1x32xf32>
    %786 = tpu.concatenate %784, %785 in 1 : vector<2x7x32xf32>, vector<2x1x32xf32> -> vector<2x8x32xf32>
    %cst_258 = arith.constant dense<0.000000e+00> : vector<2x2xf32>
    %787 = tpu.matmul %781, %4, %cst_258 {dimension_numbers = #tpu.dot_dimension_numbers<[1], [0], [0], [1], [0, 0, 1, 1], [], []>} : vector<2x32xf32>, vector<32x2xf32>, vector<2x2xf32> -> vector<2x2xf32>
    %788 = vector.extract_strided_slice %715 {offsets = [0, 1, 0], sizes = [2, 7, 2], strides = [1, 1, 1]} : vector<2x8x2xf32> to vector<2x7x2xf32>
    %789 = vector.shape_cast %787 : vector<2x2xf32> to vector<2x1x2xf32>
    %790 = tpu.concatenate %788, %789 in 1 : vector<2x7x2xf32>, vector<2x1x2xf32> -> vector<2x8x2xf32>
    %791 = arith.index_cast %c10_i32 : i32 to index
    %c0_259 = arith.constant 0 : index
    %c0_260 = arith.constant 0 : index
    %c0_261 = arith.constant 0 : index
    %792 = vector.load %arg2[%791, %c0_259, %c0_260, %c0_261] : memref<16x2x8x32xf32, #tpu.memory_space<vmem>>, vector<1x2x8x32xf32>
    %793 = vector.shape_cast %792 : vector<1x2x8x32xf32> to vector<2x8x32xf32>
    "tpu.trace_start"() <{level = 10 : i32, message = "bnh,bth->bnt"}> : () -> ()
    %cst_262 = arith.constant dense<0.000000e+00> : vector<2x8x8xf32>
    %794 = tpu.matmul %793, %786, %cst_262 {dimension_numbers = #tpu.dot_dimension_numbers<[2], [2], [1], [1], [0, 0, 0, 1, 1, 1], [0], [0]>} : vector<2x8x32xf32>, vector<2x8x32xf32>, vector<2x8x8xf32> -> vector<2x8x8xf32>
    "tpu.trace_stop"() : () -> ()
    %cst_263 = arith.constant dense<0xFF800000> : vector<2x8xf32>
    %795 = vector.multi_reduction <maximumf>, %794, %cst_263 [2] : vector<2x8x8xf32> to vector<2x8xf32>
    %796 = vector.shape_cast %795 : vector<2x8xf32> to vector<2x8x1xf32>
    %797 = vector.broadcast %796 : vector<2x8x1xf32> to vector<2x8x8xf32>
    %798 = arith.subf %794, %797 : vector<2x8x8xf32>
    %799 = math.exp %798 : vector<2x8x8xf32>
    %cst_264 = arith.constant dense<0.000000e+00> : vector<2x8xf32>
    %800 = vector.multi_reduction <add>, %799, %cst_264 [2] : vector<2x8x8xf32> to vector<2x8xf32>
    %801 = vector.shape_cast %800 : vector<2x8xf32> to vector<2x8x1xf32>
    %802 = vector.broadcast %801 : vector<2x8x1xf32> to vector<2x8x8xf32>
    %803 = arith.divf %799, %802 : vector<2x8x8xf32>
    %804 = arith.index_cast %c10_i32 : i32 to index
    %c0_265 = arith.constant 0 : index
    %c0_266 = arith.constant 0 : index
    %c0_267 = arith.constant 0 : index
    %805 = vector.load %arg8[%804, %c0_265, %c0_266, %c0_267] : memref<16x2x8x8xf32, #tpu.memory_space<vmem>>, vector<1x2x8x8xf32>
    %806 = vector.shape_cast %805 : vector<1x2x8x8xf32> to vector<2x8x8xf32>
    %807 = vector.shape_cast %803 : vector<2x8x8xf32> to vector<1x2x8x8xf32>
    tpu.vector_store %arg8[%804, %c0_265, %c0_266, %c0_267], %807 {strides = array<i32>} : memref<16x2x8x8xf32, #tpu.memory_space<vmem>>, vector<1x2x8x8xf32>,
    %808 = vector.shape_cast %5 : vector<8x2xf32> to vector<1x8x2xf32>
    %809 = vector.broadcast %808 : vector<1x8x2xf32> to vector<2x8x2xf32>
    %810 = arith.addf %790, %809 : vector<2x8x2xf32>
    "tpu.trace_start"() <{level = 10 : i32, message = "bnt,btk->bnk"}> : () -> ()
    %cst_268 = arith.constant dense<0.000000e+00> : vector<2x8x2xf32>
    %811 = tpu.matmul %803, %810, %cst_268 {dimension_numbers = #tpu.dot_dimension_numbers<[2], [1], [1], [2], [0, 0, 0, 1, 1, 2], [0], [0]>} : vector<2x8x8xf32>, vector<2x8x2xf32>, vector<2x8x2xf32> -> vector<2x8x2xf32>
    "tpu.trace_stop"() : () -> ()
    %812 = vector.extract_strided_slice %811 {offsets = [0, 0, 0], sizes = [2, 8, 1], strides = [1, 1, 1]} : vector<2x8x2xf32> to vector<2x8x1xf32>
    %813 = vector.shape_cast %812 : vector<2x8x1xf32> to vector<2x8xf32>
    %814 = vector.extract_strided_slice %811 {offsets = [0, 0, 1], sizes = [2, 8, 1], strides = [1, 1, 1]} : vector<2x8x2xf32> to vector<2x8x1xf32>
    %815 = vector.shape_cast %814 : vector<2x8x1xf32> to vector<2x8xf32>
    %cst_269 = arith.constant dense<0xFF800000> : vector<2xf32>
    %816 = vector.multi_reduction <maximumf>, %813, %cst_269 [1] : vector<2x8xf32> to vector<2xf32>
    %817 = vector.shape_cast %816 : vector<2xf32> to vector<2x1xf32>
    %818 = vector.broadcast %817 : vector<2x1xf32> to vector<2x8xf32>
    %819 = arith.subf %813, %818 : vector<2x8xf32>
    %820 = math.exp %819 : vector<2x8xf32>
    %821 = arith.index_cast %c10_i32 : i32 to index
    %c0_270 = arith.constant 0 : index
    %c0_271 = arith.constant 0 : index
    %822 = vector.load %arg3[%821, %c0_270, %c0_271] : memref<16x2x8xf32, #tpu.memory_space<vmem>>, vector<1x2x8xf32>
    %823 = vector.shape_cast %822 : vector<1x2x8xf32> to vector<2x8xf32>
    %824 = arith.mulf %820, %823 : vector<2x8xf32>
    %cst_272 = arith.constant dense<0.000000e+00> : vector<2xf32>
    %825 = vector.multi_reduction <add>, %824, %cst_272 [1] : vector<2x8xf32> to vector<2xf32>
    %826 = vector.shape_cast %825 : vector<2xf32> to vector<2x1xf32>
    %cst_273 = arith.constant 1.000000e-30 : f32
    %827 = vector.broadcast %cst_273 : f32 to vector<2x1xf32>
    %828 = arith.maximumf %826, %827 : vector<2x1xf32>
    %829 = vector.broadcast %828 : vector<2x1xf32> to vector<2x8xf32>
    %830 = arith.divf %824, %829 : vector<2x8xf32>
    %831 = arith.index_cast %c10_i32 : i32 to index
    %c0_274 = arith.constant 0 : index
    %c0_275 = arith.constant 0 : index
    %832 = vector.load %arg9[%831, %c0_274, %c0_275] : memref<16x2x8xf32, #tpu.memory_space<vmem>>, vector<1x2x8xf32>
    %833 = vector.shape_cast %832 : vector<1x2x8xf32> to vector<2x8xf32>
    %834 = vector.shape_cast %830 : vector<2x8xf32> to vector<1x2x8xf32>
    tpu.vector_store %arg9[%831, %c0_274, %c0_275], %834 {strides = array<i32>} : memref<16x2x8xf32, #tpu.memory_space<vmem>>, vector<1x2x8xf32>,
    %835 = arith.index_cast %c10_i32 : i32 to index
    %c0_276 = arith.constant 0 : index
    %c0_277 = arith.constant 0 : index
    %836 = vector.load %arg10[%835, %c0_276, %c0_277] : memref<16x2x8xf32, #tpu.memory_space<vmem>>, vector<1x2x8xf32>
    %837 = vector.shape_cast %836 : vector<1x2x8xf32> to vector<2x8xf32>
    %838 = vector.shape_cast %815 : vector<2x8xf32> to vector<1x2x8xf32>
    tpu.vector_store %arg10[%835, %c0_276, %c0_277], %838 {strides = array<i32>} : memref<16x2x8xf32, #tpu.memory_space<vmem>>, vector<1x2x8xf32>,
    %c11_i32 = arith.constant 11 : i32
    %839 = arith.index_cast %c11_i32 : i32 to index
    %c0_278 = arith.constant 0 : index
    %c0_279 = arith.constant 0 : index
    %840 = vector.load %arg1[%839, %c0_278, %c0_279] : memref<16x2x128xf32, #tpu.memory_space<vmem>>, vector<1x2x128xf32>
    %841 = vector.shape_cast %840 : vector<1x2x128xf32> to vector<2x128xf32>
    %cst_280 = arith.constant dense<0.000000e+00> : vector<2x128xf32>
    %842 = tpu.matmul %783, %3, %cst_280 {dimension_numbers = #tpu.dot_dimension_numbers<[1], [0], [0], [1], [0, 0, 1, 1], [], []>} : vector<2x32xf32>, vector<32x128xf32>, vector<2x128xf32> -> vector<2x128xf32>
    %843 = arith.addf %841, %842 : vector<2x128xf32>
    %844 = arith.negf %843 : vector<2x128xf32>
    %845 = math.exp %844 : vector<2x128xf32>
    %cst_281 = arith.constant 1.000000e+00 : f32
    %846 = vector.broadcast %cst_281 : f32 to vector<2x128xf32>
    %847 = arith.addf %846, %845 : vector<2x128xf32>
    %848 = arith.divf %846, %847 : vector<2x128xf32>
    %849 = vector.extract_strided_slice %848 {offsets = [0, 0], sizes = [2, 32], strides = [1, 1]} : vector<2x128xf32> to vector<2x32xf32>
    %850 = vector.extract_strided_slice %848 {offsets = [0, 32], sizes = [2, 32], strides = [1, 1]} : vector<2x128xf32> to vector<2x32xf32>
    %851 = vector.extract_strided_slice %848 {offsets = [0, 96], sizes = [2, 32], strides = [1, 1]} : vector<2x128xf32> to vector<2x32xf32>
    %852 = vector.extract_strided_slice %843 {offsets = [0, 64], sizes = [2, 32], strides = [1, 1]} : vector<2x128xf32> to vector<2x32xf32>
    %853 = math.tanh %852 : vector<2x32xf32>
    %854 = arith.mulf %850, %781 : vector<2x32xf32>
    %855 = arith.mulf %849, %853 : vector<2x32xf32>
    %856 = arith.addf %854, %855 : vector<2x32xf32>
    %857 = math.tanh %856 : vector<2x32xf32>
    %858 = arith.mulf %851, %857 : vector<2x32xf32>
    %859 = vector.extract_strided_slice %786 {offsets = [0, 1, 0], sizes = [2, 7, 32], strides = [1, 1, 1]} : vector<2x8x32xf32> to vector<2x7x32xf32>
    %860 = vector.shape_cast %856 : vector<2x32xf32> to vector<2x1x32xf32>
    %861 = tpu.concatenate %859, %860 in 1 : vector<2x7x32xf32>, vector<2x1x32xf32> -> vector<2x8x32xf32>
    %cst_282 = arith.constant dense<0.000000e+00> : vector<2x2xf32>
    %862 = tpu.matmul %856, %4, %cst_282 {dimension_numbers = #tpu.dot_dimension_numbers<[1], [0], [0], [1], [0, 0, 1, 1], [], []>} : vector<2x32xf32>, vector<32x2xf32>, vector<2x2xf32> -> vector<2x2xf32>
    %863 = vector.extract_strided_slice %790 {offsets = [0, 1, 0], sizes = [2, 7, 2], strides = [1, 1, 1]} : vector<2x8x2xf32> to vector<2x7x2xf32>
    %864 = vector.shape_cast %862 : vector<2x2xf32> to vector<2x1x2xf32>
    %865 = tpu.concatenate %863, %864 in 1 : vector<2x7x2xf32>, vector<2x1x2xf32> -> vector<2x8x2xf32>
    %866 = arith.index_cast %c11_i32 : i32 to index
    %c0_283 = arith.constant 0 : index
    %c0_284 = arith.constant 0 : index
    %c0_285 = arith.constant 0 : index
    %867 = vector.load %arg2[%866, %c0_283, %c0_284, %c0_285] : memref<16x2x8x32xf32, #tpu.memory_space<vmem>>, vector<1x2x8x32xf32>
    %868 = vector.shape_cast %867 : vector<1x2x8x32xf32> to vector<2x8x32xf32>
    "tpu.trace_start"() <{level = 10 : i32, message = "bnh,bth->bnt"}> : () -> ()
    %cst_286 = arith.constant dense<0.000000e+00> : vector<2x8x8xf32>
    %869 = tpu.matmul %868, %861, %cst_286 {dimension_numbers = #tpu.dot_dimension_numbers<[2], [2], [1], [1], [0, 0, 0, 1, 1, 1], [0], [0]>} : vector<2x8x32xf32>, vector<2x8x32xf32>, vector<2x8x8xf32> -> vector<2x8x8xf32>
    "tpu.trace_stop"() : () -> ()
    %cst_287 = arith.constant dense<0xFF800000> : vector<2x8xf32>
    %870 = vector.multi_reduction <maximumf>, %869, %cst_287 [2] : vector<2x8x8xf32> to vector<2x8xf32>
    %871 = vector.shape_cast %870 : vector<2x8xf32> to vector<2x8x1xf32>
    %872 = vector.broadcast %871 : vector<2x8x1xf32> to vector<2x8x8xf32>
    %873 = arith.subf %869, %872 : vector<2x8x8xf32>
    %874 = math.exp %873 : vector<2x8x8xf32>
    %cst_288 = arith.constant dense<0.000000e+00> : vector<2x8xf32>
    %875 = vector.multi_reduction <add>, %874, %cst_288 [2] : vector<2x8x8xf32> to vector<2x8xf32>
    %876 = vector.shape_cast %875 : vector<2x8xf32> to vector<2x8x1xf32>
    %877 = vector.broadcast %876 : vector<2x8x1xf32> to vector<2x8x8xf32>
    %878 = arith.divf %874, %877 : vector<2x8x8xf32>
    %879 = arith.index_cast %c11_i32 : i32 to index
    %c0_289 = arith.constant 0 : index
    %c0_290 = arith.constant 0 : index
    %c0_291 = arith.constant 0 : index
    %880 = vector.load %arg8[%879, %c0_289, %c0_290, %c0_291] : memref<16x2x8x8xf32, #tpu.memory_space<vmem>>, vector<1x2x8x8xf32>
    %881 = vector.shape_cast %880 : vector<1x2x8x8xf32> to vector<2x8x8xf32>
    %882 = vector.shape_cast %878 : vector<2x8x8xf32> to vector<1x2x8x8xf32>
    tpu.vector_store %arg8[%879, %c0_289, %c0_290, %c0_291], %882 {strides = array<i32>} : memref<16x2x8x8xf32, #tpu.memory_space<vmem>>, vector<1x2x8x8xf32>,
    %883 = vector.shape_cast %5 : vector<8x2xf32> to vector<1x8x2xf32>
    %884 = vector.broadcast %883 : vector<1x8x2xf32> to vector<2x8x2xf32>
    %885 = arith.addf %865, %884 : vector<2x8x2xf32>
    "tpu.trace_start"() <{level = 10 : i32, message = "bnt,btk->bnk"}> : () -> ()
    %cst_292 = arith.constant dense<0.000000e+00> : vector<2x8x2xf32>
    %886 = tpu.matmul %878, %885, %cst_292 {dimension_numbers = #tpu.dot_dimension_numbers<[2], [1], [1], [2], [0, 0, 0, 1, 1, 2], [0], [0]>} : vector<2x8x8xf32>, vector<2x8x2xf32>, vector<2x8x2xf32> -> vector<2x8x2xf32>
    "tpu.trace_stop"() : () -> ()
    %887 = vector.extract_strided_slice %886 {offsets = [0, 0, 0], sizes = [2, 8, 1], strides = [1, 1, 1]} : vector<2x8x2xf32> to vector<2x8x1xf32>
    %888 = vector.shape_cast %887 : vector<2x8x1xf32> to vector<2x8xf32>
    %889 = vector.extract_strided_slice %886 {offsets = [0, 0, 1], sizes = [2, 8, 1], strides = [1, 1, 1]} : vector<2x8x2xf32> to vector<2x8x1xf32>
    %890 = vector.shape_cast %889 : vector<2x8x1xf32> to vector<2x8xf32>
    %cst_293 = arith.constant dense<0xFF800000> : vector<2xf32>
    %891 = vector.multi_reduction <maximumf>, %888, %cst_293 [1] : vector<2x8xf32> to vector<2xf32>
    %892 = vector.shape_cast %891 : vector<2xf32> to vector<2x1xf32>
    %893 = vector.broadcast %892 : vector<2x1xf32> to vector<2x8xf32>
    %894 = arith.subf %888, %893 : vector<2x8xf32>
    %895 = math.exp %894 : vector<2x8xf32>
    %896 = arith.index_cast %c11_i32 : i32 to index
    %c0_294 = arith.constant 0 : index
    %c0_295 = arith.constant 0 : index
    %897 = vector.load %arg3[%896, %c0_294, %c0_295] : memref<16x2x8xf32, #tpu.memory_space<vmem>>, vector<1x2x8xf32>
    %898 = vector.shape_cast %897 : vector<1x2x8xf32> to vector<2x8xf32>
    %899 = arith.mulf %895, %898 : vector<2x8xf32>
    %cst_296 = arith.constant dense<0.000000e+00> : vector<2xf32>
    %900 = vector.multi_reduction <add>, %899, %cst_296 [1] : vector<2x8xf32> to vector<2xf32>
    %901 = vector.shape_cast %900 : vector<2xf32> to vector<2x1xf32>
    %cst_297 = arith.constant 1.000000e-30 : f32
    %902 = vector.broadcast %cst_297 : f32 to vector<2x1xf32>
    %903 = arith.maximumf %901, %902 : vector<2x1xf32>
    %904 = vector.broadcast %903 : vector<2x1xf32> to vector<2x8xf32>
    %905 = arith.divf %899, %904 : vector<2x8xf32>
    %906 = arith.index_cast %c11_i32 : i32 to index
    %c0_298 = arith.constant 0 : index
    %c0_299 = arith.constant 0 : index
    %907 = vector.load %arg9[%906, %c0_298, %c0_299] : memref<16x2x8xf32, #tpu.memory_space<vmem>>, vector<1x2x8xf32>
    %908 = vector.shape_cast %907 : vector<1x2x8xf32> to vector<2x8xf32>
    %909 = vector.shape_cast %905 : vector<2x8xf32> to vector<1x2x8xf32>
    tpu.vector_store %arg9[%906, %c0_298, %c0_299], %909 {strides = array<i32>} : memref<16x2x8xf32, #tpu.memory_space<vmem>>, vector<1x2x8xf32>,
    %910 = arith.index_cast %c11_i32 : i32 to index
    %c0_300 = arith.constant 0 : index
    %c0_301 = arith.constant 0 : index
    %911 = vector.load %arg10[%910, %c0_300, %c0_301] : memref<16x2x8xf32, #tpu.memory_space<vmem>>, vector<1x2x8xf32>
    %912 = vector.shape_cast %911 : vector<1x2x8xf32> to vector<2x8xf32>
    %913 = vector.shape_cast %890 : vector<2x8xf32> to vector<1x2x8xf32>
    tpu.vector_store %arg10[%910, %c0_300, %c0_301], %913 {strides = array<i32>} : memref<16x2x8xf32, #tpu.memory_space<vmem>>, vector<1x2x8xf32>,
    %c12_i32 = arith.constant 12 : i32
    %914 = arith.index_cast %c12_i32 : i32 to index
    %c0_302 = arith.constant 0 : index
    %c0_303 = arith.constant 0 : index
    %915 = vector.load %arg1[%914, %c0_302, %c0_303] : memref<16x2x128xf32, #tpu.memory_space<vmem>>, vector<1x2x128xf32>
    %916 = vector.shape_cast %915 : vector<1x2x128xf32> to vector<2x128xf32>
    %cst_304 = arith.constant dense<0.000000e+00> : vector<2x128xf32>
    %917 = tpu.matmul %858, %3, %cst_304 {dimension_numbers = #tpu.dot_dimension_numbers<[1], [0], [0], [1], [0, 0, 1, 1], [], []>} : vector<2x32xf32>, vector<32x128xf32>, vector<2x128xf32> -> vector<2x128xf32>
    %918 = arith.addf %916, %917 : vector<2x128xf32>
    %919 = arith.negf %918 : vector<2x128xf32>
    %920 = math.exp %919 : vector<2x128xf32>
    %cst_305 = arith.constant 1.000000e+00 : f32
    %921 = vector.broadcast %cst_305 : f32 to vector<2x128xf32>
    %922 = arith.addf %921, %920 : vector<2x128xf32>
    %923 = arith.divf %921, %922 : vector<2x128xf32>
    %924 = vector.extract_strided_slice %923 {offsets = [0, 0], sizes = [2, 32], strides = [1, 1]} : vector<2x128xf32> to vector<2x32xf32>
    %925 = vector.extract_strided_slice %923 {offsets = [0, 32], sizes = [2, 32], strides = [1, 1]} : vector<2x128xf32> to vector<2x32xf32>
    %926 = vector.extract_strided_slice %923 {offsets = [0, 96], sizes = [2, 32], strides = [1, 1]} : vector<2x128xf32> to vector<2x32xf32>
    %927 = vector.extract_strided_slice %918 {offsets = [0, 64], sizes = [2, 32], strides = [1, 1]} : vector<2x128xf32> to vector<2x32xf32>
    %928 = math.tanh %927 : vector<2x32xf32>
    %929 = arith.mulf %925, %856 : vector<2x32xf32>
    %930 = arith.mulf %924, %928 : vector<2x32xf32>
    %931 = arith.addf %929, %930 : vector<2x32xf32>
    %932 = math.tanh %931 : vector<2x32xf32>
    %933 = arith.mulf %926, %932 : vector<2x32xf32>
    %934 = vector.extract_strided_slice %861 {offsets = [0, 1, 0], sizes = [2, 7, 32], strides = [1, 1, 1]} : vector<2x8x32xf32> to vector<2x7x32xf32>
    %935 = vector.shape_cast %931 : vector<2x32xf32> to vector<2x1x32xf32>
    %936 = tpu.concatenate %934, %935 in 1 : vector<2x7x32xf32>, vector<2x1x32xf32> -> vector<2x8x32xf32>
    %cst_306 = arith.constant dense<0.000000e+00> : vector<2x2xf32>
    %937 = tpu.matmul %931, %4, %cst_306 {dimension_numbers = #tpu.dot_dimension_numbers<[1], [0], [0], [1], [0, 0, 1, 1], [], []>} : vector<2x32xf32>, vector<32x2xf32>, vector<2x2xf32> -> vector<2x2xf32>
    %938 = vector.extract_strided_slice %865 {offsets = [0, 1, 0], sizes = [2, 7, 2], strides = [1, 1, 1]} : vector<2x8x2xf32> to vector<2x7x2xf32>
    %939 = vector.shape_cast %937 : vector<2x2xf32> to vector<2x1x2xf32>
    %940 = tpu.concatenate %938, %939 in 1 : vector<2x7x2xf32>, vector<2x1x2xf32> -> vector<2x8x2xf32>
    %941 = arith.index_cast %c12_i32 : i32 to index
    %c0_307 = arith.constant 0 : index
    %c0_308 = arith.constant 0 : index
    %c0_309 = arith.constant 0 : index
    %942 = vector.load %arg2[%941, %c0_307, %c0_308, %c0_309] : memref<16x2x8x32xf32, #tpu.memory_space<vmem>>, vector<1x2x8x32xf32>
    %943 = vector.shape_cast %942 : vector<1x2x8x32xf32> to vector<2x8x32xf32>
    "tpu.trace_start"() <{level = 10 : i32, message = "bnh,bth->bnt"}> : () -> ()
    %cst_310 = arith.constant dense<0.000000e+00> : vector<2x8x8xf32>
    %944 = tpu.matmul %943, %936, %cst_310 {dimension_numbers = #tpu.dot_dimension_numbers<[2], [2], [1], [1], [0, 0, 0, 1, 1, 1], [0], [0]>} : vector<2x8x32xf32>, vector<2x8x32xf32>, vector<2x8x8xf32> -> vector<2x8x8xf32>
    "tpu.trace_stop"() : () -> ()
    %cst_311 = arith.constant dense<0xFF800000> : vector<2x8xf32>
    %945 = vector.multi_reduction <maximumf>, %944, %cst_311 [2] : vector<2x8x8xf32> to vector<2x8xf32>
    %946 = vector.shape_cast %945 : vector<2x8xf32> to vector<2x8x1xf32>
    %947 = vector.broadcast %946 : vector<2x8x1xf32> to vector<2x8x8xf32>
    %948 = arith.subf %944, %947 : vector<2x8x8xf32>
    %949 = math.exp %948 : vector<2x8x8xf32>
    %cst_312 = arith.constant dense<0.000000e+00> : vector<2x8xf32>
    %950 = vector.multi_reduction <add>, %949, %cst_312 [2] : vector<2x8x8xf32> to vector<2x8xf32>
    %951 = vector.shape_cast %950 : vector<2x8xf32> to vector<2x8x1xf32>
    %952 = vector.broadcast %951 : vector<2x8x1xf32> to vector<2x8x8xf32>
    %953 = arith.divf %949, %952 : vector<2x8x8xf32>
    %954 = arith.index_cast %c12_i32 : i32 to index
    %c0_313 = arith.constant 0 : index
    %c0_314 = arith.constant 0 : index
    %c0_315 = arith.constant 0 : index
    %955 = vector.load %arg8[%954, %c0_313, %c0_314, %c0_315] : memref<16x2x8x8xf32, #tpu.memory_space<vmem>>, vector<1x2x8x8xf32>
    %956 = vector.shape_cast %955 : vector<1x2x8x8xf32> to vector<2x8x8xf32>
    %957 = vector.shape_cast %953 : vector<2x8x8xf32> to vector<1x2x8x8xf32>
    tpu.vector_store %arg8[%954, %c0_313, %c0_314, %c0_315], %957 {strides = array<i32>} : memref<16x2x8x8xf32, #tpu.memory_space<vmem>>, vector<1x2x8x8xf32>,
    %958 = vector.shape_cast %5 : vector<8x2xf32> to vector<1x8x2xf32>
    %959 = vector.broadcast %958 : vector<1x8x2xf32> to vector<2x8x2xf32>
    %960 = arith.addf %940, %959 : vector<2x8x2xf32>
    "tpu.trace_start"() <{level = 10 : i32, message = "bnt,btk->bnk"}> : () -> ()
    %cst_316 = arith.constant dense<0.000000e+00> : vector<2x8x2xf32>
    %961 = tpu.matmul %953, %960, %cst_316 {dimension_numbers = #tpu.dot_dimension_numbers<[2], [1], [1], [2], [0, 0, 0, 1, 1, 2], [0], [0]>} : vector<2x8x8xf32>, vector<2x8x2xf32>, vector<2x8x2xf32> -> vector<2x8x2xf32>
    "tpu.trace_stop"() : () -> ()
    %962 = vector.extract_strided_slice %961 {offsets = [0, 0, 0], sizes = [2, 8, 1], strides = [1, 1, 1]} : vector<2x8x2xf32> to vector<2x8x1xf32>
    %963 = vector.shape_cast %962 : vector<2x8x1xf32> to vector<2x8xf32>
    %964 = vector.extract_strided_slice %961 {offsets = [0, 0, 1], sizes = [2, 8, 1], strides = [1, 1, 1]} : vector<2x8x2xf32> to vector<2x8x1xf32>
    %965 = vector.shape_cast %964 : vector<2x8x1xf32> to vector<2x8xf32>
    %cst_317 = arith.constant dense<0xFF800000> : vector<2xf32>
    %966 = vector.multi_reduction <maximumf>, %963, %cst_317 [1] : vector<2x8xf32> to vector<2xf32>
    %967 = vector.shape_cast %966 : vector<2xf32> to vector<2x1xf32>
    %968 = vector.broadcast %967 : vector<2x1xf32> to vector<2x8xf32>
    %969 = arith.subf %963, %968 : vector<2x8xf32>
    %970 = math.exp %969 : vector<2x8xf32>
    %971 = arith.index_cast %c12_i32 : i32 to index
    %c0_318 = arith.constant 0 : index
    %c0_319 = arith.constant 0 : index
    %972 = vector.load %arg3[%971, %c0_318, %c0_319] : memref<16x2x8xf32, #tpu.memory_space<vmem>>, vector<1x2x8xf32>
    %973 = vector.shape_cast %972 : vector<1x2x8xf32> to vector<2x8xf32>
    %974 = arith.mulf %970, %973 : vector<2x8xf32>
    %cst_320 = arith.constant dense<0.000000e+00> : vector<2xf32>
    %975 = vector.multi_reduction <add>, %974, %cst_320 [1] : vector<2x8xf32> to vector<2xf32>
    %976 = vector.shape_cast %975 : vector<2xf32> to vector<2x1xf32>
    %cst_321 = arith.constant 1.000000e-30 : f32
    %977 = vector.broadcast %cst_321 : f32 to vector<2x1xf32>
    %978 = arith.maximumf %976, %977 : vector<2x1xf32>
    %979 = vector.broadcast %978 : vector<2x1xf32> to vector<2x8xf32>
    %980 = arith.divf %974, %979 : vector<2x8xf32>
    %981 = arith.index_cast %c12_i32 : i32 to index
    %c0_322 = arith.constant 0 : index
    %c0_323 = arith.constant 0 : index
    %982 = vector.load %arg9[%981, %c0_322, %c0_323] : memref<16x2x8xf32, #tpu.memory_space<vmem>>, vector<1x2x8xf32>
    %983 = vector.shape_cast %982 : vector<1x2x8xf32> to vector<2x8xf32>
    %984 = vector.shape_cast %980 : vector<2x8xf32> to vector<1x2x8xf32>
    tpu.vector_store %arg9[%981, %c0_322, %c0_323], %984 {strides = array<i32>} : memref<16x2x8xf32, #tpu.memory_space<vmem>>, vector<1x2x8xf32>,
    %985 = arith.index_cast %c12_i32 : i32 to index
    %c0_324 = arith.constant 0 : index
    %c0_325 = arith.constant 0 : index
    %986 = vector.load %arg10[%985, %c0_324, %c0_325] : memref<16x2x8xf32, #tpu.memory_space<vmem>>, vector<1x2x8xf32>
    %987 = vector.shape_cast %986 : vector<1x2x8xf32> to vector<2x8xf32>
    %988 = vector.shape_cast %965 : vector<2x8xf32> to vector<1x2x8xf32>
    tpu.vector_store %arg10[%985, %c0_324, %c0_325], %988 {strides = array<i32>} : memref<16x2x8xf32, #tpu.memory_space<vmem>>, vector<1x2x8xf32>,
    %c13_i32 = arith.constant 13 : i32
    %989 = arith.index_cast %c13_i32 : i32 to index
    %c0_326 = arith.constant 0 : index
    %c0_327 = arith.constant 0 : index
    %990 = vector.load %arg1[%989, %c0_326, %c0_327] : memref<16x2x128xf32, #tpu.memory_space<vmem>>, vector<1x2x128xf32>
    %991 = vector.shape_cast %990 : vector<1x2x128xf32> to vector<2x128xf32>
    %cst_328 = arith.constant dense<0.000000e+00> : vector<2x128xf32>
    %992 = tpu.matmul %933, %3, %cst_328 {dimension_numbers = #tpu.dot_dimension_numbers<[1], [0], [0], [1], [0, 0, 1, 1], [], []>} : vector<2x32xf32>, vector<32x128xf32>, vector<2x128xf32> -> vector<2x128xf32>
    %993 = arith.addf %991, %992 : vector<2x128xf32>
    %994 = arith.negf %993 : vector<2x128xf32>
    %995 = math.exp %994 : vector<2x128xf32>
    %cst_329 = arith.constant 1.000000e+00 : f32
    %996 = vector.broadcast %cst_329 : f32 to vector<2x128xf32>
    %997 = arith.addf %996, %995 : vector<2x128xf32>
    %998 = arith.divf %996, %997 : vector<2x128xf32>
    %999 = vector.extract_strided_slice %998 {offsets = [0, 0], sizes = [2, 32], strides = [1, 1]} : vector<2x128xf32> to vector<2x32xf32>
    %1000 = vector.extract_strided_slice %998 {offsets = [0, 32], sizes = [2, 32], strides = [1, 1]} : vector<2x128xf32> to vector<2x32xf32>
    %1001 = vector.extract_strided_slice %998 {offsets = [0, 96], sizes = [2, 32], strides = [1, 1]} : vector<2x128xf32> to vector<2x32xf32>
    %1002 = vector.extract_strided_slice %993 {offsets = [0, 64], sizes = [2, 32], strides = [1, 1]} : vector<2x128xf32> to vector<2x32xf32>
    %1003 = math.tanh %1002 : vector<2x32xf32>
    %1004 = arith.mulf %1000, %931 : vector<2x32xf32>
    %1005 = arith.mulf %999, %1003 : vector<2x32xf32>
    %1006 = arith.addf %1004, %1005 : vector<2x32xf32>
    %1007 = math.tanh %1006 : vector<2x32xf32>
    %1008 = arith.mulf %1001, %1007 : vector<2x32xf32>
    %1009 = vector.extract_strided_slice %936 {offsets = [0, 1, 0], sizes = [2, 7, 32], strides = [1, 1, 1]} : vector<2x8x32xf32> to vector<2x7x32xf32>
    %1010 = vector.shape_cast %1006 : vector<2x32xf32> to vector<2x1x32xf32>
    %1011 = tpu.concatenate %1009, %1010 in 1 : vector<2x7x32xf32>, vector<2x1x32xf32> -> vector<2x8x32xf32>
    %cst_330 = arith.constant dense<0.000000e+00> : vector<2x2xf32>
    %1012 = tpu.matmul %1006, %4, %cst_330 {dimension_numbers = #tpu.dot_dimension_numbers<[1], [0], [0], [1], [0, 0, 1, 1], [], []>} : vector<2x32xf32>, vector<32x2xf32>, vector<2x2xf32> -> vector<2x2xf32>
    %1013 = vector.extract_strided_slice %940 {offsets = [0, 1, 0], sizes = [2, 7, 2], strides = [1, 1, 1]} : vector<2x8x2xf32> to vector<2x7x2xf32>
    %1014 = vector.shape_cast %1012 : vector<2x2xf32> to vector<2x1x2xf32>
    %1015 = tpu.concatenate %1013, %1014 in 1 : vector<2x7x2xf32>, vector<2x1x2xf32> -> vector<2x8x2xf32>
    %1016 = arith.index_cast %c13_i32 : i32 to index
    %c0_331 = arith.constant 0 : index
    %c0_332 = arith.constant 0 : index
    %c0_333 = arith.constant 0 : index
    %1017 = vector.load %arg2[%1016, %c0_331, %c0_332, %c0_333] : memref<16x2x8x32xf32, #tpu.memory_space<vmem>>, vector<1x2x8x32xf32>
    %1018 = vector.shape_cast %1017 : vector<1x2x8x32xf32> to vector<2x8x32xf32>
    "tpu.trace_start"() <{level = 10 : i32, message = "bnh,bth->bnt"}> : () -> ()
    %cst_334 = arith.constant dense<0.000000e+00> : vector<2x8x8xf32>
    %1019 = tpu.matmul %1018, %1011, %cst_334 {dimension_numbers = #tpu.dot_dimension_numbers<[2], [2], [1], [1], [0, 0, 0, 1, 1, 1], [0], [0]>} : vector<2x8x32xf32>, vector<2x8x32xf32>, vector<2x8x8xf32> -> vector<2x8x8xf32>
    "tpu.trace_stop"() : () -> ()
    %cst_335 = arith.constant dense<0xFF800000> : vector<2x8xf32>
    %1020 = vector.multi_reduction <maximumf>, %1019, %cst_335 [2] : vector<2x8x8xf32> to vector<2x8xf32>
    %1021 = vector.shape_cast %1020 : vector<2x8xf32> to vector<2x8x1xf32>
    %1022 = vector.broadcast %1021 : vector<2x8x1xf32> to vector<2x8x8xf32>
    %1023 = arith.subf %1019, %1022 : vector<2x8x8xf32>
    %1024 = math.exp %1023 : vector<2x8x8xf32>
    %cst_336 = arith.constant dense<0.000000e+00> : vector<2x8xf32>
    %1025 = vector.multi_reduction <add>, %1024, %cst_336 [2] : vector<2x8x8xf32> to vector<2x8xf32>
    %1026 = vector.shape_cast %1025 : vector<2x8xf32> to vector<2x8x1xf32>
    %1027 = vector.broadcast %1026 : vector<2x8x1xf32> to vector<2x8x8xf32>
    %1028 = arith.divf %1024, %1027 : vector<2x8x8xf32>
    %1029 = arith.index_cast %c13_i32 : i32 to index
    %c0_337 = arith.constant 0 : index
    %c0_338 = arith.constant 0 : index
    %c0_339 = arith.constant 0 : index
    %1030 = vector.load %arg8[%1029, %c0_337, %c0_338, %c0_339] : memref<16x2x8x8xf32, #tpu.memory_space<vmem>>, vector<1x2x8x8xf32>
    %1031 = vector.shape_cast %1030 : vector<1x2x8x8xf32> to vector<2x8x8xf32>
    %1032 = vector.shape_cast %1028 : vector<2x8x8xf32> to vector<1x2x8x8xf32>
    tpu.vector_store %arg8[%1029, %c0_337, %c0_338, %c0_339], %1032 {strides = array<i32>} : memref<16x2x8x8xf32, #tpu.memory_space<vmem>>, vector<1x2x8x8xf32>,
    %1033 = vector.shape_cast %5 : vector<8x2xf32> to vector<1x8x2xf32>
    %1034 = vector.broadcast %1033 : vector<1x8x2xf32> to vector<2x8x2xf32>
    %1035 = arith.addf %1015, %1034 : vector<2x8x2xf32>
    "tpu.trace_start"() <{level = 10 : i32, message = "bnt,btk->bnk"}> : () -> ()
    %cst_340 = arith.constant dense<0.000000e+00> : vector<2x8x2xf32>
    %1036 = tpu.matmul %1028, %1035, %cst_340 {dimension_numbers = #tpu.dot_dimension_numbers<[2], [1], [1], [2], [0, 0, 0, 1, 1, 2], [0], [0]>} : vector<2x8x8xf32>, vector<2x8x2xf32>, vector<2x8x2xf32> -> vector<2x8x2xf32>
    "tpu.trace_stop"() : () -> ()
    %1037 = vector.extract_strided_slice %1036 {offsets = [0, 0, 0], sizes = [2, 8, 1], strides = [1, 1, 1]} : vector<2x8x2xf32> to vector<2x8x1xf32>
    %1038 = vector.shape_cast %1037 : vector<2x8x1xf32> to vector<2x8xf32>
    %1039 = vector.extract_strided_slice %1036 {offsets = [0, 0, 1], sizes = [2, 8, 1], strides = [1, 1, 1]} : vector<2x8x2xf32> to vector<2x8x1xf32>
    %1040 = vector.shape_cast %1039 : vector<2x8x1xf32> to vector<2x8xf32>
    %cst_341 = arith.constant dense<0xFF800000> : vector<2xf32>
    %1041 = vector.multi_reduction <maximumf>, %1038, %cst_341 [1] : vector<2x8xf32> to vector<2xf32>
    %1042 = vector.shape_cast %1041 : vector<2xf32> to vector<2x1xf32>
    %1043 = vector.broadcast %1042 : vector<2x1xf32> to vector<2x8xf32>
    %1044 = arith.subf %1038, %1043 : vector<2x8xf32>
    %1045 = math.exp %1044 : vector<2x8xf32>
    %1046 = arith.index_cast %c13_i32 : i32 to index
    %c0_342 = arith.constant 0 : index
    %c0_343 = arith.constant 0 : index
    %1047 = vector.load %arg3[%1046, %c0_342, %c0_343] : memref<16x2x8xf32, #tpu.memory_space<vmem>>, vector<1x2x8xf32>
    %1048 = vector.shape_cast %1047 : vector<1x2x8xf32> to vector<2x8xf32>
    %1049 = arith.mulf %1045, %1048 : vector<2x8xf32>
    %cst_344 = arith.constant dense<0.000000e+00> : vector<2xf32>
    %1050 = vector.multi_reduction <add>, %1049, %cst_344 [1] : vector<2x8xf32> to vector<2xf32>
    %1051 = vector.shape_cast %1050 : vector<2xf32> to vector<2x1xf32>
    %cst_345 = arith.constant 1.000000e-30 : f32
    %1052 = vector.broadcast %cst_345 : f32 to vector<2x1xf32>
    %1053 = arith.maximumf %1051, %1052 : vector<2x1xf32>
    %1054 = vector.broadcast %1053 : vector<2x1xf32> to vector<2x8xf32>
    %1055 = arith.divf %1049, %1054 : vector<2x8xf32>
    %1056 = arith.index_cast %c13_i32 : i32 to index
    %c0_346 = arith.constant 0 : index
    %c0_347 = arith.constant 0 : index
    %1057 = vector.load %arg9[%1056, %c0_346, %c0_347] : memref<16x2x8xf32, #tpu.memory_space<vmem>>, vector<1x2x8xf32>
    %1058 = vector.shape_cast %1057 : vector<1x2x8xf32> to vector<2x8xf32>
    %1059 = vector.shape_cast %1055 : vector<2x8xf32> to vector<1x2x8xf32>
    tpu.vector_store %arg9[%1056, %c0_346, %c0_347], %1059 {strides = array<i32>} : memref<16x2x8xf32, #tpu.memory_space<vmem>>, vector<1x2x8xf32>,
    %1060 = arith.index_cast %c13_i32 : i32 to index
    %c0_348 = arith.constant 0 : index
    %c0_349 = arith.constant 0 : index
    %1061 = vector.load %arg10[%1060, %c0_348, %c0_349] : memref<16x2x8xf32, #tpu.memory_space<vmem>>, vector<1x2x8xf32>
    %1062 = vector.shape_cast %1061 : vector<1x2x8xf32> to vector<2x8xf32>
    %1063 = vector.shape_cast %1040 : vector<2x8xf32> to vector<1x2x8xf32>
    tpu.vector_store %arg10[%1060, %c0_348, %c0_349], %1063 {strides = array<i32>} : memref<16x2x8xf32, #tpu.memory_space<vmem>>, vector<1x2x8xf32>,
    %c14_i32 = arith.constant 14 : i32
    %1064 = arith.index_cast %c14_i32 : i32 to index
    %c0_350 = arith.constant 0 : index
    %c0_351 = arith.constant 0 : index
    %1065 = vector.load %arg1[%1064, %c0_350, %c0_351] : memref<16x2x128xf32, #tpu.memory_space<vmem>>, vector<1x2x128xf32>
    %1066 = vector.shape_cast %1065 : vector<1x2x128xf32> to vector<2x128xf32>
    %cst_352 = arith.constant dense<0.000000e+00> : vector<2x128xf32>
    %1067 = tpu.matmul %1008, %3, %cst_352 {dimension_numbers = #tpu.dot_dimension_numbers<[1], [0], [0], [1], [0, 0, 1, 1], [], []>} : vector<2x32xf32>, vector<32x128xf32>, vector<2x128xf32> -> vector<2x128xf32>
    %1068 = arith.addf %1066, %1067 : vector<2x128xf32>
    %1069 = arith.negf %1068 : vector<2x128xf32>
    %1070 = math.exp %1069 : vector<2x128xf32>
    %cst_353 = arith.constant 1.000000e+00 : f32
    %1071 = vector.broadcast %cst_353 : f32 to vector<2x128xf32>
    %1072 = arith.addf %1071, %1070 : vector<2x128xf32>
    %1073 = arith.divf %1071, %1072 : vector<2x128xf32>
    %1074 = vector.extract_strided_slice %1073 {offsets = [0, 0], sizes = [2, 32], strides = [1, 1]} : vector<2x128xf32> to vector<2x32xf32>
    %1075 = vector.extract_strided_slice %1073 {offsets = [0, 32], sizes = [2, 32], strides = [1, 1]} : vector<2x128xf32> to vector<2x32xf32>
    %1076 = vector.extract_strided_slice %1073 {offsets = [0, 96], sizes = [2, 32], strides = [1, 1]} : vector<2x128xf32> to vector<2x32xf32>
    %1077 = vector.extract_strided_slice %1068 {offsets = [0, 64], sizes = [2, 32], strides = [1, 1]} : vector<2x128xf32> to vector<2x32xf32>
    %1078 = math.tanh %1077 : vector<2x32xf32>
    %1079 = arith.mulf %1075, %1006 : vector<2x32xf32>
    %1080 = arith.mulf %1074, %1078 : vector<2x32xf32>
    %1081 = arith.addf %1079, %1080 : vector<2x32xf32>
    %1082 = math.tanh %1081 : vector<2x32xf32>
    %1083 = arith.mulf %1076, %1082 : vector<2x32xf32>
    %1084 = vector.extract_strided_slice %1011 {offsets = [0, 1, 0], sizes = [2, 7, 32], strides = [1, 1, 1]} : vector<2x8x32xf32> to vector<2x7x32xf32>
    %1085 = vector.shape_cast %1081 : vector<2x32xf32> to vector<2x1x32xf32>
    %1086 = tpu.concatenate %1084, %1085 in 1 : vector<2x7x32xf32>, vector<2x1x32xf32> -> vector<2x8x32xf32>
    %cst_354 = arith.constant dense<0.000000e+00> : vector<2x2xf32>
    %1087 = tpu.matmul %1081, %4, %cst_354 {dimension_numbers = #tpu.dot_dimension_numbers<[1], [0], [0], [1], [0, 0, 1, 1], [], []>} : vector<2x32xf32>, vector<32x2xf32>, vector<2x2xf32> -> vector<2x2xf32>
    %1088 = vector.extract_strided_slice %1015 {offsets = [0, 1, 0], sizes = [2, 7, 2], strides = [1, 1, 1]} : vector<2x8x2xf32> to vector<2x7x2xf32>
    %1089 = vector.shape_cast %1087 : vector<2x2xf32> to vector<2x1x2xf32>
    %1090 = tpu.concatenate %1088, %1089 in 1 : vector<2x7x2xf32>, vector<2x1x2xf32> -> vector<2x8x2xf32>
    %1091 = arith.index_cast %c14_i32 : i32 to index
    %c0_355 = arith.constant 0 : index
    %c0_356 = arith.constant 0 : index
    %c0_357 = arith.constant 0 : index
    %1092 = vector.load %arg2[%1091, %c0_355, %c0_356, %c0_357] : memref<16x2x8x32xf32, #tpu.memory_space<vmem>>, vector<1x2x8x32xf32>
    %1093 = vector.shape_cast %1092 : vector<1x2x8x32xf32> to vector<2x8x32xf32>
    "tpu.trace_start"() <{level = 10 : i32, message = "bnh,bth->bnt"}> : () -> ()
    %cst_358 = arith.constant dense<0.000000e+00> : vector<2x8x8xf32>
    %1094 = tpu.matmul %1093, %1086, %cst_358 {dimension_numbers = #tpu.dot_dimension_numbers<[2], [2], [1], [1], [0, 0, 0, 1, 1, 1], [0], [0]>} : vector<2x8x32xf32>, vector<2x8x32xf32>, vector<2x8x8xf32> -> vector<2x8x8xf32>
    "tpu.trace_stop"() : () -> ()
    %cst_359 = arith.constant dense<0xFF800000> : vector<2x8xf32>
    %1095 = vector.multi_reduction <maximumf>, %1094, %cst_359 [2] : vector<2x8x8xf32> to vector<2x8xf32>
    %1096 = vector.shape_cast %1095 : vector<2x8xf32> to vector<2x8x1xf32>
    %1097 = vector.broadcast %1096 : vector<2x8x1xf32> to vector<2x8x8xf32>
    %1098 = arith.subf %1094, %1097 : vector<2x8x8xf32>
    %1099 = math.exp %1098 : vector<2x8x8xf32>
    %cst_360 = arith.constant dense<0.000000e+00> : vector<2x8xf32>
    %1100 = vector.multi_reduction <add>, %1099, %cst_360 [2] : vector<2x8x8xf32> to vector<2x8xf32>
    %1101 = vector.shape_cast %1100 : vector<2x8xf32> to vector<2x8x1xf32>
    %1102 = vector.broadcast %1101 : vector<2x8x1xf32> to vector<2x8x8xf32>
    %1103 = arith.divf %1099, %1102 : vector<2x8x8xf32>
    %1104 = arith.index_cast %c14_i32 : i32 to index
    %c0_361 = arith.constant 0 : index
    %c0_362 = arith.constant 0 : index
    %c0_363 = arith.constant 0 : index
    %1105 = vector.load %arg8[%1104, %c0_361, %c0_362, %c0_363] : memref<16x2x8x8xf32, #tpu.memory_space<vmem>>, vector<1x2x8x8xf32>
    %1106 = vector.shape_cast %1105 : vector<1x2x8x8xf32> to vector<2x8x8xf32>
    %1107 = vector.shape_cast %1103 : vector<2x8x8xf32> to vector<1x2x8x8xf32>
    tpu.vector_store %arg8[%1104, %c0_361, %c0_362, %c0_363], %1107 {strides = array<i32>} : memref<16x2x8x8xf32, #tpu.memory_space<vmem>>, vector<1x2x8x8xf32>,
    %1108 = vector.shape_cast %5 : vector<8x2xf32> to vector<1x8x2xf32>
    %1109 = vector.broadcast %1108 : vector<1x8x2xf32> to vector<2x8x2xf32>
    %1110 = arith.addf %1090, %1109 : vector<2x8x2xf32>
    "tpu.trace_start"() <{level = 10 : i32, message = "bnt,btk->bnk"}> : () -> ()
    %cst_364 = arith.constant dense<0.000000e+00> : vector<2x8x2xf32>
    %1111 = tpu.matmul %1103, %1110, %cst_364 {dimension_numbers = #tpu.dot_dimension_numbers<[2], [1], [1], [2], [0, 0, 0, 1, 1, 2], [0], [0]>} : vector<2x8x8xf32>, vector<2x8x2xf32>, vector<2x8x2xf32> -> vector<2x8x2xf32>
    "tpu.trace_stop"() : () -> ()
    %1112 = vector.extract_strided_slice %1111 {offsets = [0, 0, 0], sizes = [2, 8, 1], strides = [1, 1, 1]} : vector<2x8x2xf32> to vector<2x8x1xf32>
    %1113 = vector.shape_cast %1112 : vector<2x8x1xf32> to vector<2x8xf32>
    %1114 = vector.extract_strided_slice %1111 {offsets = [0, 0, 1], sizes = [2, 8, 1], strides = [1, 1, 1]} : vector<2x8x2xf32> to vector<2x8x1xf32>
    %1115 = vector.shape_cast %1114 : vector<2x8x1xf32> to vector<2x8xf32>
    %cst_365 = arith.constant dense<0xFF800000> : vector<2xf32>
    %1116 = vector.multi_reduction <maximumf>, %1113, %cst_365 [1] : vector<2x8xf32> to vector<2xf32>
    %1117 = vector.shape_cast %1116 : vector<2xf32> to vector<2x1xf32>
    %1118 = vector.broadcast %1117 : vector<2x1xf32> to vector<2x8xf32>
    %1119 = arith.subf %1113, %1118 : vector<2x8xf32>
    %1120 = math.exp %1119 : vector<2x8xf32>
    %1121 = arith.index_cast %c14_i32 : i32 to index
    %c0_366 = arith.constant 0 : index
    %c0_367 = arith.constant 0 : index
    %1122 = vector.load %arg3[%1121, %c0_366, %c0_367] : memref<16x2x8xf32, #tpu.memory_space<vmem>>, vector<1x2x8xf32>
    %1123 = vector.shape_cast %1122 : vector<1x2x8xf32> to vector<2x8xf32>
    %1124 = arith.mulf %1120, %1123 : vector<2x8xf32>
    %cst_368 = arith.constant dense<0.000000e+00> : vector<2xf32>
    %1125 = vector.multi_reduction <add>, %1124, %cst_368 [1] : vector<2x8xf32> to vector<2xf32>
    %1126 = vector.shape_cast %1125 : vector<2xf32> to vector<2x1xf32>
    %cst_369 = arith.constant 1.000000e-30 : f32
    %1127 = vector.broadcast %cst_369 : f32 to vector<2x1xf32>
    %1128 = arith.maximumf %1126, %1127 : vector<2x1xf32>
    %1129 = vector.broadcast %1128 : vector<2x1xf32> to vector<2x8xf32>
    %1130 = arith.divf %1124, %1129 : vector<2x8xf32>
    %1131 = arith.index_cast %c14_i32 : i32 to index
    %c0_370 = arith.constant 0 : index
    %c0_371 = arith.constant 0 : index
    %1132 = vector.load %arg9[%1131, %c0_370, %c0_371] : memref<16x2x8xf32, #tpu.memory_space<vmem>>, vector<1x2x8xf32>
    %1133 = vector.shape_cast %1132 : vector<1x2x8xf32> to vector<2x8xf32>
    %1134 = vector.shape_cast %1130 : vector<2x8xf32> to vector<1x2x8xf32>
    tpu.vector_store %arg9[%1131, %c0_370, %c0_371], %1134 {strides = array<i32>} : memref<16x2x8xf32, #tpu.memory_space<vmem>>, vector<1x2x8xf32>,
    %1135 = arith.index_cast %c14_i32 : i32 to index
    %c0_372 = arith.constant 0 : index
    %c0_373 = arith.constant 0 : index
    %1136 = vector.load %arg10[%1135, %c0_372, %c0_373] : memref<16x2x8xf32, #tpu.memory_space<vmem>>, vector<1x2x8xf32>
    %1137 = vector.shape_cast %1136 : vector<1x2x8xf32> to vector<2x8xf32>
    %1138 = vector.shape_cast %1115 : vector<2x8xf32> to vector<1x2x8xf32>
    tpu.vector_store %arg10[%1135, %c0_372, %c0_373], %1138 {strides = array<i32>} : memref<16x2x8xf32, #tpu.memory_space<vmem>>, vector<1x2x8xf32>,
    %c15_i32 = arith.constant 15 : i32
    %1139 = arith.index_cast %c15_i32 : i32 to index
    %c0_374 = arith.constant 0 : index
    %c0_375 = arith.constant 0 : index
    %1140 = vector.load %arg1[%1139, %c0_374, %c0_375] : memref<16x2x128xf32, #tpu.memory_space<vmem>>, vector<1x2x128xf32>
    %1141 = vector.shape_cast %1140 : vector<1x2x128xf32> to vector<2x128xf32>
    %cst_376 = arith.constant dense<0.000000e+00> : vector<2x128xf32>
    %1142 = tpu.matmul %1083, %3, %cst_376 {dimension_numbers = #tpu.dot_dimension_numbers<[1], [0], [0], [1], [0, 0, 1, 1], [], []>} : vector<2x32xf32>, vector<32x128xf32>, vector<2x128xf32> -> vector<2x128xf32>
    %1143 = arith.addf %1141, %1142 : vector<2x128xf32>
    %1144 = arith.negf %1143 : vector<2x128xf32>
    %1145 = math.exp %1144 : vector<2x128xf32>
    %cst_377 = arith.constant 1.000000e+00 : f32
    %1146 = vector.broadcast %cst_377 : f32 to vector<2x128xf32>
    %1147 = arith.addf %1146, %1145 : vector<2x128xf32>
    %1148 = arith.divf %1146, %1147 : vector<2x128xf32>
    %1149 = vector.extract_strided_slice %1148 {offsets = [0, 0], sizes = [2, 32], strides = [1, 1]} : vector<2x128xf32> to vector<2x32xf32>
    %1150 = vector.extract_strided_slice %1148 {offsets = [0, 32], sizes = [2, 32], strides = [1, 1]} : vector<2x128xf32> to vector<2x32xf32>
    %1151 = vector.extract_strided_slice %1148 {offsets = [0, 96], sizes = [2, 32], strides = [1, 1]} : vector<2x128xf32> to vector<2x32xf32>
    %1152 = vector.extract_strided_slice %1143 {offsets = [0, 64], sizes = [2, 32], strides = [1, 1]} : vector<2x128xf32> to vector<2x32xf32>
    %1153 = math.tanh %1152 : vector<2x32xf32>
    %1154 = arith.mulf %1150, %1081 : vector<2x32xf32>
    %1155 = arith.mulf %1149, %1153 : vector<2x32xf32>
    %1156 = arith.addf %1154, %1155 : vector<2x32xf32>
    %1157 = math.tanh %1156 : vector<2x32xf32>
    %1158 = arith.mulf %1151, %1157 : vector<2x32xf32>
    %1159 = vector.extract_strided_slice %1086 {offsets = [0, 1, 0], sizes = [2, 7, 32], strides = [1, 1, 1]} : vector<2x8x32xf32> to vector<2x7x32xf32>
    %1160 = vector.shape_cast %1156 : vector<2x32xf32> to vector<2x1x32xf32>
    %1161 = tpu.concatenate %1159, %1160 in 1 : vector<2x7x32xf32>, vector<2x1x32xf32> -> vector<2x8x32xf32>
    %cst_378 = arith.constant dense<0.000000e+00> : vector<2x2xf32>
    %1162 = tpu.matmul %1156, %4, %cst_378 {dimension_numbers = #tpu.dot_dimension_numbers<[1], [0], [0], [1], [0, 0, 1, 1], [], []>} : vector<2x32xf32>, vector<32x2xf32>, vector<2x2xf32> -> vector<2x2xf32>
    %1163 = vector.extract_strided_slice %1090 {offsets = [0, 1, 0], sizes = [2, 7, 2], strides = [1, 1, 1]} : vector<2x8x2xf32> to vector<2x7x2xf32>
    %1164 = vector.shape_cast %1162 : vector<2x2xf32> to vector<2x1x2xf32>
    %1165 = tpu.concatenate %1163, %1164 in 1 : vector<2x7x2xf32>, vector<2x1x2xf32> -> vector<2x8x2xf32>
    %1166 = arith.index_cast %c15_i32 : i32 to index
    %c0_379 = arith.constant 0 : index
    %c0_380 = arith.constant 0 : index
    %c0_381 = arith.constant 0 : index
    %1167 = vector.load %arg2[%1166, %c0_379, %c0_380, %c0_381] : memref<16x2x8x32xf32, #tpu.memory_space<vmem>>, vector<1x2x8x32xf32>
    %1168 = vector.shape_cast %1167 : vector<1x2x8x32xf32> to vector<2x8x32xf32>
    "tpu.trace_start"() <{level = 10 : i32, message = "bnh,bth->bnt"}> : () -> ()
    %cst_382 = arith.constant dense<0.000000e+00> : vector<2x8x8xf32>
    %1169 = tpu.matmul %1168, %1161, %cst_382 {dimension_numbers = #tpu.dot_dimension_numbers<[2], [2], [1], [1], [0, 0, 0, 1, 1, 1], [0], [0]>} : vector<2x8x32xf32>, vector<2x8x32xf32>, vector<2x8x8xf32> -> vector<2x8x8xf32>
    "tpu.trace_stop"() : () -> ()
    %cst_383 = arith.constant dense<0xFF800000> : vector<2x8xf32>
    %1170 = vector.multi_reduction <maximumf>, %1169, %cst_383 [2] : vector<2x8x8xf32> to vector<2x8xf32>
    %1171 = vector.shape_cast %1170 : vector<2x8xf32> to vector<2x8x1xf32>
    %1172 = vector.broadcast %1171 : vector<2x8x1xf32> to vector<2x8x8xf32>
    %1173 = arith.subf %1169, %1172 : vector<2x8x8xf32>
    %1174 = math.exp %1173 : vector<2x8x8xf32>
    %cst_384 = arith.constant dense<0.000000e+00> : vector<2x8xf32>
    %1175 = vector.multi_reduction <add>, %1174, %cst_384 [2] : vector<2x8x8xf32> to vector<2x8xf32>
    %1176 = vector.shape_cast %1175 : vector<2x8xf32> to vector<2x8x1xf32>
    %1177 = vector.broadcast %1176 : vector<2x8x1xf32> to vector<2x8x8xf32>
    %1178 = arith.divf %1174, %1177 : vector<2x8x8xf32>
    %1179 = arith.index_cast %c15_i32 : i32 to index
    %c0_385 = arith.constant 0 : index
    %c0_386 = arith.constant 0 : index
    %c0_387 = arith.constant 0 : index
    %1180 = vector.load %arg8[%1179, %c0_385, %c0_386, %c0_387] : memref<16x2x8x8xf32, #tpu.memory_space<vmem>>, vector<1x2x8x8xf32>
    %1181 = vector.shape_cast %1180 : vector<1x2x8x8xf32> to vector<2x8x8xf32>
    %1182 = vector.shape_cast %1178 : vector<2x8x8xf32> to vector<1x2x8x8xf32>
    tpu.vector_store %arg8[%1179, %c0_385, %c0_386, %c0_387], %1182 {strides = array<i32>} : memref<16x2x8x8xf32, #tpu.memory_space<vmem>>, vector<1x2x8x8xf32>,
    %1183 = vector.shape_cast %5 : vector<8x2xf32> to vector<1x8x2xf32>
    %1184 = vector.broadcast %1183 : vector<1x8x2xf32> to vector<2x8x2xf32>
    %1185 = arith.addf %1165, %1184 : vector<2x8x2xf32>
    "tpu.trace_start"() <{level = 10 : i32, message = "bnt,btk->bnk"}> : () -> ()
    %cst_388 = arith.constant dense<0.000000e+00> : vector<2x8x2xf32>
    %1186 = tpu.matmul %1178, %1185, %cst_388 {dimension_numbers = #tpu.dot_dimension_numbers<[2], [1], [1], [2], [0, 0, 0, 1, 1, 2], [0], [0]>} : vector<2x8x8xf32>, vector<2x8x2xf32>, vector<2x8x2xf32> -> vector<2x8x2xf32>
    "tpu.trace_stop"() : () -> ()
    %1187 = vector.extract_strided_slice %1186 {offsets = [0, 0, 0], sizes = [2, 8, 1], strides = [1, 1, 1]} : vector<2x8x2xf32> to vector<2x8x1xf32>
    %1188 = vector.shape_cast %1187 : vector<2x8x1xf32> to vector<2x8xf32>
    %1189 = vector.extract_strided_slice %1186 {offsets = [0, 0, 1], sizes = [2, 8, 1], strides = [1, 1, 1]} : vector<2x8x2xf32> to vector<2x8x1xf32>
    %1190 = vector.shape_cast %1189 : vector<2x8x1xf32> to vector<2x8xf32>
    %cst_389 = arith.constant dense<0xFF800000> : vector<2xf32>
    %1191 = vector.multi_reduction <maximumf>, %1188, %cst_389 [1] : vector<2x8xf32> to vector<2xf32>
    %1192 = vector.shape_cast %1191 : vector<2xf32> to vector<2x1xf32>
    %1193 = vector.broadcast %1192 : vector<2x1xf32> to vector<2x8xf32>
    %1194 = arith.subf %1188, %1193 : vector<2x8xf32>
    %1195 = math.exp %1194 : vector<2x8xf32>
    %1196 = arith.index_cast %c15_i32 : i32 to index
    %c0_390 = arith.constant 0 : index
    %c0_391 = arith.constant 0 : index
    %1197 = vector.load %arg3[%1196, %c0_390, %c0_391] : memref<16x2x8xf32, #tpu.memory_space<vmem>>, vector<1x2x8xf32>
    %1198 = vector.shape_cast %1197 : vector<1x2x8xf32> to vector<2x8xf32>
    %1199 = arith.mulf %1195, %1198 : vector<2x8xf32>
    %cst_392 = arith.constant dense<0.000000e+00> : vector<2xf32>
    %1200 = vector.multi_reduction <add>, %1199, %cst_392 [1] : vector<2x8xf32> to vector<2xf32>
    %1201 = vector.shape_cast %1200 : vector<2xf32> to vector<2x1xf32>
    %cst_393 = arith.constant 1.000000e-30 : f32
    %1202 = vector.broadcast %cst_393 : f32 to vector<2x1xf32>
    %1203 = arith.maximumf %1201, %1202 : vector<2x1xf32>
    %1204 = vector.broadcast %1203 : vector<2x1xf32> to vector<2x8xf32>
    %1205 = arith.divf %1199, %1204 : vector<2x8xf32>
    %1206 = arith.index_cast %c15_i32 : i32 to index
    %c0_394 = arith.constant 0 : index
    %c0_395 = arith.constant 0 : index
    %1207 = vector.load %arg9[%1206, %c0_394, %c0_395] : memref<16x2x8xf32, #tpu.memory_space<vmem>>, vector<1x2x8xf32>
    %1208 = vector.shape_cast %1207 : vector<1x2x8xf32> to vector<2x8xf32>
    %1209 = vector.shape_cast %1205 : vector<2x8xf32> to vector<1x2x8xf32>
    tpu.vector_store %arg9[%1206, %c0_394, %c0_395], %1209 {strides = array<i32>} : memref<16x2x8xf32, #tpu.memory_space<vmem>>, vector<1x2x8xf32>,
    %1210 = arith.index_cast %c15_i32 : i32 to index
    %c0_396 = arith.constant 0 : index
    %c0_397 = arith.constant 0 : index
    %1211 = vector.load %arg10[%1210, %c0_396, %c0_397] : memref<16x2x8xf32, #tpu.memory_space<vmem>>, vector<1x2x8xf32>
    %1212 = vector.shape_cast %1211 : vector<1x2x8xf32> to vector<2x8xf32>
    %1213 = vector.shape_cast %1190 : vector<2x8xf32> to vector<1x2x8xf32>
    tpu.vector_store %arg10[%1210, %c0_396, %c0_397], %1213 {strides = array<i32>} : memref<16x2x8xf32, #tpu.memory_space<vmem>>, vector<1x2x8xf32>,
    %c16_i32 = arith.constant 16 : i32
    %c0_398 = arith.constant 0 : index
    %c0_399 = arith.constant 0 : index
    %c0_400 = arith.constant 0 : index
    %1214 = vector.load %arg11[%c0_398, %c0_399, %c0_400] : memref<2x10x32xf32, #tpu.memory_space<vmem>>, vector<2x8x32xf32>
    tpu.vector_store %arg11[%c0_398, %c0_399, %c0_400], %1161 {strides = array<i32>} : memref<2x10x32xf32, #tpu.memory_space<vmem>>, vector<2x8x32xf32>,
    %c0_401 = arith.constant 0 : index
    %c8_402 = arith.constant 8 : index
    %c0_403 = arith.constant 0 : index
    %1215 = vector.load %arg11[%c0_401, %c8_402, %c0_403] : memref<2x10x32xf32, #tpu.memory_space<vmem>>, vector<2x1x32xf32>
    %1216 = vector.shape_cast %1215 : vector<2x1x32xf32> to vector<2x32xf32>
    %1217 = vector.shape_cast %1156 : vector<2x32xf32> to vector<2x1x32xf32>
    tpu.vector_store %arg11[%c0_401, %c8_402, %c0_403], %1217 {strides = array<i32>} : memref<2x10x32xf32, #tpu.memory_space<vmem>>, vector<2x1x32xf32>,
    %c0_404 = arith.constant 0 : index
    %c9_405 = arith.constant 9 : index
    %c0_406 = arith.constant 0 : index
    %1218 = vector.load %arg11[%c0_404, %c9_405, %c0_406] : memref<2x10x32xf32, #tpu.memory_space<vmem>>, vector<2x1x32xf32>
    %1219 = vector.shape_cast %1218 : vector<2x1x32xf32> to vector<2x32xf32>
    %1220 = vector.shape_cast %1158 : vector<2x32xf32> to vector<2x1x32xf32>
    tpu.vector_store %arg11[%c0_404, %c9_405, %c0_406], %1220 {strides = array<i32>} : memref<2x10x32xf32, #tpu.memory_space<vmem>>, vector<2x1x32xf32>,
    return
  }
  func.func @transform_0(%arg0: i32) -> (i32, i32, i32) {
    %c0_i32 = arith.constant 0 : i32
    %c0_i32_0 = arith.constant 0 : i32
    %c0_i32_1 = arith.constant 0 : i32
    return %arg0, %c0_i32, %c0_i32_0 : i32, i32, i32
  }
  func.func @transform_1(%arg0: i32) -> (i32, i32, i32, i32) {
    %c0_i32 = arith.constant 0 : i32
    %c0_i32_0 = arith.constant 0 : i32
    %c0_i32_1 = arith.constant 0 : i32
    %c0_i32_2 = arith.constant 0 : i32
    return %arg0, %c0_i32, %c0_i32_0, %c0_i32_1 : i32, i32, i32, i32
  }
  func.func @transform_2(%arg0: i32) -> (i32, i32, i32) {
    %c0_i32 = arith.constant 0 : i32
    %c0_i32_0 = arith.constant 0 : i32
    %c0_i32_1 = arith.constant 0 : i32
    return %arg0, %c0_i32, %c0_i32_0 : i32, i32, i32
  }
  func.func @transform_3(%arg0: i32) -> (i32, i32, i32) {
    %c0_i32 = arith.constant 0 : i32
    %c0_i32_0 = arith.constant 0 : i32
    %c0_i32_1 = arith.constant 0 : i32
    %c0_i32_2 = arith.constant 0 : i32
    return %c0_i32, %c0_i32_0, %c0_i32_1 : i32, i32, i32
  }
  func.func @transform_4(%arg0: i32) -> (i32, i32) {
    %c0_i32 = arith.constant 0 : i32
    %c0_i32_0 = arith.constant 0 : i32
    %c0_i32_1 = arith.constant 0 : i32
    return %c0_i32, %c0_i32_0 : i32, i32
  }
  func.func @transform_5(%arg0: i32) -> (i32, i32) {
    %c0_i32 = arith.constant 0 : i32
    %c0_i32_0 = arith.constant 0 : i32
    %c0_i32_1 = arith.constant 0 : i32
    return %c0_i32, %c0_i32_0 : i32, i32
  }
  func.func @transform_6(%arg0: i32) -> (i32, i32) {
    %c0_i32 = arith.constant 0 : i32
    %c0_i32_0 = arith.constant 0 : i32
    %c0_i32_1 = arith.constant 0 : i32
    return %c0_i32, %c0_i32_0 : i32, i32
  }
  func.func @transform_7(%arg0: i32) -> (i32, i32, i32, i32) {
    %c0_i32 = arith.constant 0 : i32
    %c0_i32_0 = arith.constant 0 : i32
    %c0_i32_1 = arith.constant 0 : i32
    %c0_i32_2 = arith.constant 0 : i32
    return %arg0, %c0_i32, %c0_i32_0, %c0_i32_1 : i32, i32, i32, i32
  }
  func.func @transform_8(%arg0: i32) -> (i32, i32, i32) {
    %c0_i32 = arith.constant 0 : i32
    %c0_i32_0 = arith.constant 0 : i32
    %c0_i32_1 = arith.constant 0 : i32
    return %arg0, %c0_i32, %c0_i32_0 : i32, i32, i32
  }
  func.func @transform_9(%arg0: i32) -> (i32, i32, i32) {
    %c0_i32 = arith.constant 0 : i32
    %c0_i32_0 = arith.constant 0 : i32
    %c0_i32_1 = arith.constant 0 : i32
    return %arg0, %c0_i32, %c0_i32_0 : i32, i32, i32
  }
  func.func @transform_10(%arg0: i32) -> (i32, i32, i32) {
    %c0_i32 = arith.constant 0 : i32
    %c0_i32_0 = arith.constant 0 : i32
    %c0_i32_1 = arith.constant 0 : i32
    %c0_i32_2 = arith.constant 0 : i32
    return %c0_i32, %c0_i32_0, %c0_i32_1 : i32, i32, i32
  }
}

</mosaic_0001>

<bundles_post_ra>
// kernel: eviction_policy_forward.1
= control target key start
LH: loop header
LB: loop body
LE: loop exit
PB: predicated region body
PF: predicated region fallthrough
CT: control target
= control target key end

     0   :  { %vm40_vm0 = vcmask 254976   ;;  %vm93_vm1 = vcmask 1041409   ;;  %vm38_vm2 = vcmask 261120   ;;  %s7246_s17 = smov 64   ;;  %s7247_s20 = smov 32   ;;  %vm176_vm7 = vcmask 1046528   ;;  %s9670_s4 = inlined_call_operand.vmem [shape: f32[32,128], index: 4, kind: input, shape index: {}]   ;;  %s9671_s3 = inlined_call_operand.vmem [shape: f32[2,10,32], index: 3, kind: input, shape index: {}]   ;;  %s9672_s10 = inlined_call_operand.vmem [shape: f32[2,10,32], index: 10, kind: output, shape index: {3}]   ;;  %s9673_s0 = inlined_call_operand.vmem [shape: f32[16,2,128], index: 0, kind: input, shape index: {}]   ;;  %s9674_s5 = inlined_call_operand.vmem [shape: f32[32,2], index: 5, kind: input, shape index: {}]   ;;  %s9675_s1 = inlined_call_operand.vmem [shape: f32[16,2,8,32], index: 1, kind: input, shape index: {}]   ;;  %s9676_s6 = inlined_call_operand.vmem [shape: f32[8,2], index: 6, kind: input, shape index: {}]   ;;  %s9677_s7 = inlined_call_operand.vmem [shape: f32[16,2,8,8], index: 7, kind: output, shape index: {0}]   ;;  %s9678_s2 = inlined_call_operand.vmem [shape: f32[16,2,8], index: 2, kind: input, shape index: {}]   ;;  %s9679_s9 = inlined_call_operand.vmem [shape: f32[16,2,8], index: 9, kind: output, shape index: {2}]   ;;  %s9680_s8 = inlined_call_operand.vmem [shape: f32[16,2,8], index: 8, kind: output, shape index: {1}]  }
   0x1   :  { %v7309_v0 = vld [vmem:[%s9670_s4 + $0x18] sm:$0xff]  ;;  %v7314_v1 = vld [vmem:[%s9670_s4 + $0x10] sm:$0xff]  ;;  %v35_v2 = vld [vmem:[%s9671_s3 + $0x8] sm:$0x3]  ;;  %s7248_s21 = smov 96   ;;  %vm271_vm8 = vcmask 64512  }
   0x2   :  { %109 = vmatpush.msra.mxu1 %v7309_v0  ;;  %v37_v3 = vld [vmem:[%s9671_s3 + $0x18] sm:$0x3]  ;;  %v7326_v4 = vld [vmem:[%s9670_s4 + $0x8] sm:$0xff]  ;;  %41 = vst.msk [vmem:[%s9672_s10 + $0x8] sm:$0x3] %vm40_vm0, %v35_v2  ;;  %v7338_v5 = vld [vmem:[%s9670_s4] sm:$0xff] }
   0x3   :  { %43 = vst.msk [vmem:[%s9672_s10 + $0x18] sm:$0x3] %vm40_vm0, %v37_v3  ;;  %v89_v10 = vld [vmem:[%s9673_s0] sm:$0x3]  ;;  %v36_v42 = vld [vmem:[%s9671_s3 + $0x10] sm:$0xff]  ;;  %v7393_v45 = vld [vmem:[%s9674_s5 + $0x18] sm:$0xff] }
   0x4   :  { %110 = vmatpush.msra.mxu1 %v7314_v1  ;;  %v34_v41 = vld [vmem:[%s9671_s3] sm:$0xff]  ;;  %42 = vst.msk [vmem:[%s9672_s10 + $0x10] sm:$0xff] %vm38_vm2, %v36_v42  ;;  %78 = vmatpush.msra.mxu0 %v7393_v45  ;;  %v7400_v47 = vld [vmem:[%s9674_s5 + $0x10] sm:$0xff]  ;;  %v7405_v48 = vld [vmem:[%s9674_s5 + $0x8] sm:$0xff] }
   0x5   :  { %39 = vst.msk [vmem:[%s9672_s10] sm:$0xff] %vm38_vm2, %v34_v41  ;;  %195 = vmatpush.msra.mxu2 %v7393_v45  ;;  %v217_v51 = vld [vmem:[%s9675_s1] sm:$0xff]  ;;  %v218_v56 = vld [vmem:[%s9675_s1 + $0x8] sm:$0xff] }
   0x6   :  { %111 = vmatpush.msra.mxu1 %v7326_v4  ;;  %79 = vmatpush.msra.mxu0 %v7400_v47  ;;  %v7423_v52 = vld [vmem:[%s9674_s5] sm:$0xff] }
   0x7   :  { %196 = vmatpush.msra.mxu2 %v7400_v47 }
   0x8   :  { %112 = vmatpush.msra.mxu1 %v7338_v5  ;;  %80 = vmatpush.msra.mxu0 %v7405_v48 }
   0x9   :  { %v57_v6 = vld [vmem:[%s9672_s10 + $0x9] sm:$0x1]  ;;  %v55_v16 = vld [vmem:[%s9672_s10 + $0x8] sm:$0x1]  ;;  %197 = vmatpush.msra.mxu2 %v7405_v48 }
   0xa   :  { %v58_v7 = vld [vmem:[%s9672_s10 + $0x19] sm:$0x1]  ;;  %v56_v13 = vld [vmem:[%s9672_s10 + $0x18] sm:$0x1]  ;;  %81 = vmatpush.msra.mxu0 %v7423_v52 }
   0xb   :  { %v92_v8 = vrot.slane %v58_v7, 7  ;;  %v140_v15 = vrot.slane %v56_v13, 7  ;;  %v54_v50 = vld [vmem:[%s9672_s10 + $0x10] sm:$0xff]  ;;  %198 = vmatpush.msra.mxu2 %v7423_v52 }
   0xc   :  { %v53_v43 = vld [vmem:[%s9672_s10] sm:$0xff]  ;;  %v165_v53 = vrot.slane %v54_v50, 1  ;;  %591 = vmatpush.msrb.mxu0 %v7393_v45 }
   0xd   :  { %v94_v9 = vsel %vm93_vm1, %v92_v8, %v57_v6  ;;  %v141_v17 = vsel %vm93_vm1, %v140_v15, %v55_v16  ;;  %v164_v44 = vrot.slane %v53_v43, 1  ;;  %6482 = vmatmul.msk.f32.vlgmr.msra.gmra.mxu0 %vm38_vm2, %v53_v43 }
   0xe   :  { %6484 = vmatmul.msk.f32.vlgmr.msra.gmra.mxu1 %vm38_vm2, %v94_v9  ;;  %592 = vmatpush.msrb.mxu0 %v7400_v47 }
  0x10   :  { %593 = vmatpush.msrb.mxu0 %v7405_v48 }
  0x12   :  { %594 = vmatpush.msrb.mxu0 %v7423_v52 }
  0x15   :  { %6483 = vmatmul.msk.f32.gmra.mxu0 %vm38_vm2, %v54_v50 }
  0x8a   :  { %v83_v63 = vpop.f32.mrf.mxu0 }
  0x8b   :  { %v114_v11 = vpop.f32.mrf.mxu1  ;;  %v207_v3 = vrot.slane %v83_v63, 1 }
  0x8c   :  { %v117_v12 = vadd.f32 %v114_v11, %v89_v10  ;;  %v7456_v10 = vld [vmem:[%s9676_s6] sm:$0xff] }
  0x8e   :  { %6826 = vtanh.f32 %v117_v12  ;;  %v6485_v18 = vmul.f32 -1.442695, %v117_v12 }
  0x90   :  { %6828 = vpow2.f32 %v6485_v18 }
  0x92   :  { %v86_v2 = vpop.f32.mrf.mxu0 }
  0x93   :  { %v208_v9 = vrot.slane %v86_v2, 1 }
  0x94   :  { %v6827_v14 = vpop.eup %6826 }
  0x95   :  { %147 = vrot.lane.b32.xlu0 %v6827_v14, %s7246_s17 }
  0x96   :  { %v6829_v19 = vpop.eup %6828 }
  0x97   :  { %v121_v20 = vadd.f32 1.0, %v6829_v19 }
  0x99   :  { %6830 = vrcp.f32 %v121_v20  ;;  %v133_v26 = vand.u32 2147483648, %v121_v20  ;;  %vm127_vm4 = vweird.f32 %v121_v20  ;;  %v131_v27 = vand.u32 2147483647, %v121_v20 }
  0x9b   :  { %v134_v29 = vor.u32 1.1754944e-38, %v133_v26  ;;  %vm132_vm6 = vcmp.eq.f32.partialorder %v131_v27, 8.507059e+37 }
  0x9d   :  { %142 = vrot.lane.b32.xlu0 %v141_v17, %s7247_s20  ;;  %v6493_v17 = vld [vmem:[%s9673_s0 + $0x2] sm:$0x3] }
  0x9f   :  { %v6831_v21 = vpop.eup %6830 }
  0xa0   :  { %v123_v22 = vmul.f32 %v6831_v21, %v121_v20  ;;  %vm128_vm3 = vweird.f32 %v6831_v21 }
  0xa1   :  { %vm129_vm5 = vmor %vm127_vm4, %vm128_vm3 }
  0xa2   :  { %v124_v23 = vsub.f32 1.0, %v123_v22 }
  0xa4   :  { %v125_v24 = vmul.f32 %v6831_v21, %v124_v23 }
  0xa6   :  { %v126_v25 = vadd.f32 %v6831_v21, %v125_v24 }
  0xa8   :  { %v130_v28 = vsel %vm129_vm5, %v6831_v21, %v126_v25 }
  0xa9   :  { %v135_v31 = vsel %vm132_vm6, %v134_v29, %v130_v28 }
 0x107   :  { %v148_v30 = vpop.permute.xlu0 %147 }
 0x108   :  { %v150_v32 = vmul.f32 %v148_v30, %v135_v31 }
 0x10a   :  { %152 = vrot.lane.b32.xlu1 %v150_v32, %s7247_s20 }
 0x10f   :  { %v143_v33 = vpop.permute.xlu0 %142 }
 0x110   :  { %v145_v34 = vmul.f32 %v143_v33, %v135_v31 }
 0x17c   :  { %v153_v35 = vpop.permute.xlu1 %152 }
 0x17d   :  { %v7363_v36 = vadd.f32 %v153_v35, %v145_v34 }
 0x17f   :  { %6832 = vtanh.f32 %v7363_v36  ;;  %v168_v37 = vperm.slane %v7363_v36, 0  ;;  %v163_v38 = vrot.slane %v7363_v36, 1 }
 0x181   :  { %170 = vrot.lane.b32.xlu2 %v168_v37, %s7248_s21  ;;  %v169_v40 = vperm.slane %v163_v38, 0 }
 0x185   :  { %v6833_v39 = vpop.eup %6832 }
 0x186   :  { %158 = vrot.lane.b32.xlu1 %v6833_v39, %s7246_s17 }
 0x189   :  { %172 = vrot.lane.b32.xlu2 %v169_v40, %s7248_s21 }
 0x18e   :  { %179 = vrot.lane.b32.xlu1 %v7363_v36, %s7248_s21 }
 0x1db   :  { %v171_v46 = vpop.permute.xlu2 %170 }
 0x1dc   :  { %v7408_v49 = vsel %vm176_vm7, %v164_v44, %v171_v46 }
 0x1dd   :  { %6487 = vmatpush.xpose.msk.msra.mxu3 %vm38_vm2, %v7408_v49 }
 0x1e0   :  { %6488 = vmatmul.msk.f32.vlgmr.msra.gmra.mxu3 %vm38_vm2, %v217_v51 }
 0x1e3   :  { %v173_v54 = vpop.permute.xlu2 %172 }
 0x1e4   :  { %v7433_v55 = vsel %vm176_vm7, %v165_v53, %v173_v54 }
 0x1e5   :  { %6489 = vmatpush.xpose.msk.msrb.mxu3 %vm38_vm2, %v7433_v55 }
 0x1e8   :  { %6490 = vmatmul.msk.f32.vlgmr.msrb.gmra.mxu3 %vm38_vm2, %v218_v56 }
 0x1e9   :  { %513 = vmatpush.msra.mxu3 %v7309_v0 }
 0x1eb   :  { %514 = vmatpush.msra.mxu3 %v7314_v1 }
 0x1ed   :  { %515 = vmatpush.msra.mxu3 %v7326_v4 }
 0x1ef   :  { %516 = vmatpush.msra.mxu3 %v7338_v5 }
 0x1f8   :  { %v159_v57 = vpop.permute.xlu1 %158 }
 0x1f9   :  { %v161_v58 = vmul.f32 %v159_v57, %v135_v31 }
 0x1fb   :  { %497 = vrot.lane.b32.xlu0 %v161_v58, %s7247_s20 }
 0x200   :  { %v180_v59 = vpop.permute.xlu1 %179 }
 0x201   :  { %6486 = vmatmul.msk.f32.vlgmr.msra.gmra.mxu2 %vm38_vm2, %v180_v59 }
 0x263   :  { %v242_v60 = vpop.f32.mrf.mxu3 }
 0x264   :  { %v272_v61 = vsel %vm271_vm8, %v242_v60, -inf }
 0x265   :  { %273 = vmax.xlane.f32.xlu1 %v272_v61 }
 0x26b   :  { %v7468_v16 = vpop.f32.mrf.mxu3 }
 0x26d   :  { %v498_v62 = vpop.permute.xlu0 %497 }
 0x26e   :  { %6494 = vmatmul.msk.f32.vlgmr.msra.gmra.mxu3 %vm38_vm2, %v498_v62 }
 0x284   :  { %v200_v6 = vpop.f32.mrf.mxu2 }
 0x285   :  { %v204_v7 = vrot.slane %v200_v6, 1  ;;  %v211_v8 = vperm.slane %v200_v6, 0  ;;  %v561_v6 = vrot.slane %v7408_v49, 1 }
 0x287   :  { %v212_v11 = vperm.slane %v204_v7, 0  ;;  %v7459_v12 = vsel %vm176_vm7, %v207_v3, %v211_v8 }
 0x288   :  { %v322_v13 = vadd.f32 %v7459_v12, %v7456_v10 }
 0x289   :  { %v7464_v14 = vsel %vm176_vm7, %v208_v9, %v212_v11  ;;  %v6497_v9 = vld [vmem:[%s9675_s1 + $0x10] sm:$0xff] }
 0x28a   :  { %342 = vmatpush.msrb.mxu1 %v322_v13  ;;  %v323_v15 = vadd.f32 %v7464_v14, %v7456_v10 }
 0x28c   :  { %365 = vmatpush.msrb.mxu2 %v323_v15 }
 0x2d8   :  { %v274_v37 = vpop.xlane.xlu1 %273 }
 0x2d9   :  { %v278_v38 = vsub.f32 %v242_v60, %v274_v37  ;;  %v275_v37 = vsel %vm271_vm8, %v7468_v16, -inf }
 0x2db   :  { %v280_v39 = vmul.f32 1.442695, %v278_v38 }
 0x2f1   :  { %v518_v18 = vpop.f32.mrf.mxu3 }
 0x2f2   :  { %v521_v19 = vadd.f32 %v6493_v17, %v518_v18  ;;  %v6510_v18 = vld [vmem:[%s9673_s0 + $0x4] sm:$0x3] }
 0x2f4   :  { %6834 = vtanh.f32 %v521_v19  ;;  %v6495_v21 = vmul.f32 -1.442695, %v521_v19 }
 0x2f6   :  { %6836 = vpow2.f32 %v6495_v21 }
 0x2fa   :  { %v6835_v20 = vpop.eup %6834 }
 0x2fb   :  { %544 = vrot.lane.b32.xlu2 %v6835_v20, %s7246_s17 }
 0x2fc   :  { %v6837_v22 = vpop.eup %6836 }
 0x2fd   :  { %v525_v23 = vadd.f32 1.0, %v6837_v22 }
 0x2ff   :  { %6838 = vrcp.f32 %v525_v23  ;;  %v537_v29 = vand.u32 2147483648, %v525_v23  ;;  %vm531_vm10 = vweird.f32 %v525_v23  ;;  %v535_v30 = vand.u32 2147483647, %v525_v23 }
 0x300   :  { %6840 = vpow2.f32 %v280_v39 }
 0x301   :  { %v538_v32 = vor.u32 1.1754944e-38, %v537_v29  ;;  %vm536_vm12 = vcmp.eq.f32.partialorder %v535_v30, 8.507059e+37 }
 0x305   :  { %v6839_v24 = vpop.eup %6838 }
 0x306   :  { %v527_v25 = vmul.f32 %v6839_v24, %v525_v23  ;;  %vm532_vm9 = vweird.f32 %v6839_v24  ;;  %v6841_v40 = vpop.eup %6840  ;;  %v603_v23 = vrot.slane %v7459_v12, 1 }
 0x307   :  { %vm533_vm11 = vmor %vm531_vm10, %vm532_vm9  ;;  %v284_v41 = vsel %vm271_vm8, %v6841_v40, 0.0 }
 0x308   :  { %v528_v26 = vsub.f32 1.0, %v527_v25 }
 0x30a   :  { %v529_v27 = vmul.f32 %v6839_v24, %v528_v26  ;;  %v604_v26 = vrot.slane %v7464_v14, 1 }
 0x30c   :  { %v530_v28 = vadd.f32 %v6839_v24, %v529_v27 }
 0x30e   :  { %v534_v31 = vsel %vm533_vm11, %v6839_v24, %v530_v28 }
 0x30f   :  { %v539_v34 = vsel %vm536_vm12, %v538_v32, %v534_v31 }
 0x310   :  { %v542_v42 = vmul.f32 %v539_v34, %v7363_v36 }
 0x355   :  { %v545_v33 = vpop.permute.xlu2 %544 }
 0x356   :  { %v547_v35 = vmul.f32 %v545_v33, %v539_v34 }
 0x358   :  { %549 = vrot.lane.b32.xlu0 %v547_v35, %s7247_s20 }
 0x382   :  { %285 = vadd.xlane.f32.xlu0 %v284_v41 }
 0x3ca   :  { %v550_v43 = vpop.permute.xlu0 %549 }
 0x3cb   :  { %v7477_v44 = vadd.f32 %v550_v43, %v542_v42 }
 0x3cd   :  { %6842 = vtanh.f32 %v7477_v44  ;;  %v565_v50 = vperm.slane %v7477_v44, 0 }
 0x3d3   :  { %v6843_v46 = vpop.eup %6842 }
 0x3d4   :  { %555 = vrot.lane.b32.xlu2 %v6843_v46, %s7246_s17 }
 0x3dc   :  { %567 = vrot.lane.b32.xlu2 %v565_v50, %s7248_s21 }
 0x3f5   :  { %v286_v51 = vpop.xlane.xlu0 %285 }
 0x3f6   :  { %6844 = vrcp.f32 %v286_v51  ;;  %v301_v57 = vand.u32 2147483648, %v286_v51  ;;  %v299_v36 = vand.u32 2147483647, %v286_v51  ;;  %vm295_vm14 = vweird.f32 %v286_v51 }
 0x3f8   :  { %v302_v60 = vor.u32 1.1754944e-38, %v301_v57  ;;  %vm300_vm0 = vcmp.eq.f32.partialorder %v299_v36, 8.507059e+37 }
 0x3fc   :  { %v6845_v53 = vpop.eup %6844 }
 0x3fd   :  { %v291_v54 = vmul.f32 %v6845_v53, %v286_v51  ;;  %vm296_vm13 = vweird.f32 %v6845_v53 }
 0x3fe   :  { %vm297_vm15 = vmor %vm295_vm14, %vm296_vm13 }
 0x3ff   :  { %v292_v56 = vsub.f32 1.0, %v291_v54 }
 0x401   :  { %v293_v58 = vmul.f32 %v6845_v53, %v292_v56 }
 0x403   :  { %v294_v59 = vadd.f32 %v6845_v53, %v293_v58 }
 0x405   :  { %v298_v61 = vsel %vm297_vm15, %v6845_v53, %v294_v59 }
 0x406   :  { %v303_v62 = vsel %vm300_vm0, %v302_v60, %v298_v61 }
 0x407   :  { %v304_v63 = vmul.f32 %v6841_v40, %v303_v62  ;;  %v560_v40 = vrot.slane %v7477_v44, 1 }
 0x409   :  { %320 = vst.msk [vmem:[%s9677_s7] sm:$0xff] %vm271_vm8, %v304_v63  ;;  %6491 = vmatmul.msk.f32.vlgmr.msrb.gmra.mxu1 %vm271_vm8, %v304_v63  ;;  %v566_v41 = vperm.slane %v560_v40, 0 }
 0x42e   :  { %v556_v2 = vpop.permute.xlu2 %555 }
 0x42f   :  { %v558_v3 = vmul.f32 %v556_v2, %v539_v34 }
 0x431   :  { %894 = vrot.lane.b32.xlu2 %v558_v3, %s7247_s20 }
 0x436   :  { %v568_v7 = vpop.permute.xlu2 %567 }
 0x437   :  { %v7491_v8 = vsel %vm176_vm7, %v561_v6, %v568_v7 }
 0x438   :  { %6499 = vmatpush.xpose.msk.msra.mxu1 %vm38_vm2, %v7491_v8 }
 0x439   :  { %575 = vrot.lane.b32.xlu2 %v7477_v44, %s7248_s21 }
 0x43b   :  { %6500 = vmatmul.msk.f32.vlgmr.msra.gmra.mxu1 %vm38_vm2, %v6497_v9 }
 0x43c   :  { %910 = vmatpush.msrb.mxu1 %v7309_v0 }
 0x43e   :  { %911 = vmatpush.msrb.mxu1 %v7314_v1 }
 0x440   :  { %912 = vmatpush.msrb.mxu1 %v7326_v4 }
 0x442   :  { %913 = vmatpush.msrb.mxu1 %v7338_v5 }
 0x486   :  { %v7507_v13 = vpop.f32.mrf.mxu1 }
 0x48b   :  { %v895_v49 = vpop.permute.xlu2 %894 }
 0x48c   :  { %6511 = vmatmul.msk.f32.vlgmr.msrb.gmra.mxu1 %vm38_vm2, %v895_v49 }
 0x493   :  { %v576_v11 = vpop.permute.xlu2 %575 }
 0x494   :  { %6496 = vmatmul.msk.f32.vlgmr.msrb.gmra.mxu0 %vm38_vm2, %v576_v11 }
 0x4b8   :  { %v639_v15 = vpop.f32.mrf.mxu1 }
 0x4b9   :  { %v668_v17 = vsel %vm271_vm8, %v639_v15, -inf }
 0x4ba   :  { %669 = vmax.xlane.f32.xlu1 %v668_v17 }
 0x509   :  { %v915_v19 = vpop.f32.mrf.mxu1 }
 0x50a   :  { %v918_v20 = vadd.f32 %v6510_v18, %v915_v19  ;;  %v562_v18 = vrot.slane %v7433_v55, 1 }
 0x50c   :  { %6846 = vtanh.f32 %v918_v20  ;;  %v6512_v35 = vmul.f32 -1.442695, %v918_v20 }
 0x511   :  { %v596_v21 = vpop.f32.mrf.mxu0 }
 0x512   :  { %v6847_v22 = vpop.eup %6846  ;;  %v600_v24 = vrot.slane %v596_v21, 1  ;;  %v607_v25 = vperm.slane %v596_v21, 0 }
 0x513   :  { %941 = vrot.lane.b32.xlu2 %v6847_v22, %s7246_s17 }
 0x514   :  { %v608_v27 = vperm.slane %v600_v24, 0  ;;  %v7517_v28 = vsel %vm176_vm7, %v603_v23, %v607_v25 }
 0x515   :  { %v719_v29 = vadd.f32 %v7517_v28, %v7456_v10 }
 0x516   :  { %v7522_v30 = vsel %vm176_vm7, %v604_v26, %v608_v27  ;;  %v958_v26 = vrot.slane %v7491_v8, 1 }
 0x517   :  { %739 = vmatpush.msrb.mxu3 %v719_v29  ;;  %v720_v12 = vadd.f32 %v7522_v30, %v7456_v10 }
 0x519   :  { %762 = vmatpush.msra.mxu0 %v720_v12  ;;  %v6514_v12 = vld [vmem:[%s9675_s1 + $0x20] sm:$0xff] }
 0x52d   :  { %v670_v31 = vpop.xlane.xlu1 %669 }
 0x52e   :  { %v674_v32 = vsub.f32 %v639_v15, %v670_v31 }
 0x530   :  { %v676_v33 = vmul.f32 1.442695, %v674_v32 }
 0x532   :  { %6848 = vpow2.f32 %v676_v33 }
 0x533   :  { %6850 = vpow2.f32 %v6512_v35 }
 0x538   :  { %v6849_v14 = vpop.eup %6848 }
 0x539   :  { %v680_v34 = vsel %vm271_vm8, %v6849_v14, 0.0  ;;  %v6851_v38 = vpop.eup %6850 }
 0x53a   :  { %681 = vadd.xlane.f32.xlu0 %v680_v34  ;;  %v922_v39 = vadd.f32 1.0, %v6851_v38 }
 0x53c   :  { %6852 = vrcp.f32 %v922_v39  ;;  %v934_v53 = vand.u32 2147483648, %v922_v39  ;;  %vm928_vm4 = vweird.f32 %v922_v39  ;;  %v932_v54 = vand.u32 2147483647, %v922_v39 }
 0x53e   :  { %v935_v57 = vor.u32 1.1754944e-38, %v934_v53  ;;  %vm933_vm6 = vcmp.eq.f32.partialorder %v932_v54, 8.507059e+37 }
 0x542   :  { %276 = vmax.xlane.f32.xlu0 %v275_v37  ;;  %v6853_v42 = vpop.eup %6852 }
 0x543   :  { %v924_v43 = vmul.f32 %v6853_v42, %v922_v39  ;;  %vm929_vm3 = vweird.f32 %v6853_v42 }
 0x544   :  { %vm930_vm5 = vmor %vm928_vm4, %vm929_vm3 }
 0x545   :  { %v925_v46 = vsub.f32 1.0, %v924_v43 }
 0x547   :  { %v926_v50 = vmul.f32 %v6853_v42, %v925_v46 }
 0x549   :  { %v927_v51 = vadd.f32 %v6853_v42, %v926_v50 }
 0x54b   :  { %v931_v56 = vsel %vm930_vm5, %v6853_v42, %v927_v51  ;;  %v6498_v51 = vld [vmem:[%s9675_s1 + $0x18] sm:$0xff] }
 0x54c   :  { %v936_v36 = vsel %vm933_vm6, %v935_v57, %v931_v56  ;;  %v6527_v57 = vld [vmem:[%s9673_s0 + $0x6] sm:$0x3] }
 0x54d   :  { %v939_v21 = vmul.f32 %v936_v36, %v7477_v44 }
 0x556   :  { %569 = vrot.lane.b32.xlu0 %v566_v41, %s7248_s21 }
 0x56d   :  { %v942_v58 = vpop.permute.xlu2 %941 }
 0x56e   :  { %v944_v59 = vmul.f32 %v942_v58, %v936_v36 }
 0x570   :  { %946 = vrot.lane.b32.xlu2 %v944_v59, %s7247_s20 }
 0x5ad   :  { %v682_v60 = vpop.xlane.xlu0 %681 }
 0x5ae   :  { %6854 = vrcp.f32 %v682_v60  ;;  %v697_v2 = vand.u32 2147483648, %v682_v60  ;;  %v695_v6 = vand.u32 2147483647, %v682_v60  ;;  %vm691_vm10 = vweird.f32 %v682_v60 }
 0x5b0   :  { %v698_v9 = vor.u32 1.1754944e-38, %v697_v2  ;;  %vm696_vm12 = vcmp.eq.f32.partialorder %v695_v6, 8.507059e+37 }
 0x5b4   :  { %v6855_v61 = vpop.eup %6854 }
 0x5b5   :  { %v687_v62 = vmul.f32 %v6855_v61, %v682_v60  ;;  %vm692_vm9 = vweird.f32 %v6855_v61  ;;  %v277_v17 = vpop.xlane.xlu0 %276 }
 0x5b6   :  { %vm693_vm11 = vmor %vm691_vm10, %vm692_vm9  ;;  %v279_v31 = vsub.f32 %v7468_v16, %v277_v17  ;;  %v1001_v17 = vrot.slane %v7522_v30, 1 }
 0x5b7   :  { %v688_v63 = vsub.f32 1.0, %v687_v62 }
 0x5b8   :  { %v282_v8 = vmul.f32 1.442695, %v279_v31 }
 0x5b9   :  { %v689_v3 = vmul.f32 %v6855_v61, %v688_v63 }
 0x5bb   :  { %v690_v7 = vadd.f32 %v6855_v61, %v689_v3 }
 0x5bd   :  { %v694_v49 = vsel %vm693_vm11, %v6855_v61, %v690_v7 }
 0x5be   :  { %v699_v11 = vsel %vm696_vm12, %v698_v9, %v694_v49  ;;  %v1000_v49 = vrot.slane %v7517_v28, 1 }
 0x5bf   :  { %v700_v15 = vmul.f32 %v6849_v14, %v699_v11 }
 0x5c1   :  { %6503 = vst.msk [vmem:[%s9677_s7 + $0x10] sm:$0xff] %vm271_vm8, %v700_v15  ;;  %6505 = vmatmul.msk.f32.vlgmr.msrb.gmra.mxu3 %vm271_vm8, %v700_v15 }
 0x5c8   :  { %v570_v19 = vpop.permute.xlu0 %569 }
 0x5c9   :  { %v7539_v20 = vsel %vm176_vm7, %v562_v18, %v570_v19 }
 0x5ca   :  { %v947_v22 = vpop.permute.xlu2 %946  ;;  %6501 = vmatpush.xpose.msk.msra.mxu2 %vm38_vm2, %v7539_v20 }
 0x5cb   :  { %v7544_v23 = vadd.f32 %v947_v22, %v939_v21 }
 0x5cd   :  { %6856 = vtanh.f32 %v7544_v23  ;;  %v962_v24 = vperm.slane %v7544_v23, 0  ;;  %v957_v30 = vrot.slane %v7544_v23, 1 }
 0x5ce   :  { %6858 = vpow2.f32 %v282_v8 }
 0x5cf   :  { %964 = vrot.lane.b32.xlu1 %v962_v24, %s7248_s21 }
 0x5d3   :  { %v6857_v25 = vpop.eup %6856 }
 0x5d4   :  { %952 = vrot.lane.b32.xlu2 %v6857_v25, %s7246_s17  ;;  %v6859_v32 = vpop.eup %6858 }
 0x5d5   :  { %v287_v33 = vsel %vm271_vm8, %v6859_v32, 0.0 }
 0x5d7   :  { %972 = vrot.lane.b32.xlu1 %v7544_v23, %s7248_s21 }
 0x62e   :  { %v953_v55 = vpop.permute.xlu2 %952 }
 0x62f   :  { %v955_v44 = vmul.f32 %v953_v55, %v936_v36 }
 0x631   :  { %1291 = vrot.lane.b32.xlu2 %v955_v44, %s7247_s20 }
 0x641   :  { %v965_v27 = vpop.permute.xlu1 %964 }
 0x642   :  { %v7555_v29 = vsel %vm176_vm7, %v958_v26, %v965_v27  ;;  %v963_v26 = vperm.slane %v957_v30, 0 }
 0x643   :  { %6516 = vmatpush.xpose.msk.msra.mxu3 %vm38_vm2, %v7555_v29 }
 0x644   :  { %v7584_v54 = vpop.f32.mrf.mxu3 }
 0x646   :  { %6517 = vmatmul.msk.f32.vlgmr.msra.gmra.mxu3 %vm38_vm2, %v6514_v12 }
 0x647   :  { %1307 = vmatpush.msrb.mxu3 %v7309_v0 }
 0x649   :  { %1308 = vmatpush.msrb.mxu3 %v7314_v1  ;;  %v973_v53 = vpop.permute.xlu1 %972 }
 0x64b   :  { %1309 = vmatpush.msrb.mxu3 %v7326_v4 }
 0x64d   :  { %1310 = vmatpush.msrb.mxu3 %v7338_v5 }
 0x65a   :  { %288 = vadd.xlane.f32.xlu2 %v287_v33 }
 0x68b   :  { %v1292_v14 = vpop.permute.xlu2 %1291 }
 0x68c   :  { %6528 = vmatmul.msk.f32.vlgmr.msrb.gmra.mxu3 %vm38_vm2, %v1292_v14 }
 0x6c9   :  { %v7586_v56 = vpop.f32.mrf.mxu3 }
 0x6ca   :  { %v1065_v60 = vsel %vm271_vm8, %v7586_v56, -inf }
 0x6cd   :  { %v289_v34 = vpop.xlane.xlu2 %288 }
 0x6ce   :  { %6860 = vrcp.f32 %v289_v34  ;;  %v316_v39 = vand.u32 2147483648, %v289_v34  ;;  %v314_v40 = vand.u32 2147483647, %v289_v34  ;;  %vm310_vm14 = vweird.f32 %v289_v34 }
 0x6d0   :  { %v317_v42 = vor.u32 1.1754944e-38, %v316_v39  ;;  %vm315_vm0 = vcmp.eq.f32.partialorder %v314_v40, 8.507059e+37 }
 0x6d4   :  { %v6861_v35 = vpop.eup %6860 }
 0x6d5   :  { %v306_v37 = vmul.f32 %v6861_v35, %v289_v34  ;;  %vm311_vm13 = vweird.f32 %v6861_v35 }
 0x6d6   :  { %vm312_vm15 = vmor %vm310_vm14, %vm311_vm13 }
 0x6d7   :  { %v307_v38 = vsub.f32 1.0, %v306_v37  ;;  %v959_v37 = vrot.slane %v7539_v20, 1 }
 0x6d9   :  { %v308_v16 = vmul.f32 %v6861_v35, %v307_v38 }
 0x6db   :  { %v309_v41 = vadd.f32 %v6861_v35, %v308_v16 }
 0x6dd   :  { %v313_v43 = vsel %vm312_vm15, %v6861_v35, %v309_v41 }
 0x6de   :  { %v318_v46 = vsel %vm315_vm0, %v317_v42, %v313_v43 }
 0x6df   :  { %v319_v50 = vmul.f32 %v6859_v32, %v318_v46 }
 0x6e1   :  { %321 = vst.msk [vmem:[%s9677_s7 + $0x8] sm:$0xff] %vm271_vm8, %v319_v50  ;;  %6492 = vmatmul.msk.f32.vlgmr.msrb.gmra.mxu2 %vm271_vm8, %v319_v50 }
 0x6e2   :  { %988 = vmatpush.msrb.mxu2 %v7393_v45 }
 0x6e4   :  { %989 = vmatpush.msrb.mxu2 %v7400_v47 }
 0x6e6   :  { %990 = vmatpush.msrb.mxu2 %v7405_v48 }
 0x6e8   :  { %991 = vmatpush.msrb.mxu2 %v7423_v52 }
 0x6e9   :  { %6502 = vmatmul.msk.f32.vlgmr.msra.gmra.mxu2 %vm38_vm2, %v6498_v51 }
 0x6f1   :  { %6513 = vmatmul.msk.f32.vlgmr.msrb.gmra.mxu2 %vm38_vm2, %v973_v53 }
 0x70f   :  { %v1312_v58 = vpop.f32.mrf.mxu3 }
 0x710   :  { %v1315_v36 = vadd.f32 %v6527_v57, %v1312_v58 }
 0x712   :  { %6862 = vtanh.f32 %v1315_v36  ;;  %v6529_v61 = vmul.f32 -1.442695, %v1315_v36 }
 0x714   :  { %6864 = vpow2.f32 %v6529_v61 }
 0x718   :  { %v6863_v59 = vpop.eup %6862 }
 0x719   :  { %1338 = vrot.lane.b32.xlu1 %v6863_v59, %s7246_s17 }
 0x71a   :  { %v6865_v63 = vpop.eup %6864 }
 0x71b   :  { %v1319_v2 = vadd.f32 1.0, %v6865_v63 }
 0x71d   :  { %6866 = vrcp.f32 %v1319_v2  ;;  %v1331_v27 = vand.u32 2147483648, %v1319_v2  ;;  %vm1325_vm4 = vweird.f32 %v1319_v2  ;;  %v1329_v12 = vand.u32 2147483647, %v1319_v2 }
 0x71f   :  { %v1332_v8 = vor.u32 1.1754944e-38, %v1331_v27  ;;  %vm1330_vm6 = vcmp.eq.f32.partialorder %v1329_v12, 8.507059e+37 }
 0x723   :  { %v6867_v9 = vpop.eup %6866 }
 0x724   :  { %v1321_v22 = vmul.f32 %v6867_v9, %v1319_v2  ;;  %vm1326_vm3 = vweird.f32 %v6867_v9 }
 0x725   :  { %vm1327_vm5 = vmor %vm1325_vm4, %vm1326_vm3 }
 0x726   :  { %v1322_v28 = vsub.f32 1.0, %v1321_v22 }
 0x728   :  { %v1323_v55 = vmul.f32 %v6867_v9, %v1322_v28 }
 0x72a   :  { %v1324_v44 = vadd.f32 %v6867_v9, %v1323_v55 }
 0x72c   :  { %v1328_v31 = vsel %vm1327_vm5, %v6867_v9, %v1324_v44 }
 0x72d   :  { %v1333_v32 = vsel %vm1330_vm6, %v1332_v8, %v1328_v31  ;;  %v6515_v31 = vld [vmem:[%s9675_s1 + $0x28] sm:$0xff] }
 0x72e   :  { %v1336_v16 = vmul.f32 %v1333_v32, %v7544_v23  ;;  %v1355_v23 = vrot.slane %v7555_v29, 1 }
 0x743   :  { %1066 = vmax.xlane.f32.xlu1 %v1065_v60 }
 0x764   :  { %v7594_v62 = vpop.f32.mrf.mxu2 }
 0x76c   :  { %v7596_v3 = vpop.f32.mrf.mxu2 }
 0x76d   :  { %v671_v6 = vsel %vm271_vm8, %v7596_v3, -inf }
 0x76e   :  { %672 = vmax.xlane.f32.xlu1 %v671_v6 }
 0x774   :  { %v993_v7 = vpop.f32.mrf.mxu2 }
 0x775   :  { %v997_v11 = vrot.slane %v993_v7, 1  ;;  %v1004_v15 = vperm.slane %v993_v7, 0 }
 0x777   :  { %v1005_v18 = vperm.slane %v997_v11, 0  ;;  %v7603_v19 = vsel %vm176_vm7, %v1000_v49, %v1004_v15 }
 0x778   :  { %v1116_v21 = vadd.f32 %v7603_v19, %v7456_v10 }
 0x779   :  { %v7608_v24 = vsel %vm176_vm7, %v1001_v17, %v1005_v18 }
 0x77a   :  { %1136 = vmatpush.msra.mxu1 %v1116_v21  ;;  %v1117_v25 = vadd.f32 %v7608_v24, %v7456_v10  ;;  %v6531_v21 = vld [vmem:[%s9675_s1 + $0x30] sm:$0xff] }
 0x77c   :  { %1159 = vmatpush.msra.mxu2 %v1117_v25 }
 0x787   :  { %966 = vrot.lane.b32.xlu1 %v963_v26, %s7248_s21 }
 0x78b   :  { %v1339_v33 = vpop.permute.xlu1 %1338 }
 0x78c   :  { %v1341_v14 = vmul.f32 %v1339_v33, %v1333_v32 }
 0x78e   :  { %1343 = vrot.lane.b32.xlu0 %v1341_v14, %s7247_s20 }
 0x7b6   :  { %v1067_v34 = vpop.xlane.xlu1 %1066 }
 0x7b7   :  { %v1071_v20 = vsub.f32 %v7586_v56, %v1067_v34 }
 0x7b9   :  { %v1073_v46 = vmul.f32 1.442695, %v1071_v20 }
 0x7e1   :  { %v673_v35 = vpop.xlane.xlu1 %672 }
 0x7e2   :  { %v675_v36 = vsub.f32 %v7596_v3, %v673_v35 }
 0x7e4   :  { %v678_v59 = vmul.f32 1.442695, %v675_v36 }
 0x7f9   :  { %v967_v38 = vpop.permute.xlu1 %966 }
 0x7fa   :  { %v7617_v39 = vsel %vm176_vm7, %v959_v37, %v967_v38 }
 0x7fb   :  { %6518 = vmatpush.xpose.msk.msrb.mxu0 %vm38_vm2, %v7617_v39 }
 0x800   :  { %v1344_v40 = vpop.permute.xlu0 %1343 }
 0x801   :  { %v7622_v41 = vadd.f32 %v1344_v40, %v1336_v16 }
 0x803   :  { %6868 = vtanh.f32 %v7622_v41  ;;  %v1359_v42 = vperm.slane %v7622_v41, 0 }
 0x804   :  { %6870 = vpow2.f32 %v1073_v46  ;;  %v1397_v46 = vrot.slane %v7603_v19, 1 }
 0x805   :  { %1361 = vrot.lane.b32.xlu2 %v1359_v42, %s7248_s21  ;;  %6872 = vpow2.f32 %v678_v59 }
 0x809   :  { %v6869_v43 = vpop.eup %6868 }
 0x80a   :  { %1349 = vrot.lane.b32.xlu0 %v6869_v43, %s7246_s17  ;;  %v6871_v50 = vpop.eup %6870 }
 0x80b   :  { %v1077_v51 = vsel %vm271_vm8, %v6871_v50, 0.0  ;;  %v6873_v60 = vpop.eup %6872 }
 0x80c   :  { %v683_v61 = vsel %vm271_vm8, %v6873_v60, 0.0 }
 0x834   :  { %1078 = vadd.xlane.f32.xlu0 %v1077_v51 }
 0x848   :  { %1369 = vrot.lane.b32.xlu0 %v7622_v41, %s7248_s21 }
 0x85f   :  { %v1362_v53 = vpop.permute.xlu2 %1361 }
 0x860   :  { %v7634_v57 = vsel %vm176_vm7, %v1355_v23, %v1362_v53  ;;  %v1398_v23 = vrot.slane %v7608_v24, 1 }
 0x861   :  { %6533 = vmatpush.xpose.msk.msrb.mxu1 %vm38_vm2, %v7634_v57 }
 0x87c   :  { %v1350_v58 = vpop.permute.xlu0 %1349 }
 0x87d   :  { %v1352_v56 = vmul.f32 %v1350_v58, %v1333_v32 }
 0x87f   :  { %1688 = vrot.lane.b32.xlu2 %v1352_v56, %s7247_s20 }
 0x8a7   :  { %v1079_v63 = vpop.xlane.xlu0 %1078 }
 0x8a8   :  { %6874 = vrcp.f32 %v1079_v63  ;;  %684 = vadd.xlane.f32.xlu2 %v683_v61  ;;  %v1094_v7 = vand.u32 2147483648, %v1079_v63  ;;  %v1092_v49 = vand.u32 2147483647, %v1079_v63  ;;  %vm1088_vm10 = vweird.f32 %v1079_v63 }
 0x8aa   :  { %v1095_v15 = vor.u32 1.1754944e-38, %v1094_v7  ;;  %vm1093_vm12 = vcmp.eq.f32.partialorder %v1092_v49, 8.507059e+37 }
 0x8ae   :  { %v6875_v29 = vpop.eup %6874 }
 0x8af   :  { %v1084_v2 = vmul.f32 %v6875_v29, %v1079_v63  ;;  %vm1089_vm9 = vweird.f32 %v6875_v29 }
 0x8b0   :  { %vm1090_vm11 = vmor %vm1088_vm10, %vm1089_vm9 }
 0x8b1   :  { %v1085_v6 = vsub.f32 1.0, %v1084_v2 }
 0x8b3   :  { %v1086_v9 = vmul.f32 %v6875_v29, %v1085_v6 }
 0x8b5   :  { %v1087_v11 = vadd.f32 %v6875_v29, %v1086_v9 }
 0x8b7   :  { %v1091_v3 = vsel %vm1090_vm11, %v6875_v29, %v1087_v11 }
 0x8b8   :  { %v1096_v17 = vsel %vm1093_vm12, %v1095_v15, %v1091_v3 }
 0x8b9   :  { %v1097_v18 = vmul.f32 %v6871_v50, %v1096_v17 }
 0x8ba   :  { %v1370_v8 = vpop.permute.xlu0 %1369 }
 0x8bb   :  { %6520 = vst.msk [vmem:[%s9677_s7 + $0x20] sm:$0xff] %vm271_vm8, %v1097_v18  ;;  %6522 = vmatmul.msk.f32.vlgmr.msra.gmra.mxu1 %vm271_vm8, %v1097_v18  ;;  %v1356_v18 = vrot.slane %v7617_v39, 1 }
 0x8bc   :  { %1704 = vmatpush.msra.mxu1 %v7309_v0 }
 0x8be   :  { %1705 = vmatpush.msra.mxu1 %v7314_v1 }
 0x8c0   :  { %1706 = vmatpush.msra.mxu1 %v7326_v4 }
 0x8c2   :  { %1707 = vmatpush.msra.mxu1 %v7338_v5 }
 0x8c3   :  { %6534 = vmatmul.msk.f32.vlgmr.msrb.gmra.mxu1 %vm38_vm2, %v6531_v21 }
 0x8d9   :  { %v1689_v22 = vpop.permute.xlu2 %1688 }
 0x8da   :  { %6545 = vmatmul.msk.f32.vlgmr.msra.gmra.mxu1 %vm38_vm2, %v1689_v22 }
 0x91b   :  { %v685_v25 = vpop.xlane.xlu2 %684 }
 0x91c   :  { %6876 = vrcp.f32 %v685_v25  ;;  %v712_v0 = vand.u32 2147483648, %v685_v25  ;;  %vm706_vm13 = vweird.f32 %v685_v25  ;;  %v710_v1 = vand.u32 2147483647, %v685_v25 }
 0x91e   :  { %v713_v26 = vor.u32 1.1754944e-38, %v712_v0  ;;  %vm711_vm0 = vcmp.eq.f32.partialorder %v710_v1, 8.507059e+37 }
 0x922   :  { %v6877_v28 = vpop.eup %6876 }
 0x923   :  { %v702_v55 = vmul.f32 %v6877_v28, %v685_v25  ;;  %vm707_vm14 = vweird.f32 %v6877_v28 }
 0x924   :  { %vm708_vm15 = vmor %vm706_vm13, %vm707_vm14 }
 0x925   :  { %v703_v30 = vsub.f32 1.0, %v702_v55 }
 0x927   :  { %v704_v44 = vmul.f32 %v6877_v28, %v703_v30 }
 0x929   :  { %v705_v4 = vadd.f32 %v6877_v28, %v704_v44 }
 0x92b   :  { %v709_v5 = vsel %vm708_vm15, %v6877_v28, %v705_v4 }
 0x92c   :  { %v714_v27 = vsel %vm711_vm0, %v713_v26, %v709_v5 }
 0x92d   :  { %v715_v12 = vmul.f32 %v6873_v60, %v714_v27 }
 0x92f   :  { %6504 = vst.msk [vmem:[%s9677_s7 + $0x18] sm:$0xff] %vm271_vm8, %v715_v12  ;;  %6506 = vmatmul.msk.f32.vlgmr.msra.gmra.mxu0 %vm271_vm8, %v715_v12 }
 0x930   :  { %1385 = vmatpush.msra.mxu0 %v7393_v45  ;;  %v6544_v45 = vld [vmem:[%s9673_s0 + $0x8] sm:$0x3] }
 0x932   :  { %1386 = vmatpush.msra.mxu0 %v7400_v47 }
 0x934   :  { %1387 = vmatpush.msra.mxu0 %v7405_v48 }
 0x936   :  { %1388 = vmatpush.msra.mxu0 %v7423_v52  ;;  %v1354_v52 = vrot.slane %v7622_v41, 1 }
 0x937   :  { %6519 = vmatmul.msk.f32.vlgmr.msrb.gmra.mxu0 %vm38_vm2, %v6515_v31 }
 0x938   :  { %v7669_v32 = vpop.f32.mrf.mxu1  ;;  %v1360_v35 = vperm.slane %v1354_v52, 0 }
 0x93f   :  { %6530 = vmatmul.msk.f32.vlgmr.msra.gmra.mxu0 %vm38_vm2, %v1370_v8 }
 0x940   :  { %v1433_v33 = vpop.f32.mrf.mxu1 }
 0x941   :  { %v1462_v48 = vsel %vm271_vm8, %v1433_v33, -inf }
 0x957   :  { %v1709_v47 = vpop.f32.mrf.mxu1 }
 0x958   :  { %v1712_v14 = vadd.f32 %v6544_v45, %v1709_v47 }
 0x95a   :  { %6878 = vtanh.f32 %v1712_v14  ;;  %v6546_v37 = vmul.f32 -1.442695, %v1712_v14 }
 0x95c   :  { %6880 = vpow2.f32 %v6546_v37  ;;  %v7734_v37 = vld [vmem:[%s9670_s4 + $0x10] sm:$0xff] }
 0x960   :  { %v6879_v34 = vpop.eup %6878 }
 0x961   :  { %1735 = vrot.lane.b32.xlu0 %v6879_v34, %s7246_s17  ;;  %v1752_v34 = vrot.slane %v7634_v57, 1  ;;  %v7740_v57 = vld [vmem:[%s9670_s4 + $0x8] sm:$0xff] }
 0x962   :  { %v6881_v16 = vpop.eup %6880 }
 0x963   :  { %v1716_v40 = vadd.f32 1.0, %v6881_v16  ;;  %v7746_v16 = vld [vmem:[%s9670_s4] sm:$0xff] }
 0x965   :  { %6882 = vrcp.f32 %v1716_v40  ;;  %v1728_v24 = vand.u32 2147483648, %v1716_v40  ;;  %vm1722_vm4 = vweird.f32 %v1716_v40  ;;  %v1726_v29 = vand.u32 2147483647, %v1716_v40 }
 0x967   :  { %v1729_v6 = vor.u32 1.1754944e-38, %v1728_v24  ;;  %vm1727_vm6 = vcmp.eq.f32.partialorder %v1726_v29, 8.507059e+37 }
 0x96b   :  { %v6883_v20 = vpop.eup %6882 }
 0x96c   :  { %v1718_v36 = vmul.f32 %v6883_v20, %v1716_v40  ;;  %vm1723_vm3 = vweird.f32 %v6883_v20  ;;  %v6548_v40 = vld [vmem:[%s9675_s1 + $0x40] sm:$0xff] }
 0x96d   :  { %vm1724_vm5 = vmor %vm1722_vm4, %vm1723_vm3 }
 0x96e   :  { %v1719_v19 = vsub.f32 1.0, %v1718_v36 }
 0x970   :  { %v1720_v61 = vmul.f32 %v6883_v20, %v1719_v19 }
 0x972   :  { %v1721_v63 = vadd.f32 %v6883_v20, %v1720_v61 }
 0x974   :  { %v1725_v2 = vsel %vm1724_vm5, %v6883_v20, %v1721_v63 }
 0x975   :  { %v1730_v7 = vsel %vm1727_vm6, %v1729_v6, %v1725_v2 }
 0x976   :  { %v1733_v25 = vmul.f32 %v1730_v7, %v7622_v41 }
 0x98b   :  { %1463 = vmax.xlane.f32.xlu0 %v1462_v48 }
 0x99f   :  { %1363 = vrot.lane.b32.xlu0 %v1360_v35, %s7248_s21  ;;  %v7728_v35 = vld [vmem:[%s9670_s4 + $0x18] sm:$0xff] }
 0x9ac   :  { %v7678_v38 = vpop.f32.mrf.mxu0 }
 0x9b4   :  { %v7680_v42 = vpop.f32.mrf.mxu0 }
 0x9b5   :  { %v1068_v1 = vsel %vm271_vm8, %v7680_v42, -inf }
 0x9bc   :  { %v1390_v43 = vpop.f32.mrf.mxu0 }
 0x9bd   :  { %v1394_v50 = vrot.slane %v1390_v43, 1  ;;  %v1401_v51 = vperm.slane %v1390_v43, 0 }
 0x9bf   :  { %v1402_v53 = vperm.slane %v1394_v50, 0  ;;  %v7685_v58 = vsel %vm176_vm7, %v1397_v46, %v1401_v51 }
 0x9c0   :  { %v1513_v56 = vadd.f32 %v7685_v58, %v7456_v10 }
 0x9c1   :  { %v7690_v59 = vsel %vm176_vm7, %v1398_v23, %v1402_v53 }
 0x9c2   :  { %1533 = vmatpush.msra.mxu3 %v1513_v56  ;;  %v1514_v60 = vadd.f32 %v7690_v59, %v7456_v10 }
 0x9c4   :  { %1556 = vmatpush.msrb.mxu0 %v1514_v60 }
 0x9d3   :  { %v1736_v9 = vpop.permute.xlu0 %1735 }
 0x9d4   :  { %v1738_v49 = vmul.f32 %v1736_v9, %v1730_v7  ;;  %v7770_v9 = vld [vmem:[%s9674_s5 + $0x10] sm:$0xff] }
 0x9d6   :  { %1740 = vrot.lane.b32.xlu1 %v1738_v49, %s7247_s20  ;;  %v6532_v49 = vld [vmem:[%s9675_s1 + $0x38] sm:$0xff] }
 0x9fe   :  { %v1464_v11 = vpop.xlane.xlu0 %1463 }
 0x9ff   :  { %v1468_v15 = vsub.f32 %v1433_v33, %v1464_v11  ;;  %v7779_v11 = vld [vmem:[%s9674_s5 + $0x8] sm:$0xff] }
 0xa01   :  { %v1470_v10 = vmul.f32 1.442695, %v1468_v15  ;;  %v7785_v15 = vld [vmem:[%s9674_s5] sm:$0xff] }
 0xa03   :  { %6884 = vpow2.f32 %v1470_v10 }
 0xa09   :  { %v6885_v3 = vpop.eup %6884 }
 0xa0a   :  { %v1474_v17 = vsel %vm271_vm8, %v6885_v3, 0.0 }
 0xa0b   :  { %1475 = vadd.xlane.f32.xlu2 %v1474_v17 }
 0xa11   :  { %v1364_v21 = vpop.permute.xlu0 %1363 }
 0xa12   :  { %v7698_v22 = vsel %vm176_vm7, %v1356_v18, %v1364_v21  ;;  %v6561_v18 = vld [vmem:[%s9673_s0 + $0xa] sm:$0x3] }
 0xa13   :  { %6535 = vmatpush.xpose.msk.msrb.mxu2 %vm38_vm2, %v7698_v22 }
 0xa48   :  { %v1741_v28 = vpop.permute.xlu1 %1740 }
 0xa49   :  { %v7703_v55 = vadd.f32 %v1741_v28, %v1733_v25 }
 0xa4b   :  { %6886 = vtanh.f32 %v7703_v55  ;;  %v1756_v30 = vperm.slane %v7703_v55, 0 }
 0xa51   :  { %v6887_v0 = vpop.eup %6886 }
 0xa52   :  { %1746 = vrot.lane.b32.xlu1 %v6887_v0, %s7246_s17 }
 0xa5a   :  { %1758 = vrot.lane.b32.xlu1 %v1756_v30, %s7248_s21 }
 0xa7e   :  { %v1476_v39 = vpop.xlane.xlu2 %1475 }
 0xa7f   :  { %6888 = vrcp.f32 %v1476_v39  ;;  %v1491_v4 = vand.u32 2147483648, %v1476_v39  ;;  %v1489_v27 = vand.u32 2147483647, %v1476_v39  ;;  %vm1485_vm10 = vweird.f32 %v1476_v39 }
 0xa81   :  { %v1492_v31 = vor.u32 1.1754944e-38, %v1491_v4  ;;  %vm1490_vm12 = vcmp.eq.f32.partialorder %v1489_v27, 8.507059e+37 }
 0xa84   :  { %1069 = vmax.xlane.f32.xlu1 %v1068_v1 }
 0xa85   :  { %v6889_v44 = vpop.eup %6888 }
 0xa86   :  { %v1481_v41 = vmul.f32 %v6889_v44, %v1476_v39  ;;  %vm1486_vm9 = vweird.f32 %v6889_v44 }
 0xa87   :  { %vm1487_vm11 = vmor %vm1485_vm10, %vm1486_vm9 }
 0xa88   :  { %v1482_v26 = vsub.f32 1.0, %v1481_v41 }
 0xa8a   :  { %v1483_v5 = vmul.f32 %v6889_v44, %v1482_v26 }
 0xa8c   :  { %v1484_v12 = vadd.f32 %v6889_v44, %v1483_v5 }
 0xa8e   :  { %v1488_v8 = vsel %vm1487_vm11, %v6889_v44, %v1484_v12 }
 0xa8f   :  { %v1493_v33 = vsel %vm1490_vm12, %v1492_v31, %v1488_v8 }
 0xa90   :  { %v1494_v45 = vmul.f32 %v6885_v3, %v1493_v33 }
 0xa92   :  { %6537 = vst.msk [vmem:[%s9677_s7 + $0x30] sm:$0xff] %vm271_vm8, %v1494_v45  ;;  %6539 = vmatmul.msk.f32.vlgmr.msra.gmra.mxu3 %vm271_vm8, %v1494_v45  ;;  %v1794_v45 = vrot.slane %v7685_v58, 1 }
 0xa9d   :  { %1766 = vrot.lane.b32.xlu1 %v7703_v55, %s7248_s21 }
 0xac4   :  { %v1747_v47 = vpop.permute.xlu1 %1746 }
 0xac5   :  { %v1749_v14 = vmul.f32 %v1747_v47, %v1730_v7  ;;  %v7764_v7 = vld [vmem:[%s9674_s5 + $0x18] sm:$0xff] }
 0xac7   :  { %2085 = vrot.lane.b32.xlu2 %v1749_v14, %s7247_s20 }
 0xacc   :  { %v1759_v48 = vpop.permute.xlu1 %1758 }
 0xacd   :  { %v7721_v52 = vsel %vm176_vm7, %v1752_v34, %v1759_v48  ;;  %v1795_v48 = vrot.slane %v7690_v59, 1 }
 0xace   :  { %6550 = vmatpush.xpose.msk.msrb.mxu3 %vm38_vm2, %v7721_v52 }
 0xad1   :  { %6551 = vmatmul.msk.f32.vlgmr.msrb.gmra.mxu3 %vm38_vm2, %v6548_v40 }
 0xad2   :  { %2101 = vmatpush.msra.mxu3 %v7728_v35 }
 0xad4   :  { %2102 = vmatpush.msra.mxu3 %v7734_v37 }
 0xad6   :  { %2103 = vmatpush.msra.mxu3 %v7740_v57 }
 0xad8   :  { %2104 = vmatpush.msra.mxu3 %v7746_v16 }
 0xaf7   :  { %v1070_v43 = vpop.xlane.xlu1 %1069 }
 0xaf8   :  { %v1072_v20 = vsub.f32 %v7680_v42, %v1070_v43 }
 0xafa   :  { %v1075_v46 = vmul.f32 1.442695, %v1072_v20 }
 0xafc   :  { %6890 = vpow2.f32 %v1075_v46 }
 0xb02   :  { %v6891_v50 = vpop.eup %6890 }
 0xb03   :  { %v1080_v51 = vsel %vm271_vm8, %v6891_v50, 0.0 }
 0xb04   :  { %1081 = vadd.xlane.f32.xlu2 %v1080_v51 }
 0xb0f   :  { %v1767_v3 = vpop.permute.xlu1 %1766 }
 0xb15   :  { %v7788_v10 = vpop.f32.mrf.mxu3 }
 0xb21   :  { %v2086_v23 = vpop.permute.xlu2 %2085 }
 0xb22   :  { %6562 = vmatmul.msk.f32.vlgmr.msra.gmra.mxu3 %vm38_vm2, %v2086_v23 }
 0xb54   :  { %v1830_v17 = vpop.f32.mrf.mxu3 }
 0xb77   :  { %v1082_v53 = vpop.xlane.xlu2 %1081 }
 0xb78   :  { %6892 = vrcp.f32 %v1082_v53  ;;  %v1109_v60 = vand.u32 2147483648, %v1082_v53  ;;  %vm1103_vm13 = vweird.f32 %v1082_v53  ;;  %v1107_v61 = vand.u32 2147483647, %v1082_v53 }
 0xb7a   :  { %v1110_v42 = vor.u32 1.1754944e-38, %v1109_v60  ;;  %vm1108_vm0 = vcmp.eq.f32.partialorder %v1107_v61, 8.507059e+37 }
 0xb7e   :  { %v6893_v56 = vpop.eup %6892 }
 0xb7f   :  { %v1099_v36 = vmul.f32 %v6893_v56, %v1082_v53  ;;  %vm1104_vm14 = vweird.f32 %v6893_v56  ;;  %v1859_v53 = vsel %vm271_vm8, %v1830_v17, -inf }
 0xb80   :  { %vm1105_vm15 = vmor %vm1103_vm13, %vm1104_vm14 }
 0xb81   :  { %v1100_v19 = vsub.f32 1.0, %v1099_v36 }
 0xb83   :  { %v1101_v63 = vmul.f32 %v6893_v56, %v1100_v19 }
 0xb85   :  { %v1102_v24 = vadd.f32 %v6893_v56, %v1101_v63 }
 0xb87   :  { %v1106_v29 = vsel %vm1105_vm15, %v6893_v56, %v1102_v24 }
 0xb88   :  { %v1111_v2 = vsel %vm1108_vm0, %v1110_v42, %v1106_v29 }
 0xb89   :  { %v1112_v6 = vmul.f32 %v6891_v50, %v1111_v2  ;;  %v7808_v50 = vld [vmem:[%s9676_s6] sm:$0xff] }
 0xb8b   :  { %6521 = vst.msk [vmem:[%s9677_s7 + $0x28] sm:$0xff] %vm271_vm8, %v1112_v6  ;;  %6523 = vmatmul.msk.f32.vlgmr.msra.gmra.mxu2 %vm271_vm8, %v1112_v6  ;;  %v1751_v6 = vrot.slane %v7703_v55, 1 }
 0xb8c   :  { %1782 = vmatpush.msra.mxu2 %v7764_v7 }
 0xb8e   :  { %1783 = vmatpush.msra.mxu2 %v7770_v9 }
 0xb90   :  { %1784 = vmatpush.msra.mxu2 %v7779_v11 }
 0xb92   :  { %1785 = vmatpush.msra.mxu2 %v7785_v15 }
 0xb93   :  { %6536 = vmatmul.msk.f32.vlgmr.msrb.gmra.mxu2 %vm38_vm2, %v6532_v49  ;;  %v1757_v49 = vperm.slane %v1751_v6, 0 }
 0xb9b   :  { %6547 = vmatmul.msk.f32.vlgmr.msra.gmra.mxu2 %vm38_vm2, %v1767_v3 }
 0xba5   :  { %v2106_v21 = vpop.f32.mrf.mxu3 }
 0xba6   :  { %v2109_v25 = vadd.f32 %v6561_v18, %v2106_v21  ;;  %v2149_v21 = vrot.slane %v7721_v52, 1 }
 0xba8   :  { %6894 = vtanh.f32 %v2109_v25  ;;  %v6563_v0 = vmul.f32 -1.442695, %v2109_v25 }
 0xbaa   :  { %6896 = vpow2.f32 %v6563_v0 }
 0xbae   :  { %v6895_v28 = vpop.eup %6894 }
 0xbaf   :  { %2132 = vrot.lane.b32.xlu0 %v6895_v28, %s7246_s17 }
 0xbb0   :  { %v6897_v30 = vpop.eup %6896 }
 0xbb1   :  { %v2113_v39 = vadd.f32 1.0, %v6897_v30 }
 0xbb3   :  { %6898 = vrcp.f32 %v2113_v39  ;;  %v2125_v12 = vand.u32 2147483648, %v2113_v39  ;;  %vm2119_vm4 = vweird.f32 %v2113_v39  ;;  %v2123_v31 = vand.u32 2147483647, %v2113_v39 }
 0xbb5   :  { %v2126_v34 = vor.u32 1.1754944e-38, %v2125_v12  ;;  %vm2124_vm6 = vcmp.eq.f32.partialorder %v2123_v31, 8.507059e+37 }
 0xbb9   :  { %v6899_v1 = vpop.eup %6898 }
 0xbba   :  { %v2115_v41 = vmul.f32 %v6899_v1, %v2113_v39  ;;  %vm2120_vm3 = vweird.f32 %v6899_v1 }
 0xbbb   :  { %vm2121_vm5 = vmor %vm2119_vm4, %vm2120_vm3 }
 0xbbc   :  { %v2116_v26 = vsub.f32 1.0, %v2115_v41 }
 0xbbe   :  { %v2117_v5 = vmul.f32 %v6899_v1, %v2116_v26 }
 0xbc0   :  { %v2118_v27 = vadd.f32 %v6899_v1, %v2117_v5 }
 0xbc2   :  { %v2122_v33 = vsel %vm2121_vm5, %v6899_v1, %v2118_v27 }
 0xbc3   :  { %v2127_v46 = vsel %vm2124_vm6, %v2126_v34, %v2122_v33 }
 0xbc4   :  { %v2130_v56 = vmul.f32 %v2127_v46, %v7703_v55 }
 0xc0e   :  { %v7796_v44 = vpop.f32.mrf.mxu2 }
 0xc16   :  { %v7798_v4 = vpop.f32.mrf.mxu2 }
 0xc17   :  { %v1465_v28 = vsel %vm271_vm8, %v7798_v4, -inf }
 0xc1e   :  { %v1787_v8 = vpop.f32.mrf.mxu2 }
 0xc1f   :  { %v1791_v47 = vrot.slane %v1787_v8, 1  ;;  %v1798_v14 = vperm.slane %v1787_v8, 0  ;;  %v1753_v8 = vrot.slane %v7698_v22, 1 }
 0xc21   :  { %v1799_v40 = vperm.slane %v1791_v47, 0  ;;  %v7803_v43 = vsel %vm176_vm7, %v1794_v45, %v1798_v14  ;;  %v2133_v20 = vpop.permute.xlu0 %2132  ;;  %v6565_v47 = vld [vmem:[%s9675_s1 + $0x50] sm:$0xff] }
 0xc22   :  { %v1910_v58 = vadd.f32 %v7808_v50, %v7803_v43  ;;  %v2135_v51 = vmul.f32 %v2133_v20, %v2127_v46 }
 0xc23   :  { %v7813_v23 = vsel %vm176_vm7, %v1795_v48, %v1799_v40 }
 0xc24   :  { %2137 = vrot.lane.b32.xlu0 %v2135_v51, %s7247_s20  ;;  %1930 = vmatpush.msrb.mxu1 %v1910_v58  ;;  %v1911_v59 = vadd.f32 %v7808_v50, %v7813_v23  ;;  %v6578_v51 = vld [vmem:[%s9673_s0 + $0xc] sm:$0x3] }
 0xc26   :  { %1953 = vmatpush.msrb.mxu2 %v1911_v59 }
 0xc4e   :  { %1860 = vmax.xlane.f32.xlu0 %v1859_v53 }
 0xc96   :  { %v2138_v36 = vpop.permute.xlu0 %2137 }
 0xc97   :  { %v7820_v60 = vadd.f32 %v2138_v36, %v2130_v56 }
 0xc99   :  { %6900 = vtanh.f32 %v7820_v60  ;;  %v2153_v61 = vperm.slane %v7820_v60, 0 }
 0xc9f   :  { %v6901_v19 = vpop.eup %6900 }
 0xca0   :  { %2143 = vrot.lane.b32.xlu2 %v6901_v19, %s7246_s17 }
 0xca8   :  { %2155 = vrot.lane.b32.xlu2 %v2153_v61, %s7248_s21 }
 0xcc1   :  { %v1861_v63 = vpop.xlane.xlu0 %1860 }
 0xcc2   :  { %v1865_v42 = vsub.f32 %v1830_v17, %v1861_v63 }
 0xcc4   :  { %v1867_v24 = vmul.f32 1.442695, %v1865_v42 }
 0xcc6   :  { %6902 = vpow2.f32 %v1867_v24  ;;  %v2148_v24 = vrot.slane %v7820_v60, 1 }
 0xccc   :  { %v6903_v29 = vpop.eup %6902 }
 0xccd   :  { %v1871_v2 = vsel %vm271_vm8, %v6903_v29, 0.0 }
 0xcce   :  { %1872 = vadd.xlane.f32.xlu1 %v1871_v2 }
 0xce7   :  { %1760 = vrot.lane.b32.xlu1 %v1757_v49, %s7248_s21 }
 0xcfa   :  { %v2144_v3 = vpop.permute.xlu2 %2143 }
 0xcfb   :  { %v2146_v18 = vmul.f32 %v2144_v3, %v2127_v46  ;;  %v2154_v3 = vperm.slane %v2148_v24, 0 }
 0xcfd   :  { %2482 = vrot.lane.b32.xlu2 %v2146_v18, %s7247_s20 }
 0xd02   :  { %v2156_v25 = vpop.permute.xlu2 %2155 }
 0xd03   :  { %v7832_v17 = vsel %vm176_vm7, %v2149_v21, %v2156_v25 }
 0xd04   :  { %6567 = vmatpush.xpose.msk.msra.mxu1 %vm38_vm2, %v7832_v17 }
 0xd26   :  { %1466 = vmax.xlane.f32.xlu2 %v1465_v28 }
 0xd41   :  { %v1873_v55 = vpop.xlane.xlu1 %1872 }
 0xd42   :  { %6904 = vrcp.f32 %v1873_v55  ;;  %v1888_v1 = vand.u32 2147483648, %v1873_v55  ;;  %v1886_v52 = vand.u32 2147483647, %v1873_v55  ;;  %vm1882_vm10 = vweird.f32 %v1873_v55 }
 0xd44   :  { %v1889_v5 = vor.u32 1.1754944e-38, %v1888_v1  ;;  %vm1887_vm12 = vcmp.eq.f32.partialorder %v1886_v52, 8.507059e+37 }
 0xd48   :  { %v6905_v0 = vpop.eup %6904 }
 0xd49   :  { %v1878_v30 = vmul.f32 %v6905_v0, %v1873_v55  ;;  %vm1883_vm9 = vweird.f32 %v6905_v0  ;;  %v6549_v55 = vld [vmem:[%s9675_s1 + $0x48] sm:$0xff] }
 0xd4a   :  { %vm1884_vm11 = vmor %vm1882_vm10, %vm1883_vm9 }
 0xd4b   :  { %v1879_v39 = vsub.f32 1.0, %v1878_v30 }
 0xd4d   :  { %v1880_v41 = vmul.f32 %v6905_v0, %v1879_v39 }
 0xd4f   :  { %v1881_v26 = vadd.f32 %v6905_v0, %v1880_v41 }
 0xd51   :  { %v1885_v27 = vsel %vm1884_vm11, %v6905_v0, %v1881_v26 }
 0xd52   :  { %v1890_v12 = vsel %vm1887_vm12, %v1889_v5, %v1885_v27 }
 0xd53   :  { %v1891_v31 = vmul.f32 %v6903_v29, %v1890_v12 }
 0xd55   :  { %6554 = vst.msk [vmem:[%s9677_s7 + $0x40] sm:$0xff] %vm271_vm8, %v1891_v31  ;;  %6556 = vmatmul.msk.f32.vlgmr.msrb.gmra.mxu1 %vm271_vm8, %v1891_v31 }
 0xd56   :  { %2498 = vmatpush.msrb.mxu1 %v7728_v35 }
 0xd57   :  { %v2483_v22 = vpop.permute.xlu2 %2482 }
 0xd58   :  { %2499 = vmatpush.msrb.mxu1 %v7734_v37 }
 0xd59   :  { %v1761_v33 = vpop.permute.xlu1 %1760 }
 0xd5a   :  { %v7847_v45 = vsel %vm176_vm7, %v1753_v8, %v1761_v33  ;;  %2500 = vmatpush.msrb.mxu1 %v7740_v57 }
 0xd5b   :  { %6552 = vmatpush.xpose.msk.msra.mxu0 %vm38_vm2, %v7847_v45 }
 0xd5c   :  { %2501 = vmatpush.msrb.mxu1 %v7746_v16 }
 0xd5d   :  { %6568 = vmatmul.msk.f32.vlgmr.msra.gmra.mxu1 %vm38_vm2, %v6565_v47 }
 0xd65   :  { %6579 = vmatmul.msk.f32.vlgmr.msrb.gmra.mxu1 %vm38_vm2, %v2483_v22 }
 0xd99   :  { %v1467_v14 = vpop.xlane.xlu2 %1466 }
 0xd9a   :  { %v1469_v34 = vsub.f32 %v7798_v4, %v1467_v14 }
 0xd9c   :  { %v1472_v48 = vmul.f32 1.442695, %v1469_v34 }
 0xd9e   :  { %6906 = vpow2.f32 %v1472_v48 }
 0xda4   :  { %v6907_v40 = vpop.eup %6906 }
 0xda5   :  { %v1477_v20 = vsel %vm271_vm8, %v6907_v40, 0.0 }
 0xda6   :  { %1478 = vadd.xlane.f32.xlu0 %v1477_v20 }
 0xdba   :  { %2163 = vrot.lane.b32.xlu0 %v7820_v60, %s7248_s21 }
 0xdd2   :  { %v7862_v46 = vpop.f32.mrf.mxu1 }
 0xdda   :  { %v7864_v58 = vpop.f32.mrf.mxu1 }
 0xddb   :  { %v2256_v56 = vsel %vm271_vm8, %v7864_v58, -inf }
 0xde2   :  { %v2503_v59 = vpop.f32.mrf.mxu1 }
 0xde3   :  { %v2506_v53 = vadd.f32 %v6578_v51, %v2503_v59  ;;  %v2150_v51 = vrot.slane %v7847_v45, 1 }
 0xde5   :  { %6908 = vtanh.f32 %v2506_v53  ;;  %v6580_v28 = vmul.f32 -1.442695, %v2506_v53 }
 0xdeb   :  { %v6909_v4 = vpop.eup %6908 }
 0xdec   :  { %2529 = vrot.lane.b32.xlu0 %v6909_v4, %s7246_s17 }
 0xe16   :  { %2257 = vmax.xlane.f32.xlu0 %v2256_v56 }
 0xe19   :  { %v1479_v36 = vpop.xlane.xlu0 %1478 }
 0xe1a   :  { %6910 = vrcp.f32 %v1479_v36  ;;  %v1506_v42 = vand.u32 2147483648, %v1479_v36  ;;  %v1504_v2 = vand.u32 2147483647, %v1479_v36  ;;  %vm1500_vm14 = vweird.f32 %v1479_v36 }
 0xe1b   :  { %6912 = vpow2.f32 %v6580_v28 }
 0xe1c   :  { %v1507_v49 = vor.u32 1.1754944e-38, %v1506_v42  ;;  %vm1505_vm0 = vcmp.eq.f32.partialorder %v1504_v2, 8.507059e+37 }
 0xe20   :  { %v6911_v19 = vpop.eup %6910 }
 0xe21   :  { %v1496_v61 = vmul.f32 %v6911_v19, %v1479_v36  ;;  %vm1501_vm13 = vweird.f32 %v6911_v19  ;;  %v6913_v0 = vpop.eup %6912 }
 0xe22   :  { %vm1502_vm15 = vmor %vm1500_vm14, %vm1501_vm13  ;;  %v2510_v39 = vadd.f32 1.0, %v6913_v0 }
 0xe23   :  { %v1497_v63 = vsub.f32 1.0, %v1496_v61 }
 0xe24   :  { %6914 = vrcp.f32 %v2510_v39  ;;  %v2522_v27 = vand.u32 2147483648, %v2510_v39  ;;  %vm2516_vm4 = vweird.f32 %v2510_v39  ;;  %v2520_v12 = vand.u32 2147483647, %v2510_v39 }
 0xe25   :  { %v1498_v29 = vmul.f32 %v6911_v19, %v1497_v63  ;;  %v2192_v63 = vrot.slane %v7813_v23, 1 }
 0xe26   :  { %v2523_v8 = vor.u32 1.1754944e-38, %v2522_v27  ;;  %vm2521_vm6 = vcmp.eq.f32.partialorder %v2520_v12, 8.507059e+37  ;;  %v2546_v12 = vrot.slane %v7832_v17, 1 }
 0xe27   :  { %v1499_v6 = vadd.f32 %v6911_v19, %v1498_v29 }
 0xe29   :  { %v1503_v18 = vsel %vm1502_vm15, %v6911_v19, %v1499_v6 }
 0xe2a   :  { %2157 = vrot.lane.b32.xlu0 %v2154_v3, %s7248_s21  ;;  %v1508_v21 = vsel %vm1505_vm0, %v1507_v49, %v1503_v18  ;;  %v6915_v1 = vpop.eup %6914 }
 0xe2b   :  { %v1509_v25 = vmul.f32 %v6907_v40, %v1508_v21  ;;  %v2512_v41 = vmul.f32 %v6915_v1, %v2510_v39  ;;  %vm2517_vm3 = vweird.f32 %v6915_v1 }
 0xe2c   :  { %v2164_v30 = vpop.permute.xlu0 %2163  ;;  %vm2518_vm5 = vmor %vm2516_vm4, %vm2517_vm3 }
 0xe2d   :  { %6538 = vst.msk [vmem:[%s9677_s7 + $0x38] sm:$0xff] %vm271_vm8, %v1509_v25  ;;  %6540 = vmatmul.msk.f32.vlgmr.msrb.gmra.mxu0 %vm271_vm8, %v1509_v25  ;;  %v2513_v52 = vsub.f32 1.0, %v2512_v41 }
 0xe2e   :  { %2179 = vmatpush.msrb.mxu0 %v7764_v7 }
 0xe2f   :  { %v2514_v26 = vmul.f32 %v6915_v1, %v2513_v52 }
 0xe30   :  { %2180 = vmatpush.msrb.mxu0 %v7770_v9 }
 0xe31   :  { %v2515_v5 = vadd.f32 %v6915_v1, %v2514_v26 }
 0xe32   :  { %2181 = vmatpush.msrb.mxu0 %v7779_v11 }
 0xe33   :  { %v2519_v31 = vsel %vm2518_vm5, %v6915_v1, %v2515_v5 }
 0xe34   :  { %2182 = vmatpush.msrb.mxu0 %v7785_v15  ;;  %v2524_v47 = vsel %vm2521_vm6, %v2523_v8, %v2519_v31 }
 0xe35   :  { %6553 = vmatmul.msk.f32.vlgmr.msra.gmra.mxu0 %vm38_vm2, %v6549_v55 }
 0xe3d   :  { %6564 = vmatmul.msk.f32.vlgmr.msrb.gmra.mxu0 %vm38_vm2, %v2164_v30 }
 0xe5e   :  { %v2530_v33 = vpop.permute.xlu0 %2529 }
 0xe5f   :  { %v2532_v22 = vmul.f32 %v2530_v33, %v2524_v47  ;;  %v6582_v33 = vld [vmem:[%s9675_s1 + $0x60] sm:$0xff] }
 0xe61   :  { %2534 = vrot.lane.b32.xlu1 %v2532_v22, %s7247_s20 }
 0xe89   :  { %v2258_v14 = vpop.xlane.xlu0 %2257 }
 0xe8a   :  { %v2262_v34 = vsub.f32 %v7864_v58, %v2258_v14  ;;  %v2191_v58 = vrot.slane %v7803_v43, 1  ;;  %v2527_v43 = vmul.f32 %v2524_v47, %v7820_v60 }
 0xe8c   :  { %v2264_v48 = vmul.f32 1.442695, %v2262_v34 }
 0xe8e   :  { %6916 = vpow2.f32 %v2264_v48 }
 0xe94   :  { %v6917_v40 = vpop.eup %6916 }
 0xe95   :  { %v2268_v20 = vsel %vm271_vm8, %v6917_v40, 0.0 }
 0xe96   :  { %2269 = vadd.xlane.f32.xlu2 %v2268_v20 }
 0xe9c   :  { %v2158_v59 = vpop.permute.xlu0 %2157 }
 0xe9d   :  { %v7893_v53 = vsel %vm176_vm7, %v2150_v51, %v2158_v59 }
 0xe9e   :  { %6569 = vmatpush.xpose.msk.msra.mxu2 %vm38_vm2, %v7893_v53 }
 0xeaa   :  { %v7897_v4 = vpop.f32.mrf.mxu0 }
 0xeb2   :  { %v1856_v56 = vpop.f32.mrf.mxu0 }
 0xeb3   :  { %v1862_v21 = vsel %vm271_vm8, %v1856_v56, -inf }
 0xeba   :  { %v2184_v36 = vpop.f32.mrf.mxu0 }
 0xebb   :  { %v2188_v19 = vrot.slane %v2184_v36, 1  ;;  %v2195_v61 = vperm.slane %v2184_v36, 0 }
 0xebd   :  { %v2196_v42 = vperm.slane %v2188_v19, 0  ;;  %v7902_v45 = vsel %vm176_vm7, %v2191_v58, %v2195_v61 }
 0xebe   :  { %v2307_v24 = vadd.f32 %v7808_v50, %v7902_v45 }
 0xebf   :  { %v7907_v29 = vsel %vm176_vm7, %v2192_v63, %v2196_v42 }
 0xec0   :  { %2327 = vmatpush.msrb.mxu3 %v2307_v24  ;;  %v2308_v2 = vadd.f32 %v7808_v50, %v7907_v29 }
 0xec2   :  { %2350 = vmatpush.msra.mxu0 %v2308_v2 }
 0xed3   :  { %v2535_v6 = vpop.permute.xlu1 %2534 }
 0xed4   :  { %v7912_v49 = vadd.f32 %v2535_v6, %v2527_v43 }
 0xed6   :  { %6918 = vtanh.f32 %v7912_v49  ;;  %2560 = vrot.lane.b32.xlu0 %v7912_v49, %s7248_s21  ;;  %v2550_v3 = vperm.slane %v7912_v49, 0 }
 0xedc   :  { %v6919_v23 = vpop.eup %6918 }
 0xedd   :  { %2540 = vrot.lane.b32.xlu1 %v6919_v23, %s7246_s17  ;;  %v6566_v23 = vld [vmem:[%s9675_s1 + $0x58] sm:$0xff] }
 0xee5   :  { %2552 = vrot.lane.b32.xlu1 %v2550_v3, %s7248_s21 }
 0xf09   :  { %v2270_v18 = vpop.xlane.xlu2 %2269 }
 0xf0a   :  { %6920 = vrcp.f32 %v2270_v18  ;;  %v2285_v55 = vand.u32 2147483648, %v2270_v18  ;;  %v2283_v30 = vand.u32 2147483647, %v2270_v18  ;;  %vm2279_vm10 = vweird.f32 %v2270_v18 }
 0xf0c   :  { %v2286_v1 = vor.u32 1.1754944e-38, %v2285_v55  ;;  %vm2284_vm12 = vcmp.eq.f32.partialorder %v2283_v30, 8.507059e+37 }
 0xf0f   :  { %1863 = vmax.xlane.f32.xlu1 %v1862_v21 }
 0xf10   :  { %v6921_v60 = vpop.eup %6920 }
 0xf11   :  { %v2275_v25 = vmul.f32 %v6921_v60, %v2270_v18  ;;  %vm2280_vm9 = vweird.f32 %v6921_v60  ;;  %v6595_v18 = vld [vmem:[%s9673_s0 + $0xe] sm:$0x3] }
 0xf12   :  { %vm2281_vm11 = vmor %vm2279_vm10, %vm2280_vm9 }
 0xf13   :  { %v2276_v28 = vsub.f32 1.0, %v2275_v25 }
 0xf15   :  { %v2277_v0 = vmul.f32 %v6921_v60, %v2276_v28 }
 0xf17   :  { %v2278_v39 = vadd.f32 %v6921_v60, %v2277_v0 }
 0xf19   :  { %v2282_v41 = vsel %vm2281_vm11, %v6921_v60, %v2278_v39 }
 0xf1a   :  { %v2287_v52 = vsel %vm2284_vm12, %v2286_v1, %v2282_v41 }
 0xf1b   :  { %v2288_v26 = vmul.f32 %v6917_v40, %v2287_v52 }
 0xf1d   :  { %6571 = vst.msk [vmem:[%s9677_s7 + $0x50] sm:$0xff] %vm271_vm8, %v2288_v26  ;;  %6573 = vmatmul.msk.f32.vlgmr.msrb.gmra.mxu3 %vm271_vm8, %v2288_v26 }
 0xf48   :  { %v2561_v3 = vpop.permute.xlu0 %2560 }
 0xf4f   :  { %v2541_v5 = vpop.permute.xlu1 %2540 }
 0xf50   :  { %v2543_v27 = vmul.f32 %v2541_v5, %v2524_v47 }
 0xf52   :  { %2879 = vrot.lane.b32.xlu2 %v2543_v27, %s7247_s20 }
 0xf57   :  { %v2553_v31 = vpop.permute.xlu1 %2552 }
 0xf58   :  { %v7929_v8 = vsel %vm176_vm7, %v2546_v12, %v2553_v31 }
 0xf59   :  { %6584 = vmatpush.xpose.msk.msra.mxu3 %vm38_vm2, %v7929_v8 }
 0xf5c   :  { %6585 = vmatmul.msk.f32.vlgmr.msra.gmra.mxu3 %vm38_vm2, %v6582_v33 }
 0xf5d   :  { %2895 = vmatpush.msrb.mxu3 %v7728_v35 }
 0xf5f   :  { %2896 = vmatpush.msrb.mxu3 %v7734_v37 }
 0xf61   :  { %2897 = vmatpush.msrb.mxu3 %v7740_v57 }
 0xf63   :  { %2898 = vmatpush.msrb.mxu3 %v7746_v16 }
 0xf82   :  { %v1864_v17 = vpop.xlane.xlu1 %1863 }
 0xf83   :  { %v1866_v47 = vsub.f32 %v1856_v56, %v1864_v17 }
 0xf85   :  { %v1869_v22 = vmul.f32 1.442695, %v1866_v47 }
 0xf87   :  { %6922 = vpow2.f32 %v1869_v22 }
 0xf8d   :  { %v6923_v14 = vpop.eup %6922 }
 0xf8e   :  { %v1874_v34 = vsel %vm271_vm8, %v6923_v14, 0.0 }
 0xf8f   :  { %1875 = vadd.xlane.f32.xlu2 %v1874_v34 }
 0xfa0   :  { %v7943_v40 = vpop.f32.mrf.mxu3 }
 0xfac   :  { %v2880_v48 = vpop.permute.xlu2 %2879 }
 0xfad   :  { %6596 = vmatmul.msk.f32.vlgmr.msrb.gmra.mxu3 %vm38_vm2, %v2880_v48  ;;  %v2588_v48 = vrot.slane %v7902_v45, 1 }
 0xfdf   :  { %v2624_v20 = vpop.f32.mrf.mxu3 }
 0xfe0   :  { %v2653_v51 = vsel %vm271_vm8, %v2624_v20, -inf }
 0xfe1   :  { %2654 = vmax.xlane.f32.xlu2 %v2653_v51 }
0x1002   :  { %v1876_v59 = vpop.xlane.xlu2 %1875 }
0x1003   :  { %6924 = vrcp.f32 %v1876_v59  ;;  %v1903_v56 = vand.u32 2147483648, %v1876_v59  ;;  %vm1897_vm13 = vweird.f32 %v1876_v59  ;;  %v1901_v61 = vand.u32 2147483647, %v1876_v59 }
0x1005   :  { %v1904_v42 = vor.u32 1.1754944e-38, %v1903_v56  ;;  %vm1902_vm0 = vcmp.eq.f32.partialorder %v1901_v61, 8.507059e+37 }
0x1009   :  { %v6925_v36 = vpop.eup %6924 }
0x100a   :  { %v1893_v58 = vmul.f32 %v6925_v36, %v1876_v59  ;;  %vm1898_vm14 = vweird.f32 %v6925_v36 }
0x100b   :  { %vm1899_vm15 = vmor %vm1897_vm13, %vm1898_vm14 }
0x100c   :  { %v1894_v19 = vsub.f32 1.0, %v1893_v58 }
0x100e   :  { %v1895_v63 = vmul.f32 %v6925_v36, %v1894_v19 }
0x1010   :  { %v1896_v24 = vadd.f32 %v6925_v36, %v1895_v63 }
0x1012   :  { %v1900_v2 = vsel %vm1899_vm15, %v6925_v36, %v1896_v24  ;;  %v2589_v36 = vrot.slane %v7907_v29, 1 }
0x1013   :  { %v1905_v43 = vsel %vm1902_vm0, %v1904_v42, %v1900_v2 }
0x1014   :  { %v1906_v6 = vmul.f32 %v6923_v14, %v1905_v43 }
0x1016   :  { %6555 = vst.msk [vmem:[%s9677_s7 + $0x48] sm:$0xff] %vm271_vm8, %v1906_v6  ;;  %6557 = vmatmul.msk.f32.vlgmr.msrb.gmra.mxu2 %vm271_vm8, %v1906_v6 }
0x1017   :  { %2576 = vmatpush.msrb.mxu2 %v7764_v7 }
0x1019   :  { %2577 = vmatpush.msrb.mxu2 %v7770_v9 }
0x101b   :  { %2578 = vmatpush.msrb.mxu2 %v7779_v11 }
0x101d   :  { %2579 = vmatpush.msrb.mxu2 %v7785_v15 }
0x101e   :  { %6570 = vmatmul.msk.f32.vlgmr.msra.gmra.mxu2 %vm38_vm2, %v6566_v23 }
0x1026   :  { %6581 = vmatmul.msk.f32.vlgmr.msrb.gmra.mxu2 %vm38_vm2, %v2561_v3 }
0x1030   :  { %v2900_v21 = vpop.f32.mrf.mxu3 }
0x1031   :  { %v2903_v60 = vadd.f32 %v6595_v18, %v2900_v21 }
0x1033   :  { %6926 = vtanh.f32 %v2903_v60  ;;  %v6597_v1 = vmul.f32 -1.442695, %v2903_v60 }
0x1039   :  { %v6927_v25 = vpop.eup %6926 }
0x103a   :  { %2926 = vrot.lane.b32.xlu1 %v6927_v25, %s7246_s17 }
0x1054   :  { %v2655_v28 = vpop.xlane.xlu2 %2654 }
0x1055   :  { %v2659_v55 = vsub.f32 %v2624_v20, %v2655_v28 }
0x1057   :  { %v2661_v0 = vmul.f32 1.442695, %v2659_v55 }
0x1059   :  { %6928 = vpow2.f32 %v2661_v0 }
0x105a   :  { %6930 = vpow2.f32 %v6597_v1 }
0x105f   :  { %v6929_v30 = vpop.eup %6928 }
0x1060   :  { %v2665_v39 = vsel %vm271_vm8, %v6929_v30, 0.0  ;;  %v6931_v41 = vpop.eup %6930 }
0x1061   :  { %2666 = vadd.xlane.f32.xlu2 %v2665_v39  ;;  %v2907_v52 = vadd.f32 1.0, %v6931_v41 }
0x1063   :  { %6932 = vrcp.f32 %v2907_v52  ;;  %v2919_v47 = vand.u32 2147483648, %v2907_v52  ;;  %vm2913_vm4 = vweird.f32 %v2907_v52  ;;  %v2917_v22 = vand.u32 2147483647, %v2907_v52 }
0x1065   :  { %v2920_v59 = vor.u32 1.1754944e-38, %v2919_v47  ;;  %vm2918_vm6 = vcmp.eq.f32.partialorder %v2917_v22, 8.507059e+37 }
0x1069   :  { %v6933_v26 = vpop.eup %6932 }
0x106a   :  { %v2909_v27 = vmul.f32 %v6933_v26, %v2907_v52  ;;  %vm2914_vm3 = vweird.f32 %v6933_v26 }
0x106b   :  { %vm2915_vm5 = vmor %vm2913_vm4, %vm2914_vm3 }
0x106c   :  { %v2910_v12 = vsub.f32 1.0, %v2909_v27 }
0x106e   :  { %v2911_v33 = vmul.f32 %v6933_v26, %v2910_v12 }
0x1070   :  { %v2912_v17 = vadd.f32 %v6933_v26, %v2911_v33 }
0x1072   :  { %v2916_v34 = vsel %vm2915_vm5, %v6933_v26, %v2912_v17 }
0x1073   :  { %v2921_v19 = vsel %vm2918_vm6, %v2920_v59, %v2916_v34  ;;  %v2943_v34 = vrot.slane %v7929_v8, 1 }
0x1074   :  { %v2924_v39 = vmul.f32 %v2921_v19, %v7912_v49 }
0x1099   :  { %v7965_v5 = vpop.f32.mrf.mxu2 }
0x10a1   :  { %v2253_v31 = vpop.f32.mrf.mxu2 }
0x10a2   :  { %v2259_v29 = vsel %vm271_vm8, %v2253_v31, -inf }
0x10a3   :  { %2260 = vmax.xlane.f32.xlu2 %v2259_v29 }
0x10a9   :  { %v2581_v14 = vpop.f32.mrf.mxu2 }
0x10aa   :  { %v2585_v20 = vrot.slane %v2581_v14, 1  ;;  %v2592_v51 = vperm.slane %v2581_v14, 0  ;;  %v2545_v14 = vrot.slane %v7912_v49, 1  ;;  %v6599_v49 = vld [vmem:[%s9675_s1 + $0x70] sm:$0xff] }
0x10ac   :  { %v2593_v58 = vperm.slane %v2585_v20, 0  ;;  %v7970_v56 = vsel %vm176_vm7, %v2588_v48, %v2592_v51  ;;  %v2927_v61 = vpop.permute.xlu1 %2926  ;;  %v2551_v51 = vperm.slane %v2545_v14, 0 }
0x10ad   :  { %v2704_v63 = vadd.f32 %v7808_v50, %v7970_v56  ;;  %v2929_v42 = vmul.f32 %v2927_v61, %v2921_v19 }
0x10ae   :  { %v7975_v24 = vsel %vm176_vm7, %v2589_v36, %v2593_v58 }
0x10af   :  { %2724 = vmatpush.msra.mxu1 %v2704_v63  ;;  %2931 = vrot.lane.b32.xlu0 %v2929_v42, %s7247_s20  ;;  %v2705_v45 = vadd.f32 %v7808_v50, %v7975_v24 }
0x10b1   :  { %2747 = vmatpush.msra.mxu2 %v2705_v45  ;;  %v2547_v45 = vrot.slane %v7893_v53, 1 }
0x10d4   :  { %v2667_v2 = vpop.xlane.xlu2 %2666 }
0x10d5   :  { %6934 = vrcp.f32 %v2667_v2  ;;  %v2682_v3 = vand.u32 2147483648, %v2667_v2  ;;  %v2680_v21 = vand.u32 2147483647, %v2667_v2  ;;  %vm2676_vm10 = vweird.f32 %v2667_v2 }
0x10d7   :  { %v2683_v25 = vor.u32 1.1754944e-38, %v2682_v3  ;;  %vm2681_vm12 = vcmp.eq.f32.partialorder %v2680_v21, 8.507059e+37  ;;  %v6612_v3 = vld [vmem:[%s9673_s0 + $0x10] sm:$0x3] }
0x10db   :  { %v6935_v43 = vpop.eup %6934 }
0x10dc   :  { %v2672_v6 = vmul.f32 %v6935_v43, %v2667_v2  ;;  %vm2677_vm9 = vweird.f32 %v6935_v43 }
0x10dd   :  { %vm2678_vm11 = vmor %vm2676_vm10, %vm2677_vm9 }
0x10de   :  { %v2673_v23 = vsub.f32 1.0, %v2672_v6 }
0x10e0   :  { %v2674_v18 = vmul.f32 %v6935_v43, %v2673_v23 }
0x10e2   :  { %v2675_v60 = vadd.f32 %v6935_v43, %v2674_v18 }
0x10e4   :  { %v2679_v28 = vsel %vm2678_vm11, %v6935_v43, %v2675_v60  ;;  %v6583_v43 = vld [vmem:[%s9675_s1 + $0x68] sm:$0xff]  ;;  %v2985_v60 = vrot.slane %v7970_v56, 1 }
0x10e5   :  { %v2684_v55 = vsel %vm2681_vm12, %v2683_v25, %v2679_v28 }
0x10e6   :  { %v2685_v0 = vmul.f32 %v6929_v30, %v2684_v55  ;;  %v2986_v55 = vrot.slane %v7975_v24, 1 }
0x10e8   :  { %6588 = vst.msk [vmem:[%s9677_s7 + $0x60] sm:$0xff] %vm271_vm8, %v2685_v0  ;;  %6590 = vmatmul.msk.f32.vlgmr.msra.gmra.mxu1 %vm271_vm8, %v2685_v0 }
0x1116   :  { %v2261_v26 = vpop.xlane.xlu2 %2260 }
0x1117   :  { %v2263_v27 = vsub.f32 %v2253_v31, %v2261_v26 }
0x1119   :  { %v2266_v12 = vmul.f32 1.442695, %v2263_v27 }
0x1121   :  { %v2932_v1 = vpop.permute.xlu0 %2931 }
0x1122   :  { %v7987_v41 = vadd.f32 %v2932_v1, %v2924_v39 }
0x1124   :  { %6936 = vtanh.f32 %v7987_v41  ;;  %2957 = vrot.lane.b32.xlu2 %v7987_v41, %s7248_s21  ;;  %v2947_v30 = vperm.slane %v7987_v41, 0 }
0x1125   :  { %6938 = vpow2.f32 %v2266_v12 }
0x112a   :  { %v6937_v52 = vpop.eup %6936 }
0x112b   :  { %2937 = vrot.lane.b32.xlu0 %v6937_v52, %s7246_s17  ;;  %v6939_v33 = vpop.eup %6938 }
0x112c   :  { %v2271_v17 = vsel %vm271_vm8, %v6939_v33, 0.0 }
0x1133   :  { %2949 = vrot.lane.b32.xlu0 %v2947_v30, %s7248_s21 }
0x115d   :  { %2272 = vadd.xlane.f32.xlu0 %v2271_v17 }
0x1165   :  { %v8034_v6 = vpop.f32.mrf.mxu1 }
0x117e   :  { %v2958_v53 = vpop.permute.xlu2 %2957 }
0x119d   :  { %v2938_v47 = vpop.permute.xlu0 %2937 }
0x119e   :  { %v2940_v22 = vmul.f32 %v2938_v47, %v2921_v19 }
0x11a0   :  { %3276 = vrot.lane.b32.xlu1 %v2940_v22, %s7247_s20 }
0x11a5   :  { %v2950_v48 = vpop.permute.xlu0 %2949 }
0x11a6   :  { %v8000_v20 = vsel %vm176_vm7, %v2943_v34, %v2950_v48 }
0x11a7   :  { %6601 = vmatpush.xpose.msk.msrb.mxu1 %vm38_vm2, %v8000_v20 }
0x11a8   :  { %2554 = vrot.lane.b32.xlu1 %v2551_v51, %s7248_s21 }
0x11aa   :  { %6602 = vmatmul.msk.f32.vlgmr.msrb.gmra.mxu1 %vm38_vm2, %v6599_v49 }
0x11ab   :  { %3292 = vmatpush.msra.mxu1 %v7728_v35 }
0x11ad   :  { %3293 = vmatpush.msra.mxu1 %v7734_v37 }
0x11af   :  { %3294 = vmatpush.msra.mxu1 %v7740_v57 }
0x11b1   :  { %3295 = vmatpush.msra.mxu1 %v7746_v16 }
0x11d0   :  { %v2273_v8 = vpop.xlane.xlu0 %2272 }
0x11d1   :  { %6940 = vrcp.f32 %v2273_v8  ;;  %v2300_v36 = vand.u32 2147483648, %v2273_v8  ;;  %vm2294_vm13 = vweird.f32 %v2273_v8  ;;  %v2298_v35 = vand.u32 2147483647, %v2273_v8 }
0x11d3   :  { %v2301_v57 = vor.u32 1.1754944e-38, %v2300_v36  ;;  %vm2299_vm0 = vcmp.eq.f32.partialorder %v2298_v35, 8.507059e+37 }
0x11d7   :  { %v6941_v31 = vpop.eup %6940 }
0x11d8   :  { %v2290_v59 = vmul.f32 %v6941_v31, %v2273_v8  ;;  %vm2295_vm14 = vweird.f32 %v6941_v31 }
0x11d9   :  { %vm2296_vm15 = vmor %vm2294_vm13, %vm2295_vm14 }
0x11da   :  { %v2291_v58 = vsub.f32 1.0, %v2290_v59  ;;  %v2942_v59 = vrot.slane %v7987_v41, 1 }
0x11dc   :  { %v2292_v37 = vmul.f32 %v6941_v31, %v2291_v58  ;;  %v2948_v36 = vperm.slane %v2942_v59, 0 }
0x11de   :  { %v2293_v19 = vadd.f32 %v6941_v31, %v2292_v37 }
0x11e0   :  { %v2297_v16 = vsel %vm2296_vm15, %v6941_v31, %v2293_v19 }
0x11e1   :  { %v2302_v61 = vsel %vm2299_vm0, %v2301_v57, %v2297_v16 }
0x11e2   :  { %v2303_v63 = vmul.f32 %v6939_v33, %v2302_v61 }
0x11e4   :  { %6572 = vst.msk [vmem:[%s9677_s7 + $0x58] sm:$0xff] %vm271_vm8, %v2303_v63  ;;  %6574 = vmatmul.msk.f32.vlgmr.msra.gmra.mxu0 %vm271_vm8, %v2303_v63 }
0x1212   :  { %v3277_v42 = vpop.permute.xlu1 %3276 }
0x1213   :  { %6613 = vmatmul.msk.f32.vlgmr.msra.gmra.mxu1 %vm38_vm2, %v3277_v42 }
0x121a   :  { %v2555_v29 = vpop.permute.xlu1 %2554 }
0x121b   :  { %v8021_v2 = vsel %vm176_vm7, %v2547_v45, %v2555_v29 }
0x121c   :  { %6586 = vmatpush.xpose.msk.msrb.mxu0 %vm38_vm2, %v8021_v2  ;;  %v2944_v29 = vrot.slane %v8021_v2, 1 }
0x121f   :  { %6587 = vmatmul.msk.f32.vlgmr.msrb.gmra.mxu0 %vm38_vm2, %v6583_v43 }
0x1220   :  { %2973 = vmatpush.msra.mxu0 %v7764_v7 }
0x1222   :  { %2974 = vmatpush.msra.mxu0 %v7770_v9 }
0x1224   :  { %2975 = vmatpush.msra.mxu0 %v7779_v11 }
0x1226   :  { %2976 = vmatpush.msra.mxu0 %v7785_v15 }
0x1227   :  { %6598 = vmatmul.msk.f32.vlgmr.msra.gmra.mxu0 %vm38_vm2, %v2958_v53  ;;  %v3021_v23 = vpop.f32.mrf.mxu1 }
0x1228   :  { %v3050_v8 = vsel %vm271_vm8, %v3021_v23, -inf }
0x1261   :  { %v8039_v21 = vpop.f32.mrf.mxu0 }
0x1290   :  { %v3297_v18 = vpop.f32.mrf.mxu1 }
0x1291   :  { %v3300_v7 = vadd.f32 %v6612_v3, %v3297_v18  ;;  %v3340_v18 = vrot.slane %v8000_v20, 1 }
0x1293   :  { %6942 = vtanh.f32 %v3300_v7  ;;  %v6614_v56 = vmul.f32 -1.442695, %v3300_v7 }
0x1295   :  { %6944 = vpow2.f32 %v6614_v56 }
0x1299   :  { %v6943_v9 = vpop.eup %6942 }
0x129a   :  { %3323 = vrot.lane.b32.xlu1 %v6943_v9, %s7246_s17 }
0x129b   :  { %v6945_v26 = vpop.eup %6944 }
0x129c   :  { %v8042_v11 = vpop.f32.mrf.mxu0  ;;  %v3304_v27 = vadd.f32 1.0, %v6945_v26 }
0x129d   :  { %v2656_v31 = vsel %vm271_vm8, %v8042_v11, -inf }
0x129e   :  { %6946 = vrcp.f32 %v3304_v27  ;;  %v3316_v22 = vand.u32 2147483648, %v3304_v27  ;;  %vm3310_vm4 = vweird.f32 %v3304_v27  ;;  %v3314_v14 = vand.u32 2147483647, %v3304_v27 }
0x12a0   :  { %v3317_v48 = vor.u32 1.1754944e-38, %v3316_v22  ;;  %vm3315_vm6 = vcmp.eq.f32.partialorder %v3314_v14, 8.507059e+37  ;;  %v8110_v22 = vld [vmem:[%s9670_s4 + $0x8] sm:$0xff]  ;;  %v8116_v14 = vld [vmem:[%s9670_s4] sm:$0xff] }
0x12a4   :  { %v2978_v15 = vpop.f32.mrf.mxu0  ;;  %v6947_v24 = vpop.eup %6946 }
0x12a5   :  { %v2982_v25 = vrot.slane %v2978_v15, 1  ;;  %v2989_v28 = vperm.slane %v2978_v15, 0  ;;  %v3306_v12 = vmul.f32 %v6947_v24, %v3304_v27  ;;  %vm3311_vm3 = vweird.f32 %v6947_v24 }
0x12a6   :  { %vm3312_vm5 = vmor %vm3310_vm4, %vm3311_vm3 }
0x12a7   :  { %v2990_v0 = vperm.slane %v2982_v25, 0  ;;  %v8047_v39 = vsel %vm176_vm7, %v2985_v60, %v2989_v28  ;;  %v3307_v33 = vsub.f32 1.0, %v3306_v12 }
0x12a8   :  { %v3101_v1 = vadd.f32 %v7808_v50, %v8047_v39 }
0x12a9   :  { %v8052_v52 = vsel %vm176_vm7, %v2986_v55, %v2990_v0  ;;  %v3308_v17 = vmul.f32 %v6947_v24, %v3307_v33  ;;  %v8095_v33 = vld [vmem:[%s9670_s4 + $0x18] sm:$0xff] }
0x12aa   :  { %3121 = vmatpush.msra.mxu3 %v3101_v1  ;;  %v3102_v30 = vadd.f32 %v7808_v50, %v8052_v52 }
0x12ab   :  { %v3309_v47 = vadd.f32 %v6947_v24, %v3308_v17  ;;  %v8101_v17 = vld [vmem:[%s9670_s4 + $0x10] sm:$0xff] }
0x12ac   :  { %3144 = vmatpush.msrb.mxu0 %v3102_v30 }
0x12ad   :  { %v3313_v34 = vsel %vm3312_vm5, %v6947_v24, %v3309_v47  ;;  %v6616_v47 = vld [vmem:[%s9675_s1 + $0x80] sm:$0xff] }
0x12ae   :  { %v3318_v51 = vsel %vm3315_vm6, %v3317_v48, %v3313_v34 }
0x12af   :  { %v3321_v58 = vmul.f32 %v3318_v51, %v7987_v41 }
0x130c   :  { %v3324_v50 = vpop.permute.xlu1 %3323 }
0x130d   :  { %v3326_v49 = vmul.f32 %v3324_v50, %v3318_v51 }
0x130f   :  { %3328 = vrot.lane.b32.xlu1 %v3326_v49, %s7247_s20 }
0x1339   :  { %3051 = vmax.xlane.f32.xlu1 %v3050_v8 }
0x1341   :  { %2657 = vmax.xlane.f32.xlu1 %v2656_v31 }
0x135a   :  { %2951 = vrot.lane.b32.xlu1 %v2948_v36, %s7248_s21 }
0x1381   :  { %v3329_v35 = vpop.permute.xlu1 %3328 }
0x1382   :  { %v8063_v37 = vadd.f32 %v3329_v35, %v3321_v58 }
0x1384   :  { %6948 = vtanh.f32 %v8063_v37  ;;  %v3344_v57 = vperm.slane %v8063_v37, 0 }
0x1386   :  { %3346 = vrot.lane.b32.xlu0 %v3344_v57, %s7248_s21 }
0x138a   :  { %v6949_v19 = vpop.eup %6948 }
0x138b   :  { %3334 = vrot.lane.b32.xlu2 %v6949_v19, %s7246_s17 }
0x13ac   :  { %v3052_v16 = vpop.xlane.xlu1 %3051 }
0x13ad   :  { %v3056_v61 = vsub.f32 %v3021_v23, %v3052_v16  ;;  %v8129_v16 = vld [vmem:[%s9674_s5 + $0x18] sm:$0xff] }
0x13af   :  { %v3058_v63 = vmul.f32 1.442695, %v3056_v61  ;;  %v8135_v61 = vld [vmem:[%s9674_s5 + $0x10] sm:$0xff] }
0x13b1   :  { %6950 = vpow2.f32 %v3058_v63  ;;  %v6600_v63 = vld [vmem:[%s9675_s1 + $0x78] sm:$0xff] }
0x13b4   :  { %v2658_v41 = vpop.xlane.xlu1 %2657 }
0x13b5   :  { %v2660_v2 = vsub.f32 %v8042_v11, %v2658_v41 }
0x13b7   :  { %v6951_v42 = vpop.eup %6950  ;;  %v2663_v15 = vmul.f32 1.442695, %v2660_v2 }
0x13b8   :  { %v3062_v45 = vsel %vm271_vm8, %v6951_v42, 0.0 }
0x13b9   :  { %3063 = vadd.xlane.f32.xlu2 %v3062_v45  ;;  %6952 = vpow2.f32 %v2663_v15  ;;  %v8150_v45 = vld [vmem:[%s9674_s5] sm:$0xff] }
0x13bf   :  { %v6953_v60 = vpop.eup %6952 }
0x13c0   :  { %v2668_v25 = vsel %vm271_vm8, %v6953_v60, 0.0 }
0x13cc   :  { %v2952_v43 = vpop.permute.xlu1 %2951 }
0x13cd   :  { %v8072_v53 = vsel %vm176_vm7, %v2944_v29, %v2952_v43 }
0x13ce   :  { %6603 = vmatpush.xpose.msk.msrb.mxu2 %vm38_vm2, %v8072_v53 }
0x13d1   :  { %3354 = vrot.lane.b32.xlu2 %v8063_v37, %s7248_s21 }
0x13e5   :  { %v3335_v23 = vpop.permute.xlu2 %3334 }
0x13e6   :  { %v3337_v3 = vmul.f32 %v3335_v23, %v3318_v51  ;;  %v6629_v23 = vld [vmem:[%s9673_s0 + $0x12] sm:$0x3] }
0x13e8   :  { %3673 = vrot.lane.b32.xlu0 %v3337_v3, %s7247_s20 }
0x13f8   :  { %v3347_v7 = vpop.permute.xlu0 %3346 }
0x13f9   :  { %v8081_v9 = vsel %vm176_vm7, %v3340_v18, %v3347_v7 }
0x13fa   :  { %6618 = vmatpush.xpose.msk.msrb.mxu3 %vm38_vm2, %v8081_v9 }
0x1412   :  { %2669 = vadd.xlane.f32.xlu0 %v2668_v25 }
0x142c   :  { %v3064_v28 = vpop.xlane.xlu2 %3063 }
0x142d   :  { %6954 = vrcp.f32 %v3064_v28  ;;  %v3079_v1 = vand.u32 2147483648, %v3064_v28  ;;  %v3077_v56 = vand.u32 2147483647, %v3064_v28  ;;  %vm3073_vm10 = vweird.f32 %v3064_v28 }
0x142f   :  { %v3080_v27 = vor.u32 1.1754944e-38, %v3079_v1  ;;  %vm3078_vm12 = vcmp.eq.f32.partialorder %v3077_v56, 8.507059e+37  ;;  %v3383_v1 = vrot.slane %v8052_v52, 1 }
0x1433   :  { %v6955_v55 = vpop.eup %6954 }
0x1434   :  { %v3069_v0 = vmul.f32 %v6955_v55, %v3064_v28  ;;  %vm3074_vm9 = vweird.f32 %v6955_v55  ;;  %v3355_v41 = vpop.permute.xlu2 %3354  ;;  %v3382_v28 = vrot.slane %v8047_v39, 1 }
0x1435   :  { %vm3075_vm11 = vmor %vm3073_vm10, %vm3074_vm9 }
0x1436   :  { %v3070_v20 = vsub.f32 1.0, %v3069_v0 }
0x1438   :  { %v3071_v30 = vmul.f32 %v6955_v55, %v3070_v20 }
0x143a   :  { %v3072_v26 = vadd.f32 %v6955_v55, %v3071_v30 }
0x143c   :  { %v3076_v11 = vsel %vm3075_vm11, %v6955_v55, %v3072_v26  ;;  %v8174_v26 = vld [vmem:[%s9676_s6] sm:$0xff] }
0x143d   :  { %v3081_v24 = vsel %vm3078_vm12, %v3080_v27, %v3076_v11 }
0x143e   :  { %v3082_v12 = vmul.f32 %v6951_v42, %v3081_v24  ;;  %v8144_v42 = vld [vmem:[%s9674_s5 + $0x8] sm:$0xff] }
0x1440   :  { %6605 = vst.msk [vmem:[%s9677_s7 + $0x70] sm:$0xff] %vm271_vm8, %v3082_v12  ;;  %6607 = vmatmul.msk.f32.vlgmr.msra.gmra.mxu3 %vm271_vm8, %v3082_v12 }
0x1441   :  { %3689 = vmatpush.msra.mxu3 %v8095_v33 }
0x1443   :  { %3690 = vmatpush.msra.mxu3 %v8101_v17 }
0x1445   :  { %3691 = vmatpush.msra.mxu3 %v8110_v22 }
0x1447   :  { %3692 = vmatpush.msra.mxu3 %v8116_v14 }
0x1448   :  { %6619 = vmatmul.msk.f32.vlgmr.msrb.gmra.mxu3 %vm38_vm2, %v6616_v47 }
0x145a   :  { %v3674_v34 = vpop.permute.xlu0 %3673 }
0x145b   :  { %6630 = vmatmul.msk.f32.vlgmr.msra.gmra.mxu3 %vm38_vm2, %v3674_v34 }
0x1485   :  { %v2670_v48 = vpop.xlane.xlu0 %2669 }
0x1486   :  { %6956 = vrcp.f32 %v2670_v48  ;;  %v2697_v49 = vand.u32 2147483648, %v2670_v48  ;;  %vm2691_vm13 = vweird.f32 %v2670_v48  ;;  %v2695_v31 = vand.u32 2147483647, %v2670_v48 }
0x1488   :  { %v2698_v36 = vor.u32 1.1754944e-38, %v2697_v49  ;;  %vm2696_vm0 = vcmp.eq.f32.partialorder %v2695_v31, 8.507059e+37 }
0x148c   :  { %v6957_v50 = vpop.eup %6956 }
0x148d   :  { %v2687_v51 = vmul.f32 %v6957_v50, %v2670_v48  ;;  %vm2692_vm14 = vweird.f32 %v6957_v50 }
0x148e   :  { %vm2693_vm15 = vmor %vm2691_vm13, %vm2692_vm14 }
0x148f   :  { %v2688_v8 = vsub.f32 1.0, %v2687_v51 }
0x1491   :  { %v2689_v59 = vmul.f32 %v6957_v50, %v2688_v8 }
0x1493   :  { %v2690_v58 = vadd.f32 %v6957_v50, %v2689_v59 }
0x1495   :  { %v2694_v35 = vsel %vm2693_vm15, %v6957_v50, %v2690_v58 }
0x1496   :  { %v2699_v57 = vsel %vm2696_vm0, %v2698_v36, %v2694_v35 }
0x1497   :  { %v2700_v19 = vmul.f32 %v6953_v60, %v2699_v57 }
0x1499   :  { %6589 = vst.msk [vmem:[%s9677_s7 + $0x68] sm:$0xff] %vm271_vm8, %v2700_v19  ;;  %6591 = vmatmul.msk.f32.vlgmr.msra.gmra.mxu2 %vm271_vm8, %v2700_v19 }
0x149a   :  { %3370 = vmatpush.msra.mxu2 %v8129_v16 }
0x149c   :  { %3371 = vmatpush.msra.mxu2 %v8135_v61 }
0x149e   :  { %3372 = vmatpush.msra.mxu2 %v8144_v42 }
0x14a0   :  { %3373 = vmatpush.msra.mxu2 %v8150_v45 }
0x14a1   :  { %6604 = vmatmul.msk.f32.vlgmr.msrb.gmra.mxu2 %vm38_vm2, %v6600_v63 }
0x14a9   :  { %6615 = vmatmul.msk.f32.vlgmr.msra.gmra.mxu2 %vm38_vm2, %v3355_v41 }
0x14c3   :  { %v8155_v29 = vpop.f32.mrf.mxu3 }
0x14cb   :  { %v3418_v43 = vpop.f32.mrf.mxu3 }
0x14cc   :  { %v3447_v2 = vsel %vm271_vm8, %v3418_v43, -inf }
0x14de   :  { %v3694_v3 = vpop.f32.mrf.mxu3 }
0x14df   :  { %v3697_v18 = vadd.f32 %v6629_v23, %v3694_v3 }
0x14e1   :  { %6958 = vtanh.f32 %v3697_v18  ;;  %v6631_v55 = vmul.f32 -1.442695, %v3697_v18 }
0x14e3   :  { %6960 = vpow2.f32 %v6631_v55 }
0x14e7   :  { %v6959_v7 = vpop.eup %6958 }
0x14e8   :  { %3720 = vrot.lane.b32.xlu1 %v6959_v7, %s7246_s17 }
0x14e9   :  { %v6961_v11 = vpop.eup %6960 }
0x14ea   :  { %v3701_v24 = vadd.f32 1.0, %v6961_v11 }
0x14ec   :  { %6962 = vrcp.f32 %v3701_v24  ;;  %v3713_v51 = vand.u32 2147483648, %v3701_v24  ;;  %vm3707_vm4 = vweird.f32 %v3701_v24  ;;  %v3711_v49 = vand.u32 2147483647, %v3701_v24 }
0x14ee   :  { %v3714_v31 = vor.u32 1.1754944e-38, %v3713_v51  ;;  %vm3712_vm6 = vcmp.eq.f32.partialorder %v3711_v49, 8.507059e+37  ;;  %v6633_v51 = vld [vmem:[%s9675_s1 + $0x90] sm:$0xff] }
0x14f2   :  { %v6963_v12 = vpop.eup %6962 }
0x14f3   :  { %v3703_v47 = vmul.f32 %v6963_v12, %v3701_v24  ;;  %vm3708_vm3 = vweird.f32 %v6963_v12 }
0x14f4   :  { %vm3709_vm5 = vmor %vm3707_vm4, %vm3708_vm3 }
0x14f5   :  { %v3704_v34 = vsub.f32 1.0, %v3703_v47 }
0x14f7   :  { %v3705_v48 = vmul.f32 %v6963_v12, %v3704_v34  ;;  %v3737_v34 = vrot.slane %v8081_v9, 1  ;;  %v3341_v9 = vrot.slane %v8072_v53, 1 }
0x14f9   :  { %v3706_v50 = vadd.f32 %v6963_v12, %v3705_v48 }
0x14fb   :  { %v3710_v8 = vsel %vm3709_vm5, %v6963_v12, %v3706_v50 }
0x14fc   :  { %v3715_v36 = vsel %vm3712_vm6, %v3714_v31, %v3710_v8 }
0x14fd   :  { %v3718_v23 = vmul.f32 %v3715_v36, %v8063_v37 }
0x1512   :  { %3448 = vmax.xlane.f32.xlu1 %v3447_v2  ;;  %v3339_v2 = vrot.slane %v8063_v37, 1 }
0x151c   :  { %v8162_v15 = vpop.f32.mrf.mxu2 }
0x1524   :  { %v8164_v60 = vpop.f32.mrf.mxu2 }
0x152c   :  { %v3375_v25 = vpop.f32.mrf.mxu2 }
0x152d   :  { %v3379_v0 = vrot.slane %v3375_v25, 1  ;;  %v3386_v20 = vperm.slane %v3375_v25, 0  ;;  %v3345_v25 = vperm.slane %v3339_v2, 0 }
0x152f   :  { %v3387_v30 = vperm.slane %v3379_v0, 0  ;;  %v8169_v56 = vsel %vm176_vm7, %v3382_v28, %v3386_v20  ;;  %v3053_v28 = vsel %vm271_vm8, %v8164_v60, -inf }
0x1530   :  { %v3498_v27 = vadd.f32 %v8174_v26, %v8169_v56 }
0x1531   :  { %v8179_v39 = vsel %vm176_vm7, %v3383_v1, %v3387_v30 }
0x1532   :  { %3518 = vmatpush.msrb.mxu1 %v3498_v27  ;;  %v3499_v52 = vadd.f32 %v8174_v26, %v8179_v39 }
0x1534   :  { %3541 = vmatpush.msrb.mxu2 %v3499_v52 }
0x155a   :  { %v3721_v59 = vpop.permute.xlu1 %3720 }
0x155b   :  { %v3723_v58 = vmul.f32 %v3721_v59, %v3715_v36 }
0x155d   :  { %3725 = vrot.lane.b32.xlu2 %v3723_v58, %s7247_s20 }
0x1585   :  { %v3449_v35 = vpop.xlane.xlu1 %3448 }
0x1586   :  { %v3453_v57 = vsub.f32 %v3418_v43, %v3449_v35 }
0x1588   :  { %v3455_v19 = vmul.f32 1.442695, %v3453_v57 }
0x158a   :  { %6964 = vpow2.f32 %v3455_v19 }
0x1590   :  { %v6965_v63 = vpop.eup %6964 }
0x1591   :  { %v3459_v41 = vsel %vm271_vm8, %v6965_v63, 0.0 }
0x1592   :  { %3460 = vadd.xlane.f32.xlu2 %v3459_v41 }
0x15b7   :  { %v3726_v3 = vpop.permute.xlu2 %3725 }
0x15b8   :  { %v8186_v18 = vadd.f32 %v3726_v3, %v3718_v23 }
0x15ba   :  { %6966 = vtanh.f32 %v8186_v18  ;;  %v3741_v7 = vperm.slane %v8186_v18, 0 }
0x15bc   :  { %3743 = vrot.lane.b32.xlu1 %v3741_v7, %s7248_s21 }
0x15c0   :  { %v6967_v43 = vpop.eup %6966 }
0x15c1   :  { %3731 = vrot.lane.b32.xlu0 %v6967_v43, %s7246_s17 }
0x15c4   :  { %3348 = vrot.lane.b32.xlu1 %v3345_v25, %s7248_s21 }
0x15eb   :  { %3054 = vmax.xlane.f32.xlu0 %v3053_v28 }
0x1605   :  { %v3461_v55 = vpop.xlane.xlu2 %3460 }
0x1606   :  { %6968 = vrcp.f32 %v3461_v55  ;;  %v3476_v30 = vand.u32 2147483648, %v3461_v55  ;;  %v3474_v52 = vand.u32 2147483647, %v3461_v55  ;;  %vm3470_vm10 = vweird.f32 %v3461_v55 }
0x1608   :  { %v3477_v11 = vor.u32 1.1754944e-38, %v3476_v30  ;;  %vm3475_vm12 = vcmp.eq.f32.partialorder %v3474_v52, 8.507059e+37 }
0x160c   :  { %v6969_v0 = vpop.eup %6968 }
0x160d   :  { %v3466_v20 = vmul.f32 %v6969_v0, %v3461_v55  ;;  %vm3471_vm9 = vweird.f32 %v6969_v0 }
0x160e   :  { %vm3472_vm11 = vmor %vm3470_vm10, %vm3471_vm9 }
0x160f   :  { %v3467_v1 = vsub.f32 1.0, %v3466_v20 }
0x1611   :  { %v3468_v27 = vmul.f32 %v6969_v0, %v3467_v1 }
0x1613   :  { %v3469_v37 = vadd.f32 %v6969_v0, %v3468_v27  ;;  %v6617_v27 = vld [vmem:[%s9675_s1 + $0x88] sm:$0xff] }
0x1615   :  { %v3473_v24 = vsel %vm3472_vm11, %v6969_v0, %v3469_v37  ;;  %v6646_v37 = vld [vmem:[%s9673_s0 + $0x14] sm:$0x3] }
0x1616   :  { %v3478_v12 = vsel %vm3475_vm12, %v3477_v11, %v3473_v24 }
0x1617   :  { %v3479_v47 = vmul.f32 %v6965_v63, %v3478_v12 }
0x1619   :  { %6622 = vst.msk [vmem:[%s9677_s7 + $0x80] sm:$0xff] %vm271_vm8, %v3479_v47  ;;  %6624 = vmatmul.msk.f32.vlgmr.msrb.gmra.mxu1 %vm271_vm8, %v3479_v47 }
0x162e   :  { %v3744_v48 = vpop.permute.xlu1 %3743 }
0x162f   :  { %v8203_v50 = vsel %vm176_vm7, %v3737_v34, %v3744_v48 }
0x1630   :  { %6635 = vmatpush.xpose.msk.msra.mxu1 %vm38_vm2, %v8203_v50 }
0x1633   :  { %6636 = vmatmul.msk.f32.vlgmr.msra.gmra.mxu1 %vm38_vm2, %v6633_v51  ;;  %v3732_v49 = vpop.permute.xlu0 %3731 }
0x1634   :  { %4086 = vmatpush.msrb.mxu1 %v8095_v33  ;;  %v3734_v8 = vmul.f32 %v3732_v49, %v3715_v36 }
0x1636   :  { %4087 = vmatpush.msrb.mxu1 %v8101_v17  ;;  %v3349_v31 = vpop.permute.xlu1 %3348  ;;  %4070 = vrot.lane.b32.xlu2 %v3734_v8, %s7247_s20 }
0x1637   :  { %v8217_v59 = vsel %vm176_vm7, %v3341_v9, %v3349_v31 }
0x1638   :  { %4088 = vmatpush.msrb.mxu1 %v8110_v22  ;;  %6620 = vmatpush.xpose.msk.msra.mxu0 %vm38_vm2, %v8217_v59 }
0x163a   :  { %4089 = vmatpush.msrb.mxu1 %v8116_v14 }
0x163e   :  { %3751 = vrot.lane.b32.xlu2 %v8186_v18, %s7248_s21 }
0x165e   :  { %v3055_v36 = vpop.xlane.xlu0 %3054 }
0x165f   :  { %v3057_v58 = vsub.f32 %v8164_v60, %v3055_v36 }
0x1661   :  { %v3060_v53 = vmul.f32 1.442695, %v3057_v58 }
0x1663   :  { %6970 = vpow2.f32 %v3060_v53  ;;  %v3779_v53 = vrot.slane %v8169_v56, 1 }
0x1669   :  { %v6971_v35 = vpop.eup %6970 }
0x166a   :  { %v3065_v57 = vsel %vm271_vm8, %v6971_v35, 0.0 }
0x166b   :  { %3066 = vadd.xlane.f32.xlu0 %v3065_v57 }
0x1690   :  { %v4071_v19 = vpop.permute.xlu2 %4070 }
0x1691   :  { %6647 = vmatmul.msk.f32.vlgmr.msrb.gmra.mxu1 %vm38_vm2, %v4071_v19  ;;  %v3780_v19 = vrot.slane %v8179_v39, 1 }
0x1696   :  { %v8227_v63 = vpop.f32.mrf.mxu1 }
0x1698   :  { %v3752_v52 = vpop.permute.xlu2 %3751 }
0x16b0   :  { %v8229_v41 = vpop.f32.mrf.mxu1 }
0x16b1   :  { %v3844_v23 = vsel %vm271_vm8, %v8229_v41, -inf }
0x16b2   :  { %3845 = vmax.xlane.f32.xlu2 %v3844_v23 }
0x16de   :  { %v3067_v3 = vpop.xlane.xlu0 %3066 }
0x16df   :  { %6972 = vrcp.f32 %v3067_v3  ;;  %v3094_v2 = vand.u32 2147483648, %v3067_v3  ;;  %vm3088_vm13 = vweird.f32 %v3067_v3  ;;  %v3092_v25 = vand.u32 2147483647, %v3067_v3 }
0x16e1   :  { %v3095_v55 = vor.u32 1.1754944e-38, %v3094_v2  ;;  %vm3093_vm0 = vcmp.eq.f32.partialorder %v3092_v25, 8.507059e+37 }
0x16e5   :  { %v6973_v60 = vpop.eup %6972 }
0x16e6   :  { %v3084_v7 = vmul.f32 %v6973_v60, %v3067_v3  ;;  %vm3089_vm14 = vweird.f32 %v6973_v60 }
0x16e7   :  { %vm3090_vm15 = vmor %vm3088_vm13, %vm3089_vm14 }
0x16e8   :  { %v3085_v43 = vsub.f32 1.0, %v3084_v7 }
0x16ea   :  { %v3086_v28 = vmul.f32 %v6973_v60, %v3085_v43 }
0x16ec   :  { %v3087_v0 = vadd.f32 %v6973_v60, %v3086_v28 }
0x16ee   :  { %v3091_v20 = vsel %vm3090_vm15, %v6973_v60, %v3087_v0 }
0x16ef   :  { %v3096_v1 = vsel %vm3093_vm0, %v3095_v55, %v3091_v20 }
0x16f0   :  { %v3097_v30 = vmul.f32 %v6971_v35, %v3096_v1 }
0x16f2   :  { %6606 = vst.msk [vmem:[%s9677_s7 + $0x78] sm:$0xff] %vm271_vm8, %v3097_v30  ;;  %6608 = vmatmul.msk.f32.vlgmr.msrb.gmra.mxu0 %vm271_vm8, %v3097_v30 }
0x16f3   :  { %3767 = vmatpush.msrb.mxu0 %v8129_v16 }
0x16f5   :  { %3768 = vmatpush.msrb.mxu0 %v8135_v61 }
0x16f7   :  { %3769 = vmatpush.msrb.mxu0 %v8144_v42 }
0x16f9   :  { %3770 = vmatpush.msrb.mxu0 %v8150_v45 }
0x16fa   :  { %6621 = vmatmul.msk.f32.vlgmr.msra.gmra.mxu0 %vm38_vm2, %v6617_v27 }
0x1702   :  { %6632 = vmatmul.msk.f32.vlgmr.msrb.gmra.mxu0 %vm38_vm2, %v3752_v52 }
0x170e   :  { %v4091_v11 = vpop.f32.mrf.mxu1 }
0x170f   :  { %v4094_v24 = vadd.f32 %v6646_v37, %v4091_v11 }
0x1711   :  { %6974 = vtanh.f32 %v4094_v24  ;;  %v6648_v47 = vmul.f32 -1.442695, %v4094_v24 }
0x1713   :  { %6976 = vpow2.f32 %v6648_v47 }
0x1717   :  { %v6975_v12 = vpop.eup %6974 }
0x1718   :  { %4117 = vrot.lane.b32.xlu0 %v6975_v12, %s7246_s17 }
0x1719   :  { %v6977_v34 = vpop.eup %6976 }
0x171a   :  { %v4098_v48 = vadd.f32 1.0, %v6977_v34 }
0x171c   :  { %6978 = vrcp.f32 %v4098_v48  ;;  %v4110_v43 = vand.u32 2147483648, %v4098_v48  ;;  %vm4104_vm4 = vweird.f32 %v4098_v48  ;;  %v4108_v25 = vand.u32 2147483647, %v4098_v48 }
0x171e   :  { %v4111_v28 = vor.u32 1.1754944e-38, %v4110_v43  ;;  %vm4109_vm6 = vcmp.eq.f32.partialorder %v4108_v25, 8.507059e+37 }
0x1722   :  { %v6979_v49 = vpop.eup %6978 }
0x1723   :  { %v4100_v9 = vmul.f32 %v6979_v49, %v4098_v48  ;;  %vm4105_vm3 = vweird.f32 %v6979_v49 }
0x1724   :  { %vm4106_vm5 = vmor %vm4104_vm4, %vm4105_vm3 }
0x1725   :  { %v4101_v31 = vsub.f32 1.0, %v4100_v9  ;;  %v3846_v24 = vpop.xlane.xlu2 %3845 }
0x1726   :  { %v3850_v12 = vsub.f32 %v8229_v41, %v3846_v24  ;;  %v4134_v41 = vrot.slane %v8203_v50, 1  ;;  %v3738_v50 = vrot.slane %v8217_v59, 1 }
0x1727   :  { %v4102_v58 = vmul.f32 %v6979_v49, %v4101_v31 }
0x1728   :  { %v3852_v47 = vmul.f32 1.442695, %v3850_v12 }
0x1729   :  { %v4103_v7 = vadd.f32 %v6979_v49, %v4102_v58 }
0x172b   :  { %v4107_v39 = vsel %vm4106_vm5, %v6979_v49, %v4103_v7 }
0x172c   :  { %v4112_v55 = vsel %vm4109_vm6, %v4111_v28, %v4107_v39 }
0x172d   :  { %v4115_v30 = vmul.f32 %v4112_v55, %v8186_v18 }
0x176f   :  { %v8251_v51 = vpop.f32.mrf.mxu0 }
0x1777   :  { %v3444_v8 = vpop.f32.mrf.mxu0 }
0x1778   :  { %v3450_v1 = vsel %vm271_vm8, %v3444_v8, -inf }
0x177f   :  { %v3772_v36 = vpop.f32.mrf.mxu0 }
0x1780   :  { %v3776_v35 = vrot.slane %v3772_v36, 1  ;;  %v3783_v57 = vperm.slane %v3772_v36, 0 }
0x1782   :  { %v3784_v23 = vperm.slane %v3776_v35, 0  ;;  %v8256_v3 = vsel %vm176_vm7, %v3779_v53, %v3783_v57  ;;  %v3736_v53 = vrot.slane %v8186_v18, 1 }
0x1783   :  { %v3895_v60 = vadd.f32 %v8174_v26, %v8256_v3 }
0x1784   :  { %v8261_v2 = vsel %vm176_vm7, %v3780_v19, %v3784_v23  ;;  %v3742_v35 = vperm.slane %v3736_v53, 0 }
0x1785   :  { %3915 = vmatpush.msrb.mxu3 %v3895_v60  ;;  %v3896_v56 = vadd.f32 %v8174_v26, %v8261_v2 }
0x1787   :  { %3938 = vmatpush.msra.mxu0 %v3896_v56 }
0x178a   :  { %v4118_v0 = vpop.permute.xlu0 %4117 }
0x178b   :  { %v4120_v20 = vmul.f32 %v4118_v0, %v4112_v55 }
0x178d   :  { %4122 = vrot.lane.b32.xlu1 %v4120_v20, %s7247_s20 }
0x17b7   :  { %3451 = vmax.xlane.f32.xlu1 %v3450_v1 }
0x17ff   :  { %v4123_v27 = vpop.permute.xlu1 %4122 }
0x1800   :  { %v8268_v52 = vadd.f32 %v4123_v27, %v4115_v30 }
0x1802   :  { %6980 = vtanh.f32 %v8268_v52  ;;  %v4138_v37 = vperm.slane %v8268_v52, 0 }
0x1803   :  { %6982 = vpow2.f32 %v3852_v47 }
0x1804   :  { %4140 = vrot.lane.b32.xlu1 %v4138_v37, %s7248_s21 }
0x1808   :  { %v6981_v11 = vpop.eup %6980 }
0x1809   :  { %4128 = vrot.lane.b32.xlu0 %v6981_v11, %s7246_s17  ;;  %v6983_v9 = vpop.eup %6982 }
0x180a   :  { %v3856_v31 = vsel %vm271_vm8, %v6983_v9, 0.0 }
0x180c   :  { %4148 = vrot.lane.b32.xlu1 %v8268_v52, %s7248_s21 }
0x182a   :  { %v3452_v34 = vpop.xlane.xlu1 %3451 }
0x182b   :  { %v3454_v48 = vsub.f32 %v3444_v8, %v3452_v34 }
0x182d   :  { %v3457_v49 = vmul.f32 1.442695, %v3454_v48 }
0x182f   :  { %6984 = vpow2.f32 %v3457_v49 }
0x1833   :  { %3857 = vadd.xlane.f32.xlu0 %v3856_v31 }
0x1835   :  { %v6985_v36 = vpop.eup %6984 }
0x1836   :  { %v3462_v58 = vsel %vm271_vm8, %v6985_v36, 0.0 }
0x1837   :  { %3463 = vadd.xlane.f32.xlu2 %v3462_v58 }
0x184f   :  { %3745 = vrot.lane.b32.xlu2 %v3742_v35, %s7248_s21 }
0x1876   :  { %v4141_v57 = vpop.permute.xlu1 %4140 }
0x1877   :  { %v8283_v8 = vsel %vm176_vm7, %v4134_v41, %v4141_v57 }
0x1878   :  { %6652 = vmatpush.xpose.msk.msra.mxu3 %vm38_vm2, %v8283_v8 }
0x187b   :  { %v4129_v19 = vpop.permute.xlu0 %4128 }
0x187c   :  { %v4131_v23 = vmul.f32 %v4129_v19, %v4112_v55 }
0x187e   :  { %4467 = vrot.lane.b32.xlu0 %v4131_v23, %s7247_s20  ;;  %v4149_v35 = vpop.permute.xlu1 %4148 }
0x18a6   :  { %v3858_v60 = vpop.xlane.xlu0 %3857 }
0x18a7   :  { %6986 = vrcp.f32 %v3858_v60  ;;  %v3873_v39 = vand.u32 2147483648, %v3858_v60  ;;  %v3871_v0 = vand.u32 2147483647, %v3858_v60  ;;  %vm3867_vm10 = vweird.f32 %v3858_v60 }
0x18a9   :  { %v3874_v59 = vor.u32 1.1754944e-38, %v3873_v39  ;;  %vm3872_vm14 = vcmp.eq.f32.partialorder %v3871_v0, 8.507059e+37 }
0x18aa   :  { %v3464_v7 = vpop.xlane.xlu2 %3463 }
0x18ab   :  { %6988 = vrcp.f32 %v3464_v7  ;;  %vm3485_vm11 = vweird.f32 %v3464_v7  ;;  %v3491_v55 = vand.u32 2147483648, %v3464_v7  ;;  %v3489_v11 = vand.u32 2147483647, %v3464_v7 }
0x18ad   :  { %v6987_v18 = vpop.eup %6986  ;;  %v3492_v47 = vor.u32 1.1754944e-38, %v3491_v55  ;;  %vm3490_vm0 = vcmp.eq.f32.partialorder %v3489_v11, 8.507059e+37  ;;  %v6663_v55 = vld [vmem:[%s9673_s0 + $0x16] sm:$0x3] }
0x18ae   :  { %v3863_v43 = vmul.f32 %v6987_v18, %v3858_v60  ;;  %vm3868_vm9 = vweird.f32 %v6987_v18 }
0x18af   :  { %vm3869_vm13 = vmor %vm3867_vm10, %vm3868_vm9 }
0x18b0   :  { %v3864_v56 = vsub.f32 1.0, %v3863_v43 }
0x18b1   :  { %v6989_v25 = vpop.eup %6988 }
0x18b2   :  { %v3865_v28 = vmul.f32 %v6987_v18, %v3864_v56  ;;  %v3481_v20 = vmul.f32 %v6989_v25, %v3464_v7  ;;  %v3746_v1 = vpop.permute.xlu2 %3745  ;;  %vm3486_vm12 = vweird.f32 %v6989_v25  ;;  %v4176_v7 = vrot.slane %v8256_v3, 1 }
0x18b3   :  { %v8290_v30 = vsel %vm176_vm7, %v3738_v50, %v3746_v1  ;;  %vm3487_vm15 = vmor %vm3485_vm11, %vm3486_vm12  ;;  %v4177_v56 = vrot.slane %v8261_v2, 1  ;;  %v4133_v3 = vrot.slane %v8268_v52, 1 }
0x18b4   :  { %v3866_v27 = vadd.f32 %v6987_v18, %v3865_v28  ;;  %v3482_v37 = vsub.f32 1.0, %v3481_v20  ;;  %6637 = vmatpush.xpose.msk.msra.mxu2 %vm38_vm2, %v8290_v30 }
0x18b5   :  { %v4139_v20 = vperm.slane %v4133_v3, 0 }
0x18b6   :  { %v3870_v24 = vsel %vm3869_vm13, %v6987_v18, %v3866_v27  ;;  %v3483_v12 = vmul.f32 %v6989_v25, %v3482_v37 }
0x18b7   :  { %v3875_v34 = vsel %vm3872_vm14, %v3874_v59, %v3870_v24 }
0x18b8   :  { %v3484_v48 = vadd.f32 %v6989_v25, %v3483_v12  ;;  %v3876_v49 = vmul.f32 %v6983_v9, %v3875_v34  ;;  %v6650_v9 = vld [vmem:[%s9675_s1 + $0xa0] sm:$0xff] }
0x18ba   :  { %v3488_v31 = vsel %vm3487_vm15, %v6989_v25, %v3484_v48  ;;  %6639 = vst.msk [vmem:[%s9677_s7 + $0x90] sm:$0xff] %vm271_vm8, %v3876_v49  ;;  %6641 = vmatmul.msk.f32.vlgmr.msrb.gmra.mxu3 %vm271_vm8, %v3876_v49 }
0x18bb   :  { %v3493_v58 = vsel %vm3490_vm0, %v3492_v47, %v3488_v31  ;;  %4483 = vmatpush.msrb.mxu3 %v8095_v33  ;;  %v4135_v47 = vrot.slane %v8290_v30, 1 }
0x18bc   :  { %v3494_v53 = vmul.f32 %v6985_v36, %v3493_v58  ;;  %v6634_v36 = vld [vmem:[%s9675_s1 + $0x98] sm:$0xff] }
0x18bd   :  { %4484 = vmatpush.msrb.mxu3 %v8101_v17 }
0x18be   :  { %6623 = vst.msk [vmem:[%s9677_s7 + $0x88] sm:$0xff] %vm271_vm8, %v3494_v53  ;;  %6625 = vmatmul.msk.f32.vlgmr.msrb.gmra.mxu2 %vm271_vm8, %v3494_v53 }
0x18bf   :  { %4164 = vmatpush.msrb.mxu2 %v8129_v16  ;;  %4485 = vmatpush.msrb.mxu3 %v8110_v22 }
0x18c1   :  { %4165 = vmatpush.msrb.mxu2 %v8135_v61  ;;  %4486 = vmatpush.msrb.mxu3 %v8116_v14 }
0x18c2   :  { %6653 = vmatmul.msk.f32.vlgmr.msra.gmra.mxu3 %vm38_vm2, %v6650_v9 }
0x18c3   :  { %4166 = vmatpush.msrb.mxu2 %v8144_v42 }
0x18c5   :  { %4167 = vmatpush.msrb.mxu2 %v8150_v45 }
0x18c6   :  { %6638 = vmatmul.msk.f32.vlgmr.msra.gmra.mxu2 %vm38_vm2, %v6634_v36 }
0x18ce   :  { %6649 = vmatmul.msk.f32.vlgmr.msrb.gmra.mxu2 %vm38_vm2, %v4149_v35 }
0x18f0   :  { %v4468_v41 = vpop.permute.xlu0 %4467 }
0x18f1   :  { %6664 = vmatmul.msk.f32.vlgmr.msrb.gmra.mxu3 %vm38_vm2, %v4468_v41 }
0x193d   :  { %v8338_v1 = vpop.f32.mrf.mxu3 }
0x1941   :  { %v8322_v57 = vpop.f32.mrf.mxu2 }
0x1945   :  { %v4212_v2 = vpop.f32.mrf.mxu3 }
0x1946   :  { %v4241_v59 = vsel %vm271_vm8, %v4212_v2, -inf }
0x1949   :  { %v3841_v19 = vpop.f32.mrf.mxu2 }
0x194a   :  { %v3847_v23 = vsel %vm271_vm8, %v3841_v19, -inf }
0x194b   :  { %3848 = vmax.xlane.f32.xlu2 %v3847_v23 }
0x1951   :  { %v4169_v60 = vpop.f32.mrf.mxu2 }
0x1952   :  { %v4173_v18 = vrot.slane %v4169_v60, 1  ;;  %v4180_v43 = vperm.slane %v4169_v60, 0 }
0x1954   :  { %v4181_v25 = vperm.slane %v4173_v18, 0  ;;  %v8328_v50 = vsel %vm176_vm7, %v4176_v7, %v4180_v43 }
0x1955   :  { %v4292_v39 = vadd.f32 %v8174_v26, %v8328_v50 }
0x1956   :  { %v8333_v28 = vsel %vm176_vm7, %v4177_v56, %v4181_v25 }
0x1957   :  { %4312 = vmatpush.msra.mxu1 %v4292_v39  ;;  %v4293_v0 = vadd.f32 %v8174_v26, %v8333_v28 }
0x1959   :  { %4335 = vmatpush.msra.mxu2 %v4293_v0 }
0x1963   :  { %4142 = vrot.lane.b32.xlu2 %v4139_v20, %s7248_s21 }
0x1974   :  { %v4488_v27 = vpop.f32.mrf.mxu3 }
0x1975   :  { %v4491_v37 = vadd.f32 %v6663_v55, %v4488_v27 }
0x1977   :  { %6990 = vtanh.f32 %v4491_v37  ;;  %v6665_v12 = vmul.f32 -1.442695, %v4491_v37 }
0x1979   :  { %6992 = vpow2.f32 %v6665_v12 }
0x197d   :  { %v6991_v11 = vpop.eup %6990 }
0x197e   :  { %4514 = vrot.lane.b32.xlu1 %v6991_v11, %s7246_s17 }
0x197f   :  { %v6993_v49 = vpop.eup %6992 }
0x1980   :  { %v4495_v31 = vadd.f32 1.0, %v6993_v49 }
0x1982   :  { %6994 = vrcp.f32 %v4495_v31  ;;  %v4507_v41 = vand.u32 2147483648, %v4495_v31  ;;  %vm4501_vm4 = vweird.f32 %v4495_v31  ;;  %v4505_v30 = vand.u32 2147483647, %v4495_v31 }
0x1984   :  { %v4508_v60 = vor.u32 1.1754944e-38, %v4507_v41  ;;  %vm4506_vm6 = vcmp.eq.f32.partialorder %v4505_v30, 8.507059e+37 }
0x1988   :  { %v6995_v58 = vpop.eup %6994 }
0x1989   :  { %v4497_v53 = vmul.f32 %v6995_v58, %v4495_v31  ;;  %vm4502_vm3 = vweird.f32 %v6995_v58 }
0x198a   :  { %vm4503_vm5 = vmor %vm4501_vm4, %vm4502_vm3 }
0x198b   :  { %v4498_v9 = vsub.f32 1.0, %v4497_v53 }
0x198d   :  { %v4499_v36 = vmul.f32 %v6995_v58, %v4498_v9 }
0x198f   :  { %v4500_v35 = vadd.f32 %v6995_v58, %v4499_v36 }
0x1991   :  { %v4504_v23 = vsel %vm4503_vm5, %v6995_v58, %v4500_v35 }
0x1992   :  { %v8352_v7 = vsel %vm4506_vm6, %v4508_v60, %v4504_v23 }
0x1993   :  { %v4512_v11 = vmul.f32 %v8352_v7, %v8268_v52 }
0x19a8   :  { %4242 = vmax.xlane.f32.xlu1 %v4241_v59 }
0x19be   :  { %v3849_v24 = vpop.xlane.xlu2 %3848 }
0x19bf   :  { %v3851_v56 = vsub.f32 %v3841_v19, %v3849_v24 }
0x19c1   :  { %v3854_v25 = vmul.f32 1.442695, %v3851_v56 }
0x19c3   :  { %6996 = vpow2.f32 %v3854_v25 }
0x19c6   :  { %v4143_v34 = vpop.permute.xlu2 %4142 }
0x19c7   :  { %v8348_v48 = vsel %vm176_vm7, %v4135_v47, %v4143_v34 }
0x19c8   :  { %6654 = vmatpush.xpose.msk.msrb.mxu0 %vm38_vm2, %v8348_v48 }
0x19c9   :  { %v6997_v39 = vpop.eup %6996 }
0x19ca   :  { %v3859_v0 = vsel %vm271_vm8, %v6997_v39, 0.0 }
0x19f0   :  { %v4515_v18 = vpop.permute.xlu1 %4514 }
0x19f1   :  { %v4517_v43 = vmul.f32 %v4515_v18, %v8352_v7 }
0x19f3   :  { %4519 = vrot.lane.b32.xlu0 %v4517_v43, %s7247_s20 }
0x1a1b   :  { %v4243_v3 = vpop.xlane.xlu1 %4242 }
0x1a1c   :  { %v4247_v20 = vsub.f32 %v4212_v2, %v4243_v3 }
0x1a1d   :  { %3860 = vadd.xlane.f32.xlu0 %v3859_v0 }
0x1a1e   :  { %v4249_v55 = vmul.f32 1.442695, %v4247_v20 }
0x1a20   :  { %6998 = vpow2.f32 %v4249_v55 }
0x1a26   :  { %v6999_v27 = vpop.eup %6998 }
0x1a27   :  { %v4253_v37 = vsel %vm271_vm8, %v6999_v27, 0.0 }
0x1a28   :  { %4254 = vadd.xlane.f32.xlu0 %v4253_v37 }
0x1a65   :  { %v4520_v59 = vpop.permute.xlu0 %4519 }
0x1a66   :  { %v8360_v12 = vadd.f32 %v4520_v59, %v4512_v11  ;;  %v4531_v11 = vrot.slane %v8283_v8, 1 }
0x1a68   :  { %7000 = vtanh.f32 %v8360_v12  ;;  %v4535_v19 = vperm.slane %v8360_v12, 0 }
0x1a6a   :  { %4537 = vrot.lane.b32.xlu2 %v4535_v19, %s7248_s21 }
0x1a6e   :  { %v7001_v2 = vpop.eup %7000 }
0x1a6f   :  { %4525 = vrot.lane.b32.xlu1 %v7001_v2, %s7246_s17 }
0x1a77   :  { %4545 = vrot.lane.b32.xlu1 %v8360_v12, %s7248_s21 }
0x1a90   :  { %v3861_v24 = vpop.xlane.xlu0 %3860 }
0x1a91   :  { %7002 = vrcp.f32 %v3861_v24  ;;  %v3888_v52 = vand.u32 2147483648, %v3861_v24  ;;  %vm3882_vm9 = vweird.f32 %v3861_v24  ;;  %v3886_v31 = vand.u32 2147483647, %v3861_v24 }
0x1a93   :  { %v3889_v9 = vor.u32 1.1754944e-38, %v3888_v52  ;;  %vm3887_vm12 = vcmp.eq.f32.partialorder %v3886_v31, 8.507059e+37  ;;  %v9683_v52 = vmov 0   ;;  %v4573_v31 = vrot.slane %v8328_v50, 1 }
0x1a94   :  { %6754 = vset.pattern.permute.xlu2 %v9683_v52  ;;  %6753 = vset.pattern.permute.xlu0 %v9683_v52 }
0x1a97   :  { %v7003_v47 = vpop.eup %7002 }
0x1a98   :  { %v3878_v34 = vmul.f32 %v7003_v47, %v3861_v24  ;;  %vm3883_vm10 = vweird.f32 %v7003_v47 }
0x1a99   :  { %vm3884_vm11 = vmor %vm3882_vm9, %vm3883_vm10 }
0x1a9a   :  { %v3879_v49 = vsub.f32 1.0, %v3878_v34 }
0x1a9b   :  { %v4255_v58 = vpop.xlane.xlu0 %4254 }
0x1a9c   :  { %v3880_v53 = vmul.f32 %v7003_v47, %v3879_v49  ;;  %7004 = vrcp.f32 %v4255_v58  ;;  %v4270_v43 = vand.u32 2147483648, %v4255_v58  ;;  %v4268_v25 = vand.u32 2147483647, %v4255_v58 }
0x1a9d   :  { %vm4264_vm14 = vweird.f32 %v4255_v58 }
0x1a9e   :  { %v3881_v36 = vadd.f32 %v7003_v47, %v3880_v53  ;;  %v4271_v3 = vor.u32 1.1754944e-38, %v4270_v43  ;;  %vm4269_vm0 = vcmp.eq.f32.partialorder %v4268_v25, 8.507059e+37 }
0x1aa0   :  { %v3885_v35 = vsel %vm3884_vm11, %v7003_v47, %v3881_v36 }
0x1aa1   :  { %v3890_v41 = vsel %vm3887_vm12, %v3889_v9, %v3885_v35  ;;  %v4574_v9 = vrot.slane %v8333_v28, 1 }
0x1aa2   :  { %v7005_v30 = vpop.eup %7004  ;;  %v3891_v23 = vmul.f32 %v6997_v39, %v3890_v41  ;;  %v6651_v39 = vld [vmem:[%s9675_s1 + $0xa8] sm:$0xff] }
0x1aa3   :  { %v4260_v60 = vmul.f32 %v7005_v30, %v4255_v58  ;;  %vm4265_vm13 = vweird.f32 %v7005_v30 }
0x1aa4   :  { %6640 = vst.msk [vmem:[%s9677_s7 + $0x98] sm:$0xff] %vm271_vm8, %v3891_v23  ;;  %6642 = vmatmul.msk.f32.vlgmr.msra.gmra.mxu0 %vm271_vm8, %v3891_v23  ;;  %vm4266_vm15 = vmor %vm4264_vm14, %vm4265_vm13  ;;  %vm384_vm13 = vcmask 58368  }
0x1aa5   :  { %v4261_v18 = vsub.f32 1.0, %v4260_v60  ;;  %4561 = vmatpush.msra.mxu0 %v8129_v16 }
0x1aa7   :  { %v4262_v56 = vmul.f32 %v7005_v30, %v4261_v18  ;;  %4562 = vmatpush.msra.mxu0 %v8135_v61 }
0x1aa9   :  { %v4263_v0 = vadd.f32 %v7005_v30, %v4262_v56  ;;  %4563 = vmatpush.msra.mxu0 %v8144_v42  ;;  %v6680_v56 = vld [vmem:[%s9673_s0 + $0x18] sm:$0x3] }
0x1aab   :  { %v4267_v20 = vsel %vm4266_vm15, %v7005_v30, %v4263_v0  ;;  %4564 = vmatpush.msra.mxu0 %v8150_v45 }
0x1aac   :  { %v4272_v55 = vsel %vm4269_vm0, %v4271_v3, %v4267_v20  ;;  %6655 = vmatmul.msk.f32.vlgmr.msrb.gmra.mxu0 %vm38_vm2, %v6651_v39 }
0x1aad   :  { %v4273_v37 = vmul.f32 %v6999_v27, %v4272_v55  ;;  %v6667_v27 = vld [vmem:[%s9675_s1 + $0xb0] sm:$0xff] }
0x1aaf   :  { %6656 = vst.msk [vmem:[%s9677_s7 + $0xa0] sm:$0xff] %vm271_vm8, %v4273_v37  ;;  %6658 = vmatmul.msk.f32.vlgmr.msra.gmra.mxu1 %vm271_vm8, %v4273_v37 }
0x1ac4   :  { %v4538_v59 = vpop.permute.xlu2 %4537 }
0x1ac5   :  { %v8388_v19 = vsel %vm176_vm7, %v4531_v11, %v4538_v59 }
0x1ac6   :  { %6669 = vmatpush.xpose.msk.msrb.mxu1 %vm38_vm2, %v8388_v19 }
0x1ac9   :  { %6670 = vmatmul.msk.f32.vlgmr.msrb.gmra.mxu1 %vm38_vm2, %v6667_v27 }
0x1aca   :  { %4880 = vmatpush.msra.mxu1 %v8095_v33 }
0x1acc   :  { %4881 = vmatpush.msra.mxu1 %v8101_v17 }
0x1ace   :  { %4882 = vmatpush.msra.mxu1 %v8110_v22 }
0x1ad0   :  { %4883 = vmatpush.msra.mxu1 %v8116_v14 }
0x1ae1   :  { %v4526_v8 = vpop.permute.xlu1 %4525 }
0x1ae2   :  { %v4528_v2 = vmul.f32 %v4526_v8, %v8352_v7 }
0x1ae4   :  { %4864 = vrot.lane.b32.xlu0 %v4528_v2, %s7247_s20 }
0x1ae9   :  { %v4546_v24 = vpop.permute.xlu1 %4545 }
0x1aea   :  { %6666 = vmatmul.msk.f32.vlgmr.msra.gmra.mxu0 %vm38_vm2, %v4546_v24 }
0x1b21   :  { %v8403_v47 = vpop.f32.mrf.mxu0 }
0x1b29   :  { %v4238_v34 = vpop.f32.mrf.mxu0 }
0x1b2a   :  { %v4244_v33 = vsel %vm271_vm8, %v4238_v34, -inf }
0x1b2b   :  { %4245 = vmax.xlane.f32.xlu2 %v4244_v33 }
0x1b2c   :  { %v8408_v17 = vpop.f32.mrf.mxu1 }
0x1b46   :  { %v8410_v22 = vpop.f32.mrf.mxu1 }
0x1b47   :  { %v4638_v14 = vsel %vm271_vm8, %v8410_v22, -inf }
0x1b48   :  { %4639 = vmax.xlane.f32.xlu2 %v4638_v14 }
0x1b56   :  { %v4865_v7 = vpop.permute.xlu0 %4864 }
0x1b57   :  { %6681 = vmatmul.msk.f32.vlgmr.msra.gmra.mxu1 %vm38_vm2, %v4865_v7 }
0x1b60   :  { %376 = vperm.xlu2 %6754, %v7594_v62  }
0x1b67   :  { %v4566_v49 = vpop.f32.mrf.mxu0 }
0x1b68   :  { %v4570_v58 = vrot.slane %v4566_v49, 1  ;;  %v4577_v53 = vperm.slane %v4566_v49, 0 }
0x1b6a   :  { %v4578_v36 = vperm.slane %v4570_v58, 0  ;;  %v8419_v35 = vsel %vm176_vm7, %v4573_v31, %v4577_v53 }
0x1b6b   :  { %v4689_v41 = vadd.f32 %v8174_v26, %v8419_v35 }
0x1b6c   :  { %v8424_v30 = vsel %vm176_vm7, %v4574_v9, %v4578_v36 }
0x1b6d   :  { %4709 = vmatpush.msra.mxu3 %v4689_v41  ;;  %v4690_v23 = vadd.f32 %v8174_v26, %v8424_v30  ;;  %v4530_v26 = vrot.slane %v8360_v12, 1 }
0x1b6f   :  { %4732 = vmatpush.msrb.mxu0 %v4690_v23  ;;  %v4536_v3 = vperm.slane %v4530_v26, 0  ;;  %v378_v26 = vlaneseq }
0x1b9e   :  { %v4246_v50 = vpop.xlane.xlu2 %4245 }
0x1b9f   :  { %v4248_v60 = vsub.f32 %v4238_v34, %v4246_v50 }
0x1ba1   :  { %v4251_v18 = vmul.f32 1.442695, %v4248_v60 }
0x1ba3   :  { %7006 = vpow2.f32 %v4251_v18 }
0x1ba9   :  { %v7007_v28 = vpop.eup %7006 }
0x1baa   :  { %v4256_v43 = vsel %vm271_vm8, %v7007_v28, 0.0 }
0x1bab   :  { %4257 = vadd.xlane.f32.xlu1 %v4256_v43 }
0x1bd4   :  { %v4885_v25 = vpop.f32.mrf.mxu1 }
0x1bd5   :  { %v4888_v0 = vadd.f32 %v6680_v56, %v4885_v25  ;;  %v4532_v25 = vrot.slane %v8348_v48, 1  ;;  %v4640_v48 = vpop.xlane.xlu2 %4639 }
0x1bd7   :  { %7008 = vtanh.f32 %v4888_v0  ;;  %v6682_v55 = vmul.f32 -1.442695, %v4888_v0 }
0x1bdd   :  { %v7009_v39 = vpop.eup %7008 }
0x1bde   :  { %4911 = vrot.lane.b32.xlu0 %v7009_v39, %s7246_s17 }
0x1be6   :  { %4539 = vrot.lane.b32.xlu0 %v4536_v3, %s7248_s21  ;;  %v8452_v3 = vshrl.u32 %v378_v26, 7 }
0x1be8   :  { %6755 = vset.pattern.permute.xlu1 %v8452_v3  ;;  %6756 = vset.pattern.permute.xlu2 %v8452_v3 }
0x1c1e   :  { %v4258_v20 = vpop.xlane.xlu1 %4257 }
0x1c1f   :  { %7010 = vrcp.f32 %v4258_v20  ;;  %vm4279_vm3 = vweird.f32 %v4258_v20  ;;  %v4285_v8 = vand.u32 2147483648, %v4258_v20  ;;  %v4283_v24 = vand.u32 2147483647, %v4258_v20 }
0x1c20   :  { %7012 = vpow2.f32 %v6682_v55 }
0x1c21   :  { %v4286_v33 = vor.u32 1.1754944e-38, %v4285_v8  ;;  %vm4284_vm6 = vcmp.eq.f32.partialorder %v4283_v24, 8.507059e+37 }
0x1c25   :  { %v7011_v37 = vpop.eup %7010 }
0x1c26   :  { %v4275_v11 = vmul.f32 %v7011_v37, %v4258_v20  ;;  %vm4280_vm4 = vweird.f32 %v7011_v37  ;;  %v7013_v34 = vpop.eup %7012 }
0x1c27   :  { %vm4281_vm5 = vmor %vm4279_vm3, %vm4280_vm4  ;;  %v4892_v14 = vadd.f32 1.0, %v7013_v34  ;;  %v4644_v34 = vsub.f32 %v8410_v22, %v4640_v48 }
0x1c28   :  { %v4276_v59 = vsub.f32 1.0, %v4275_v11  ;;  %v399_v11 = vld [vmem:[%s9678_s2] sm:$0x3] }
0x1c29   :  { %7014 = vrcp.f32 %v4892_v14  ;;  %v4904_v23 = vand.u32 2147483648, %v4892_v14  ;;  %vm4898_vm10 = vweird.f32 %v4892_v14  ;;  %v4902_v50 = vand.u32 2147483647, %v4892_v14 }
0x1c2a   :  { %v4277_v27 = vmul.f32 %v7011_v37, %v4276_v59  ;;  %v408_v8 = vperm.slane %v399_v11, 1 }
0x1c2b   :  { %v4905_v18 = vor.u32 1.1754944e-38, %v4904_v23  ;;  %vm4903_vm12 = vcmp.eq.f32.partialorder %v4902_v50, 8.507059e+37 }
0x1c2c   :  { %v4278_v2 = vadd.f32 %v7011_v37, %v4277_v27 }
0x1c2e   :  { %v4282_v7 = vsel %vm4281_vm5, %v7011_v37, %v4278_v2 }
0x1c2f   :  { %v4287_v49 = vsel %vm4284_vm6, %v4286_v33, %v4282_v7  ;;  %v7015_v58 = vpop.eup %7014  ;;  %v401_v33 = vperm.slane %v399_v11, 0 }
0x1c30   :  { %v4288_v31 = vmul.f32 %v7007_v28, %v4287_v49  ;;  %v4894_v53 = vmul.f32 %v7015_v58, %v4892_v14  ;;  %vm4899_vm9 = vweird.f32 %v7015_v58  ;;  %v4646_v14 = vmul.f32 1.442695, %v4644_v34  ;;  %v8504_v34 = vld [vmem:[%s9670_s4 + $0x18] sm:$0xff] }
0x1c31   :  { %vm4900_vm11 = vmor %vm4898_vm10, %vm4899_vm9 }
0x1c32   :  { %6657 = vst.msk [vmem:[%s9677_s7 + $0xa8] sm:$0xff] %vm271_vm8, %v4288_v31  ;;  %6659 = vmatmul.msk.f32.vlgmr.msra.gmra.mxu2 %vm271_vm8, %v4288_v31  ;;  %v4895_v9 = vsub.f32 1.0, %v4894_v53  ;;  %v4928_v31 = vrot.slane %v8388_v19, 1 }
0x1c34   :  { %v4896_v36 = vmul.f32 %v7015_v58, %v4895_v9 }
0x1c36   :  { %v4897_v41 = vadd.f32 %v7015_v58, %v4896_v36 }
0x1c38   :  { %v4901_v60 = vsel %vm4900_vm11, %v7015_v58, %v4897_v41 }
0x1c39   :  { %v4906_v43 = vsel %vm4903_vm12, %v4905_v18, %v4901_v60 }
0x1c3a   :  { %v4909_v20 = vmul.f32 %v4906_v43, %v8360_v12 }
0x1c50   :  { %v4912_v28 = vpop.permute.xlu0 %4911 }
0x1c51   :  { %v4914_v56 = vmul.f32 %v4912_v28, %v4906_v43  ;;  %v6668_v28 = vld [vmem:[%s9675_s1 + $0xb8] sm:$0xff] }
0x1c53   :  { %4916 = vrot.lane.b32.xlu0 %v4914_v56, %s7247_s20 }
0x1c58   :  { %v4540_v0 = vpop.permute.xlu0 %4539 }
0x1c59   :  { %v8443_v39 = vsel %vm176_vm7, %v4532_v25, %v4540_v0 }
0x1c5a   :  { %6671 = vmatpush.xpose.msk.msrb.mxu2 %vm38_vm2, %v8443_v39 }
0x1c5b   :  { %373 = vperm.xlu0 %6753, %v7507_v13  }
0x1c5d   :  { %6672 = vmatmul.msk.f32.vlgmr.msrb.gmra.mxu2 %vm38_vm2, %v6668_v28 }
0x1c5e   :  { %4958 = vmatpush.msra.mxu2 %v8129_v16 }
0x1c60   :  { %4959 = vmatpush.msra.mxu2 %v8135_v61  ;;  %v8461_v61 = vand.u32 127, %v378_v26 }
0x1c62   :  { %4960 = vmatpush.msra.mxu2 %v8144_v42  ;;  %v377_v42 = vpop.permute.xlu2 %376 }
0x1c63   :  { %v381_v12 = vperm.slane %v377_v42, %v8461_v61 }
0x1c64   :  { %4961 = vmatpush.msra.mxu2 %v8150_v45 }
0x1cc5   :  { %v4917_v55 = vpop.permute.xlu0 %4916 }
0x1cc6   :  { %v8457_v37 = vadd.f32 %v4917_v55, %v4909_v20 }
0x1cc8   :  { %7016 = vtanh.f32 %v8457_v37  ;;  %v4932_v16 = vperm.slane %v8457_v37, 0 }
0x1cc9   :  { %7018 = vpow2.f32 %v4646_v14  ;;  %v6684_v14 = vld [vmem:[%s9675_s1 + $0xc0] sm:$0xff] }
0x1cca   :  { %4934 = vrot.lane.b32.xlu2 %v4932_v16, %s7248_s21 }
0x1ccd   :  { %v374_v45 = vpop.permute.xlu0 %373 }
0x1cce   :  { %v7017_v59 = vpop.eup %7016  ;;  %v380_v27 = vperm.slane %v374_v45, %v8461_v61 }
0x1ccf   :  { %4922 = vrot.lane.b32.xlu0 %v7017_v59, %s7246_s17  ;;  %v7019_v7 = vpop.eup %7018 }
0x1cd0   :  { %v382_v2 = vsel %vm93_vm1, %v381_v12, %v380_v27  ;;  %v4650_v49 = vsel %vm271_vm8, %v7019_v7, 0.0 }
0x1cd1   :  { %v385_v24 = vsel %vm384_vm13, %v382_v2, -inf }
0x1cd2   :  { %386 = vmax.xlane.f32.xlu1 %v385_v24  ;;  %413 = vperm.xlu2 %6756, %v408_v8  }
0x1cda   :  { %6758 = vset.pattern.permute.xlu2 %v9683_v52 }
0x1ceb   :  { %406 = vperm.xlu1 %6755, %v401_v33   ;;  %v8510_v33 = vld [vmem:[%s9670_s4 + $0x10] sm:$0xff] }
0x1cf3   :  { %6757 = vset.pattern.permute.xlu1 %v9683_v52 }
0x1cf9   :  { %4651 = vadd.xlane.f32.xlu0 %v4650_v49  ;;  %v8525_v49 = vld [vmem:[%s9670_s4] sm:$0xff] }
0x1d24   :  { %v4935_v58 = vpop.permute.xlu2 %4934 }
0x1d25   :  { %v8478_v53 = vsel %vm176_vm7, %v4928_v31, %v4935_v58  ;;  %v8530_v58 = vpop.f32.mrf.mxu2 }
0x1d26   :  { %6686 = vmatpush.xpose.msk.msrb.mxu3 %vm38_vm2, %v8478_v53 }
0x1d2c   :  { %v414_v18 = vpop.permute.xlu2 %413 }
0x1d41   :  { %v4923_v22 = vpop.permute.xlu0 %4922 }
0x1d42   :  { %v4925_v9 = vmul.f32 %v4923_v22, %v4906_v43 }
0x1d44   :  { %5261 = vrot.lane.b32.xlu2 %v4925_v9, %s7247_s20 }
0x1d45   :  { %v387_v36 = vpop.xlane.xlu1 %386 }
0x1d46   :  { %v390_v41 = vperm.slane %v387_v36, 1  ;;  %v389_v60 = vperm.slane %v387_v36, 0 }
0x1d48   :  { %v394_v23 = vsub.f32 %v7594_v62, %v390_v41  ;;  %v393_v19 = vsub.f32 %v7507_v13, %v389_v60 }
0x1d4a   :  { %v397_v50 = vmul.f32 1.442695, %v394_v23  ;;  %v395_v43 = vmul.f32 1.442695, %v393_v19 }
0x1d4c   :  { %7020 = vpow2.f32 %v397_v50  ;;  %v8535_v50 = vpop.f32.mrf.mxu2 }
0x1d4d   :  { %7022 = vpow2.f32 %v395_v43  ;;  %v4641_v19 = vsel %vm271_vm8, %v8535_v50, -inf }
0x1d4e   :  { %4642 = vmax.xlane.f32.xlu0 %v4641_v19  ;;  %v9681_v19 = vmov 1  }
0x1d52   :  { %v7021_v56 = vpop.eup %7020 }
0x1d53   :  { %v8489_v25 = vmul.f32 %v7021_v56, %v414_v18  ;;  %v7023_v0 = vpop.eup %7022 }
0x1d55   :  { %425 = vperm.xlu2 %6758, %v8489_v25  }
0x1d5d   :  { %v407_v26 = vpop.permute.xlu1 %406 }
0x1d5e   :  { %v8492_v48 = vmul.f32 %v7023_v0, %v407_v26 }
0x1d60   :  { %422 = vperm.xlu1 %6757, %v8492_v48  }
0x1d68   :  { %6762 = vset.pattern.permute.xlu1 %v8452_v3 }
0x1d6c   :  { %v4652_v20 = vpop.xlane.xlu0 %4651 }
0x1d6d   :  { %7024 = vrcp.f32 %v4652_v20  ;;  %v4667_v45 = vand.u32 2147483648, %v4652_v20  ;;  %v4665_v59 = vand.u32 2147483647, %v4652_v20  ;;  %vm4661_vm15 = vweird.f32 %v4652_v20 }
0x1d6f   :  { %v4668_v27 = vor.u32 1.1754944e-38, %v4667_v45  ;;  %vm4666_vm3 = vcmp.eq.f32.partialorder %v4665_v59, 8.507059e+37 }
0x1d73   :  { %v7025_v55 = vpop.eup %7024 }
0x1d74   :  { %v4657_v16 = vmul.f32 %v7025_v55, %v4652_v20  ;;  %vm4662_vm14 = vweird.f32 %v7025_v55 }
0x1d75   :  { %vm4663_vm0 = vmor %vm4661_vm15, %vm4662_vm14 }
0x1d76   :  { %v4658_v42 = vsub.f32 1.0, %v4657_v16 }
0x1d78   :  { %v4659_v11 = vmul.f32 %v7025_v55, %v4658_v42 }
0x1d7a   :  { %v4660_v12 = vadd.f32 %v7025_v55, %v4659_v11 }
0x1d7c   :  { %v4664_v8 = vsel %vm4663_vm0, %v7025_v55, %v4660_v12 }
0x1d7d   :  { %v4669_v2 = vsel %vm4666_vm3, %v4668_v27, %v4664_v8 }
0x1d7e   :  { %v4670_v24 = vmul.f32 %v7019_v7, %v4669_v2  ;;  %v8519_v7 = vld [vmem:[%s9670_s4 + $0x8] sm:$0xff] }
0x1d80   :  { %6673 = vst.msk [vmem:[%s9677_s7 + $0xb0] sm:$0xff] %vm271_vm8, %v4670_v24  ;;  %6675 = vmatmul.msk.f32.vlgmr.msra.gmra.mxu3 %vm271_vm8, %v4670_v24 }
0x1d81   :  { %5277 = vmatpush.msra.mxu3 %v8504_v34 }
0x1d83   :  { %5278 = vmatpush.msra.mxu3 %v8510_v33 }
0x1d85   :  { %5279 = vmatpush.msra.mxu3 %v8519_v7 }
0x1d87   :  { %5280 = vmatpush.msra.mxu3 %v8525_v49 }
0x1d88   :  { %6687 = vmatmul.msk.f32.vlgmr.msrb.gmra.mxu3 %vm38_vm2, %v6684_v14 }
0x1d9e   :  { %v5262_v31 = vpop.permute.xlu2 %5261 }
0x1d9f   :  { %6698 = vmatmul.msk.f32.vlgmr.msra.gmra.mxu3 %vm38_vm2, %v5262_v31 }
0x1daf   :  { %v426_v22 = vpop.permute.xlu2 %425 }
0x1db0   :  { %v428_v36 = vperm.slane %v426_v22, %v8461_v61 }
0x1dd2   :  { %v423_v9 = vpop.permute.xlu1 %422 }
0x1dd3   :  { %v427_v41 = vperm.slane %v423_v9, %v8461_v61 }
0x1dd5   :  { %v429_v23 = vsel %vm93_vm1, %v428_v36, %v427_v41 }
0x1dd6   :  { %v431_v60 = vsel %vm384_vm13, %v429_v23, 0.0 }
0x1dd7   :  { %432 = vadd.xlane.f32.xlu1 %v431_v60 }
0x1e4a   :  { %v433_v18 = vpop.xlane.xlu1 %432 }
0x1e4b   :  { %v434_v28 = vmax.f32 %v433_v18, 1e-30  ;;  %v4927_v18 = vrot.slane %v8457_v37, 1 }
0x1e4d   :  { %v436_v56 = vperm.slane %v434_v28, 0  ;;  %v437_v43 = vperm.slane %v434_v28, 1  ;;  %v4933_v28 = vperm.slane %v4927_v18, 0 }
0x1e4f   :  { %7026 = vrcp.f32 %v436_v56  ;;  %v451_v45 = vand.u32 2147483648, %v436_v56  ;;  %v466_v11 = vand.u32 2147483648, %v437_v43  ;;  %v449_v12 = vand.u32 2147483647, %v436_v56 }
0x1e50   :  { %7028 = vrcp.f32 %v437_v43  ;;  %v464_v8 = vand.u32 2147483647, %v437_v43  ;;  %vm445_vm6 = vweird.f32 %v436_v56  ;;  %vm460_vm9 = vweird.f32 %v437_v43 }
0x1e51   :  { %v452_v14 = vor.u32 1.1754944e-38, %v451_v45  ;;  %v467_v31 = vor.u32 1.1754944e-38, %v466_v11  ;;  %vm450_vm12 = vcmp.eq.f32.partialorder %v449_v12, 8.507059e+37 }
0x1e52   :  { %vm465_vm14 = vcmp.eq.f32.partialorder %v464_v8, 8.507059e+37 }
0x1e55   :  { %v7027_v0 = vpop.eup %7026 }
0x1e56   :  { %v7029_v26 = vpop.eup %7028  ;;  %v441_v20 = vmul.f32 %v7027_v0, %v436_v56  ;;  %vm446_vm4 = vweird.f32 %v7027_v0  ;;  %v4643_v56 = vpop.xlane.xlu0 %4642 }
0x1e57   :  { %v456_v55 = vmul.f32 %v7029_v26, %v437_v43  ;;  %vm461_vm5 = vweird.f32 %v7029_v26  ;;  %vm447_vm10 = vmor %vm445_vm6, %vm446_vm4 }
0x1e58   :  { %v442_v16 = vsub.f32 1.0, %v441_v20  ;;  %vm462_vm11 = vmor %vm460_vm9, %vm461_vm5 }
0x1e59   :  { %v457_v42 = vsub.f32 1.0, %v456_v55 }
0x1e5a   :  { %v443_v59 = vmul.f32 %v7027_v0, %v442_v16 }
0x1e5b   :  { %v458_v27 = vmul.f32 %v7029_v26, %v457_v42 }
0x1e5c   :  { %v444_v2 = vadd.f32 %v7027_v0, %v443_v59  ;;  %v4645_v59 = vsub.f32 %v8535_v50, %v4643_v56 }
0x1e5d   :  { %v459_v24 = vadd.f32 %v7029_v26, %v458_v27 }
0x1e5e   :  { %v448_v22 = vsel %vm447_vm10, %v7027_v0, %v444_v2  ;;  %v4648_v12 = vmul.f32 1.442695, %v4645_v59 }
0x1e5f   :  { %v463_v9 = vsel %vm462_vm11, %v7029_v26, %v459_v24  ;;  %v453_v36 = vsel %vm450_vm12, %v452_v14, %v448_v22  ;;  %v8575_v22 = vpop.f32.mrf.mxu3 }
0x1e60   :  { %v468_v41 = vsel %vm465_vm14, %v467_v31, %v463_v9  ;;  %v454_v23 = vmul.f32 %v453_v36, %v8492_v48  ;;  %7030 = vpow2.f32 %v4648_v12 }
0x1e61   :  { %v469_v60 = vmul.f32 %v468_v41, %v8489_v25  ;;  %v6507_v25 = vld [vmem:[%s9678_s2 + $0x2] sm:$0x3]  ;;  %v4929_v41 = vrot.slane %v8443_v39, 1 }
0x1e62   :  { %473 = vperm.xlu2 %6758, %v454_v23   ;;  %v796_v48 = vperm.slane %v6507_v25, 0 }
0x1e63   :  { %476 = vperm.xlu0 %6753, %v469_v60  }
0x1e66   :  { %v7031_v31 = vpop.eup %7030 }
0x1e67   :  { %v4653_v50 = vsel %vm271_vm8, %v7031_v31, 0.0  ;;  %v8577_v36 = vpop.f32.mrf.mxu3 }
0x1e6a   :  { %6759 = vset.pattern.permute.xlu2 %v9681_v19 }
0x1e6b   :  { %484 = vperm.xlu2 %6759, %v7507_v13  }
0x1e6f   :  { %v5282_v18 = vpop.f32.mrf.mxu3 }
0x1e73   :  { %487 = vperm.xlu2 %6759, %v7594_v62  }
0x1e7b   :  { %6760 = vset.pattern.permute.xlu2 %v9683_v52 }
0x1e7c   :  { %770 = vperm.xlu2 %6760, %v7584_v54  }
0x1e84   :  { %773 = vperm.xlu2 %6760, %v7678_v38  }
0x1e8c   :  { %6761 = vset.pattern.permute.xlu2 %v8452_v3 }
0x1e94   :  { %801 = vperm.xlu2 %6761, %v796_v48   ;;  %v6697_v48 = vld [vmem:[%s9673_s0 + $0x1a] sm:$0x3] }
0x1e9c   :  { %4936 = vrot.lane.b32.xlu2 %v4933_v28, %s7248_s21  ;;  %v803_v28 = vperm.slane %v6507_v25, 1 }
0x1e9d   :  { %6763 = vset.pattern.permute.xlu2 %v9683_v52 }
0x1ebc   :  { %v474_v13 = vpop.permute.xlu2 %473 }
0x1ebd   :  { %v478_v16 = vperm.slane %v474_v13, %v8461_v61  ;;  %v8588_v13 = vadd.f32 %v6697_v48, %v5282_v18 }
0x1ebf   :  { %7032 = vtanh.f32 %v8588_v13 }
0x1ec5   :  { %v485_v62 = vpop.permute.xlu2 %484 }
0x1ec6   :  { %v489_v0 = vperm.slane %v485_v62, %v8461_v61  ;;  %v7033_v62 = vpop.eup %7032 }
0x1ecd   :  { %v488_v43 = vpop.permute.xlu2 %487 }
0x1ece   :  { %v490_v26 = vperm.slane %v488_v43, %v8461_v61 }
0x1ed0   :  { %v491_v20 = vsel %vm93_vm1, %v490_v26, %v489_v0 }
0x1ed1   :  { %493 = vst.msk [vmem:[%s9679_s9] sm:$0x3] %vm384_vm13, %v491_v20 }
0x1ed5   :  { %v477_v55 = vpop.permute.xlu0 %476 }
0x1ed6   :  { %v479_v42 = vperm.slane %v477_v55, %v8461_v61  ;;  %v771_v45 = vpop.permute.xlu2 %770 }
0x1ed7   :  { %v775_v8 = vperm.slane %v771_v45, %v8461_v61 }
0x1ed8   :  { %v480_v11 = vsel %vm93_vm1, %v479_v42, %v478_v16 }
0x1ed9   :  { %482 = vst.msk [vmem:[%s9680_s8] sm:$0x3] %vm384_vm13, %v480_v11 }
0x1ede   :  { %v774_v27 = vpop.permute.xlu2 %773 }
0x1edf   :  { %v776_v2 = vperm.slane %v774_v27, %v8461_v61 }
0x1ee1   :  { %v777_v24 = vsel %vm93_vm1, %v776_v2, %v775_v8 }
0x1ee2   :  { %v779_v14 = vsel %vm384_vm13, %v777_v24, -inf }
0x1ee3   :  { %780 = vmax.xlane.f32.xlu1 %v779_v14 }
0x1eeb   :  { %4654 = vadd.xlane.f32.xlu1 %v4653_v50 }
0x1eee   :  { %v802_v9 = vpop.permute.xlu2 %801 }
0x1ef6   :  { %v4937_v23 = vpop.permute.xlu2 %4936 }
0x1ef7   :  { %v8581_v60 = vsel %vm176_vm7, %v4929_v41, %v4937_v23  ;;  %v8609_v41 = vld [vmem:[%s9674_s5 + $0x18] sm:$0xff]  ;;  %v8615_v23 = vld [vmem:[%s9674_s5 + $0x10] sm:$0xff] }
0x1ef8   :  { %6688 = vmatpush.xpose.msk.msra.mxu0 %vm38_vm2, %v8581_v60 }
0x1f04   :  { %808 = vperm.xlu1 %6762, %v803_v28   ;;  %v8623_v28 = vld [vmem:[%s9674_s5 + $0x8] sm:$0xff] }
0x1f0c   :  { %5308 = vrot.lane.b32.xlu1 %v7033_v62, %s7246_s17  ;;  %v8630_v62 = vld [vmem:[%s9674_s5] sm:$0xff] }
0x1f0d   :  { %6764 = vset.pattern.permute.xlu1 %v9683_v52 }
0x1f56   :  { %v781_v39 = vpop.xlane.xlu1 %780 }
0x1f57   :  { %v783_v56 = vperm.slane %v781_v39, 0  ;;  %v784_v25 = vperm.slane %v781_v39, 1 }
0x1f59   :  { %v787_v43 = vsub.f32 %v7584_v54, %v783_v56  ;;  %v788_v45 = vsub.f32 %v7678_v38, %v784_v25 }
0x1f5b   :  { %v789_v0 = vmul.f32 1.442695, %v787_v43  ;;  %v791_v8 = vmul.f32 1.442695, %v788_v45  ;;  %v4970_v45 = vrot.slane %v8419_v35, 1 }
0x1f5d   :  { %7034 = vpow2.f32 %v789_v0 }
0x1f5e   :  { %v4655_v26 = vpop.xlane.xlu1 %4654 }
0x1f5f   :  { %7036 = vrcp.f32 %v4655_v26  ;;  %v4682_v59 = vand.u32 2147483648, %v4655_v26  ;;  %v4680_v27 = vand.u32 2147483647, %v4655_v26  ;;  %vm4676_vm0 = vweird.f32 %v4655_v26 }
0x1f60   :  { %7038 = vpow2.f32 %v791_v8 }
0x1f61   :  { %v4683_v24 = vor.u32 1.1754944e-38, %v4682_v59  ;;  %vm4681_vm4 = vcmp.eq.f32.partialorder %v4680_v27, 8.507059e+37 }
0x1f63   :  { %v7035_v20 = vpop.eup %7034 }
0x1f64   :  { %v8594_v55 = vmul.f32 %v7035_v20, %v802_v9 }
0x1f65   :  { %v7037_v16 = vpop.eup %7036 }
0x1f66   :  { %v4672_v42 = vmul.f32 %v7037_v16, %v4655_v26  ;;  %817 = vperm.xlu2 %6763, %v8594_v55   ;;  %vm4677_vm15 = vweird.f32 %v7037_v16 }
0x1f67   :  { %vm4678_vm3 = vmor %vm4676_vm0, %vm4677_vm15 }
0x1f68   :  { %v4673_v11 = vsub.f32 1.0, %v4672_v42 }
0x1f6a   :  { %v4674_v12 = vmul.f32 %v7037_v16, %v4673_v11 }
0x1f6c   :  { %v4675_v2 = vadd.f32 %v7037_v16, %v4674_v12  ;;  %v4971_v12 = vrot.slane %v8424_v30, 1  ;;  %v6699_v30 = vmul.f32 -1.442695, %v8588_v13 }
0x1f6e   :  { %v4679_v14 = vsel %vm4678_vm3, %v7037_v16, %v4675_v2  ;;  %4942 = vrot.lane.b32.xlu2 %v8457_v37, %s7248_s21  ;;  %v5035_v16 = vsel %vm271_vm8, %v8577_v36, -inf  ;;  %v8648_v2 = vld [vmem:[%s9676_s6] sm:$0xff]  ;;  %7040 = vpow2.f32 %v6699_v30 }
0x1f6f   :  { %v4684_v50 = vsel %vm4681_vm4, %v4683_v24, %v4679_v14  ;;  %6765 = vset.pattern.permute.xlu2 %v8452_v3 }
0x1f70   :  { %v4685_v9 = vmul.f32 %v7031_v31, %v4684_v50  ;;  %v7039_v31 = vpop.eup %7038 }
0x1f72   :  { %6674 = vst.msk [vmem:[%s9677_s7 + $0xb8] sm:$0xff] %vm271_vm8, %v4685_v9  ;;  %6676 = vmatmul.msk.f32.vlgmr.msrb.gmra.mxu0 %vm271_vm8, %v4685_v9 }
0x1f73   :  { %5355 = vmatpush.msrb.mxu0 %v8609_v41 }
0x1f75   :  { %5356 = vmatpush.msrb.mxu0 %v8615_v23 }
0x1f76   :  { %v809_v48 = vpop.permute.xlu1 %808 }
0x1f77   :  { %v8618_v18 = vmul.f32 %v7039_v31, %v809_v48  ;;  %5357 = vmatpush.msrb.mxu0 %v8623_v28  ;;  %v7041_v31 = vpop.eup %7040 }
0x1f79   :  { %820 = vperm.xlu0 %6753, %v8618_v18   ;;  %5358 = vmatpush.msrb.mxu0 %v8630_v62 }
0x1fc0   :  { %v818_v39 = vpop.permute.xlu2 %817 }
0x1fc1   :  { %v822_v0 = vperm.slane %v818_v39, %v8461_v61 }
0x1fc8   :  { %v4943_v56 = vpop.permute.xlu2 %4942 }
0x1fc9   :  { %6683 = vmatmul.msk.f32.vlgmr.msra.gmra.mxu2 %vm38_vm2, %v4943_v56  ;;  %v5289_v56 = vadd.f32 1.0, %v7041_v31 }
0x1fcb   :  { %vm5295_vm3 = vweird.f32 %v5289_v56 }
0x1feb   :  { %v821_v43 = vpop.permute.xlu0 %820 }
0x1fec   :  { %v823_v26 = vperm.slane %v821_v43, %v8461_v61 }
0x1fee   :  { %v824_v20 = vsel %vm93_vm1, %v823_v26, %v822_v0 }
0x1fef   :  { %v826_v25 = vsel %vm384_vm13, %v824_v20, 0.0 }
0x1ff0   :  { %827 = vadd.xlane.f32.xlu2 %v826_v25 }
0x1ff8   :  { %5036 = vmax.xlane.f32.xlu2 %v5035_v16 }
0x204c   :  { %v4963_v42 = vpop.f32.mrf.mxu2 }
0x204d   :  { %v4967_v11 = vrot.slane %v4963_v42, 1  ;;  %v4974_v59 = vperm.slane %v4963_v42, 0 }
0x204f   :  { %v4975_v27 = vperm.slane %v4967_v11, 0  ;;  %v8643_v8 = vsel %vm176_vm7, %v4970_v45, %v4974_v59 }
0x2050   :  { %v5086_v24 = vadd.f32 %v8648_v2, %v8643_v8 }
0x2051   :  { %v8653_v14 = vsel %vm176_vm7, %v4971_v12, %v4975_v27 }
0x2052   :  { %5106 = vmatpush.msrb.mxu1 %v5086_v24  ;;  %v5087_v35 = vadd.f32 %v8648_v2, %v8653_v14 }
0x2054   :  { %5129 = vmatpush.msrb.mxu2 %v5087_v35 }
0x2063   :  { %v828_v50 = vpop.xlane.xlu2 %827 }
0x2064   :  { %v829_v9 = vmax.f32 %v828_v50, 1e-30 }
0x2066   :  { %v831_v48 = vperm.slane %v829_v9, 0  ;;  %v832_v39 = vperm.slane %v829_v9, 1 }
0x2068   :  { %7042 = vrcp.f32 %v831_v48  ;;  %v846_v42 = vand.u32 2147483648, %v831_v48  ;;  %v861_v11 = vand.u32 2147483648, %v832_v39  ;;  %v844_v59 = vand.u32 2147483647, %v831_v48 }
0x2069   :  { %7044 = vrcp.f32 %v832_v39  ;;  %v859_v27 = vand.u32 2147483647, %v832_v39  ;;  %vm840_vm9 = vweird.f32 %v831_v48  ;;  %vm855_vm10 = vweird.f32 %v832_v39 }
0x206a   :  { %7046 = vrcp.f32 %v5289_v56  ;;  %v847_v50 = vor.u32 1.1754944e-38, %v846_v42  ;;  %v862_v9 = vor.u32 1.1754944e-38, %v861_v11  ;;  %vm845_vm14 = vcmp.eq.f32.partialorder %v844_v59, 8.507059e+37  ;;  %v5309_v11 = vpop.permute.xlu1 %5308 }
0x206b   :  { %vm860_vm15 = vcmp.eq.f32.partialorder %v859_v27, 8.507059e+37 }
0x206e   :  { %v7043_v43 = vpop.eup %7042 }
0x206f   :  { %v7045_v0 = vpop.eup %7044  ;;  %v836_v26 = vmul.f32 %v7043_v43, %v831_v48  ;;  %vm841_vm5 = vweird.f32 %v7043_v43 }
0x2070   :  { %v851_v20 = vmul.f32 %v7045_v0, %v832_v39  ;;  %v7047_v45 = vpop.eup %7046  ;;  %vm856_vm6 = vweird.f32 %v7045_v0  ;;  %vm842_vm11 = vmor %vm840_vm9, %vm841_vm5  ;;  %v5301_v39 = vand.u32 2147483648, %v5289_v56 }
0x2071   :  { %v837_v25 = vsub.f32 1.0, %v836_v26  ;;  %v5291_v35 = vmul.f32 %v7047_v45, %v5289_v56  ;;  %vm857_vm12 = vmor %vm855_vm10, %vm856_vm6  ;;  %vm5296_vm0 = vweird.f32 %v7047_v45 }
0x2072   :  { %v852_v16 = vsub.f32 1.0, %v851_v20  ;;  %vm5297_vm4 = vmor %vm5295_vm3, %vm5296_vm0  ;;  %v5302_v42 = vor.u32 1.1754944e-38, %v5301_v39 }
0x2073   :  { %v838_v13 = vmul.f32 %v7043_v43, %v837_v25 }
0x2074   :  { %v853_v12 = vmul.f32 %v7045_v0, %v852_v16  ;;  %v5292_v16 = vsub.f32 1.0, %v5291_v35 }
0x2075   :  { %v839_v24 = vadd.f32 %v7043_v43, %v838_v13 }
0x2076   :  { %v854_v30 = vadd.f32 %v7045_v0, %v853_v12  ;;  %v5293_v48 = vmul.f32 %v7047_v45, %v5292_v16 }
0x2077   :  { %v843_v31 = vsel %vm842_vm11, %v7043_v43, %v839_v24  ;;  %v5299_v43 = vand.u32 2147483647, %v5289_v56  ;;  %v9685_v56 = vmov 0  }
0x2078   :  { %v858_v26 = vsel %vm857_vm12, %v7045_v0, %v854_v30  ;;  %v848_v20 = vsel %vm845_vm14, %v847_v50, %v843_v31  ;;  %v5294_v13 = vadd.f32 %v7047_v45, %v5293_v48 }
0x2079   :  { %v863_v25 = vsel %vm860_vm15, %v862_v9, %v858_v26  ;;  %v849_v19 = vmul.f32 %v848_v20, %v8594_v55  ;;  %vm5300_vm5 = vcmp.eq.f32.partialorder %v5299_v43, 8.507059e+37 }
0x207a   :  { %v864_v52 = vmul.f32 %v863_v25, %v8618_v18  ;;  %v5298_v0 = vsel %vm5297_vm4, %v7047_v45, %v5294_v13  ;;  %v5037_v45 = vpop.xlane.xlu2 %5036 }
0x207b   :  { %868 = vperm.xlu0 %6753, %v849_v19   ;;  %v8662_v55 = vsel %vm5300_vm5, %v5302_v42, %v5298_v0  ;;  %v5041_v59 = vsub.f32 %v8577_v36, %v5037_v45 }
0x207c   :  { %871 = vperm.xlu1 %6764, %v864_v52   ;;  %v5311_v19 = vmul.f32 %v5309_v11, %v8662_v55  ;;  %v6524_v52 = vld [vmem:[%s9678_s2 + $0x4] sm:$0x3]  ;;  %v5306_v39 = vmul.f32 %v8662_v55, %v8457_v37  ;;  %v6685_v11 = vld [vmem:[%s9675_s1 + $0xc8] sm:$0xff] }
0x207d   :  { %v1200_v18 = vperm.slane %v6524_v52, 1  ;;  %v5043_v12 = vmul.f32 1.442695, %v5041_v59  ;;  %v1193_v35 = vperm.slane %v6524_v52, 0  ;;  %6689 = vmatmul.msk.f32.vlgmr.msra.gmra.mxu0 %vm38_vm2, %v6685_v11 }
0x207f   :  { %7048 = vpow2.f32 %v5043_v12  ;;  %1198 = vperm.xlu2 %6765, %v1193_v35  }
0x2083   :  { %1170 = vperm.xlu0 %6753, %v7796_v44  }
0x2084   :  { %1167 = vperm.xlu1 %6764, %v7669_v32  }
0x2085   :  { %v7049_v27 = vpop.eup %7048 }
0x2086   :  { %v5047_v24 = vsel %vm271_vm8, %v7049_v27, 0.0 }
0x2087   :  { %6767 = vset.pattern.permute.xlu2 %v9685_v56 }
0x208b   :  { %6766 = vset.pattern.permute.xlu0 %v8452_v3 }
0x208c   :  { %5313 = vrot.lane.b32.xlu1 %v5311_v19, %s7247_s20 }
0x2093   :  { %1205 = vperm.xlu0 %6766, %v1200_v18  }
0x209b   :  { %6768 = vset.pattern.permute.xlu0 %v9685_v56 }
0x20bd   :  { %5048 = vadd.xlane.f32.xlu0 %v5047_v24 }
0x20ed   :  { %v869_v30 = vpop.permute.xlu0 %868 }
0x20ee   :  { %v872_v50 = vpop.permute.xlu1 %871  ;;  %v873_v9 = vperm.slane %v869_v30, %v8461_v61 }
0x20ef   :  { %v874_v31 = vperm.slane %v872_v50, %v8461_v61 }
0x20f1   :  { %v875_v26 = vsel %vm93_vm1, %v874_v31, %v873_v9 }
0x20f2   :  { %6508 = vst.msk [vmem:[%s9680_s8 + $0x2] sm:$0x3] %vm384_vm13, %v875_v26 }
0x20f5   :  { %v1171_v36 = vpop.permute.xlu0 %1170 }
0x20f6   :  { %v1168_v20 = vpop.permute.xlu1 %1167  ;;  %v1173_v25 = vperm.slane %v1171_v36, %v8461_v61 }
0x20f7   :  { %v1172_v16 = vperm.slane %v1168_v20, %v8461_v61 }
0x20f9   :  { %v1174_v48 = vsel %vm93_vm1, %v1173_v25, %v1172_v16 }
0x20fa   :  { %v1176_v13 = vsel %vm384_vm13, %v1174_v48, -inf }
0x20fb   :  { %1177 = vmax.xlane.f32.xlu1 %v1176_v13 }
0x20fe   :  { %v5314_v43 = vpop.permute.xlu1 %5313 }
0x20ff   :  { %v8687_v0 = vadd.f32 %v5314_v43, %v5306_v39 }
0x2101   :  { %7050 = vtanh.f32 %v8687_v0 }
0x2105   :  { %v1206_v19 = vpop.permute.xlu0 %1205 }
0x2107   :  { %v7051_v42 = vpop.eup %7050 }
0x2108   :  { %5319 = vrot.lane.b32.xlu2 %v7051_v42, %s7246_s17 }
0x2130   :  { %v5049_v52 = vpop.xlane.xlu0 %5048 }
0x2131   :  { %7052 = vrcp.f32 %v5049_v52  ;;  %v5064_v59 = vand.u32 2147483648, %v5049_v52  ;;  %v5062_v24 = vand.u32 2147483647, %v5049_v52  ;;  %vm5058_vm9 = vweird.f32 %v5049_v52 }
0x2133   :  { %v5065_v30 = vor.u32 1.1754944e-38, %v5064_v59  ;;  %vm5063_vm11 = vcmp.eq.f32.partialorder %v5062_v24, 8.507059e+37 }
0x2137   :  { %v7053_v18 = vpop.eup %7052 }
0x2138   :  { %v5054_v45 = vmul.f32 %v7053_v18, %v5049_v52  ;;  %vm5059_vm6 = vweird.f32 %v7053_v18  ;;  %v8702_v52 = vpop.f32.mrf.mxu0 }
0x2139   :  { %vm5060_vm10 = vmor %vm5058_vm9, %vm5059_vm6 }
0x213a   :  { %v5055_v37 = vsub.f32 1.0, %v5054_v45 }
0x213c   :  { %v5056_v12 = vmul.f32 %v7053_v18, %v5055_v37 }
0x213e   :  { %v5057_v35 = vadd.f32 %v7053_v18, %v5056_v12 }
0x2140   :  { %v5061_v50 = vsel %vm5060_vm10, %v7053_v18, %v5057_v35  ;;  %v5032_v18 = vpop.f32.mrf.mxu0 }
0x2141   :  { %v5066_v9 = vsel %vm5063_vm11, %v5065_v30, %v5061_v50  ;;  %v5038_v45 = vsel %vm271_vm8, %v5032_v18, -inf }
0x2142   :  { %v5067_v31 = vmul.f32 %v7049_v27, %v5066_v9  ;;  %v1199_v27 = vpop.permute.xlu2 %1198 }
0x2144   :  { %6690 = vst.msk [vmem:[%s9677_s7 + $0xc0] sm:$0xff] %vm271_vm8, %v5067_v31  ;;  %6692 = vmatmul.msk.f32.vlgmr.msrb.gmra.mxu1 %vm271_vm8, %v5067_v31 }
0x2162   :  { %v5320_v37 = vpop.permute.xlu2 %5319 }
0x2163   :  { %v5322_v9 = vmul.f32 %v5320_v37, %v8662_v55 }
0x216e   :  { %v1178_v26 = vpop.xlane.xlu1 %1177 }
0x216f   :  { %v1180_v36 = vperm.slane %v1178_v26, 0  ;;  %v1181_v20 = vperm.slane %v1178_v26, 1 }
0x2171   :  { %v1184_v25 = vsub.f32 %v7669_v32, %v1180_v36  ;;  %v1185_v16 = vsub.f32 %v7796_v44, %v1181_v20 }
0x2173   :  { %v1186_v48 = vmul.f32 1.442695, %v1184_v25  ;;  %v1188_v13 = vmul.f32 1.442695, %v1185_v16 }
0x2175   :  { %7054 = vpow2.f32 %v1186_v48 }
0x2176   :  { %7056 = vpow2.f32 %v1188_v13 }
0x217b   :  { %v7055_v39 = vpop.eup %7054 }
0x217c   :  { %v7057_v43 = vpop.eup %7056  ;;  %v1209_v42 = vmul.f32 %v7055_v39, %v1199_v27 }
0x217d   :  { %v1210_v11 = vmul.f32 %v7057_v43, %v1206_v19  ;;  %v5329_v19 = vperm.slane %v8687_v0, 0 }
0x217e   :  { %1214 = vperm.xlu0 %6768, %v1209_v42  }
0x217f   :  { %1217 = vperm.xlu2 %6767, %v1210_v11  }
0x21a8   :  { %5039 = vmax.xlane.f32.xlu2 %v5038_v45 }
0x21d9   :  { %v1218_v59 = vpop.permute.xlu2 %1217 }
0x21da   :  { %v1220_v24 = vperm.slane %v1218_v59, %v8461_v61 }
0x21f0   :  { %v1215_v12 = vpop.permute.xlu0 %1214 }
0x21f1   :  { %v1219_v35 = vperm.slane %v1215_v12, %v8461_v61 }
0x21f3   :  { %v1221_v30 = vsel %vm93_vm1, %v1220_v24, %v1219_v35 }
0x21f4   :  { %v1223_v50 = vsel %vm384_vm13, %v1221_v30, 0.0 }
0x21f5   :  { %1224 = vadd.xlane.f32.xlu1 %v1223_v50 }
0x220e   :  { %5331 = vrot.lane.b32.xlu1 %v5329_v19, %s7248_s21 }
0x2216   :  { %5658 = vrot.lane.b32.xlu1 %v5322_v9, %s7247_s20 }
0x221b   :  { %v5040_v31 = vpop.xlane.xlu2 %5039 }
0x221c   :  { %v5042_v26 = vsub.f32 %v5032_v18, %v5040_v31 }
0x221e   :  { %v5045_v36 = vmul.f32 1.442695, %v5042_v26 }
0x2220   :  { %7058 = vpow2.f32 %v5045_v36 }
0x2226   :  { %v8713_v20 = vpop.eup %7058 }
0x2227   :  { %v5050_v25 = vsel %vm271_vm8, %v8713_v20, 0.0 }
0x2240   :  { %5051 = vadd.xlane.f32.xlu1 %v5050_v25 }
0x2268   :  { %v1225_v16 = vpop.xlane.xlu1 %1224 }
0x2269   :  { %v1226_v48 = vmax.f32 %v1225_v16, 1e-30 }
0x226b   :  { %v1228_v13 = vperm.slane %v1226_v48, 0  ;;  %v1229_v39 = vperm.slane %v1226_v48, 1 }
0x226d   :  { %7060 = vrcp.f32 %v1228_v13  ;;  %v1243_v59 = vand.u32 2147483648, %v1228_v13  ;;  %v1258_v12 = vand.u32 2147483648, %v1229_v39  ;;  %v1241_v35 = vand.u32 2147483647, %v1228_v13 }
0x226e   :  { %7062 = vrcp.f32 %v1229_v39  ;;  %v1256_v50 = vand.u32 2147483647, %v1229_v39  ;;  %vm1237_vm15 = vweird.f32 %v1228_v13  ;;  %vm1252_vm0 = vweird.f32 %v1229_v39 }
0x226f   :  { %v1244_v31 = vor.u32 1.1754944e-38, %v1243_v59  ;;  %v1259_v26 = vor.u32 1.1754944e-38, %v1258_v12  ;;  %vm1242_vm5 = vcmp.eq.f32.partialorder %v1241_v35, 8.507059e+37 }
0x2270   :  { %vm1257_vm6 = vcmp.eq.f32.partialorder %v1256_v50, 8.507059e+37 }
0x2273   :  { %v7061_v27 = vpop.eup %7060 }
0x2274   :  { %v7063_v55 = vpop.eup %7062  ;;  %v1233_v43 = vmul.f32 %v7061_v27, %v1228_v13  ;;  %vm1238_vm12 = vweird.f32 %v7061_v27 }
0x2275   :  { %v1248_v45 = vmul.f32 %v7063_v55, %v1229_v39  ;;  %vm1253_vm14 = vweird.f32 %v7063_v55  ;;  %vm1239_vm3 = vmor %vm1237_vm15, %vm1238_vm12  ;;  %v6701_v39 = vld [vmem:[%s9675_s1 + $0xd0] sm:$0xff] }
0x2276   :  { %v1234_v37 = vsub.f32 1.0, %v1233_v43  ;;  %vm1254_vm4 = vmor %vm1252_vm0, %vm1253_vm14 }
0x2277   :  { %v1249_v18 = vsub.f32 1.0, %v1248_v45  ;;  %v5325_v45 = vrot.slane %v8478_v53, 1  ;;  %v5324_v53 = vrot.slane %v8687_v0, 1 }
0x2278   :  { %v1235_v24 = vmul.f32 %v7061_v27, %v1234_v37 }
0x2279   :  { %v1250_v30 = vmul.f32 %v7063_v55, %v1249_v18 }
0x227a   :  { %v1236_v19 = vadd.f32 %v7061_v27, %v1235_v24 }
0x227b   :  { %v1251_v9 = vadd.f32 %v7063_v55, %v1250_v30 }
0x227c   :  { %v1240_v36 = vsel %vm1239_vm3, %v7061_v27, %v1236_v19  ;;  %v6541_v19 = vld [vmem:[%s9678_s2 + $0x6] sm:$0x3] }
0x227d   :  { %v1255_v25 = vsel %vm1254_vm4, %v7063_v55, %v1251_v9  ;;  %v1245_v16 = vsel %vm1242_vm5, %v1244_v31, %v1240_v36  ;;  %v1590_v9 = vperm.slane %v6541_v19, 0  ;;  %v1597_v31 = vperm.slane %v6541_v19, 1 }
0x227e   :  { %v1260_v48 = vsel %vm1257_vm6, %v1259_v26, %v1255_v25  ;;  %v1246_v43 = vmul.f32 %v1245_v16, %v1209_v42 }
0x227f   :  { %v1261_v37 = vmul.f32 %v1260_v48, %v1210_v11  ;;  %v5330_v11 = vperm.slane %v5324_v53, 0  ;;  %v5326_v53 = vrot.slane %v8581_v60, 1 }
0x2280   :  { %1265 = vperm.xlu2 %6767, %v1246_v43   ;;  %v5332_v18 = vpop.permute.xlu1 %5331 }
0x2281   :  { %1268 = vperm.xlu0 %6768, %v1261_v37   ;;  %v8719_v13 = vsel %vm176_vm7, %v5325_v45, %v5332_v18 }
0x2282   :  { %6703 = vmatpush.xpose.msk.msra.mxu1 %vm38_vm2, %v8719_v13 }
0x2285   :  { %6704 = vmatmul.msk.f32.vlgmr.msra.gmra.mxu1 %vm38_vm2, %v6701_v39 }
0x2286   :  { %5674 = vmatpush.msrb.mxu1 %v8504_v34 }
0x2288   :  { %5675 = vmatpush.msrb.mxu1 %v8510_v33  ;;  %1564 = vperm.xlu2 %6767, %v7788_v10   ;;  %v5659_v42 = vpop.permute.xlu1 %5658 }
0x2289   :  { %1567 = vperm.xlu0 %6768, %v7897_v4  }
0x228a   :  { %5676 = vmatpush.msrb.mxu1 %v8519_v7 }
0x228c   :  { %5677 = vmatpush.msrb.mxu1 %v8525_v49 }
0x228d   :  { %6715 = vmatmul.msk.f32.vlgmr.msrb.gmra.mxu1 %vm38_vm2, %v5659_v42 }
0x2291   :  { %5333 = vrot.lane.b32.xlu0 %v5330_v11, %s7248_s21 }
0x2292   :  { %6769 = vset.pattern.permute.xlu0 %v8452_v3 }
0x229a   :  { %1595 = vperm.xlu0 %6769, %v1590_v9  }
0x22a2   :  { %1602 = vperm.xlu0 %6769, %v1597_v31   ;;  %v8791_v31 = vld [vmem:[%s9678_s2 + $0x8] sm:$0x3] }
0x22aa   :  { %6770 = vset.pattern.permute.xlu0 %v9685_v56 }
0x22b3   :  { %v5052_v34 = vpop.xlane.xlu1 %5051 }
0x22b4   :  { %7064 = vrcp.f32 %v5052_v34  ;;  %v5079_v55 = vand.u32 2147483648, %v5052_v34  ;;  %vm5073_vm9 = vweird.f32 %v5052_v34  ;;  %v5077_v59 = vand.u32 2147483647, %v5052_v34 }
0x22b6   :  { %v5080_v12 = vor.u32 1.1754944e-38, %v5079_v55  ;;  %vm5078_vm12 = vcmp.eq.f32.partialorder %v5077_v59, 8.507059e+37 }
0x22ba   :  { %v7065_v33 = vpop.eup %7064 }
0x22bb   :  { %v5069_v27 = vmul.f32 %v7065_v33, %v5052_v34  ;;  %vm5074_vm10 = vweird.f32 %v7065_v33  ;;  %v8768_v34 = vpop.f32.mrf.mxu1 }
0x22bc   :  { %vm5075_vm11 = vmor %vm5073_vm9, %vm5074_vm10 }
0x22bd   :  { %v5070_v7 = vsub.f32 1.0, %v5069_v27 }
0x22bf   :  { %v5071_v49 = vmul.f32 %v7065_v33, %v5070_v7 }
0x22c1   :  { %v5072_v24 = vadd.f32 %v7065_v33, %v5071_v49 }
0x22c3   :  { %v5076_v35 = vsel %vm5075_vm11, %v7065_v33, %v5072_v24 }
0x22c4   :  { %v5081_v30 = vsel %vm5078_vm12, %v5080_v12, %v5076_v35 }
0x22c5   :  { %v5082_v50 = vmul.f32 %v8713_v20, %v5081_v30 }
0x22c7   :  { %6691 = vst.msk [vmem:[%s9677_s7 + $0xc8] sm:$0xff] %vm271_vm8, %v5082_v50  ;;  %6693 = vmatmul.msk.f32.vlgmr.msrb.gmra.mxu2 %vm271_vm8, %v5082_v50 }
0x22da   :  { %v1266_v26 = vpop.permute.xlu2 %1265 }
0x22db   :  { %v1270_v20 = vperm.slane %v1266_v26, %v8461_v61  ;;  %v1987_v26 = vperm.slane %v8791_v31, 0 }
0x22e2   :  { %v1565_v48 = vpop.permute.xlu2 %1564 }
0x22e3   :  { %v1569_v45 = vperm.slane %v1565_v48, %v8461_v61 }
0x22f3   :  { %v1269_v36 = vpop.permute.xlu0 %1268 }
0x22f4   :  { %v1271_v25 = vperm.slane %v1269_v36, %v8461_v61  ;;  %v9686_v36 = vmov 1  }
0x22f6   :  { %v1272_v16 = vsel %vm93_vm1, %v1271_v25, %v1270_v20 }
0x22f7   :  { %6525 = vst.msk [vmem:[%s9680_s8 + $0x4] sm:$0x3] %vm384_vm13, %v1272_v16 }
0x22fb   :  { %v1568_v43 = vpop.permute.xlu0 %1567 }
0x22fc   :  { %v1570_v37 = vperm.slane %v1568_v43, %v8461_v61 }
0x22fe   :  { %v1571_v18 = vsel %vm93_vm1, %v1570_v37, %v1569_v45 }
0x22ff   :  { %v1573_v39 = vsel %vm384_vm13, %v1571_v18, -inf }
0x2300   :  { %1574 = vmax.xlane.f32.xlu2 %v1573_v39  ;;  %v6702_v39 = vld [vmem:[%s9675_s1 + $0xd8] sm:$0xff] }
0x2302   :  { %v8770_v27 = vpop.f32.mrf.mxu1 }
0x2303   :  { %v5334_v42 = vpop.permute.xlu0 %5333  ;;  %v5432_v20 = vsel %vm271_vm8, %v8770_v27, -inf }
0x2304   :  { %v8760_v11 = vsel %vm176_vm7, %v5326_v53, %v5334_v42 }
0x2305   :  { %6705 = vmatpush.xpose.msk.msra.mxu2 %vm38_vm2, %v8760_v11 }
0x2308   :  { %6706 = vmatmul.msk.f32.vlgmr.msra.gmra.mxu2 %vm38_vm2, %v6702_v39 }
0x2309   :  { %5752 = vmatpush.msrb.mxu2 %v8609_v41 }
0x230b   :  { %5753 = vmatpush.msrb.mxu2 %v8615_v23  ;;  %v6714_v23 = vld [vmem:[%s9673_s0 + $0x1c] sm:$0x3] }
0x230c   :  { %v1596_v49 = vpop.permute.xlu0 %1595 }
0x230d   :  { %5754 = vmatpush.msrb.mxu2 %v8623_v28  ;;  %v5679_v28 = vpop.f32.mrf.mxu1 }
0x230e   :  { %v5682_v35 = vadd.f32 %v6714_v23, %v5679_v28 }
0x230f   :  { %5755 = vmatpush.msrb.mxu2 %v8630_v62 }
0x2310   :  { %v6716_v53 = vmul.f32 -1.442695, %v5682_v35 }
0x2314   :  { %v1603_v30 = vpop.permute.xlu0 %1602 }
0x2373   :  { %v1575_v33 = vpop.xlane.xlu2 %1574 }
0x2374   :  { %v1577_v60 = vperm.slane %v1575_v33, 0  ;;  %v1578_v55 = vperm.slane %v1575_v33, 1 }
0x2376   :  { %v1581_v7 = vsub.f32 %v7788_v10, %v1577_v60  ;;  %v1582_v59 = vsub.f32 %v7897_v4, %v1578_v55 }
0x2378   :  { %v1583_v12 = vmul.f32 1.442695, %v1581_v7  ;;  %v1585_v41 = vmul.f32 1.442695, %v1582_v59 }
0x237a   :  { %7066 = vpow2.f32 %v1583_v12 }
0x237b   :  { %7068 = vpow2.f32 %v1585_v41  ;;  %v5367_v41 = vrot.slane %v8643_v8, 1 }
0x237c   :  { %7070 = vtanh.f32 %v5682_v35 }
0x237d   :  { %7072 = vpow2.f32 %v6716_v53 }
0x2380   :  { %v7067_v62 = vpop.eup %7066 }
0x2381   :  { %v7069_v24 = vpop.eup %7068  ;;  %v8777_v50 = vmul.f32 %v7067_v62, %v1596_v49 }
0x2382   :  { %v8779_v19 = vmul.f32 %v7069_v24, %v1603_v30  ;;  %v7071_v9 = vpop.eup %7070  ;;  %v5368_v24 = vrot.slane %v8653_v14, 1 }
0x2383   :  { %1611 = vperm.xlu0 %6770, %v8777_v50   ;;  %v7073_v55 = vpop.eup %7072 }
0x2384   :  { %1614 = vperm.xlu1 %6764, %v8779_v19   ;;  %v5686_v7 = vadd.f32 1.0, %v7073_v55 }
0x2386   :  { %vm5692_vm5 = vweird.f32 %v5686_v7 }
0x238b   :  { %5339 = vrot.lane.b32.xlu0 %v8687_v0, %s7248_s21 }
0x238c   :  { %5705 = vrot.lane.b32.xlu1 %v7071_v9, %s7246_s17 }
0x2394   :  { %1961 = vperm.xlu1 %6764, %v7862_v46  }
0x239c   :  { %6771 = vset.pattern.permute.xlu1 %v8452_v3 }
0x23a4   :  { %1992 = vperm.xlu1 %6771, %v1987_v26  }
0x23ac   :  { %6773 = vset.pattern.permute.xlu1 %v9686_v36 }
0x23ce   :  { %5433 = vmax.xlane.f32.xlu1 %v5432_v20 }
0x23f5   :  { %v1612_v25 = vpop.permute.xlu0 %1611 }
0x23f6   :  { %v1615_v16 = vpop.permute.xlu1 %1614  ;;  %v1616_v48 = vperm.slane %v1612_v25, %v8461_v61 }
0x23f7   :  { %v1617_v43 = vperm.slane %v1615_v16, %v8461_v61 }
0x23f9   :  { %v1618_v45 = vsel %vm93_vm1, %v1617_v43, %v1616_v48 }
0x23fa   :  { %v1620_v37 = vsel %vm384_vm13, %v1618_v45, 0.0 }
0x23fb   :  { %1621 = vadd.xlane.f32.xlu2 %v1620_v37 }
0x23fd   :  { %v5340_v18 = vpop.permute.xlu0 %5339 }
0x23fe   :  { %6700 = vmatmul.msk.f32.vlgmr.msrb.gmra.mxu0 %vm38_vm2, %v5340_v18 }
0x246e   :  { %v8806_v42 = vpop.xlane.xlu2 %1621 }
0x246f   :  { %v1623_v33 = vmax.f32 %v8806_v42, 1e-30 }
0x2471   :  { %v1626_v60 = vperm.slane %v1623_v33, 1 }
0x2473   :  { %7074 = vrcp.f32 %v1626_v60  ;;  %v1655_v9 = vand.u32 2147483648, %v1626_v60  ;;  %v1653_v16 = vand.u32 2147483647, %v1626_v60  ;;  %vm1649_vm15 = vweird.f32 %v1626_v60 }
0x2474   :  { %7076 = vrcp.f32 %v5686_v7 }
0x2475   :  { %v1656_v45 = vor.u32 1.1754944e-38, %v1655_v9  ;;  %vm1654_vm3 = vcmp.eq.f32.partialorder %v1653_v16, 8.507059e+37 }
0x2479   :  { %v7075_v59 = vpop.eup %7074 }
0x247a   :  { %v1645_v49 = vmul.f32 %v7075_v59, %v1626_v60  ;;  %v7077_v26 = vpop.eup %7076  ;;  %vm1650_vm14 = vweird.f32 %v7075_v59 }
0x247b   :  { %v5360_v12 = vpop.f32.mrf.mxu0  ;;  %v5688_v43 = vmul.f32 %v7077_v26, %v5686_v7  ;;  %vm1651_vm0 = vmor %vm1649_vm15, %vm1650_vm14  ;;  %vm5693_vm4 = vweird.f32 %v7077_v26 }
0x247c   :  { %v5364_v23 = vrot.slane %v5360_v12, 1  ;;  %v5371_v28 = vperm.slane %v5360_v12, 0  ;;  %v1646_v62 = vsub.f32 1.0, %v1645_v49  ;;  %v5698_v12 = vand.u32 2147483648, %v5686_v7  ;;  %vm5694_vm6 = vmor %vm5692_vm5, %vm5693_vm4 }
0x247d   :  { %v5689_v53 = vsub.f32 1.0, %v5688_v43 }
0x247e   :  { %v5372_v35 = vperm.slane %v5364_v23, 0  ;;  %v8814_v30 = vsel %vm176_vm7, %v5367_v41, %v5371_v28  ;;  %v1647_v25 = vmul.f32 %v7075_v59, %v1646_v62  ;;  %v5699_v41 = vor.u32 1.1754944e-38, %v5698_v12  ;;  %v5706_v23 = vpop.permute.xlu1 %5705 }
0x247f   :  { %v5483_v20 = vadd.f32 %v8648_v2, %v8814_v30  ;;  %v5690_v55 = vmul.f32 %v7077_v26, %v5689_v53 }
0x2480   :  { %v8819_v48 = vsel %vm176_vm7, %v5368_v24, %v5372_v35  ;;  %v1648_v14 = vadd.f32 %v7075_v59, %v1647_v25  ;;  %v8834_v24 = vpop.f32.mrf.mxu2 }
0x2481   :  { %5503 = vmatpush.msrb.mxu3 %v5483_v20  ;;  %v5484_v8 = vadd.f32 %v8648_v2, %v8819_v48  ;;  %v5691_v49 = vadd.f32 %v7077_v26, %v5690_v55  ;;  %v5696_v2 = vand.u32 2147483647, %v5686_v7 }
0x2482   :  { %v1652_v37 = vsel %vm1651_vm0, %v7075_v59, %v1648_v14 }
0x2483   :  { %5526 = vmatpush.msra.mxu0 %v5484_v8  ;;  %v1657_v18 = vsel %vm1654_vm3, %v1656_v45, %v1652_v37  ;;  %v5695_v60 = vsel %vm5694_vm6, %v7077_v26, %v5691_v49  ;;  %vm5697_vm9 = vcmp.eq.f32.partialorder %v5696_v2, 8.507059e+37  ;;  %v1625_v8 = vperm.slane %v1623_v33, 0 }
0x2484   :  { %v1658_v39 = vmul.f32 %v1657_v18, %v8779_v19  ;;  %v8825_v59 = vsel %vm5697_vm9, %v5699_v41, %v5695_v60  ;;  %v1994_v19 = vperm.slane %v8791_v31, 1 }
0x2485   :  { %v5708_v28 = vmul.f32 %v5706_v23, %v8825_v59  ;;  %v5703_v42 = vmul.f32 %v8825_v59, %v8687_v0  ;;  %v1640_v41 = vand.u32 2147483648, %v1625_v8  ;;  %vm1634_vm11 = vweird.f32 %v1625_v8 }
0x2486   :  { %1665 = vperm.xlu2 %6767, %v1658_v39   ;;  %v1962_v62 = vpop.permute.xlu1 %1961  ;;  %v1638_v23 = vand.u32 2147483647, %v1625_v8 }
0x2487   :  { %v1966_v45 = vperm.slane %v1962_v62, %v8461_v61  ;;  %v1641_v62 = vor.u32 1.1754944e-38, %v1640_v41 }
0x2488   :  { %v5429_v20 = vpop.f32.mrf.mxu2  ;;  %vm1639_vm14 = vcmp.eq.f32.partialorder %v1638_v23, 8.507059e+37 }
0x2489   :  { %v5435_v25 = vsel %vm271_vm8, %v5429_v20, -inf }
0x248e   :  { %1964 = vperm.xlu2 %6767, %v7965_v5   ;;  %v8832_v7 = vpop.permute.xlu1 %1992 }
0x2496   :  { %6772 = vset.pattern.permute.xlu2 %v8452_v3  ;;  %v5434_v35 = vpop.xlane.xlu1 %5433 }
0x2497   :  { %5710 = vrot.lane.b32.xlu2 %v5708_v28, %s7247_s20  ;;  %v5438_v9 = vsub.f32 %v8770_v27, %v5434_v35 }
0x2499   :  { %v5440_v26 = vmul.f32 1.442695, %v5438_v9 }
0x249b   :  { %7078 = vpow2.f32 %v5440_v26 }
0x249c   :  { %7080 = vrcp.f32 %v1625_v8 }
0x249f   :  { %1999 = vperm.xlu2 %6772, %v1994_v19  }
0x24a1   :  { %v8838_v16 = vpop.eup %7078 }
0x24a2   :  { %v5444_v31 = vsel %vm271_vm8, %v8838_v16, 0.0  ;;  %v7081_v43 = vpop.eup %7080 }
0x24a3   :  { %v1630_v37 = vmul.f32 %v7081_v43, %v1625_v8  ;;  %vm1635_vm10 = vweird.f32 %v7081_v43 }
0x24a4   :  { %vm1636_vm12 = vmor %vm1634_vm11, %vm1635_vm10 }
0x24a5   :  { %v1631_v55 = vsub.f32 1.0, %v1630_v37 }
0x24a7   :  { %6774 = vset.pattern.permute.xlu2 %v9685_v56  ;;  %v1632_v49 = vmul.f32 %v7081_v43, %v1631_v55 }
0x24a9   :  { %v1633_v60 = vadd.f32 %v7081_v43, %v1632_v49 }
0x24ab   :  { %v1637_v19 = vsel %vm1636_vm12, %v7081_v43, %v1633_v60 }
0x24ac   :  { %v1642_v9 = vsel %vm1639_vm14, %v1641_v62, %v1637_v19 }
0x24ad   :  { %v1643_v26 = vmul.f32 %v1642_v9, %v8777_v50  ;;  %v5722_v50 = vrot.slane %v8719_v13, 1  ;;  %v5723_v13 = vrot.slane %v8760_v11, 1  ;;  %v7238_v11 = vld [vmem:[%s9670_s4 + $0x10] sm:$0xff] }
0x24c8   :  { %5436 = vmax.xlane.f32.xlu2 %v5435_v25 }
0x24d0   :  { %5445 = vadd.xlane.f32.xlu2 %v5444_v31 }
0x24e0   :  { %v8844_v14 = vpop.permute.xlu2 %1665 }
0x24e8   :  { %v1965_v27 = vpop.permute.xlu2 %1964 }
0x24e9   :  { %v1967_v18 = vperm.slane %v1965_v27, %v8461_v61 }
0x24eb   :  { %v1968_v39 = vsel %vm93_vm1, %v1967_v18, %v1966_v45 }
0x24ec   :  { %v1970_v53 = vsel %vm384_vm13, %v1968_v39, -inf }
0x24ed   :  { %1971 = vmax.xlane.f32.xlu0 %v1970_v53 }
0x24f1   :  { %v5711_v33 = vpop.permute.xlu2 %5710 }
0x24f2   :  { %v8852_v12 = vadd.f32 %v5711_v33, %v5703_v42 }
0x24f4   :  { %7082 = vtanh.f32 %v8852_v12  ;;  %v5726_v2 = vperm.slane %v8852_v12, 0  ;;  %v5721_v28 = vrot.slane %v8852_v12, 1 }
0x24f6   :  { %5728 = vrot.lane.b32.xlu2 %v5726_v2, %s7248_s21  ;;  %v5727_v35 = vperm.slane %v5721_v28, 0 }
0x24f9   :  { %v8861_v25 = vpop.permute.xlu2 %1999 }
0x24fa   :  { %v7083_v0 = vpop.eup %7082 }
0x24fb   :  { %5716 = vrot.lane.b32.xlu1 %v7083_v0, %s7246_s17  ;;  %v7237_v0 = vld [vmem:[%s9670_s4 + $0x18] sm:$0xff] }
0x24fe   :  { %5730 = vrot.lane.b32.xlu2 %v5727_v35, %s7248_s21  ;;  %v7240_v35 = vld [vmem:[%s9670_s4] sm:$0xff] }
0x2501   :  { %1662 = vperm.xlu0 %6770, %v1643_v26  }
0x253b   :  { %v5437_v31 = vpop.xlane.xlu2 %5436 }
0x253c   :  { %v5439_v8 = vsub.f32 %v5429_v20, %v5437_v31 }
0x253e   :  { %v5442_v27 = vmul.f32 1.442695, %v5439_v8 }
0x2540   :  { %7084 = vpow2.f32 %v5442_v27 }
0x2543   :  { %v5446_v45 = vpop.xlane.xlu2 %5445 }
0x2544   :  { %7086 = vrcp.f32 %v5446_v45  ;;  %v5461_v55 = vand.u32 2147483648, %v5446_v45  ;;  %v5459_v33 = vand.u32 2147483647, %v5446_v45  ;;  %vm5455_vm0 = vweird.f32 %v5446_v45 }
0x2546   :  { %v8863_v43 = vpop.eup %7084  ;;  %v5462_v60 = vor.u32 1.1754944e-38, %v5461_v55  ;;  %vm5460_vm4 = vcmp.eq.f32.partialorder %v5459_v33, 8.507059e+37  ;;  %v1668_v55 = vperm.slane %v8844_v14, %v8461_v61 }
0x2547   :  { %v5447_v37 = vsel %vm271_vm8, %v8863_v43, 0.0 }
0x2548   :  { %5448 = vadd.xlane.f32.xlu1 %v5447_v37 }
0x254a   :  { %v7087_v18 = vpop.eup %7086 }
0x254b   :  { %v5451_v39 = vmul.f32 %v7087_v18, %v5446_v45  ;;  %vm5456_vm15 = vweird.f32 %v7087_v18 }
0x254c   :  { %vm5457_vm3 = vmor %vm5455_vm0, %vm5456_vm15 }
0x254d   :  { %v5452_v53 = vsub.f32 1.0, %v5451_v39 }
0x254f   :  { %v5453_v42 = vmul.f32 %v7087_v18, %v5452_v53 }
0x2550   :  { %v5729_v20 = vpop.permute.xlu2 %5728 }
0x2551   :  { %v5454_v49 = vadd.f32 %v7087_v18, %v5453_v42  ;;  %v8869_v2 = vsel %vm176_vm7, %v5722_v50, %v5729_v20 }
0x2552   :  { %6720 = vmatpush.xpose.msk.msra.mxu3 %vm38_vm2, %v8869_v2 }
0x2553   :  { %v5458_v41 = vsel %vm5457_vm3, %v7087_v18, %v5454_v49 }
0x2554   :  { %v5463_v23 = vsel %vm5460_vm4, %v5462_v60, %v5458_v41 }
0x2555   :  { %v5464_v28 = vmul.f32 %v8838_v16, %v5463_v23  ;;  %v7239_v16 = vld [vmem:[%s9670_s4 + $0x8] sm:$0xff] }
0x2557   :  { %6707 = vst.msk [vmem:[%s9677_s7 + $0xd0] sm:$0xff] %vm271_vm8, %v5464_v28  ;;  %6709 = vmatmul.msk.f32.vlgmr.msrb.gmra.mxu3 %vm271_vm8, %v5464_v28 }
0x2558   :  { %v5731_v19 = vpop.permute.xlu2 %5730  ;;  %6071 = vmatpush.msrb.mxu3 %v7237_v0 }
0x2559   :  { %v8884_v62 = vsel %vm176_vm7, %v5723_v13, %v5731_v19 }
0x255a   :  { %6722 = vmatpush.xpose.msk.msrb.mxu0 %vm38_vm2, %v8884_v62  ;;  %6072 = vmatpush.msrb.mxu3 %v7238_v11 }
0x255c   :  { %6073 = vmatpush.msrb.mxu3 %v7239_v16 }
0x255e   :  { %6074 = vmatpush.msrb.mxu3 %v7240_v35 }
0x2560   :  { %v1972_v9 = vpop.xlane.xlu0 %1971 }
0x2561   :  { %883 = vperm.xlu1 %6773, %v7678_v38   ;;  %v1974_v26 = vperm.slane %v1972_v9, 0  ;;  %v1975_v27 = vperm.slane %v1972_v9, 1 }
0x2563   :  { %v1978_v31 = vsub.f32 %v7862_v46, %v1974_v26  ;;  %v1979_v37 = vsub.f32 %v7965_v5, %v1975_v27 }
0x2565   :  { %v1980_v8 = vmul.f32 1.442695, %v1978_v31  ;;  %v1982_v39 = vmul.f32 1.442695, %v1979_v37 }
0x2567   :  { %7088 = vpow2.f32 %v1980_v8 }
0x2568   :  { %7090 = vpow2.f32 %v1982_v39 }
0x2569   :  { %1277 = vperm.xlu1 %6773, %v7669_v32  }
0x256d   :  { %v7089_v45 = vpop.eup %7088  ;;  %v5717_v38 = vpop.permute.xlu1 %5716 }
0x256e   :  { %v8902_v18 = vmul.f32 %v7089_v45, %v8832_v7  ;;  %v5719_v32 = vmul.f32 %v5717_v38, %v8825_v59  ;;  %v8926_v59 = vld [vmem:[%s9678_s2 + $0xa] sm:$0x3]  ;;  %v7241_v45 = vld [vmem:[%s9674_s5 + $0x18] sm:$0xff]  ;;  %v7242_v38 = vld [vmem:[%s9674_s5 + $0x10] sm:$0xff] }
0x256f   :  { %v2384_v14 = vperm.slane %v8926_v59, 0 }
0x2570   :  { %2008 = vperm.xlu0 %6770, %v8902_v18  }
0x2571   :  { %1280 = vperm.xlu1 %6773, %v7796_v44   ;;  %v7091_v44 = vpop.eup %7090 }
0x2572   :  { %v8918_v7 = vmul.f32 %v7091_v44, %v8861_v25 }
0x2573   :  { %v1663_v53 = vpop.permute.xlu0 %1662 }
0x2574   :  { %v1667_v50 = vperm.slane %v1663_v53, %v8461_v61 }
0x2576   :  { %v1669_v42 = vsel %vm93_vm1, %v1668_v55, %v1667_v50  ;;  %v7243_v55 = vld [vmem:[%s9674_s5 + $0x8] sm:$0xff] }
0x2577   :  { %6542 = vst.msk [vmem:[%s9680_s8 + $0x6] sm:$0x3] %vm384_vm13, %v1669_v42  ;;  %v7244_v42 = vld [vmem:[%s9674_s5] sm:$0xff] }
0x2578   :  { %6055 = vrot.lane.b32.xlu0 %v5719_v32, %s7247_s20 }
0x2579   :  { %1674 = vperm.xlu1 %6773, %v7788_v10   ;;  %v6718_v10 = vld [vmem:[%s9675_s1 + $0xe0] sm:$0xff] }
0x257a   :  { %6721 = vmatmul.msk.f32.vlgmr.msra.gmra.mxu3 %vm38_vm2, %v6718_v10 }
0x2580   :  { %2011 = vperm.xlu0 %6770, %v8918_v7  }
0x2581   :  { %2071 = vperm.xlu1 %6773, %v7862_v46  }
0x2589   :  { %6777 = vset.pattern.permute.xlu1 %v8452_v3 }
0x2591   :  { %2389 = vperm.xlu1 %6777, %v2384_v14  }
0x2599   :  { %5736 = vrot.lane.b32.xlu1 %v8852_v12, %s7248_s21 }
0x25bb   :  { %v5449_v46 = vpop.xlane.xlu1 %5448 }
0x25bc   :  { %7092 = vrcp.f32 %v5449_v46  ;;  %vm5470_vm5 = vweird.f32 %v5449_v46  ;;  %v5476_v13 = vand.u32 2147483648, %v5449_v46  ;;  %v5474_v16 = vand.u32 2147483647, %v5449_v46 }
0x25be   :  { %v5477_v9 = vor.u32 1.1754944e-38, %v5476_v13  ;;  %vm5475_vm10 = vcmp.eq.f32.partialorder %v5474_v16, 8.507059e+37 }
0x25c2   :  { %v7093_v33 = vpop.eup %7092 }
0x25c3   :  { %v5466_v20 = vmul.f32 %v7093_v33, %v5449_v46  ;;  %vm5471_vm6 = vweird.f32 %v7093_v33 }
0x25c4   :  { %vm5472_vm9 = vmor %vm5470_vm5, %vm5471_vm6 }
0x25c5   :  { %v5467_v60 = vsub.f32 1.0, %v5466_v20 }
0x25c7   :  { %v5468_v41 = vmul.f32 %v7093_v33, %v5467_v60 }
0x25c9   :  { %v5469_v11 = vadd.f32 %v7093_v33, %v5468_v41 }
0x25cb   :  { %v5473_v26 = vsel %vm5472_vm9, %v7093_v33, %v5469_v11 }
0x25cc   :  { %v5478_v8 = vsel %vm5475_vm10, %v5477_v9, %v5473_v26 }
0x25cd   :  { %v5479_v27 = vmul.f32 %v8863_v43, %v5478_v8 }
0x25cf   :  { %6708 = vst.msk [vmem:[%s9677_s7 + $0xd8] sm:$0xff] %vm271_vm8, %v5479_v27  ;;  %6710 = vmatmul.msk.f32.vlgmr.msra.gmra.mxu0 %vm271_vm8, %v5479_v27 }
0x25d0   :  { %6149 = vmatpush.msra.mxu0 %v7241_v45 }
0x25d2   :  { %6150 = vmatpush.msra.mxu0 %v7242_v38 }
0x25d3   :  { %v8935_v25 = vpop.permute.xlu1 %883 }
0x25d4   :  { %6151 = vmatpush.msra.mxu0 %v7243_v55 }
0x25d6   :  { %6152 = vmatpush.msra.mxu0 %v7244_v42  ;;  %v5764_v42 = vrot.slane %v8814_v30, 1 }
0x25db   :  { %v1278_v49 = vpop.permute.xlu1 %1277 }
0x25dc   :  { %v1282_v19 = vperm.slane %v1278_v49, %v8461_v61 }
0x25e2   :  { %v2009_v23 = vpop.permute.xlu0 %2008 }
0x25e3   :  { %v1281_v28 = vpop.permute.xlu1 %1280  ;;  %v2013_v43 = vperm.slane %v2009_v23, %v8461_v61 }
0x25e4   :  { %v1283_v0 = vperm.slane %v1281_v28, %v8461_v61 }
0x25e6   :  { %v1284_v35 = vsel %vm93_vm1, %v1283_v0, %v1282_v19 }
0x25e7   :  { %6526 = vst.msk [vmem:[%s9679_s9 + $0x4] sm:$0x3] %vm384_vm13, %v1284_v35 }
0x25ea   :  { %v6056_v31 = vpop.permute.xlu0 %6055 }
0x25eb   :  { %6732 = vmatmul.msk.f32.vlgmr.msrb.gmra.mxu3 %vm38_vm2, %v6056_v31  ;;  %v8954_v37 = vpop.permute.xlu1 %1674 }
0x25f2   :  { %v2012_v39 = vpop.permute.xlu0 %2011 }
0x25f3   :  { %v2014_v53 = vperm.slane %v2012_v39, %v8461_v61  ;;  %v8969_v44 = vpop.permute.xlu1 %2071 }
0x25f5   :  { %v2015_v50 = vsel %vm93_vm1, %v2014_v53, %v2013_v43 }
0x25f6   :  { %v2017_v32 = vsel %vm384_vm13, %v2015_v50, 0.0 }
0x25f7   :  { %2018 = vadd.xlane.f32.xlu0 %v2017_v32 }
0x2603   :  { %v8971_v14 = vpop.permute.xlu1 %2389 }
0x260b   :  { %v5737_v10 = vpop.permute.xlu1 %5736 }
0x260c   :  { %6717 = vmatmul.msk.f32.vlgmr.msrb.gmra.mxu2 %vm38_vm2, %v5737_v10 }
0x266a   :  { %v2019_v46 = vpop.xlane.xlu0 %2018 }
0x266b   :  { %v2020_v33 = vmax.f32 %v2019_v46, 1e-30 }
0x266d   :  { %v2022_v20 = vperm.slane %v2020_v33, 0  ;;  %v2023_v49 = vperm.slane %v2020_v33, 1  ;;  %v5765_v33 = vrot.slane %v8819_v48, 1 }
0x266f   :  { %7094 = vrcp.f32 %v2022_v20  ;;  %v2037_v0 = vand.u32 2147483648, %v2022_v20  ;;  %v2035_v16 = vand.u32 2147483647, %v2022_v20  ;;  %vm2031_vm12 = vweird.f32 %v2022_v20 }
0x2670   :  { %7096 = vrcp.f32 %v2023_v49  ;;  %v2052_v45 = vand.u32 2147483648, %v2023_v49  ;;  %vm2046_vm3 = vweird.f32 %v2023_v49  ;;  %v2050_v38 = vand.u32 2147483647, %v2023_v49 }
0x2671   :  { %v2038_v26 = vor.u32 1.1754944e-38, %v2037_v0  ;;  %vm2036_vm15 = vcmp.eq.f32.partialorder %v2035_v16, 8.507059e+37  ;;  %v2076_v0 = vperm.slane %v8969_v44, %v8461_v61 }
0x2672   :  { %v2053_v53 = vor.u32 1.1754944e-38, %v2052_v45  ;;  %vm2051_vm5 = vcmp.eq.f32.partialorder %v2050_v38, 8.507059e+37 }
0x2675   :  { %v7095_v60 = vpop.eup %7094 }
0x2676   :  { %v7097_v41 = vpop.eup %7096  ;;  %v2027_v23 = vmul.f32 %v7095_v60, %v2022_v20  ;;  %vm2032_vm11 = vweird.f32 %v7095_v60 }
0x2677   :  { %v2042_v28 = vmul.f32 %v7097_v41, %v2023_v49  ;;  %vm2033_vm14 = vmor %vm2031_vm12, %vm2032_vm11  ;;  %vm2047_vm0 = vweird.f32 %v7097_v41  ;;  %v8985_v49 = vld [vmem:[%s9676_s6] sm:$0xff] }
0x2678   :  { %v2028_v13 = vsub.f32 1.0, %v2027_v23  ;;  %vm2048_vm4 = vmor %vm2046_vm3, %vm2047_vm0 }
0x2679   :  { %v2043_v19 = vsub.f32 1.0, %v2042_v28 }
0x267a   :  { %v2029_v11 = vmul.f32 %v7095_v60, %v2028_v13 }
0x267b   :  { %v2044_v35 = vmul.f32 %v7097_v41, %v2043_v19 }
0x267c   :  { %v2030_v9 = vadd.f32 %v7095_v60, %v2029_v11 }
0x267d   :  { %v2045_v8 = vadd.f32 %v7097_v41, %v2044_v35 }
0x267e   :  { %v2034_v31 = vsel %vm2033_vm14, %v7095_v60, %v2030_v9 }
0x267f   :  { %v2039_v27 = vsel %vm2036_vm15, %v2038_v26, %v2034_v31  ;;  %v2049_v43 = vsel %vm2048_vm4, %v7097_v41, %v2045_v8  ;;  %v2391_v41 = vperm.slane %v8926_v59, 1 }
0x2680   :  { %v2040_v39 = vmul.f32 %v2039_v27, %v8902_v18  ;;  %v2054_v55 = vsel %vm2051_vm5, %v2053_v53, %v2049_v43 }
0x2681   :  { %v2055_v50 = vmul.f32 %v2054_v55, %v8918_v7 }
0x2682   :  { %2059 = vperm.xlu2 %6774, %v2040_v39  }
0x268a   :  { %2062 = vperm.xlu2 %6774, %v2055_v50  }
0x268f   :  { %v5757_v32 = vpop.f32.mrf.mxu2 }
0x2690   :  { %v5761_v10 = vrot.slane %v5757_v32, 1  ;;  %v5768_v46 = vperm.slane %v5757_v32, 0 }
0x2692   :  { %v5769_v20 = vperm.slane %v5761_v10, 0  ;;  %v8979_v18 = vsel %vm176_vm7, %v5764_v42, %v5768_v46  ;;  %6775 = vset.pattern.permute.xlu2 %v9686_v36 }
0x2693   :  { %v5880_v7 = vadd.f32 %v8985_v49, %v8979_v18  ;;  %2074 = vperm.xlu2 %6775, %v7965_v5  }
0x2694   :  { %v8991_v30 = vsel %vm176_vm7, %v5765_v33, %v5769_v20 }
0x2695   :  { %5900 = vmatpush.msra.mxu1 %v5880_v7  ;;  %v5881_v48 = vadd.f32 %v8985_v49, %v8991_v30 }
0x2697   :  { %5923 = vmatpush.msra.mxu2 %v5881_v48 }
0x269b   :  { %6776 = vset.pattern.permute.xlu2 %v9685_v56 }
0x269c   :  { %2358 = vperm.xlu2 %6776, %v7943_v40  }
0x26a4   :  { %2361 = vperm.xlu2 %6776, %v8039_v21  }
0x26ac   :  { %6778 = vset.pattern.permute.xlu2 %v8452_v3 }
0x26b4   :  { %2396 = vperm.xlu2 %6778, %v2391_v41   ;;  %v6592_v41 = vld [vmem:[%s9678_s2 + $0xc] sm:$0x3] }
0x26bc   :  { %6779 = vset.pattern.permute.xlu2 %v9685_v56 }
0x26dc   :  { %v2060_v60 = vpop.permute.xlu2 %2059 }
0x26dd   :  { %v2064_v23 = vperm.slane %v2060_v60, %v8461_v61 }
0x26e4   :  { %v2063_v5 = vpop.permute.xlu2 %2062 }
0x26e5   :  { %v2065_v28 = vperm.slane %v2063_v5, %v8461_v61  ;;  %v2781_v5 = vperm.slane %v6592_v41, 0 }
0x26e7   :  { %v2066_v13 = vsel %vm93_vm1, %v2065_v28, %v2064_v23 }
0x26e8   :  { %6559 = vst.msk [vmem:[%s9680_s8 + $0x8] sm:$0x3] %vm384_vm13, %v2066_v13 }
0x26ed   :  { %v2075_v19 = vpop.permute.xlu2 %2074 }
0x26ee   :  { %v2077_v59 = vperm.slane %v2075_v19, %v8461_v61 }
0x26f0   :  { %v2078_v11 = vsel %vm93_vm1, %v2077_v59, %v2076_v0  ;;  %v6719_v0 = vld [vmem:[%s9675_s1 + $0xe8] sm:$0xff] }
0x26f1   :  { %6560 = vst.msk [vmem:[%s9679_s9 + $0x8] sm:$0x3] %vm384_vm13, %v2078_v11  ;;  %6723 = vmatmul.msk.f32.vlgmr.msrb.gmra.mxu0 %vm38_vm2, %v6719_v0 }
0x26f6   :  { %v2359_v16 = vpop.permute.xlu2 %2358 }
0x26f7   :  { %v2363_v9 = vperm.slane %v2359_v16, %v8461_v61 }
0x26fe   :  { %v2362_v35 = vpop.permute.xlu2 %2361 }
0x26ff   :  { %v2364_v26 = vperm.slane %v2362_v35, %v8461_v61 }
0x2701   :  { %v2365_v31 = vsel %vm93_vm1, %v2364_v26, %v2363_v9 }
0x2702   :  { %v2367_v8 = vsel %vm384_vm13, %v2365_v31, -inf }
0x2703   :  { %2368 = vmax.xlane.f32.xlu0 %v2367_v8 }
0x270e   :  { %v2397_v55 = vpop.permute.xlu2 %2396 }
0x2776   :  { %v2369_v44 = vpop.xlane.xlu0 %2368 }
0x2777   :  { %v2371_v27 = vperm.slane %v2369_v44, 0  ;;  %v2372_v45 = vperm.slane %v2369_v44, 1 }
0x2779   :  { %v2375_v39 = vsub.f32 %v7943_v40, %v2371_v27  ;;  %v2376_v38 = vsub.f32 %v8039_v21, %v2372_v45 }
0x277b   :  { %v2377_v43 = vmul.f32 1.442695, %v2375_v39  ;;  %v2379_v53 = vmul.f32 1.442695, %v2376_v38 }
0x277d   :  { %7098 = vpow2.f32 %v2377_v43 }
0x277e   :  { %7100 = vpow2.f32 %v2379_v53 }
0x2783   :  { %v7099_v50 = vpop.eup %7098 }
0x2784   :  { %v7101_v32 = vpop.eup %7100  ;;  %v2400_v42 = vmul.f32 %v7099_v50, %v8971_v14  ;;  %v2788_v14 = vperm.slane %v6592_v41, 1 }
0x2785   :  { %v2401_v10 = vmul.f32 %v7101_v32, %v2397_v55 }
0x2786   :  { %2405 = vperm.xlu0 %6770, %v2400_v42  }
0x2787   :  { %2408 = vperm.xlu2 %6779, %v2401_v10  }
0x27e1   :  { %v2409_v46 = vpop.permute.xlu2 %2408 }
0x27e2   :  { %v2411_v20 = vperm.slane %v2409_v46, %v8461_v61 }
0x27f8   :  { %v2406_v33 = vpop.permute.xlu0 %2405 }
0x27f9   :  { %v2410_v7 = vperm.slane %v2406_v33, %v8461_v61 }
0x27fb   :  { %v2412_v48 = vsel %vm93_vm1, %v2411_v20, %v2410_v7 }
0x27fc   :  { %v2414_v60 = vsel %vm384_vm13, %v2412_v48, 0.0 }
0x27fd   :  { %2415 = vadd.xlane.f32.xlu1 %v2414_v60  ;;  %v9040_v60 = vpop.f32.mrf.mxu0 }
0x2816   :  { %2786 = vperm.xlu1 %6777, %v2781_v5   ;;  %v5826_v5 = vpop.f32.mrf.mxu0 }
0x281e   :  { %2793 = vperm.xlu1 %6777, %v2788_v14  }
0x2826   :  { %6782 = vset.pattern.permute.xlu1 %v9685_v56 }
0x2870   :  { %v2416_v23 = vpop.xlane.xlu1 %2415 }
0x2871   :  { %v2417_v28 = vmax.f32 %v2416_v23, 1e-30 }
0x2873   :  { %v2419_v13 = vperm.slane %v2417_v28, 0  ;;  %v2420_v19 = vperm.slane %v2417_v28, 1 }
0x2875   :  { %7102 = vrcp.f32 %v2419_v13  ;;  %v2434_v31 = vand.u32 2147483648, %v2419_v13  ;;  %v2449_v8 = vand.u32 2147483648, %v2420_v19  ;;  %v2432_v27 = vand.u32 2147483647, %v2419_v13 }
0x2876   :  { %7104 = vrcp.f32 %v2420_v19  ;;  %v2447_v39 = vand.u32 2147483647, %v2420_v19  ;;  %vm2428_vm10 = vweird.f32 %v2419_v13  ;;  %vm2443_vm11 = vweird.f32 %v2420_v19 }
0x2877   :  { %v2435_v53 = vor.u32 1.1754944e-38, %v2434_v31  ;;  %v2450_v55 = vor.u32 1.1754944e-38, %v2449_v8  ;;  %vm2433_vm15 = vcmp.eq.f32.partialorder %v2432_v27, 8.507059e+37 }
0x2878   :  { %vm2448_vm0 = vcmp.eq.f32.partialorder %v2447_v39, 8.507059e+37 }
0x287b   :  { %v7103_v59 = vpop.eup %7102 }
0x287c   :  { %v7105_v11 = vpop.eup %7104  ;;  %v2424_v16 = vmul.f32 %v7103_v59, %v2419_v13  ;;  %vm2429_vm6 = vweird.f32 %v7103_v59 }
0x287d   :  { %v2439_v35 = vmul.f32 %v7105_v11, %v2420_v19  ;;  %vm2444_vm9 = vweird.f32 %v7105_v11  ;;  %vm2430_vm12 = vmor %vm2428_vm10, %vm2429_vm6 }
0x287e   :  { %v2425_v9 = vsub.f32 1.0, %v2424_v16  ;;  %vm2445_vm14 = vmor %vm2443_vm11, %vm2444_vm9 }
0x287f   :  { %v2440_v26 = vsub.f32 1.0, %v2439_v35 }
0x2880   :  { %v2426_v44 = vmul.f32 %v7103_v59, %v2425_v9 }
0x2881   :  { %v2441_v45 = vmul.f32 %v7105_v11, %v2440_v26 }
0x2882   :  { %v2427_v38 = vadd.f32 %v7103_v59, %v2426_v44 }
0x2883   :  { %v2442_v43 = vadd.f32 %v7105_v11, %v2441_v45 }
0x2884   :  { %v2431_v50 = vsel %vm2430_vm12, %v7103_v59, %v2427_v38 }
0x2885   :  { %v2446_v32 = vsel %vm2445_vm14, %v7105_v11, %v2442_v43  ;;  %v2436_v46 = vsel %vm2433_vm15, %v2435_v53, %v2431_v50 }
0x2886   :  { %v2451_v33 = vsel %vm2448_vm0, %v2450_v55, %v2446_v32  ;;  %v2437_v20 = vmul.f32 %v2436_v46, %v2400_v42  ;;  %v5832_v42 = vsel %vm271_vm8, %v5826_v5, -inf  ;;  %v9065_v46 = vpop.f32.mrf.mxu3 }
0x2887   :  { %v2452_v7 = vmul.f32 %v2451_v33, %v2401_v10  ;;  %5833 = vmax.xlane.f32.xlu1 %v5832_v42  ;;  %v6731_v42 = vld [vmem:[%s9673_s0 + $0x1e] sm:$0x3] }
0x2888   :  { %2456 = vperm.xlu2 %6779, %v2437_v20   ;;  %v2787_v8 = vpop.permute.xlu1 %2786 }
0x2889   :  { %2459 = vperm.xlu0 %6770, %v2452_v7  }
0x288e   :  { %v5800_v20 = vpop.f32.mrf.mxu3 }
0x288f   :  { %v5829_v7 = vsel %vm271_vm8, %v5800_v20, -inf }
0x2890   :  { %6780 = vset.pattern.permute.xlu2 %v9686_v36  ;;  %v2794_v38 = vpop.permute.xlu1 %2793 }
0x2891   :  { %2758 = vperm.xlu0 %6770, %v8162_v15   ;;  %2468 = vperm.xlu2 %6780, %v7943_v40  }
0x2899   :  { %6781 = vset.pattern.permute.xlu2 %v9685_v56 }
0x289a   :  { %2755 = vperm.xlu2 %6781, %v8034_v6  }
0x28e2   :  { %v2457_v48 = vpop.permute.xlu2 %2456 }
0x28e3   :  { %v2461_v14 = vperm.slane %v2457_v48, %v8461_v61 }
0x28eb   :  { %v9042_v41 = vpop.permute.xlu2 %2468 }
0x28f4   :  { %v2756_v28 = vpop.permute.xlu2 %2755 }
0x28f5   :  { %v2760_v19 = vperm.slane %v2756_v28, %v8461_v61 }
0x28fa   :  { %v5834_v55 = vpop.xlane.xlu1 %5833 }
0x28fb   :  { %v2460_v10 = vpop.permute.xlu0 %2459  ;;  %v5836_v50 = vsub.f32 %v5826_v5, %v5834_v55 }
0x28fc   :  { %v2462_v23 = vperm.slane %v2460_v10, %v8461_v61  ;;  %v6076_v10 = vpop.f32.mrf.mxu3 }
0x28fd   :  { %v5839_v32 = vmul.f32 1.442695, %v5836_v50 }
0x28fe   :  { %v2463_v40 = vsel %vm93_vm1, %v2462_v23, %v2461_v14  ;;  %v6079_v14 = vadd.f32 %v6731_v42, %v6076_v10 }
0x28ff   :  { %6576 = vst.msk [vmem:[%s9680_s8 + $0xa] sm:$0x3] %vm384_vm13, %v2463_v40 }
0x2900   :  { %v6733_v23 = vmul.f32 -1.442695, %v6079_v14 }
0x2903   :  { %v2759_v13 = vpop.permute.xlu0 %2758 }
0x2904   :  { %v2761_v0 = vperm.slane %v2759_v13, %v8461_v61 }
0x2906   :  { %v2762_v59 = vsel %vm93_vm1, %v2761_v0, %v2760_v19 }
0x2907   :  { %v2764_v11 = vsel %vm384_vm13, %v2762_v59, -inf }
0x2908   :  { %2765 = vmax.xlane.f32.xlu0 %v2764_v11 }
0x297b   :  { %v2766_v16 = vpop.xlane.xlu0 %2765 }
0x297c   :  { %v2768_v35 = vperm.slane %v2766_v16, 0  ;;  %v2769_v9 = vperm.slane %v2766_v16, 1 }
0x297e   :  { %v2772_v26 = vsub.f32 %v8034_v6, %v2768_v35  ;;  %v2773_v31 = vsub.f32 %v8162_v15, %v2769_v9 }
0x2980   :  { %v2774_v44 = vmul.f32 1.442695, %v2772_v26  ;;  %v2776_v27 = vmul.f32 1.442695, %v2773_v31 }
0x2982   :  { %7106 = vpow2.f32 %v2774_v44 }
0x2983   :  { %7108 = vpow2.f32 %v2776_v27 }
0x2984   :  { %7110 = vpow2.f32 %v5839_v32 }
0x2985   :  { %7112 = vtanh.f32 %v6079_v14 }
0x2986   :  { %7114 = vpow2.f32 %v6733_v23 }
0x2988   :  { %v7107_v45 = vpop.eup %7106 }
0x2989   :  { %v7109_v39 = vpop.eup %7108  ;;  %v9058_v43 = vmul.f32 %v7107_v45, %v2787_v8 }
0x298a   :  { %v9060_v53 = vmul.f32 %v7109_v39, %v2794_v38  ;;  %v7111_v33 = vpop.eup %7110 }
0x298b   :  { %2802 = vperm.xlu1 %6782, %v9058_v43   ;;  %v5844_v48 = vsel %vm271_vm8, %v7111_v33, 0.0  ;;  %v7113_v5 = vpop.eup %7112 }
0x298c   :  { %2805 = vperm.xlu2 %6781, %v9060_v53   ;;  %v7115_v40 = vpop.eup %7114 }
0x298d   :  { %v6083_v28 = vadd.f32 1.0, %v7115_v40 }
0x298f   :  { %7116 = vrcp.f32 %v6083_v28  ;;  %vm6089_vm4 = vweird.f32 %v6083_v28  ;;  %v6093_v44 = vand.u32 2147483647, %v6083_v28 }
0x2991   :  { %vm6094_vm6 = vcmp.eq.f32.partialorder %v6093_v44, 8.507059e+37 }
0x2993   :  { %6783 = vset.pattern.permute.xlu1 %v9686_v36 }
0x2995   :  { %v7117_v13 = vpop.eup %7116 }
0x2996   :  { %v6085_v19 = vmul.f32 %v7117_v13, %v6083_v28  ;;  %vm6090_vm3 = vweird.f32 %v7117_v13 }
0x2997   :  { %vm6091_vm5 = vmor %vm6089_vm4, %vm6090_vm3 }
0x2998   :  { %v6086_v11 = vsub.f32 1.0, %v6085_v19 }
0x299a   :  { %v6087_v16 = vmul.f32 %v7117_v13, %v6086_v11 }
0x299c   :  { %v6088_v31 = vadd.f32 %v7117_v13, %v6087_v16 }
0x299e   :  { %v6092_v27 = vsel %vm6091_vm5, %v7117_v13, %v6088_v31 }
0x29b5   :  { %5830 = vmax.xlane.f32.xlu2 %v5829_v7  ;;  %5845 = vadd.xlane.f32.xlu1 %v5844_v48 }
0x29cd   :  { %6102 = vrot.lane.b32.xlu2 %v7113_v5, %s7246_s17 }
0x29ce   :  { %2865 = vperm.xlu1 %6783, %v8034_v6   ;;  %v6095_v6 = vand.u32 2147483648, %v6083_v28 }
0x29d0   :  { %v6096_v45 = vor.u32 1.1754944e-38, %v6095_v6 }
0x29d2   :  { %v9075_v55 = vsel %vm6094_vm6, %v6096_v45, %v6092_v27 }
0x29d6   :  { %6788 = vset.pattern.permute.xlu1 %v9685_v56 }
0x29e6   :  { %v2806_v0 = vpop.permute.xlu2 %2805 }
0x29e7   :  { %v2808_v11 = vperm.slane %v2806_v0, %v8461_v61  ;;  %v6100_v0 = vmul.f32 %v9075_v55, %v8852_v12 }
0x29fd   :  { %v2803_v59 = vpop.permute.xlu1 %2802 }
0x29fe   :  { %v2807_v19 = vperm.slane %v2803_v59, %v8461_v61 }
0x2a00   :  { %v2809_v16 = vsel %vm93_vm1, %v2808_v11, %v2807_v19 }
0x2a28   :  { %v5831_v35 = vpop.xlane.xlu2 %5830  ;;  %v5846_v9 = vpop.xlane.xlu1 %5845 }
0x2a29   :  { %v5835_v26 = vsub.f32 %v5800_v20, %v5831_v35  ;;  %7118 = vrcp.f32 %v5846_v9  ;;  %v5873_v32 = vand.u32 2147483648, %v5846_v9  ;;  %vm5867_vm9 = vweird.f32 %v5846_v9 }
0x2a2a   :  { %v5871_v48 = vand.u32 2147483647, %v5846_v9  ;;  %v2811_v35 = vsel %vm384_vm13, %v2809_v16, 0.0 }
0x2a2b   :  { %v5837_v8 = vmul.f32 1.442695, %v5835_v26  ;;  %v5874_v5 = vor.u32 1.1754944e-38, %v5873_v32 }
0x2a2c   :  { %vm5872_vm12 = vcmp.eq.f32.partialorder %v5871_v48, 8.507059e+37 }
0x2a2d   :  { %7120 = vpow2.f32 %v5837_v8 }
0x2a2f   :  { %v7119_v39 = vpop.eup %7118 }
0x2a30   :  { %v5863_v38 = vmul.f32 %v7119_v39, %v5846_v9  ;;  %v6103_v50 = vpop.permute.xlu2 %6102  ;;  %vm5868_vm10 = vweird.f32 %v7119_v39 }
0x2a31   :  { %v6105_v20 = vmul.f32 %v6103_v50, %v9075_v55  ;;  %vm5869_vm11 = vmor %vm5867_vm9, %vm5868_vm10 }
0x2a32   :  { %v5864_v7 = vsub.f32 1.0, %v5863_v38 }
0x2a33   :  { %v7121_v42 = vpop.eup %7120  ;;  %6107 = vrot.lane.b32.xlu2 %v6105_v20, %s7247_s20 }
0x2a34   :  { %v5865_v10 = vmul.f32 %v7119_v39, %v5864_v7  ;;  %v5841_v14 = vsel %vm271_vm8, %v7121_v42, 0.0 }
0x2a35   :  { %5842 = vadd.xlane.f32.xlu0 %v5841_v14 }
0x2a36   :  { %v5866_v23 = vadd.f32 %v7119_v39, %v5865_v10 }
0x2a38   :  { %v5870_v40 = vsel %vm5869_vm11, %v7119_v39, %v5866_v23 }
0x2a39   :  { %v5875_v28 = vsel %vm5872_vm12, %v5874_v5, %v5870_v40 }
0x2a3a   :  { %v5876_v13 = vmul.f32 %v7111_v33, %v5875_v28  ;;  %v9094_v33 = vld [vmem:[%s9678_s2 + $0xe] sm:$0x3] }
0x2a3b   :  { %v3185_v9 = vperm.slane %v9094_v33, 1 }
0x2a3c   :  { %6725 = vst.msk [vmem:[%s9677_s7 + $0xe8] sm:$0xff] %vm271_vm8, %v5876_v13  ;;  %6727 = vmatmul.msk.f32.vlgmr.msra.gmra.mxu2 %vm271_vm8, %v5876_v13 }
0x2a5c   :  { %2812 = vadd.xlane.f32.xlu2 %v2811_v35 }
0x2a74   :  { %3155 = vperm.xlu2 %6781, %v8251_v51  }
0x2a7c   :  { %6785 = vset.pattern.permute.xlu2 %v8452_v3 }
0x2a84   :  { %3190 = vperm.xlu2 %6785, %v3185_v9  }
0x2a8c   :  { %6787 = vset.pattern.permute.xlu2 %v9685_v56 }
0x2a8d   :  { %v6108_v59 = vpop.permute.xlu2 %6107 }
0x2a8e   :  { %v9100_v26 = vadd.f32 %v6108_v59, %v6100_v0 }
0x2a90   :  { %v6123_v31 = vperm.slane %v9100_v26, 0  ;;  %v6118_v6 = vrot.slane %v9100_v26, 1 }
0x2a92   :  { %6125 = vrot.lane.b32.xlu0 %v6123_v31, %s7248_s21  ;;  %v6124_v8 = vperm.slane %v6118_v6, 0 }
0x2a94   :  { %6127 = vrot.lane.b32.xlu2 %v6124_v8, %s7248_s21 }
0x2a9c   :  { %6133 = vrot.lane.b32.xlu2 %v9100_v26, %s7248_s21 }
0x2aa8   :  { %v5843_v44 = vpop.xlane.xlu0 %5842 }
0x2aa9   :  { %7122 = vrcp.f32 %v5843_v44  ;;  %v5858_v39 = vand.u32 2147483648, %v5843_v44  ;;  %v5856_v50 = vand.u32 2147483647, %v5843_v44  ;;  %vm5852_vm15 = vweird.f32 %v5843_v44 }
0x2aab   :  { %v5859_v20 = vor.u32 1.1754944e-38, %v5858_v39  ;;  %vm5857_vm3 = vcmp.eq.f32.partialorder %v5856_v50, 8.507059e+37 }
0x2aaf   :  { %v7123_v12 = vpop.eup %7122 }
0x2ab0   :  { %v5848_v27 = vmul.f32 %v7123_v12, %v5843_v44  ;;  %vm5853_vm14 = vweird.f32 %v7123_v12 }
0x2ab1   :  { %vm5854_vm0 = vmor %vm5852_vm15, %vm5853_vm14  ;;  %vm6451_vm15 = vcmask 253952  }
0x2ab2   :  { %v5849_v45 = vsub.f32 1.0, %v5848_v27 }
0x2ab4   :  { %v5850_v38 = vmul.f32 %v7123_v12, %v5849_v45 }
0x2ab6   :  { %v5851_v32 = vadd.f32 %v7123_v12, %v5850_v38 }
0x2ab8   :  { %v5855_v7 = vsel %vm5854_vm0, %v7123_v12, %v5851_v32 }
0x2ab9   :  { %v5860_v48 = vsel %vm5857_vm3, %v5859_v20, %v5855_v7 }
0x2aba   :  { %v5861_v10 = vmul.f32 %v7121_v42, %v5860_v48  ;;  %v6120_v48 = vrot.slane %v8884_v62, 1  ;;  %v6119_v62 = vrot.slane %v8869_v2, 1 }
0x2abc   :  { %6724 = vst.msk [vmem:[%s9677_s7 + $0xe0] sm:$0xff] %vm271_vm8, %v5861_v10  ;;  %6726 = vmatmul.msk.f32.vlgmr.msra.gmra.mxu1 %vm271_vm8, %v5861_v10 }
0x2acf   :  { %v2813_v14 = vpop.xlane.xlu2 %2812 }
0x2ad0   :  { %v2814_v5 = vmax.f32 %v2813_v14, 1e-30 }
0x2ad2   :  { %v2816_v23 = vperm.slane %v2814_v5, 0  ;;  %v2817_v40 = vperm.slane %v2814_v5, 1 }
0x2ad4   :  { %7124 = vrcp.f32 %v2816_v23  ;;  %v2831_v9 = vand.u32 2147483648, %v2816_v23  ;;  %v2829_v59 = vand.u32 2147483647, %v2816_v23  ;;  %vm2825_vm5 = vweird.f32 %v2816_v23 }
0x2ad5   :  { %7126 = vrcp.f32 %v2817_v40  ;;  %v2846_v39 = vand.u32 2147483648, %v2817_v40  ;;  %vm2840_vm11 = vweird.f32 %v2817_v40  ;;  %v2844_v50 = vand.u32 2147483647, %v2817_v40 }
0x2ad6   :  { %v2832_v8 = vor.u32 1.1754944e-38, %v2831_v9  ;;  %vm2830_vm9 = vcmp.eq.f32.partialorder %v2829_v59, 8.507059e+37 }
0x2ad7   :  { %v3156_v16 = vpop.permute.xlu2 %3155  ;;  %v2847_v20 = vor.u32 1.1754944e-38, %v2846_v39  ;;  %vm2845_vm14 = vcmp.eq.f32.partialorder %v2844_v50, 8.507059e+37  ;;  %v9161_v50 = vpop.permute.xlu1 %2865 }
0x2ada   :  { %v7125_v28 = vpop.eup %7124 }
0x2adb   :  { %v7127_v13 = vpop.eup %7126  ;;  %v2821_v19 = vmul.f32 %v7125_v28, %v2816_v23  ;;  %vm2826_vm4 = vweird.f32 %v7125_v28 }
0x2adc   :  { %v2836_v11 = vmul.f32 %v7127_v13, %v2817_v40  ;;  %vm2827_vm6 = vmor %vm2825_vm5, %vm2826_vm4  ;;  %vm2841_vm10 = vweird.f32 %v7127_v13 }
0x2add   :  { %v2822_v35 = vsub.f32 1.0, %v2821_v19  ;;  %vm2842_vm12 = vmor %vm2840_vm11, %vm2841_vm10 }
0x2ade   :  { %v2837_v42 = vsub.f32 1.0, %v2836_v11 }
0x2adf   :  { %v2823_v0 = vmul.f32 %v7125_v28, %v2822_v35  ;;  %v9113_v27 = vpop.permute.xlu2 %3190 }
0x2ae0   :  { %v2838_v31 = vmul.f32 %v7127_v13, %v2837_v42  ;;  %v3158_v42 = vperm.slane %v3156_v16, %v8461_v61 }
0x2ae1   :  { %v2824_v6 = vadd.f32 %v7125_v28, %v2823_v0 }
0x2ae2   :  { %v2839_v12 = vadd.f32 %v7127_v13, %v2838_v31  ;;  %v6161_v31 = vrot.slane %v8979_v18, 1 }
0x2ae3   :  { %v2828_v44 = vsel %vm2827_vm6, %v7125_v28, %v2824_v6  ;;  %v3178_v28 = vperm.slane %v9094_v33, 0 }
0x2ae4   :  { %v2833_v45 = vsel %vm2830_vm9, %v2832_v8, %v2828_v44  ;;  %v2843_v32 = vsel %vm2842_vm12, %v7127_v13, %v2839_v12  ;;  %v6162_v44 = vrot.slane %v8991_v30, 1 }
0x2ae5   :  { %v2834_v38 = vmul.f32 %v2833_v45, %v9058_v43  ;;  %v2848_v7 = vsel %vm2845_vm14, %v2847_v20, %v2843_v32 }
0x2ae6   :  { %v2849_v10 = vmul.f32 %v2848_v7, %v9060_v53 }
0x2ae7   :  { %2853 = vperm.xlu0 %6770, %v2834_v38  }
0x2aee   :  { %v6128_v14 = vpop.permute.xlu2 %6127 }
0x2aef   :  { %v6132_v5 = vsel %vm176_vm7, %v6120_v48, %v6128_v14  ;;  %6453 = vst.msk [vmem:[%s9672_s10 + $0x18] sm:$0x1] %vm6451_vm15, %v6128_v14  ;;  %2856 = vperm.xlu0 %6770, %v2849_v10  }
0x2af0   :  { %6450 = vst.msk [vmem:[%s9672_s10 + $0x10] sm:$0xff] %vm38_vm2, %v6132_v5  ;;  %6739 = vmatpush.xpose.msk.msrb.mxu2 %vm38_vm2, %v6132_v5 }
0x2af6   :  { %v6134_v43 = vpop.permute.xlu2 %6133 }
0x2af7   :  { %3152 = vperm.xlu0 %6770, %v8155_v29   ;;  %6734 = vmatmul.msk.f32.vlgmr.msra.gmra.mxu0 %vm38_vm2, %v6134_v43 }
0x2aff   :  { %6784 = vset.pattern.permute.xlu0 %v8452_v3 }
0x2b04   :  { %v6126_v53 = vpop.permute.xlu0 %6125 }
0x2b05   :  { %v6131_v23 = vsel %vm176_vm7, %v6119_v62, %v6126_v53  ;;  %6452 = vst.msk [vmem:[%s9672_s10 + $0x8] sm:$0x1] %vm6451_vm15, %v6126_v53 }
0x2b06   :  { %6449 = vst.msk [vmem:[%s9672_s10] sm:$0xff] %vm38_vm2, %v6131_v23  ;;  %6737 = vmatpush.xpose.msk.msrb.mxu1 %vm38_vm2, %v6131_v23 }
0x2b07   :  { %3183 = vperm.xlu0 %6784, %v3178_v28  }
0x2b0f   :  { %6786 = vset.pattern.permute.xlu0 %v9685_v56 }
0x2b59   :  { %v2854_v40 = vpop.permute.xlu0 %2853 }
0x2b5a   :  { %v2858_v13 = vperm.slane %v2854_v40, %v8461_v61 }
0x2b61   :  { %v2857_v2 = vpop.permute.xlu0 %2856 }
0x2b62   :  { %v2859_v19 = vperm.slane %v2857_v2, %v8461_v61 }
0x2b64   :  { %v2860_v11 = vsel %vm93_vm1, %v2859_v19, %v2858_v13 }
0x2b65   :  { %6593 = vst.msk [vmem:[%s9680_s8 + $0xc] sm:$0x3] %vm384_vm13, %v2860_v11 }
0x2b69   :  { %v3153_v35 = vpop.permute.xlu0 %3152 }
0x2b6a   :  { %v3157_v33 = vperm.slane %v3153_v35, %v8461_v61 }
0x2b6c   :  { %v3159_v9 = vsel %vm93_vm1, %v3158_v42, %v3157_v33 }
0x2b6d   :  { %v3161_v0 = vsel %vm384_vm13, %v3159_v9, -inf }
0x2b6e   :  { %3162 = vmax.xlane.f32.xlu1 %v3161_v0 }
0x2b74   :  { %v6154_v59 = vpop.f32.mrf.mxu0 }
0x2b75   :  { %v6158_v6 = vrot.slane %v6154_v59, 1  ;;  %v6165_v8 = vperm.slane %v6154_v59, 0 }
0x2b77   :  { %v6166_v12 = vperm.slane %v6158_v6, 0  ;;  %v6169_v45 = vsel %vm176_vm7, %v6161_v31, %v6165_v8 }
0x2b78   :  { %v6277_v39 = vadd.f32 %v8985_v49, %v6169_v45 }
0x2b79   :  { %v6170_v16 = vsel %vm176_vm7, %v6162_v44, %v6166_v12  ;;  %v3184_v14 = vpop.permute.xlu0 %3183 }
0x2b7a   :  { %6297 = vmatpush.msra.mxu3 %v6277_v39  ;;  %v6278_v38 = vadd.f32 %v8985_v49, %v6170_v16 }
0x2b7c   :  { %6320 = vmatpush.msrb.mxu0 %v6278_v38 }
0x2be1   :  { %v3163_v32 = vpop.xlane.xlu1 %3162 }
0x2be2   :  { %v3165_v20 = vperm.slane %v3163_v32, 0  ;;  %v3166_v18 = vperm.slane %v3163_v32, 1 }
0x2be4   :  { %v3169_v7 = vsub.f32 %v8155_v29, %v3165_v20  ;;  %v3170_v30 = vsub.f32 %v8251_v51, %v3166_v18 }
0x2be6   :  { %v3171_v48 = vmul.f32 1.442695, %v3169_v7  ;;  %v3173_v10 = vmul.f32 1.442695, %v3170_v30 }
0x2be8   :  { %7128 = vpow2.f32 %v3171_v48 }
0x2be9   :  { %7130 = vpow2.f32 %v3173_v10 }
0x2bee   :  { %v7129_v5 = vpop.eup %7128 }
0x2bef   :  { %v7131_v43 = vpop.eup %7130  ;;  %v3194_v62 = vmul.f32 %v7129_v5, %v3184_v14  ;;  %v6626_v5 = vld [vmem:[%s9678_s2 + $0x10] sm:$0x3] }
0x2bf0   :  { %v3195_v49 = vmul.f32 %v7131_v43, %v9113_v27  ;;  %v3582_v43 = vperm.slane %v6626_v5, 1 }
0x2bf1   :  { %3199 = vperm.xlu0 %6786, %v3194_v62  }
0x2bf2   :  { %3202 = vperm.xlu2 %6787, %v3195_v49  }
0x2c4c   :  { %v3203_v53 = vpop.permute.xlu2 %3202 }
0x2c4d   :  { %v3205_v40 = vperm.slane %v3203_v53, %v8461_v61 }
0x2c63   :  { %v3200_v23 = vpop.permute.xlu0 %3199 }
0x2c64   :  { %v3204_v28 = vperm.slane %v3200_v23, %v8461_v61 }
0x2c66   :  { %v3206_v2 = vsel %vm93_vm1, %v3205_v40, %v3204_v28 }
0x2c67   :  { %v3208_v13 = vsel %vm384_vm13, %v3206_v2, 0.0 }
0x2c68   :  { %3209 = vadd.xlane.f32.xlu0 %v3208_v13 }
0x2c7c   :  { %3552 = vperm.xlu0 %6786, %v8322_v57  }
0x2cdb   :  { %v3210_v19 = vpop.xlane.xlu0 %3209 }
0x2cdc   :  { %v3211_v11 = vmax.f32 %v3210_v19, 1e-30 }
0x2cde   :  { %v3213_v35 = vperm.slane %v3211_v11, 0  ;;  %v3214_v42 = vperm.slane %v3211_v11, 1 }
0x2ce0   :  { %7132 = vrcp.f32 %v3213_v35  ;;  %v3228_v6 = vand.u32 2147483648, %v3213_v35  ;;  %v3243_v8 = vand.u32 2147483648, %v3214_v42  ;;  %v3226_v12 = vand.u32 2147483647, %v3213_v35 }
0x2ce1   :  { %7134 = vrcp.f32 %v3214_v42  ;;  %v3241_v39 = vand.u32 2147483647, %v3214_v42  ;;  %vm3222_vm3 = vweird.f32 %v3213_v35  ;;  %vm3237_vm4 = vweird.f32 %v3214_v42 }
0x2ce2   :  { %v3229_v32 = vor.u32 1.1754944e-38, %v3228_v6  ;;  %v3244_v20 = vor.u32 1.1754944e-38, %v3243_v8  ;;  %vm3227_vm9 = vcmp.eq.f32.partialorder %v3226_v12, 8.507059e+37 }
0x2ce3   :  { %vm3242_vm10 = vcmp.eq.f32.partialorder %v3241_v39, 8.507059e+37 }
0x2ce6   :  { %v7133_v27 = vpop.eup %7132 }
0x2ce7   :  { %v7135_v33 = vpop.eup %7134  ;;  %v3218_v9 = vmul.f32 %v7133_v27, %v3213_v35  ;;  %vm3223_vm7 = vweird.f32 %v7133_v27 }
0x2ce8   :  { %v3233_v0 = vmul.f32 %v7135_v33, %v3214_v42  ;;  %vm3238_vm0 = vweird.f32 %v7135_v33  ;;  %vm3224_vm5 = vmor %vm3222_vm3, %vm3223_vm7 }
0x2ce9   :  { %v3219_v59 = vsub.f32 1.0, %v3218_v9  ;;  %vm3239_vm6 = vmor %vm3237_vm4, %vm3238_vm0 }
0x2cea   :  { %v3234_v31 = vsub.f32 1.0, %v3233_v0  ;;  %v6736_v0 = vld [vmem:[%s9675_s1 + $0xf8] sm:$0xff] }
0x2ceb   :  { %v3220_v44 = vmul.f32 %v7133_v27, %v3219_v59  ;;  %6740 = vmatmul.msk.f32.vlgmr.msrb.gmra.mxu2 %vm38_vm2, %v6736_v0 }
0x2cec   :  { %v3235_v45 = vmul.f32 %v7135_v33, %v3234_v31 }
0x2ced   :  { %v3221_v16 = vadd.f32 %v7133_v27, %v3220_v44 }
0x2cee   :  { %v3236_v38 = vadd.f32 %v7135_v33, %v3235_v45  ;;  %v3553_v19 = vpop.permute.xlu0 %3552 }
0x2cef   :  { %v3225_v18 = vsel %vm3224_vm5, %v7133_v27, %v3221_v16  ;;  %v3555_v35 = vperm.slane %v3553_v19, %v8461_v61 }
0x2cf0   :  { %v3240_v7 = vsel %vm3239_vm6, %v7135_v33, %v3236_v38  ;;  %v3230_v30 = vsel %vm3227_vm9, %v3229_v32, %v3225_v18  ;;  %v3575_v33 = vperm.slane %v6626_v5, 0 }
0x2cf1   :  { %v3245_v48 = vsel %vm3242_vm10, %v3244_v20, %v3240_v7  ;;  %v3231_v10 = vmul.f32 %v3230_v30, %v3194_v62 }
0x2cf2   :  { %v3246_v14 = vmul.f32 %v3245_v48, %v3195_v49 }
0x2cf3   :  { %3250 = vperm.xlu1 %6788, %v3231_v10  }
0x2cf4   :  { %3253 = vperm.xlu2 %6787, %v3246_v14   ;;  %v9219_v14 = vpop.f32.mrf.mxu2 }
0x2cfb   :  { %3549 = vperm.xlu1 %6788, %v8227_v63  }
0x2cfc   :  { %6789 = vset.pattern.permute.xlu2 %v9686_v36 }
0x2cfd   :  { %3262 = vperm.xlu2 %6789, %v8155_v29  }
0x2d03   :  { %6791 = vset.pattern.permute.xlu1 %v8452_v3 }
0x2d05   :  { %3265 = vperm.xlu2 %6789, %v8251_v51  }
0x2d0b   :  { %3587 = vperm.xlu1 %6791, %v3582_v43  }
0x2d0d   :  { %6790 = vset.pattern.permute.xlu2 %v8452_v3 }
0x2d13   :  { %6793 = vset.pattern.permute.xlu1 %v9686_v36 }
0x2d14   :  { %3659 = vperm.xlu1 %6793, %v8227_v63  }
0x2d15   :  { %3580 = vperm.xlu2 %6790, %v3575_v33  }
0x2d1c   :  { %6795 = vset.pattern.permute.xlu1 %v9685_v56 }
0x2d1d   :  { %3946 = vperm.xlu1 %6795, %v8338_v1   ;;  %6792 = vset.pattern.permute.xlu2 %v9685_v56 }
0x2d25   :  { %6797 = vset.pattern.permute.xlu1 %v8452_v3 }
0x2d4e   :  { %v3254_v29 = vpop.permute.xlu2 %3253 }
0x2d4f   :  { %v3256_v28 = vperm.slane %v3254_v29, %v8461_v61 }
0x2d57   :  { %v3263_v62 = vpop.permute.xlu2 %3262 }
0x2d58   :  { %v3267_v53 = vperm.slane %v3263_v62, %v8461_v61 }
0x2d5f   :  { %v3266_v49 = vpop.permute.xlu2 %3265 }
0x2d60   :  { %v3268_v51 = vperm.slane %v3266_v49, %v8461_v61 }
0x2d62   :  { %v3269_v23 = vsel %vm93_vm1, %v3268_v51, %v3267_v53 }
0x2d63   :  { %6611 = vst.msk [vmem:[%s9679_s9 + $0xe] sm:$0x3] %vm384_vm13, %v3269_v23 }
0x2d65   :  { %v3251_v40 = vpop.permute.xlu1 %3250 }
0x2d66   :  { %v3255_v2 = vperm.slane %v3251_v40, %v8461_v61 }
0x2d68   :  { %v3257_v13 = vsel %vm93_vm1, %v3256_v28, %v3255_v2 }
0x2d69   :  { %6610 = vst.msk [vmem:[%s9680_s8 + $0xe] sm:$0x3] %vm384_vm13, %v3257_v13 }
0x2d6d   :  { %v3550_v11 = vpop.permute.xlu1 %3549 }
0x2d6e   :  { %v3554_v42 = vperm.slane %v3550_v11, %v8461_v61  ;;  %v9223_v29 = vpop.f32.mrf.mxu2 }
0x2d6f   :  { %v3581_v39 = vpop.permute.xlu2 %3580  ;;  %v6229_v62 = vsel %vm271_vm8, %v9223_v29, -inf }
0x2d70   :  { %v3556_v27 = vsel %vm93_vm1, %v3555_v35, %v3554_v42  ;;  %6230 = vmax.xlane.f32.xlu1 %v6229_v62 }
0x2d71   :  { %v3558_v9 = vsel %vm384_vm13, %v3556_v27, -inf }
0x2d72   :  { %3559 = vmax.xlane.f32.xlu0 %v3558_v9  ;;  %v9232_v9 = vpop.f32.mrf.mxu1 }
0x2d7d   :  { %v3588_v20 = vpop.permute.xlu1 %3587 }
0x2de5   :  { %v3560_v59 = vpop.xlane.xlu0 %3559 }
0x2de6   :  { %v3562_v31 = vperm.slane %v3560_v59, 0  ;;  %v3563_v6 = vperm.slane %v3560_v59, 1 }
0x2de8   :  { %v3566_v8 = vsub.f32 %v8227_v63, %v3562_v31  ;;  %v3567_v44 = vsub.f32 %v8322_v57, %v3563_v6  ;;  %v6735_v63 = vld [vmem:[%s9675_s1 + $0xf0] sm:$0xff] }
0x2de9   :  { %6738 = vmatmul.msk.f32.vlgmr.msrb.gmra.mxu1 %vm38_vm2, %v6735_v63  ;;  %v6643_v31 = vld [vmem:[%s9678_s2 + $0x12] sm:$0x3] }
0x2dea   :  { %v3568_v12 = vmul.f32 1.442695, %v3566_v8  ;;  %v3570_v45 = vmul.f32 1.442695, %v3567_v44  ;;  %v3972_v6 = vperm.slane %v6643_v31, 0  ;;  %v3979_v62 = vperm.slane %v6643_v31, 1 }
0x2dec   :  { %7136 = vpow2.f32 %v3568_v12  ;;  %3977 = vperm.xlu1 %6797, %v3972_v6  }
0x2ded   :  { %7138 = vpow2.f32 %v3570_v45 }
0x2df2   :  { %v7137_v16 = vpop.eup %7136 }
0x2df3   :  { %v3591_v38 = vmul.f32 %v7137_v16, %v3581_v39  ;;  %v7139_v32 = vpop.eup %7138 }
0x2df4   :  { %v9210_v18 = vmul.f32 %v7139_v32, %v3588_v20  ;;  %6799 = vset.pattern.permute.xlu1 %v9685_v56 }
0x2df5   :  { %3596 = vperm.xlu2 %6792, %v3591_v38  }
0x2dfd   :  { %3599 = vperm.xlu2 %6792, %v9210_v18  }
0x2e4f   :  { %v3597_v7 = vpop.permute.xlu2 %3596 }
0x2e50   :  { %v3601_v48 = vperm.slane %v3597_v7, %v8461_v61 }
0x2e57   :  { %v3600_v30 = vpop.permute.xlu2 %3599 }
0x2e58   :  { %v3602_v10 = vperm.slane %v3600_v30, %v8461_v61 }
0x2e5a   :  { %v3603_v5 = vsel %vm93_vm1, %v3602_v10, %v3601_v48 }
0x2e5b   :  { %v3605_v43 = vsel %vm384_vm13, %v3603_v5, 0.0 }
0x2e5c   :  { %3606 = vadd.xlane.f32.xlu0 %v3605_v43 }
0x2e66   :  { %v6197_v0 = vpop.f32.mrf.mxu1 }
0x2e67   :  { %v6226_v59 = vsel %vm271_vm8, %v6197_v0, -inf }
0x2ecf   :  { %v3607_v49 = vpop.xlane.xlu0 %3606 }
0x2ed0   :  { %v3608_v53 = vmax.f32 %v3607_v49, 1e-30 }
0x2ed2   :  { %v3610_v51 = vperm.slane %v3608_v53, 0  ;;  %v3611_v44 = vperm.slane %v3608_v53, 1 }
0x2ed4   :  { %7140 = vrcp.f32 %v3610_v51  ;;  %v3625_v2 = vand.u32 2147483648, %v3610_v51  ;;  %v3623_v19 = vand.u32 2147483647, %v3610_v51  ;;  %vm3619_vm11 = vweird.f32 %v3610_v51 }
0x2ed5   :  { %7142 = vrcp.f32 %v3611_v44  ;;  %v3640_v53 = vand.u32 2147483648, %v3611_v44  ;;  %vm3634_vm0 = vweird.f32 %v3611_v44 }
0x2ed6   :  { %v3626_v35 = vor.u32 1.1754944e-38, %v3625_v2  ;;  %vm3624_vm14 = vcmp.eq.f32.partialorder %v3623_v19, 8.507059e+37 }
0x2eda   :  { %v7141_v23 = vpop.eup %7140 }
0x2edb   :  { %v3615_v40 = vmul.f32 %v7141_v23, %v3610_v51  ;;  %vm3620_vm2 = vweird.f32 %v7141_v23  ;;  %v3638_v51 = vand.u32 2147483647, %v3611_v44 }
0x2edc   :  { %vm3621_vm12 = vmor %vm3619_vm11, %vm3620_vm2 }
0x2edd   :  { %v3616_v28 = vsub.f32 1.0, %v3615_v40  ;;  %v3641_v40 = vor.u32 1.1754944e-38, %v3640_v53  ;;  %vm3639_vm4 = vcmp.eq.f32.partialorder %v3638_v51, 8.507059e+37 }
0x2edf   :  { %v3617_v13 = vmul.f32 %v7141_v23, %v3616_v28 }
0x2ee1   :  { %v3618_v11 = vadd.f32 %v7141_v23, %v3617_v13 }
0x2ee3   :  { %v3622_v42 = vsel %vm3621_vm12, %v7141_v23, %v3618_v11 }
0x2ee4   :  { %v3627_v27 = vsel %vm3624_vm14, %v3626_v35, %v3622_v42 }
0x2ee5   :  { %v3628_v33 = vmul.f32 %v3627_v27, %v3591_v38  ;;  %v7143_v38 = vpop.eup %7142 }
0x2ee6   :  { %v3630_v7 = vmul.f32 %v7143_v38, %v3611_v44  ;;  %vm3635_vm7 = vweird.f32 %v7143_v38 }
0x2ee7   :  { %3647 = vperm.xlu2 %6792, %v3628_v33   ;;  %vm3636_vm3 = vmor %vm3634_vm0, %vm3635_vm7 }
0x2ee8   :  { %v3631_v5 = vsub.f32 1.0, %v3630_v7 }
0x2eea   :  { %v3632_v43 = vmul.f32 %v7143_v38, %v3631_v5 }
0x2eec   :  { %v3633_v49 = vadd.f32 %v7143_v38, %v3632_v43 }
0x2eee   :  { %v3637_v23 = vsel %vm3636_vm3, %v7143_v38, %v3633_v49 }
0x2eef   :  { %6794 = vset.pattern.permute.xlu2 %v9686_v36  ;;  %v3642_v28 = vsel %vm3639_vm4, %v3641_v40, %v3637_v23 }
0x2ef0   :  { %3662 = vperm.xlu2 %6794, %v8322_v57   ;;  %v3660_v57 = vpop.permute.xlu1 %3659  ;;  %v3643_v2 = vmul.f32 %v3642_v28, %v9210_v18 }
0x2ef1   :  { %v3664_v45 = vperm.slane %v3660_v57, %v8461_v61 }
0x2ef8   :  { %6796 = vset.pattern.permute.xlu2 %v9685_v56  ;;  %v3947_v32 = vpop.permute.xlu1 %3946 }
0x2ef9   :  { %3949 = vperm.xlu2 %6796, %v8403_v47   ;;  %v3951_v63 = vperm.slane %v3947_v32, %v8461_v61 }
0x2f00   :  { %v6231_v13 = vpop.xlane.xlu1 %6230 }
0x2f01   :  { %6798 = vset.pattern.permute.xlu2 %v8452_v3  ;;  %v6233_v35 = vsub.f32 %v9223_v29, %v6231_v13 }
0x2f03   :  { %v6236_v27 = vmul.f32 1.442695, %v6233_v35 }
0x2f22   :  { %6227 = vmax.xlane.f32.xlu2 %v6226_v59 }
0x2f3a   :  { %3984 = vperm.xlu2 %6798, %v3979_v62  }
0x2f41   :  { %v9238_v8 = vpop.permute.xlu2 %3647 }
0x2f42   :  { %6800 = vset.pattern.permute.xlu2 %v9685_v56 }
0x2f4a   :  { %v3663_v12 = vpop.permute.xlu2 %3662 }
0x2f4b   :  { %v3665_v39 = vperm.slane %v3663_v12, %v8461_v61 }
0x2f4d   :  { %v3666_v16 = vsel %vm93_vm1, %v3665_v39, %v3664_v45  ;;  %v3978_v39 = vpop.permute.xlu1 %3977 }
0x2f4e   :  { %6628 = vst.msk [vmem:[%s9679_s9 + $0x10] sm:$0x3] %vm384_vm13, %v3666_v16 }
0x2f53   :  { %v3950_v20 = vpop.permute.xlu2 %3949 }
0x2f54   :  { %v3952_v30 = vperm.slane %v3950_v20, %v8461_v61 }
0x2f56   :  { %v3953_v48 = vsel %vm93_vm1, %v3952_v30, %v3951_v63  ;;  %v3652_v30 = vperm.slane %v9238_v8, %v8461_v61 }
0x2f57   :  { %v3955_v10 = vsel %vm384_vm13, %v3953_v48, -inf }
0x2f58   :  { %3956 = vmax.xlane.f32.xlu0 %v3955_v10 }
0x2f6c   :  { %3650 = vperm.xlu0 %6786, %v3643_v2  }
0x2f74   :  { %4740 = vperm.xlu0 %6786, %v8575_v22  }
0x2f7c   :  { %5534 = vperm.xlu0 %6786, %v9065_v46  }
0x2f84   :  { %5931 = vperm.xlu0 %6786, %v9232_v9  }
0x2f8c   :  { %6802 = vset.pattern.permute.xlu0 %v8452_v3 }
0x2f95   :  { %v6228_v19 = vpop.xlane.xlu2 %6227 }
0x2f96   :  { %v6232_v11 = vsub.f32 %v6197_v0, %v6228_v19 }
0x2f98   :  { %v6234_v42 = vmul.f32 1.442695, %v6232_v11 }
0x2f9a   :  { %7144 = vpow2.f32 %v6234_v42 }
0x2f9b   :  { %7146 = vpow2.f32 %v6236_v27 }
0x2f9d   :  { %v3985_v16 = vpop.permute.xlu2 %3984 }
0x2fa0   :  { %v7145_v33 = vpop.eup %7144 }
0x2fa1   :  { %v6238_v18 = vsel %vm271_vm8, %v7145_v33, 0.0  ;;  %v7147_v59 = vpop.eup %7146 }
0x2fa2   :  { %6239 = vadd.xlane.f32.xlu1 %v6238_v18  ;;  %v6241_v31 = vsel %vm271_vm8, %v7147_v59, 0.0 }
0x2faa   :  { %6242 = vadd.xlane.f32.xlu1 %v6241_v31 }
0x2fcb   :  { %v3957_v6 = vpop.xlane.xlu0 %3956 }
0x2fcc   :  { %v3959_v57 = vperm.slane %v3957_v6, 0  ;;  %v3960_v44 = vperm.slane %v3957_v6, 1 }
0x2fce   :  { %v3963_v12 = vsub.f32 %v8338_v1, %v3959_v57  ;;  %v3964_v0 = vsub.f32 %v8403_v47, %v3960_v44 }
0x2fd0   :  { %v3965_v29 = vmul.f32 1.442695, %v3963_v12  ;;  %v3967_v45 = vmul.f32 1.442695, %v3964_v0 }
0x2fd2   :  { %7148 = vpow2.f32 %v3965_v29 }
0x2fd3   :  { %7150 = vpow2.f32 %v3967_v45 }
0x2fd8   :  { %v7149_v38 = vpop.eup %7148 }
0x2fd9   :  { %v7151_v32 = vpop.eup %7150  ;;  %v9263_v20 = vmul.f32 %v7149_v38, %v3978_v39 }
0x2fda   :  { %v9265_v63 = vmul.f32 %v7151_v32, %v3985_v16 }
0x2fdb   :  { %3993 = vperm.xlu1 %6799, %v9263_v20  }
0x2fdc   :  { %3996 = vperm.xlu2 %6800, %v9265_v63  }
0x2fde   :  { %v3651_v7 = vpop.permute.xlu0 %3650 }
0x2fdf   :  { %v3653_v48 = vperm.slane %v3651_v7, %v8461_v61 }
0x2fe1   :  { %v3654_v10 = vsel %vm93_vm1, %v3653_v48, %v3652_v30 }
0x2fe2   :  { %6627 = vst.msk [vmem:[%s9680_s8 + $0x10] sm:$0x3] %vm384_vm13, %v3654_v10 }
0x3015   :  { %v6240_v5 = vpop.xlane.xlu1 %6239 }
0x3016   :  { %7152 = vrcp.f32 %v6240_v5  ;;  %v6255_v51 = vand.u32 2147483648, %v6240_v5  ;;  %v6253_v8 = vand.u32 2147483647, %v6240_v5  ;;  %vm6249_vm6 = vweird.f32 %v6240_v5 }
0x3018   :  { %v6256_v2 = vor.u32 1.1754944e-38, %v6255_v51  ;;  %vm6254_vm10 = vcmp.eq.f32.partialorder %v6253_v8, 8.507059e+37 }
0x301c   :  { %v7153_v43 = vpop.eup %7152 }
0x301d   :  { %v6245_v62 = vmul.f32 %v7153_v43, %v6240_v5  ;;  %v6243_v49 = vpop.xlane.xlu1 %6242  ;;  %vm6250_vm5 = vweird.f32 %v7153_v43 }
0x301e   :  { %7154 = vrcp.f32 %v6243_v49  ;;  %vm6251_vm9 = vmor %vm6249_vm6, %vm6250_vm5  ;;  %v6270_v27 = vand.u32 2147483648, %v6243_v49  ;;  %v6268_v31 = vand.u32 2147483647, %v6243_v49  ;;  %vm6264_vm11 = vweird.f32 %v6243_v49 }
0x301f   :  { %v6246_v53 = vsub.f32 1.0, %v6245_v62 }
0x3020   :  { %v6271_v57 = vor.u32 1.1754944e-38, %v6270_v27  ;;  %vm6269_vm14 = vcmp.eq.f32.partialorder %v6268_v31, 8.507059e+37 }
0x3021   :  { %v6247_v23 = vmul.f32 %v7153_v43, %v6246_v53 }
0x3023   :  { %v6248_v40 = vadd.f32 %v7153_v43, %v6247_v23 }
0x3024   :  { %v7155_v28 = vpop.eup %7154 }
0x3025   :  { %v6252_v13 = vsel %vm6251_vm9, %v7153_v43, %v6248_v40  ;;  %v6260_v19 = vmul.f32 %v7155_v28, %v6243_v49  ;;  %vm6265_vm2 = vweird.f32 %v7155_v28 }
0x3026   :  { %v6257_v11 = vsel %vm6254_vm10, %v6256_v2, %v6252_v13  ;;  %vm6266_vm12 = vmor %vm6264_vm11, %vm6265_vm2 }
0x3027   :  { %v6258_v35 = vmul.f32 %v7145_v33, %v6257_v11  ;;  %v6261_v42 = vsub.f32 1.0, %v6260_v19 }
0x3029   :  { %6741 = vst.msk [vmem:[%s9677_s7 + $0xf0] sm:$0xff] %vm271_vm8, %v6258_v35  ;;  %v6262_v18 = vmul.f32 %v7155_v28, %v6261_v42  ;;  %6743 = vmatmul.msk.f32.vlgmr.msra.gmra.mxu3 %vm271_vm8, %v6258_v35 }
0x302b   :  { %v6263_v6 = vadd.f32 %v7155_v28, %v6262_v18 }
0x302d   :  { %v6267_v44 = vsel %vm6266_vm12, %v7155_v28, %v6263_v6 }
0x302e   :  { %v6272_v12 = vsel %vm6269_vm14, %v6271_v57, %v6267_v44 }
0x302f   :  { %v6273_v33 = vmul.f32 %v7147_v59, %v6272_v12 }
0x3031   :  { %6742 = vst.msk [vmem:[%s9677_s7 + $0xf8] sm:$0xff] %vm271_vm8, %v6273_v33  ;;  %6744 = vmatmul.msk.f32.vlgmr.msrb.gmra.mxu0 %vm271_vm8, %v6273_v33 }
0x3036   :  { %v3997_v0 = vpop.permute.xlu2 %3996 }
0x3037   :  { %v3999_v45 = vperm.slane %v3997_v0, %v8461_v61 }
0x304d   :  { %v3994_v29 = vpop.permute.xlu1 %3993 }
0x304e   :  { %v3998_v39 = vperm.slane %v3994_v29, %v8461_v61 }
0x3050   :  { %v4000_v16 = vsel %vm93_vm1, %v3999_v45, %v3998_v39 }
0x3051   :  { %v4002_v38 = vsel %vm384_vm13, %v4000_v16, 0.0 }
0x3052   :  { %4003 = vadd.xlane.f32.xlu1 %v4002_v38  ;;  %v4741_v38 = vpop.permute.xlu0 %4740 }
0x306b   :  { %5140 = vperm.xlu1 %6799, %v8834_v24  }
0x3073   :  { %6801 = vset.pattern.permute.xlu1 %v8452_v3 }
0x30c5   :  { %v4004_v59 = vpop.xlane.xlu1 %4003 }
0x30c6   :  { %v4005_v32 = vmax.f32 %v4004_v59, 1e-30 }
0x30c8   :  { %v4007_v7 = vperm.slane %v4005_v32, 0  ;;  %v4008_v30 = vperm.slane %v4005_v32, 1  ;;  %v4745_v32 = vperm.slane %v4741_v38, %v8461_v61  ;;  %v9344_v38 = vpop.f32.mrf.mxu3 }
0x30ca   :  { %7156 = vrcp.f32 %v4007_v7  ;;  %v4022_v53 = vand.u32 2147483648, %v4007_v7  ;;  %v4020_v23 = vand.u32 2147483647, %v4007_v7  ;;  %vm4016_vm7 = vweird.f32 %v4007_v7 }
0x30cb   :  { %7158 = vrcp.f32 %v4008_v30  ;;  %v4037_v11 = vand.u32 2147483648, %v4008_v30  ;;  %vm4031_vm5 = vweird.f32 %v4008_v30  ;;  %v4035_v42 = vand.u32 2147483647, %v4008_v30 }
0x30cc   :  { %v4023_v28 = vor.u32 1.1754944e-38, %v4022_v53  ;;  %vm4021_vm3 = vcmp.eq.f32.partialorder %v4020_v23, 8.507059e+37  ;;  %v5535_v53 = vpop.permute.xlu0 %5534 }
0x30cd   :  { %v4038_v18 = vor.u32 1.1754944e-38, %v4037_v11  ;;  %vm4036_vm9 = vcmp.eq.f32.partialorder %v4035_v42, 8.507059e+37 }
0x30d0   :  { %v7157_v48 = vpop.eup %7156 }
0x30d1   :  { %v7159_v10 = vpop.eup %7158  ;;  %v4012_v5 = vmul.f32 %v7157_v48, %v4007_v7  ;;  %vm4017_vm8 = vweird.f32 %v7157_v48 }
0x30d2   :  { %v4027_v43 = vmul.f32 %v7159_v10, %v4008_v30  ;;  %vm4018_vm0 = vmor %vm4016_vm7, %vm4017_vm8  ;;  %vm4032_vm4 = vweird.f32 %v7159_v10 }
0x30d3   :  { %v4013_v62 = vsub.f32 1.0, %v4012_v5  ;;  %vm4033_vm6 = vmor %vm4031_vm5, %vm4032_vm4 }
0x30d4   :  { %v4028_v49 = vsub.f32 1.0, %v4027_v43 }
0x30d5   :  { %v4014_v51 = vmul.f32 %v7157_v48, %v4013_v62 }
0x30d6   :  { %v4029_v8 = vmul.f32 %v7159_v10, %v4028_v49 }
0x30d7   :  { %v4015_v40 = vadd.f32 %v7157_v48, %v4014_v51 }
0x30d8   :  { %v4030_v13 = vadd.f32 %v7159_v10, %v4029_v8  ;;  %v5539_v8 = vperm.slane %v5535_v53, %v8461_v61 }
0x30d9   :  { %v4019_v2 = vsel %vm4018_vm0, %v7157_v48, %v4015_v40 }
0x30da   :  { %v4024_v19 = vsel %vm4021_vm3, %v4023_v28, %v4019_v2  ;;  %v4034_v27 = vsel %vm4033_vm6, %v7159_v10, %v4030_v13  ;;  %v5932_v13 = vpop.permute.xlu0 %5931 }
0x30db   :  { %v4025_v35 = vmul.f32 %v4024_v19, %v9263_v20  ;;  %v4039_v31 = vsel %vm4036_vm9, %v4038_v18, %v4034_v27  ;;  %v5936_v11 = vperm.slane %v5932_v13, %v8461_v61  ;;  %v6677_v18 = vld [vmem:[%s9678_s2 + $0x16] sm:$0x3] }
0x30dc   :  { %v4040_v6 = vmul.f32 %v4039_v31, %v9265_v63  ;;  %v4766_v31 = vperm.slane %v6677_v18, 0 }
0x30dd   :  { %4044 = vperm.xlu2 %6800, %v4025_v35   ;;  %v5141_v10 = vpop.permute.xlu1 %5140 }
0x30de   :  { %v5143_v43 = vperm.slane %v5141_v10, %v8461_v61 }
0x30e5   :  { %4047 = vperm.xlu2 %6800, %v4040_v6   ;;  %v6694_v6 = vld [vmem:[%s9678_s2 + $0x18] sm:$0x3] }
0x30ed   :  { %4343 = vperm.xlu2 %6800, %v8408_v17  }
0x30f5   :  { %4346 = vperm.xlu2 %6800, %v8530_v58  }
0x30fd   :  { %4743 = vperm.xlu2 %6800, %v8702_v52  }
0x3105   :  { %5137 = vperm.xlu2 %6800, %v8768_v34  }
0x310d   :  { %5537 = vperm.xlu2 %6800, %v9040_v60  }
0x3115   :  { %5934 = vperm.xlu2 %6800, %v9219_v14  }
0x311d   :  { %6803 = vset.pattern.permute.xlu2 %v8452_v3 }
0x3137   :  { %v4045_v20 = vpop.permute.xlu2 %4044 }
0x3138   :  { %v4049_v44 = vperm.slane %v4045_v20, %v8461_v61  ;;  %v6660_v20 = vld [vmem:[%s9678_s2 + $0x14] sm:$0x3] }
0x313f   :  { %v4048_v57 = vpop.permute.xlu2 %4047 }
0x3140   :  { %v4050_v63 = vperm.slane %v4048_v57, %v8461_v61  ;;  %v5163_v57 = vperm.slane %v6694_v6, 0 }
0x3142   :  { %v4051_v12 = vsel %vm93_vm1, %v4050_v63, %v4049_v44  ;;  %v4369_v44 = vperm.slane %v6660_v20, 0  ;;  %v4376_v63 = vperm.slane %v6660_v20, 1 }
0x3143   :  { %6644 = vst.msk [vmem:[%s9680_s8 + $0x12] sm:$0x3] %vm384_vm13, %v4051_v12  ;;  %v6711_v12 = vld [vmem:[%s9678_s2 + $0x1a] sm:$0x3] }
0x3147   :  { %v4344_v33 = vpop.permute.xlu2 %4343 }
0x3148   :  { %v4348_v29 = vperm.slane %v4344_v33, %v8461_v61  ;;  %v5560_v33 = vperm.slane %v6711_v12, 0 }
0x314f   :  { %v4347_v0 = vpop.permute.xlu2 %4346 }
0x3150   :  { %v4349_v45 = vperm.slane %v4347_v0, %v8461_v61  ;;  %v4773_v0 = vperm.slane %v6677_v18, 1 }
0x3152   :  { %v4350_v39 = vsel %vm93_vm1, %v4349_v45, %v4348_v29  ;;  %v6728_v29 = vld [vmem:[%s9678_s2 + $0x1c] sm:$0x3] }
0x3153   :  { %v4352_v16 = vsel %vm384_vm13, %v4350_v39, -inf  ;;  %v5957_v45 = vperm.slane %v6728_v29, 0  ;;  %v5964_v39 = vperm.slane %v6728_v29, 1 }
0x3154   :  { %4353 = vmax.xlane.f32.xlu1 %v4352_v16  ;;  %v5170_v16 = vperm.slane %v6694_v6, 1 }
0x3157   :  { %v4744_v59 = vpop.permute.xlu2 %4743 }
0x3158   :  { %v4746_v7 = vperm.slane %v4744_v59, %v8461_v61  ;;  %v5567_v59 = vperm.slane %v6711_v12, 1 }
0x315a   :  { %v4747_v30 = vsel %vm93_vm1, %v4746_v7, %v4745_v32  ;;  %v6745_v32 = vld [vmem:[%s9678_s2 + $0x1e] sm:$0x3] }
0x315b   :  { %v4749_v48 = vsel %vm384_vm13, %v4747_v30, -inf  ;;  %v6354_v7 = vperm.slane %v6745_v32, 0  ;;  %v6361_v30 = vperm.slane %v6745_v32, 1 }
0x315c   :  { %4750 = vmax.xlane.f32.xlu0 %v4749_v48 }
0x315f   :  { %v5138_v5 = vpop.permute.xlu2 %5137 }
0x3160   :  { %v5142_v62 = vperm.slane %v5138_v5, %v8461_v61 }
0x3162   :  { %v5144_v49 = vsel %vm93_vm1, %v5143_v43, %v5142_v62 }
0x3163   :  { %v5146_v51 = vsel %vm384_vm13, %v5144_v49, -inf }
0x3164   :  { %5147 = vmax.xlane.f32.xlu2 %v5146_v51 }
0x3167   :  { %v5538_v23 = vpop.permute.xlu2 %5537 }
0x3168   :  { %v5540_v40 = vperm.slane %v5538_v23, %v8461_v61 }
0x316a   :  { %v5541_v28 = vsel %vm93_vm1, %v5540_v40, %v5539_v8 }
0x316b   :  { %v5543_v2 = vsel %vm384_vm13, %v5541_v28, -inf }
0x316c   :  { %5544 = vmax.xlane.f32.xlu1 %v5543_v2 }
0x316f   :  { %v5935_v19 = vpop.permute.xlu2 %5934 }
0x3170   :  { %v5937_v35 = vperm.slane %v5935_v19, %v8461_v61 }
0x3172   :  { %v5938_v42 = vsel %vm93_vm1, %v5937_v35, %v5936_v11 }
0x3173   :  { %v5940_v27 = vsel %vm384_vm13, %v5938_v42, -inf }
0x3174   :  { %5941 = vmax.xlane.f32.xlu0 %v5940_v27 }
0x317c   :  { %4771 = vperm.xlu2 %6803, %v4766_v31  }
0x3184   :  { %5168 = vperm.xlu2 %6803, %v5163_v57  }
0x3185   :  { %4374 = vperm.xlu1 %6801, %v4369_v44  }
0x3188   :  { %4381 = vperm.xlu0 %6802, %v4376_v63  }
0x318c   :  { %5565 = vperm.xlu2 %6803, %v5560_v33  }
0x318d   :  { %4778 = vperm.xlu1 %6801, %v4773_v0  }
0x3190   :  { %5962 = vperm.xlu0 %6802, %v5957_v45  }
0x3194   :  { %5969 = vperm.xlu2 %6803, %v5964_v39  }
0x3195   :  { %5175 = vperm.xlu1 %6801, %v5170_v16  }
0x3198   :  { %6804 = vset.pattern.permute.xlu0 %v9685_v56 }
0x3199   :  { %6328 = vperm.xlu0 %6804, %v9344_v38  }
0x319c   :  { %6806 = vset.pattern.permute.xlu2 %v9685_v56 }
0x319d   :  { %5572 = vperm.xlu1 %6801, %v5567_v59  }
0x31a1   :  { %6805 = vset.pattern.permute.xlu0 %v8452_v3 }
0x31a5   :  { %6359 = vperm.xlu1 %6801, %v6354_v7  }
0x31a9   :  { %6366 = vperm.xlu0 %6805, %v6361_v30  }
0x31ad   :  { %6807 = vset.pattern.permute.xlu1 %v9685_v56 }
0x31b1   :  { %6808 = vset.pattern.permute.xlu0 %v9685_v56 }
0x31c7   :  { %v4354_v23 = vpop.xlane.xlu1 %4353 }
0x31c8   :  { %v4356_v3 = vperm.slane %v4354_v23, 0  ;;  %v4357_v8 = vperm.slane %v4354_v23, 1 }
0x31ca   :  { %v4360_v40 = vsub.f32 %v8408_v17, %v4356_v3  ;;  %v4361_v28 = vsub.f32 %v8530_v58, %v4357_v8 }
0x31cc   :  { %v4362_v2 = vmul.f32 1.442695, %v4360_v40  ;;  %v4364_v42 = vmul.f32 1.442695, %v4361_v28 }
0x31cf   :  { %v4751_v48 = vpop.xlane.xlu0 %4750 }
0x31d0   :  { %v4753_v10 = vperm.slane %v4751_v48, 0  ;;  %v4754_v13 = vperm.slane %v4751_v48, 1 }
0x31d2   :  { %v4757_v5 = vsub.f32 %v8575_v22, %v4753_v10  ;;  %v4758_v18 = vsub.f32 %v8702_v52, %v4754_v13 }
0x31d4   :  { %v4759_v43 = vmul.f32 1.442695, %v4757_v5  ;;  %v4761_v20 = vmul.f32 1.442695, %v4758_v18 }
0x31d6   :  { %7160 = vpow2.f32 %v4759_v43 }
0x31d7   :  { %v5148_v62 = vpop.xlane.xlu2 %5147  ;;  %7162 = vpow2.f32 %v4362_v2 }
0x31d8   :  { %v5150_v11 = vperm.slane %v5148_v62, 0  ;;  %7164 = vpow2.f32 %v4364_v42  ;;  %v5151_v57 = vperm.slane %v5148_v62, 1 }
0x31d9   :  { %7166 = vpow2.f32 %v4761_v20 }
0x31da   :  { %v5154_v31 = vsub.f32 %v8768_v34, %v5150_v11  ;;  %v5155_v45 = vsub.f32 %v8834_v24, %v5151_v57 }
0x31dc   :  { %v7161_v49 = vpop.eup %7160  ;;  %v5156_v63 = vmul.f32 1.442695, %v5154_v31  ;;  %v5158_v30 = vmul.f32 1.442695, %v5155_v45 }
0x31dd   :  { %v7163_v44 = vpop.eup %7162 }
0x31de   :  { %v7165_v39 = vpop.eup %7164  ;;  %7168 = vpow2.f32 %v5156_v63 }
0x31df   :  { %v4772_v53 = vpop.permute.xlu2 %4771  ;;  %v5545_v35 = vpop.xlane.xlu1 %5544 }
0x31e0   :  { %v9356_v51 = vmul.f32 %v7161_v49, %v4772_v53  ;;  %v5547_v33 = vperm.slane %v5545_v35, 0  ;;  %v5548_v48 = vperm.slane %v5545_v35, 1  ;;  %v7167_v10 = vpop.eup %7166 }
0x31e2   :  { %4787 = vperm.xlu0 %6808, %v9356_v51   ;;  %v5551_v32 = vsub.f32 %v9065_v46, %v5547_v33  ;;  %v5552_v23 = vsub.f32 %v9040_v60, %v5548_v48 }
0x31e4   :  { %v5553_v43 = vmul.f32 1.442695, %v5551_v32  ;;  %v7169_v53 = vpop.eup %7168  ;;  %v5555_v13 = vmul.f32 1.442695, %v5552_v23 }
0x31e7   :  { %v5942_v19 = vpop.xlane.xlu0 %5941  ;;  %v5169_v7 = vpop.permute.xlu2 %5168 }
0x31e8   :  { %v5944_v27 = vperm.slane %v5942_v19, 0  ;;  %v5945_v62 = vperm.slane %v5942_v19, 1  ;;  %v9376_v40 = vmul.f32 %v7169_v53, %v5169_v7 }
0x31ea   :  { %v5948_v6 = vsub.f32 %v9232_v9, %v5944_v27  ;;  %v5949_v2 = vsub.f32 %v9219_v14, %v5945_v62 }
0x31ec   :  { %v5950_v0 = vmul.f32 1.442695, %v5948_v6  ;;  %v5952_v42 = vmul.f32 1.442695, %v5949_v2 }
0x31ee   :  { %7170 = vpow2.f32 %v5950_v0 }
0x31ef   :  { %7172 = vpow2.f32 %v5158_v30  ;;  %v5566_v19 = vpop.permute.xlu2 %5565 }
0x31f0   :  { %7174 = vpow2.f32 %v5553_v43 }
0x31f1   :  { %7176 = vpow2.f32 %v5555_v13 }
0x31f2   :  { %7178 = vpow2.f32 %v5952_v42 }
0x31f3   :  { %7180 = vtanh.f32 %v9100_v26 }
0x31f4   :  { %v7171_v3 = vpop.eup %7170 }
0x31f5   :  { %v7173_v11 = vpop.eup %7172 }
0x31f6   :  { %v7175_v18 = vpop.eup %7174 }
0x31f7   :  { %v4375_v12 = vpop.permute.xlu1 %4374  ;;  %v9385_v31 = vmul.f32 %v7175_v18, %v5566_v19  ;;  %v7177_v6 = vpop.eup %7176 }
0x31f8   :  { %v9364_v29 = vmul.f32 %v7163_v44, %v4375_v12  ;;  %v5970_v57 = vpop.permute.xlu2 %5969  ;;  %v7179_v63 = vpop.eup %7178 }
0x31f9   :  { %v9391_v12 = vmul.f32 %v7179_v63, %v5970_v57  ;;  %v9418_v63 = vpop.f32.mrf.mxu0 }
0x31fa   :  { %v4382_v16 = vpop.permute.xlu0 %4381  ;;  %4390 = vperm.xlu2 %6806, %v9364_v29  }
0x31fb   :  { %v9368_v59 = vmul.f32 %v7165_v39, %v4382_v16 }
0x31fd   :  { %4393 = vperm.xlu1 %6807, %v9368_v59  }
0x31ff   :  { %v4779_v5 = vpop.permute.xlu1 %4778 }
0x3200   :  { %v9372_v49 = vmul.f32 %v7167_v10, %v4779_v5 }
0x3202   :  { %v5963_v8 = vpop.permute.xlu0 %5962  ;;  %4790 = vperm.xlu2 %6806, %v9372_v49  }
0x3203   :  { %v9378_v28 = vmul.f32 %v7171_v3, %v5963_v8 }
0x3205   :  { %5184 = vperm.xlu1 %6807, %v9376_v40  }
0x3207   :  { %v5176_v35 = vpop.permute.xlu1 %5175 }
0x3208   :  { %v9382_v27 = vmul.f32 %v7173_v11, %v5176_v35 }
0x320a   :  { %5187 = vperm.xlu2 %6806, %v9382_v27  }
0x320b   :  { %v9394_v33 = vpop.permute.xlu0 %6328 }
0x320d   :  { %5581 = vperm.xlu1 %6807, %v9385_v31  }
0x320f   :  { %v5573_v20 = vpop.permute.xlu1 %5572 }
0x3210   :  { %v9388_v44 = vmul.f32 %v7177_v6, %v5573_v20 }
0x3212   :  { %5584 = vperm.xlu0 %6808, %v9388_v44  }
0x3215   :  { %5981 = vperm.xlu1 %6807, %v9391_v12  }
0x3217   :  { %v9402_v10 = vpop.permute.xlu1 %6359 }
0x321b   :  { %v9396_v0 = vpop.permute.xlu0 %6366 }
0x3254   :  { %v4391_v45 = vpop.permute.xlu2 %4390  ;;  %v4788_v39 = vpop.permute.xlu0 %4787 }
0x3255   :  { %v4792_v32 = vperm.slane %v4788_v39, %v8461_v61  ;;  %v4395_v43 = vperm.slane %v4391_v45, %v8461_v61  ;;  %v7181_v45 = vpop.eup %7180 }
0x325c   :  { %v4791_v16 = vpop.permute.xlu2 %4790 }
0x325d   :  { %v4793_v7 = vperm.slane %v4791_v16, %v8461_v61 }
0x325f   :  { %v4794_v30 = vsel %vm93_vm1, %v4793_v7, %v4792_v32 }
0x3260   :  { %v4796_v48 = vsel %vm384_vm13, %v4794_v30, 0.0 }
0x3261   :  { %4797 = vadd.xlane.f32.xlu0 %v4796_v48 }
0x3264   :  { %v5188_v3 = vpop.permute.xlu2 %5187 }
0x3265   :  { %v5190_v2 = vperm.slane %v5188_v3, %v8461_v61 }
0x326f   :  { %v4394_v5 = vpop.permute.xlu1 %4393 }
0x3270   :  { %v4396_v62 = vperm.slane %v4394_v5, %v8461_v61 }
0x3272   :  { %v4397_v53 = vsel %vm93_vm1, %v4396_v62, %v4395_v43 }
0x3273   :  { %v4399_v23 = vsel %vm384_vm13, %v4397_v53, 0.0 }
0x3274   :  { %4400 = vadd.xlane.f32.xlu1 %v4399_v23 }
0x3277   :  { %v5185_v8 = vpop.permute.xlu1 %5184 }
0x3278   :  { %v5189_v13 = vperm.slane %v5185_v8, %v8461_v61 }
0x327a   :  { %v5191_v19 = vsel %vm93_vm1, %v5190_v2, %v5189_v13 }
0x327b   :  { %v5193_v11 = vsel %vm384_vm13, %v5191_v19, 0.0 }
0x327c   :  { %5194 = vadd.xlane.f32.xlu2 %v5193_v11 }
0x327f   :  { %v5582_v35 = vpop.permute.xlu1 %5581 }
0x3280   :  { %v5586_v18 = vperm.slane %v5582_v35, %v8461_v61 }
0x3284   :  { %v5585_v42 = vpop.permute.xlu0 %5584 }
0x3285   :  { %v5587_v6 = vperm.slane %v5585_v42, %v8461_v61 }
0x3287   :  { %v5588_v20 = vsel %vm93_vm1, %v5587_v6, %v5586_v18  ;;  %v5982_v39 = vpop.permute.xlu1 %5981 }
0x3288   :  { %v5590_v57 = vsel %vm384_vm13, %v5588_v20, 0.0  ;;  %v5984_v19 = vperm.slane %v5982_v39, %v8461_v61 }
0x3289   :  { %5591 = vadd.xlane.f32.xlu1 %v5590_v57 }
0x3294   :  { %5978 = vperm.xlu2 %6806, %v9378_v28  }
0x329c   :  { %6331 = vperm.xlu2 %6806, %v9418_v63  }
0x32a2   :  { %6113 = vrot.lane.b32.xlu1 %v7181_v45, %s7246_s17 }
0x32a4   :  { %6810 = vset.pattern.permute.xlu2 %v9686_v36 }
0x32d4   :  { %v9423_v16 = vpop.xlane.xlu0 %4797 }
0x32d5   :  { %v4799_v7 = vmax.f32 %v9423_v16, 1e-30 }
0x32d7   :  { %v4802_v26 = vperm.slane %v4799_v7, 1 }
0x32d9   :  { %vm4825_vm8 = vweird.f32 %v4802_v26 }
0x32e7   :  { %v4401_v32 = vpop.xlane.xlu1 %4400 }
0x32e8   :  { %v4402_v30 = vmax.f32 %v4401_v32, 1e-30 }
0x32ea   :  { %v4404_v48 = vperm.slane %v4402_v30, 0 }
0x32ec   :  { %7182 = vrcp.f32 %v4404_v48  ;;  %v4419_v3 = vand.u32 2147483648, %v4404_v48  ;;  %v4417_v13 = vand.u32 2147483647, %v4404_v48  ;;  %vm4413_vm2 = vweird.f32 %v4404_v48 }
0x32ed   :  { %7184 = vrcp.f32 %v4802_v26 }
0x32ee   :  { %v4420_v6 = vor.u32 1.1754944e-38, %v4419_v3  ;;  %vm4418_vm12 = vcmp.eq.f32.partialorder %v4417_v13, 8.507059e+37 }
0x32ef   :  { %v9428_v5 = vpop.xlane.xlu2 %5194 }
0x32f2   :  { %v7183_v43 = vpop.eup %7182 }
0x32f3   :  { %v4409_v62 = vmul.f32 %v7183_v43, %v4404_v48  ;;  %v7185_v23 = vpop.eup %7184  ;;  %vm4414_vm10 = vweird.f32 %v7183_v43  ;;  %v6333_v48 = vperm.slane %v9394_v33, %v8461_v61  ;;  %v4829_v33 = vand.u32 2147483647, %v4802_v26 }
0x32f4   :  { %v4821_v35 = vmul.f32 %v7185_v23, %v4802_v26  ;;  %vm4415_vm11 = vmor %vm4413_vm2, %vm4414_vm10  ;;  %vm4826_vm14 = vweird.f32 %v7185_v23 }
0x32f5   :  { %v4410_v53 = vsub.f32 1.0, %v4409_v62  ;;  %vm4827_vm7 = vmor %vm4825_vm8, %vm4826_vm14  ;;  %vm4830_vm0 = vcmp.eq.f32.partialorder %v4829_v33, 8.507059e+37 }
0x32f6   :  { %v4822_v32 = vsub.f32 1.0, %v4821_v35  ;;  %v4831_v35 = vand.u32 2147483648, %v4802_v26 }
0x32f7   :  { %v5979_v8 = vpop.permute.xlu2 %5978  ;;  %v4411_v2 = vmul.f32 %v7183_v43, %v4410_v53 }
0x32f8   :  { %v5983_v11 = vperm.slane %v5979_v8, %v8461_v61  ;;  %v4405_v8 = vperm.slane %v4402_v30, 1  ;;  %v4823_v3 = vmul.f32 %v7185_v23, %v4822_v32 }
0x32f9   :  { %v4412_v42 = vadd.f32 %v7183_v43, %v4411_v2 }
0x32fa   :  { %v5985_v18 = vsel %vm93_vm1, %v5984_v19, %v5983_v11  ;;  %7186 = vrcp.f32 %v4405_v8  ;;  %vm4428_vm4 = vweird.f32 %v4405_v8 }
0x32fb   :  { %v5987_v20 = vsel %vm384_vm13, %v5985_v18, 0.0  ;;  %v4416_v57 = vsel %vm4415_vm11, %v7183_v43, %v4412_v42  ;;  %v4832_v18 = vor.u32 1.1754944e-38, %v4831_v35 }
0x32fc   :  { %5988 = vadd.xlane.f32.xlu0 %v5987_v20  ;;  %v4421_v45 = vsel %vm4418_vm12, %v4420_v6, %v4416_v57  ;;  %v9435_v53 = vpop.xlane.xlu1 %5591 }
0x32fd   :  { %v4422_v62 = vmul.f32 %v4421_v45, %v9364_v29  ;;  %v5593_v19 = vmax.f32 %v9435_v53, 1e-30  ;;  %v4824_v29 = vadd.f32 %v7185_v23, %v4823_v3 }
0x32ff   :  { %v6332_v39 = vpop.permute.xlu2 %6331  ;;  %4441 = vperm.xlu1 %6807, %v4422_v62   ;;  %v5596_v11 = vperm.slane %v5593_v19, 1  ;;  %v4828_v30 = vsel %vm4827_vm7, %v7185_v23, %v4824_v29  ;;  %v4434_v23 = vand.u32 2147483648, %v4405_v8 }
0x3300   :  { %v6334_v2 = vperm.slane %v6332_v39, %v8461_v61  ;;  %v7187_v42 = vpop.eup %7186  ;;  %v4833_v6 = vsel %vm4830_vm0, %v4832_v18, %v4828_v30 }
0x3301   :  { %7188 = vrcp.f32 %v5596_v11  ;;  %v4424_v20 = vmul.f32 %v7187_v42, %v4405_v8  ;;  %v4834_v57 = vmul.f32 %v4833_v6, %v9372_v49  ;;  %vm4429_vm3 = vweird.f32 %v7187_v42 }
0x3302   :  { %v6335_v43 = vsel %vm93_vm1, %v6334_v2, %v6333_v48  ;;  %v4432_v48 = vand.u32 2147483647, %v4405_v8  ;;  %vm4430_vm5 = vmor %vm4428_vm4, %vm4429_vm3  ;;  %v4435_v3 = vor.u32 1.1754944e-38, %v4434_v23  ;;  %v5625_v29 = vand.u32 2147483648, %v5596_v11 }
0x3303   :  { %v6337_v13 = vsel %vm384_vm13, %v6335_v43, -inf  ;;  %v4425_v32 = vsub.f32 1.0, %v4424_v20  ;;  %vm5619_vm10 = vweird.f32 %v5596_v11  ;;  %v5623_v35 = vand.u32 2147483647, %v5596_v11 }
0x3304   :  { %6338 = vmax.xlane.f32.xlu2 %v6337_v13  ;;  %vm4433_vm6 = vcmp.eq.f32.partialorder %v4432_v48, 8.507059e+37  ;;  %v5626_v8 = vor.u32 1.1754944e-38, %v5625_v29 }
0x3305   :  { %v4426_v39 = vmul.f32 %v7187_v42, %v4425_v32  ;;  %vm5624_vm11 = vcmp.eq.f32.partialorder %v5623_v35, 8.507059e+37 }
0x3307   :  { %6812 = vset.pattern.permute.xlu1 %v9686_v36  ;;  %v7189_v45 = vpop.eup %7188 }
0x3308   :  { %4453 = vperm.xlu1 %6812, %v8408_v17   ;;  %v5615_v62 = vmul.f32 %v7189_v45, %v5596_v11  ;;  %v4427_v17 = vadd.f32 %v7187_v42, %v4426_v39  ;;  %vm5620_vm9 = vweird.f32 %v7189_v45 }
0x3309   :  { %vm5621_vm2 = vmor %vm5619_vm10, %vm5620_vm9 }
0x330a   :  { %v5616_v26 = vsub.f32 1.0, %v5615_v62  ;;  %v4431_v49 = vsel %vm4430_vm5, %v7187_v42, %v4427_v17 }
0x330b   :  { %v4436_v13 = vsel %vm4433_vm6, %v4435_v3, %v4431_v49 }
0x330c   :  { %v5617_v2 = vmul.f32 %v7189_v45, %v5616_v26 }
0x330e   :  { %v5618_v43 = vadd.f32 %v7189_v45, %v5617_v2 }
0x3310   :  { %6814 = vset.pattern.permute.xlu1 %v9685_v56  ;;  %v5622_v33 = vsel %vm5621_vm2, %v7189_v45, %v5618_v43 }
0x3311   :  { %4841 = vperm.xlu1 %6814, %v4834_v57  }
0x3314   :  { %v9464_v11 = vpop.permute.xlu1 %6113 }
0x3319   :  { %6815 = vset.pattern.permute.xlu1 %v9686_v36 }
0x331a   :  { %4853 = vperm.xlu1 %6815, %v8702_v52   ;;  %v4437_v52 = vmul.f32 %v4436_v13, %v9368_v59 }
0x331c   :  { %4059 = vperm.xlu2 %6810, %v8403_v47   ;;  %v5627_v47 = vsel %vm5624_vm11, %v5626_v8, %v5622_v33 }
0x331d   :  { %v5628_v30 = vmul.f32 %v5627_v47, %v9388_v44 }
0x3322   :  { %5247 = vperm.xlu1 %6815, %v8768_v34   ;;  %v5196_v34 = vmax.f32 %v9428_v5, 1e-30 }
0x3324   :  { %6811 = vset.pattern.permute.xlu2 %v9685_v56  ;;  %v5198_v59 = vperm.slane %v5196_v34, 0 }
0x3325   :  { %4444 = vperm.xlu2 %6811, %v4437_v52  }
0x3326   :  { %7190 = vrcp.f32 %v5198_v59  ;;  %vm5207_vm3 = vweird.f32 %v5198_v59 }
0x332a   :  { %6818 = vset.pattern.permute.xlu1 %v9685_v56 }
0x332b   :  { %5635 = vperm.xlu1 %6818, %v5628_v30  }
0x332d   :  { %6813 = vset.pattern.permute.xlu2 %v9686_v36 }
0x332e   :  { %4456 = vperm.xlu2 %6813, %v8530_v58   ;;  %v7191_v58 = vpop.eup %7190 }
0x332f   :  { %v5203_v20 = vmul.f32 %v7191_v58, %v5198_v59  ;;  %vm5208_vm0 = vweird.f32 %v7191_v58 }
0x3330   :  { %vm5209_vm4 = vmor %vm5207_vm3, %vm5208_vm0 }
0x3331   :  { %v5204_v17 = vsub.f32 1.0, %v5203_v20 }
0x3333   :  { %v5205_v29 = vmul.f32 %v7191_v58, %v5204_v17 }
0x3336   :  { %4850 = vperm.xlu2 %6813, %v8575_v22  }
0x333e   :  { %6816 = vset.pattern.permute.xlu2 %v9685_v56 }
0x336f   :  { %v9466_v44 = vpop.xlane.xlu0 %5988 }
0x3370   :  { %v5990_v42 = vmax.f32 %v9466_v44, 1e-30 }
0x3371   :  { %v4442_v22 = vpop.permute.xlu1 %4441 }
0x3372   :  { %v5992_v18 = vperm.slane %v5990_v42, 0 }
0x3374   :  { %7192 = vrcp.f32 %v5992_v18  ;;  %v6007_v49 = vand.u32 2147483648, %v5992_v18  ;;  %v6005_v13 = vand.u32 2147483647, %v5992_v18  ;;  %vm6001_vm14 = vweird.f32 %v5992_v18 }
0x3376   :  { %v6008_v33 = vor.u32 1.1754944e-38, %v6007_v49  ;;  %vm6006_vm7 = vcmp.eq.f32.partialorder %v6005_v13, 8.507059e+37 }
0x3377   :  { %v6339_v6 = vpop.xlane.xlu2 %6338 }
0x3378   :  { %v6341_v57 = vperm.slane %v6339_v6, 0  ;;  %v6342_v45 = vperm.slane %v6339_v6, 1  ;;  %v5206_v6 = vadd.f32 %v7191_v58, %v5205_v29 }
0x337a   :  { %v7193_v32 = vpop.eup %7192  ;;  %v6345_v62 = vsub.f32 %v9344_v38, %v6341_v57  ;;  %v6346_v39 = vsub.f32 %v9418_v63, %v6342_v45  ;;  %v4454_v35 = vpop.permute.xlu1 %4453  ;;  %v5210_v17 = vsel %vm5209_vm4, %v7191_v58, %v5206_v6 }
0x337b   :  { %v5997_v26 = vmul.f32 %v7193_v32, %v5992_v18  ;;  %vm6002_vm12 = vweird.f32 %v7193_v32  ;;  %v5211_v18 = vand.u32 2147483647, %v5198_v59  ;;  %v4458_v58 = vperm.slane %v4454_v35, %v8461_v61 }
0x337c   :  { %v6347_v23 = vmul.f32 1.442695, %v6345_v62  ;;  %v6349_v48 = vmul.f32 1.442695, %v6346_v39  ;;  %vm6003_vm8 = vmor %vm6001_vm14, %vm6002_vm12  ;;  %v5213_v62 = vand.u32 2147483648, %v5198_v59 }
0x337d   :  { %v5998_v2 = vsub.f32 1.0, %v5997_v26  ;;  %v4446_v26 = vperm.slane %v4442_v22, %v8461_v61  ;;  %vm5212_vm5 = vcmp.eq.f32.partialorder %v5211_v18, 8.507059e+37 }
0x337e   :  { %7194 = vpow2.f32 %v6347_v23  ;;  %v5214_v23 = vor.u32 1.1754944e-38, %v5213_v62 }
0x337f   :  { %7196 = vpow2.f32 %v6349_v48  ;;  %v9473_v3 = vpop.permute.xlu2 %4059  ;;  %v5999_v43 = vmul.f32 %v7193_v32, %v5998_v2 }
0x3380   :  { %v5215_v59 = vsel %vm5212_vm5, %v5214_v23, %v5210_v17 }
0x3381   :  { %v6000_v52 = vadd.f32 %v7193_v32, %v5999_v43  ;;  %v5216_v48 = vmul.f32 %v5215_v59, %v9376_v40 }
0x3383   :  { %v6004_v8 = vsel %vm6003_vm8, %v7193_v32, %v6000_v52  ;;  %v5595_v52 = vperm.slane %v5593_v19, 0 }
0x3384   :  { %v7195_v47 = vpop.eup %7194  ;;  %v6009_v30 = vsel %vm6006_vm7, %v6008_v33, %v6004_v8 }
0x3385   :  { %v7197_v20 = vpop.eup %7196  ;;  %v9476_v57 = vmul.f32 %v7195_v47, %v9402_v10  ;;  %v6010_v45 = vmul.f32 %v6009_v30, %v9378_v28  ;;  %vm5604_vm0 = vweird.f32 %v5595_v52 }
0x3386   :  { %v9480_v39 = vmul.f32 %v7197_v20, %v9396_v0  ;;  %v9487_v0 = vpop.permute.xlu1 %4841 }
0x3387   :  { %6375 = vperm.xlu0 %6808, %v9476_v57   ;;  %v4445_v32 = vpop.permute.xlu2 %4444  ;;  %6029 = vperm.xlu1 %6818, %v6010_v45  }
0x3388   :  { %6378 = vperm.xlu2 %6816, %v9480_v39   ;;  %v4447_v10 = vperm.slane %v4445_v32, %v8461_v61 }
0x338a   :  { %v4448_v28 = vsel %vm93_vm1, %v4447_v10, %v4446_v26 }
0x338b   :  { %6661 = vst.msk [vmem:[%s9680_s8 + $0x14] sm:$0x3] %vm384_vm13, %v4448_v28  ;;  %v5610_v28 = vand.u32 2147483648, %v5595_v52 }
0x338e   :  { %v4854_v40 = vpop.permute.xlu1 %4853 }
0x338f   :  { %6809 = vset.pattern.permute.xlu0 %v9686_v36  ;;  %v4457_v22 = vpop.permute.xlu2 %4456  ;;  %6821 = vset.pattern.permute.xlu1 %v9686_v36  ;;  %v4856_v13 = vperm.slane %v4854_v40, %v8461_v61 }
0x3390   :  { %5235 = vperm.xlu2 %6816, %v5216_v48   ;;  %v4459_v2 = vperm.slane %v4457_v22, %v8461_v61  ;;  %880 = vperm.xlu0 %6809, %v7584_v54   ;;  %v5608_v48 = vand.u32 2147483647, %v5595_v52  ;;  %v5611_v22 = vor.u32 1.1754944e-38, %v5610_v28  ;;  %v4844_v28 = vperm.slane %v9487_v0, %v8461_v61 }
0x3391   :  { %6041 = vperm.xlu1 %6821, %v9232_v9   ;;  %v4801_v9 = vperm.slane %v4799_v7, 0 }
0x3392   :  { %v4460_v49 = vsel %vm93_vm1, %v4459_v2, %v4458_v58  ;;  %vm5609_vm4 = vcmp.eq.f32.partialorder %v5608_v48, 8.507059e+37 }
0x3393   :  { %6662 = vst.msk [vmem:[%s9679_s9 + $0x14] sm:$0x3] %vm384_vm13, %v4460_v49  ;;  %7198 = vrcp.f32 %v4801_v9  ;;  %vm4810_vm9 = vweird.f32 %v4801_v9  ;;  %v4814_v30 = vand.u32 2147483647, %v4801_v9 }
0x3395   :  { %vm4815_vm2 = vcmp.eq.f32.partialorder %v4814_v30, 8.507059e+37 }
0x3397   :  { %v4851_v43 = vpop.permute.xlu2 %4850 }
0x3398   :  { %6817 = vset.pattern.permute.xlu2 %v9686_v36  ;;  %v4855_v29 = vperm.slane %v4851_v43, %v8461_v61  ;;  %1677 = vperm.xlu0 %6809, %v7897_v4   ;;  %v5199_v4 = vperm.slane %v5196_v34, 1  ;;  %v4816_v34 = vand.u32 2147483648, %v4801_v9  ;;  %v5248_v43 = vpop.permute.xlu1 %5247 }
0x3399   :  { %5250 = vperm.xlu2 %6817, %v8834_v24   ;;  %6823 = vset.pattern.permute.xlu1 %v9685_v56  ;;  %v7199_v35 = vpop.eup %7198 }
0x339a   :  { %v4857_v54 = vsel %vm93_vm1, %v4856_v13, %v4855_v29  ;;  %7200 = vrcp.f32 %v5199_v4  ;;  %v4806_v24 = vmul.f32 %v7199_v35, %v4801_v9  ;;  %vm4811_vm6 = vweird.f32 %v7199_v35 }
0x339b   :  { %6679 = vst.msk [vmem:[%s9679_s9 + $0x16] sm:$0x3] %vm384_vm13, %v4857_v54  ;;  %7202 = vrcp.f32 %v5595_v52  ;;  %vm4812_vm10 = vmor %vm4810_vm9, %vm4811_vm6  ;;  %v4817_v6 = vor.u32 1.1754944e-38, %v4816_v34  ;;  %v5228_v62 = vand.u32 2147483648, %v5199_v4  ;;  %vm5222_vm12 = vweird.f32 %v5199_v4 }
0x339c   :  { %v4807_v33 = vsub.f32 1.0, %v4806_v24  ;;  %v5226_v32 = vand.u32 2147483647, %v5199_v4  ;;  %v5252_v29 = vperm.slane %v5248_v43, %v8461_v61 }
0x339d   :  { %v5229_v10 = vor.u32 1.1754944e-38, %v5228_v62 }
0x339e   :  { %v4808_v7 = vmul.f32 %v7199_v35, %v4807_v33  ;;  %vm5227_vm8 = vcmp.eq.f32.partialorder %v5226_v32, 8.507059e+37  ;;  %v2870_v32 = vperm.slane %v9161_v50, %v8461_v61 }
0x33a0   :  { %2471 = vperm.xlu0 %6809, %v8039_v21   ;;  %v7201_v8 = vpop.eup %7200  ;;  %v4809_v21 = vadd.f32 %v7199_v35, %v4808_v7  ;;  %v5636_v0 = vpop.permute.xlu1 %5635 }
0x33a1   :  { %v5218_v16 = vmul.f32 %v7201_v8, %v5199_v4  ;;  %v7203_v5 = vpop.eup %7202  ;;  %vm5223_vm11 = vweird.f32 %v7201_v8 }
0x33a2   :  { %v4813_v53 = vsel %vm4812_vm10, %v7199_v35, %v4809_v21  ;;  %vm5224_vm14 = vmor %vm5222_vm12, %vm5223_vm11  ;;  %vm5605_vm7 = vweird.f32 %v7203_v5  ;;  %v1679_v21 = vperm.slane %v8954_v37, %v8461_v61 }
0x33a3   :  { %v5219_v47 = vsub.f32 1.0, %v5218_v16  ;;  %v4818_v20 = vsel %vm4815_vm2, %v4817_v6, %v4813_v53  ;;  %vm5606_vm3 = vmor %vm5604_vm0, %vm5605_vm7  ;;  %v2473_v53 = vperm.slane %v9042_v41, %v8461_v61 }
0x33a4   :  { %v4819_v18 = vmul.f32 %v4818_v20, %v9356_v51 }
0x33a5   :  { %v5220_v19 = vmul.f32 %v7201_v8, %v5219_v47 }
0x33a8   :  { %2868 = vperm.xlu0 %6809, %v8162_v15   ;;  %v5600_v15 = vmul.f32 %v7203_v5, %v5595_v52 }
0x33aa   :  { %v5601_v45 = vsub.f32 1.0, %v5600_v15 }
0x33ac   :  { %v5602_v26 = vmul.f32 %v7203_v5, %v5601_v45 }
0x33ae   :  { %v5603_v23 = vadd.f32 %v7203_v5, %v5602_v26 }
0x33b0   :  { %4056 = vperm.xlu0 %6809, %v8338_v1   ;;  %v5221_v1 = vadd.f32 %v7201_v8, %v5220_v19  ;;  %v5607_v51 = vsel %vm5606_vm3, %v7203_v5, %v5603_v23 }
0x33b1   :  { %v5612_v58 = vsel %vm5609_vm4, %v5611_v22, %v5607_v51 }
0x33b2   :  { %v5613_v2 = vmul.f32 %v5612_v58, %v9385_v31  ;;  %v5993_v31 = vperm.slane %v5990_v42, 1  ;;  %v5638_v58 = vperm.slane %v5636_v0, %v8461_v61 }
0x33b4   :  { %7204 = vrcp.f32 %v5993_v31  ;;  %v6022_v37 = vand.u32 2147483648, %v5993_v31  ;;  %vm6016_vm6 = vweird.f32 %v5993_v31  ;;  %v6020_v45 = vand.u32 2147483647, %v5993_v31 }
0x33b6   :  { %v6023_v62 = vor.u32 1.1754944e-38, %v6022_v37  ;;  %vm6021_vm10 = vcmp.eq.f32.partialorder %v6020_v45, 8.507059e+37 }
0x33b8   :  { %5647 = vperm.xlu0 %6809, %v9040_v60   ;;  %v5225_v60 = vsel %vm5224_vm14, %v7201_v8, %v5221_v1  ;;  %v886_v8 = vperm.slane %v8935_v25, %v8461_v61 }
0x33b9   :  { %v5230_v17 = vsel %vm5227_vm8, %v5229_v10, %v5225_v60 }
0x33ba   :  { %v5231_v59 = vmul.f32 %v5230_v17, %v9382_v27  ;;  %v7205_v7 = vpop.eup %7204  ;;  %v4062_v17 = vperm.slane %v9473_v3, %v8461_v61 }
0x33bb   :  { %v6012_v42 = vmul.f32 %v7205_v7, %v5993_v31  ;;  %vm6017_vm5 = vweird.f32 %v7205_v7 }
0x33bc   :  { %vm6018_vm9 = vmor %vm6016_vm6, %vm6017_vm5 }
0x33bd   :  { %v6013_v5 = vsub.f32 1.0, %v6012_v42 }
0x33bf   :  { %v6014_v30 = vmul.f32 %v7205_v7, %v6013_v5 }
0x33c0   :  { %6819 = vset.pattern.permute.xlu0 %v9685_v56 }
0x33c1   :  { %4838 = vperm.xlu0 %6819, %v4819_v18   ;;  %v6015_v6 = vadd.f32 %v7205_v7, %v6014_v30 }
0x33c3   :  { %v6019_v1 = vsel %vm6018_vm9, %v7205_v7, %v6015_v6 }
0x33c4   :  { %v6024_v18 = vsel %vm6021_vm10, %v6023_v62, %v6019_v1 }
0x33c5   :  { %v6025_v10 = vmul.f32 %v6024_v18, %v9391_v12 }
0x33c9   :  { %5238 = vperm.xlu0 %6819, %v5231_v59  }
0x33d1   :  { %5632 = vperm.xlu0 %6819, %v5613_v2  }
0x33e2   :  { %v6379_v49 = vpop.permute.xlu2 %6378 }
0x33e3   :  { %v6381_v4 = vperm.slane %v6379_v49, %v8461_v61 }
0x33ea   :  { %v9530_v40 = vpop.permute.xlu2 %5235 }
0x33f3   :  { %v5251_v13 = vpop.permute.xlu2 %5250 }
0x33f4   :  { %v5253_v27 = vperm.slane %v5251_v13, %v8461_v61 }
0x33f6   :  { %v5254_v54 = vsel %vm93_vm1, %v5253_v27, %v5252_v29 }
0x33f7   :  { %6696 = vst.msk [vmem:[%s9679_s9 + $0x18] sm:$0x3] %vm384_vm13, %v5254_v54 }
0x33f9   :  { %v6376_v9 = vpop.permute.xlu0 %6375 }
0x33fa   :  { %v6380_v35 = vperm.slane %v6376_v9, %v8461_v61 }
0x33fc   :  { %v6382_v24 = vsel %vm93_vm1, %v6381_v4, %v6380_v35 }
0x33fd   :  { %v6384_v52 = vsel %vm384_vm13, %v6382_v24, 0.0  ;;  %v6030_v24 = vpop.permute.xlu1 %6029 }
0x33fe   :  { %6385 = vadd.xlane.f32.xlu2 %v6384_v52 }
0x3402   :  { %v881_v33 = vpop.permute.xlu0 %880 }
0x3403   :  { %v885_v16 = vperm.slane %v881_v33, %v8461_v61 }
0x3405   :  { %v887_v44 = vsel %vm93_vm1, %v886_v8, %v885_v16  ;;  %v6034_v16 = vperm.slane %v6030_v24, %v8461_v61  ;;  %v6042_v62 = vpop.permute.xlu1 %6041 }
0x3406   :  { %6509 = vst.msk [vmem:[%s9679_s9 + $0x2] sm:$0x3] %vm384_vm13, %v887_v44 }
0x340a   :  { %v1678_v47 = vpop.permute.xlu0 %1677 }
0x340b   :  { %v1680_v34 = vperm.slane %v1678_v47, %v8461_v61 }
0x340d   :  { %v1681_v25 = vsel %vm93_vm1, %v1680_v34, %v1679_v21 }
0x340e   :  { %6543 = vst.msk [vmem:[%s9679_s9 + $0x6] sm:$0x3] %vm384_vm13, %v1681_v25 }
0x3412   :  { %v2472_v15 = vpop.permute.xlu0 %2471 }
0x3413   :  { %v2474_v19 = vperm.slane %v2472_v15, %v8461_v61 }
0x3415   :  { %v2475_v20 = vsel %vm93_vm1, %v2474_v19, %v2473_v53 }
0x3416   :  { %6577 = vst.msk [vmem:[%s9679_s9 + $0xa] sm:$0x3] %vm384_vm13, %v2475_v20  ;;  %5644 = vperm.xlu2 %6817, %v9065_v46  }
0x341a   :  { %v2869_v41 = vpop.permute.xlu0 %2868 }
0x341b   :  { %v2871_v60 = vperm.slane %v2869_v41, %v8461_v61 }
0x341d   :  { %v2872_v26 = vsel %vm93_vm1, %v2871_v60, %v2870_v32 }
0x341e   :  { %6594 = vst.msk [vmem:[%s9679_s9 + $0xc] sm:$0x3] %vm384_vm13, %v2872_v26  ;;  %6820 = vset.pattern.permute.xlu2 %v9685_v56  ;;  %v9593_v56 = vmul.f32 %v9464_v11, %v9075_v55  ;;  %v5240_v55 = vperm.slane %v9530_v40, %v8461_v61  ;;  %v6046_v26 = vperm.slane %v6042_v62, %v8461_v61 }
0x341f   :  { %6032 = vperm.xlu2 %6820, %v6025_v10  }
0x3420   :  { %v6456_v48 = vperm.slane %v9593_v56, 0 }
0x3422   :  { %v4057_v46 = vpop.permute.xlu0 %4056 }
0x3423   :  { %v4061_v50 = vperm.slane %v4057_v46, %v8461_v61  ;;  %v6455_v46 = vrot.slane %v9593_v56, 1 }
0x3425   :  { %v4063_v23 = vsel %vm93_vm1, %v4062_v17, %v4061_v50  ;;  %v6457_v50 = vperm.slane %v6455_v46, 0 }
0x3426   :  { %6645 = vst.msk [vmem:[%s9679_s9 + $0x12] sm:$0x3] %vm384_vm13, %v4063_v23 }
0x3427   :  { %6822 = vset.pattern.permute.xlu2 %v9686_v36 }
0x3428   :  { %6044 = vperm.xlu2 %6822, %v9219_v14  }
0x342a   :  { %v5648_v12 = vpop.permute.xlu0 %5647 }
0x342b   :  { %v5650_v54 = vperm.slane %v5648_v12, %v8461_v61 }
0x3430   :  { %6438 = vperm.xlu2 %6822, %v9344_v38  }
0x3433   :  { %v4839_v3 = vpop.permute.xlu0 %4838 }
0x3434   :  { %v4843_v59 = vperm.slane %v4839_v3, %v8461_v61 }
0x3436   :  { %v4845_v51 = vsel %vm93_vm1, %v4844_v28, %v4843_v59 }
0x3437   :  { %6678 = vst.msk [vmem:[%s9680_s8 + $0x16] sm:$0x3] %vm384_vm13, %v4845_v51 }
0x3438   :  { %6458 = vrot.lane.b32.xlu2 %v6456_v48, %s7247_s20 }
0x343b   :  { %v5239_v14 = vpop.permute.xlu0 %5238 }
0x343c   :  { %v5241_v38 = vperm.slane %v5239_v14, %v8461_v61 }
0x343e   :  { %v5242_v11 = vsel %vm93_vm1, %v5241_v38, %v5240_v55 }
0x343f   :  { %6695 = vst.msk [vmem:[%s9680_s8 + $0x18] sm:$0x3] %vm384_vm13, %v5242_v11 }
0x3443   :  { %v5633_v22 = vpop.permute.xlu0 %5632 }
0x3444   :  { %v5637_v2 = vperm.slane %v5633_v22, %v8461_v61 }
0x3446   :  { %v5639_v49 = vsel %vm93_vm1, %v5638_v58, %v5637_v2 }
0x3447   :  { %6712 = vst.msk [vmem:[%s9680_s8 + $0x1a] sm:$0x3] %vm384_vm13, %v5639_v49 }
0x3471   :  { %v6386_v40 = vpop.xlane.xlu2 %6385 }
0x3472   :  { %v6387_v43 = vmax.f32 %v6386_v40, 1e-30 }
0x3474   :  { %v6389_v13 = vperm.slane %v6387_v43, 0  ;;  %v6390_v29 = vperm.slane %v6387_v43, 1 }
0x3476   :  { %7206 = vrcp.f32 %v6389_v13  ;;  %v6404_v44 = vand.u32 2147483648, %v6389_v13  ;;  %v6419_v47 = vand.u32 2147483648, %v6390_v29  ;;  %v6402_v5 = vand.u32 2147483647, %v6389_v13 }
0x3477   :  { %7208 = vrcp.f32 %v6390_v29  ;;  %v6417_v30 = vand.u32 2147483647, %v6390_v29  ;;  %vm6398_vm12 = vweird.f32 %v6389_v13  ;;  %vm6413_vm14 = vweird.f32 %v6390_v29 }
0x3478   :  { %v6405_v6 = vor.u32 1.1754944e-38, %v6404_v44  ;;  %v6420_v37 = vor.u32 1.1754944e-38, %v6419_v47  ;;  %vm6403_vm0 = vcmp.eq.f32.partialorder %v6402_v5, 8.507059e+37 }
0x3479   :  { %v5645_v27 = vpop.permute.xlu2 %5644  ;;  %vm6418_vm3 = vcmp.eq.f32.partialorder %v6417_v30, 8.507059e+37 }
0x347a   :  { %v5649_v9 = vperm.slane %v5645_v27, %v8461_v61 }
0x347c   :  { %v7207_v31 = vpop.eup %7206  ;;  %v5651_v4 = vsel %vm93_vm1, %v5650_v54, %v5649_v9 }
0x347d   :  { %v7209_v35 = vpop.eup %7208  ;;  %v6394_v52 = vmul.f32 %v7207_v31, %v6389_v13  ;;  %6713 = vst.msk [vmem:[%s9679_s9 + $0x1a] sm:$0x3] %vm384_vm13, %v5651_v4  ;;  %vm6399_vm2 = vweird.f32 %v7207_v31 }
0x347e   :  { %v6409_v33 = vmul.f32 %v7209_v35, %v6390_v29  ;;  %vm6414_vm11 = vweird.f32 %v7209_v35  ;;  %vm6400_vm8 = vmor %vm6398_vm12, %vm6399_vm2 }
0x347f   :  { %v6395_v8 = vsub.f32 1.0, %v6394_v52  ;;  %vm6415_vm7 = vmor %vm6413_vm14, %vm6414_vm11 }
0x3480   :  { %v6410_v7 = vsub.f32 1.0, %v6409_v33 }
0x3481   :  { %v6033_v42 = vpop.permute.xlu2 %6032  ;;  %v6396_v21 = vmul.f32 %v7207_v31, %v6395_v8 }
0x3482   :  { %v6035_v34 = vperm.slane %v6033_v42, %v8461_v61  ;;  %v6411_v25 = vmul.f32 %v7209_v35, %v6410_v7 }
0x3483   :  { %v6397_v15 = vadd.f32 %v7207_v31, %v6396_v21 }
0x3484   :  { %v6036_v53 = vsel %vm93_vm1, %v6035_v34, %v6034_v16  ;;  %v6412_v19 = vadd.f32 %v7209_v35, %v6411_v25 }
0x3485   :  { %6729 = vst.msk [vmem:[%s9680_s8 + $0x1c] sm:$0x3] %vm384_vm13, %v6036_v53  ;;  %v6401_v20 = vsel %vm6400_vm8, %v7207_v31, %v6397_v15 }
0x3486   :  { %v6416_v45 = vsel %vm6415_vm7, %v7209_v35, %v6412_v19  ;;  %v6406_v1 = vsel %vm6403_vm0, %v6405_v6, %v6401_v20 }
0x3487   :  { %v6421_v41 = vsel %vm6418_vm3, %v6420_v37, %v6416_v45  ;;  %v6407_v18 = vmul.f32 %v6406_v1, %v9476_v57 }
0x3488   :  { %v6422_v32 = vmul.f32 %v6421_v41, %v9480_v39 }
0x3489   :  { %v6045_v60 = vpop.permute.xlu2 %6044  ;;  %6426 = vperm.xlu0 %6819, %v6407_v18  }
0x348a   :  { %v6047_v10 = vperm.slane %v6045_v60, %v8461_v61  ;;  %6429 = vperm.xlu1 %6823, %v6422_v32  }
0x348c   :  { %v6048_v17 = vsel %vm93_vm1, %v6047_v10, %v6046_v26 }
0x348d   :  { %6730 = vst.msk [vmem:[%s9679_s9 + $0x1c] sm:$0x3] %vm384_vm13, %v6048_v17 }
0x3491   :  { %v6439_v57 = vpop.permute.xlu2 %6438  ;;  %6460 = vrot.lane.b32.xlu0 %v6457_v50, %s7247_s20 }
0x3492   :  { %6824 = vset.pattern.permute.xlu1 %v9686_v36  ;;  %6825 = vset.pattern.permute.xlu0 %v9686_v36  ;;  %v6443_v59 = vperm.slane %v6439_v57, %v8461_v61 }
0x3493   :  { %6441 = vperm.xlu1 %6824, %v9418_v63  }
0x3499   :  { %v6459_v39 = vpop.permute.xlu2 %6458 }
0x349a   :  { %6464 = vst.msk [vmem:[%s9672_s10 + $0x9] sm:$0x1] %vm6451_vm15, %v6459_v39 }
0x34fb   :  { %v6427_v23 = vpop.permute.xlu0 %6426 }
0x34fc   :  { %v6431_v12 = vperm.slane %v6427_v23, %v8461_v61  ;;  %v6430_v56 = vpop.permute.xlu1 %6429 }
0x34fd   :  { %v6432_v3 = vperm.slane %v6430_v56, %v8461_v61 }
0x34ff   :  { %v6433_v28 = vsel %vm93_vm1, %v6432_v3, %v6431_v12 }
0x3500   :  { %6746 = vst.msk [vmem:[%s9680_s8 + $0x1e] sm:$0x3] %vm384_vm13, %v6433_v28 }
0x3503   :  { %v6461_v36 = vpop.permute.xlu0 %6460 }
0x3504   :  { %6465 = vst.msk [vmem:[%s9672_s10 + $0x19] sm:$0x1] %vm6451_vm15, %v6461_v36 }
0x3505   :  { %v6442_v63 = vpop.permute.xlu1 %6441 }
0x3506   :  { %v6444_v48 = vperm.slane %v6442_v63, %v8461_v61 }
0x3508   :  { %v6445_v51 = vsel %vm93_vm1, %v6444_v48, %v6443_v59 }
0x3509   :  { %6747 = vst.msk [vmem:[%s9679_s9 + $0x1e] sm:$0x3] %vm384_vm13, %v6445_v51 }

</bundles_post_ra>
